<compile_context>
chip_gen: v6e
topology: v6e:2x2x1
jax: 0.10.0
libtpu: 0.0.40
codegen_flags: <defaults>
</compile_context>

<pallas_src>
import functools
import math

import numpy as np
import jax
import jax.numpy as jnp
from jax.experimental import pallas as pl
from jax.experimental.pallas import tpu as pltpu


# ------------------------------ fused kernel --------------------------------

def _fused_kernel(*refs, W, W2, W4):
    (x_ref, p2t_ref, p4t_ref, pu34t_ref, pu2t_ref,
     wt_ref, bt_ref, d4_ref, d5_ref, d6_ref,
     kf1_ref, kl1_ref, kf2_ref, kl2_ref, kf3_ref, kl3_ref) = refs[:16]
    l3w = refs[16:26]
    l2w = refs[26:36]
    l1w = refs[36:46]
    (en1_ref, de1_ref, en2_ref, de2_ref, en3_ref, de3_ref,
     ds22_ref, ds44_ref) = refs[46:54]

    def conv3x3(xa, w_ref, Wimg, kf, kl):
        """Channel-major 3x3 conv (padding=1) via im2col + one MXU dot.

        xa    : (Cin, P) f32, pixels flattened row-major (p = h*W + w) on lanes.
        w_ref : (Cout, 9*Cin) bf16, column index = (dh*3 + dw)*Cin + ci.
        kf/kl : (1, P) f32 keep-masks (0 where w == 0 / w == Wimg-1).
        """
        cin, Pimg = xa.shape
        zpad = jnp.zeros((cin, Wimg + 1), xa.dtype)
        xf = jnp.concatenate([zpad, xa, zpad], axis=1)      # flat zero halo
        taps = []
        for dy in (-1, 0, 1):
            for dx in (-1, 0, 1):
                off = (Wimg + 1) + dy * Wimg + dx
                t = jax.lax.slice_in_dim(xf, off, off + Pimg, axis=1)
                if dx == 1:
                    t = t * kl          # no right neighbour at w == Wimg-1
                elif dx == -1:
                    t = t * kf          # no left neighbour at w == 0
                taps.append(t.astype(jnp.bfloat16))
        patch = jnp.concatenate(taps, axis=0)               # (9*Cin, P) bf16
        return jnp.dot(w_ref[...], patch,
                       preferred_element_type=jnp.float32)  # (Cout, P) f32

    def run_layer(xin, Wimg, kf_ref, kl_ref, lw):
        """conv33->LReLU->BN->Drop->conv33->LReLU->BN->Drop->conv33 (eval)."""
        (w1, b1, sc1, sh1, w2, b2, sc2, sh2, w3, b3) = lw
        kf = kf_ref[...]
        kl = kl_ref[...]
        y = conv3x3(xin, w1, Wimg, kf, kl) + b1[...]
        y = jnp.where(y >= 0.0, y, 0.2 * y)
        y = y * sc1[...] + sh1[...]                 # eval BN (post-activation)
        y = conv3x3(y, w2, Wimg, kf, kl) + b2[...]
        y = jnp.where(y >= 0.0, y, 0.2 * y)
        y = y * sc2[...] + sh2[...]
        return conv3x3(y, w3, Wimg, kf, kl) + b3[...]        # (E, P) f32

    def softmax_ch(z):                               # softmax over channels
        m = jnp.max(z, axis=0, keepdims=True)
        e = jnp.exp(z - m)
        s = jnp.sum(e, axis=0, keepdims=True)
        return e * pl.reciprocal(s, approx=True)

    x = x_ref[0]                                     # (band, H*W) f32

    # AvgPool2d(2, ceil) / AvgPool2d(4, ceil): one channel-major dot each.
    ds22 = jnp.dot(x, p2t_ref[...], preferred_element_type=jnp.float32)
    ds44 = jnp.dot(x, p4t_ref[...], preferred_element_type=jnp.float32)
    ds22_ref[0] = ds22
    ds44_ref[0] = ds44

    # ---- stage 3 (coarsest) ----
    lay3 = run_layer(ds44, W4, kf3_ref, kl3_ref, l3w)            # (E, P4)
    en3 = softmax_ch(lay3)
    en3_ref[0] = en3
    de3_ref[0] = jnp.dot(d6_ref[...], en3, preferred_element_type=jnp.float32)
    up3 = jnp.dot(lay3, pu34t_ref[...], preferred_element_type=jnp.float32)
    t3 = jnp.dot(wt_ref[...], up3,
                 preferred_element_type=jnp.float32) + bt_ref[...]

    # ---- stage 2 ----
    lay2 = run_layer(jnp.concatenate([ds22, t3], axis=0),
                     W2, kf2_ref, kl2_ref, l2w)                  # (E, P2)
    en2 = softmax_ch(lay2)
    en2_ref[0] = en2
    de2_ref[0] = jnp.dot(d5_ref[...], en2, preferred_element_type=jnp.float32)
    up2 = jnp.dot(lay2, pu2t_ref[...], preferred_element_type=jnp.float32)
    t2 = jnp.dot(wt_ref[...], up2,
                 preferred_element_type=jnp.float32) + bt_ref[...]

    # ---- stage 1 (full resolution) ----
    lay1 = run_layer(jnp.concatenate([x, t2], axis=0),
                     W, kf1_ref, kl1_ref, l1w)                   # (E, P)
    en1 = softmax_ch(lay1)
    en1_ref[0] = en1
    de1_ref[0] = jnp.dot(d4_ref[...], en1, preferred_element_type=jnp.float32)


# --------------------------- host-side constants -----------------------------

def _avgpool_matrix(n, k):
    """AvgPool1d(k, stride=k, ceil_mode=True, padding=0) as (ceil(n/k), n)."""
    out = int(math.ceil(n / k))
    M = np.zeros((out, n), np.float32)
    for i in range(out):
        lo, hi = i * k, min((i + 1) * k, n)
        M[i, lo:hi] = 1.0 / (hi - lo)
    return M


def _bilinear_matrix(n_in, n_out):
    """F.interpolate(mode='bilinear', align_corners=False), one 1-D factor."""
    M = np.zeros((n_out, n_in), np.float32)
    scale = n_in / n_out
    for i in range(n_out):
        src = max((i + 0.5) * scale - 0.5, 0.0)
        i0 = min(int(np.floor(src)), n_in - 1)
        i1 = min(i0 + 1, n_in - 1)
        w1 = src - i0
        M[i, i0] += 1.0 - w1
        M[i, i1] += w1
    return M


def _border_keep_masks(Wimg, P):
    """f32 keep-masks over flattened pixels for the +/-1 horizontal taps."""
    w = np.arange(P, dtype=np.int64) % Wimg
    kf = (w != 0).astype(np.float32).reshape(1, P)          # keep for dx=-1
    kl = (w != Wimg - 1).astype(np.float32).reshape(1, P)   # keep for dx=+1
    return kf, kl


def _fs(a):
    nd = a.ndim
    return pl.BlockSpec(a.shape, lambda n: (0,) * nd)


# ------------------------------ parameters ----------------------------------

def make_layer_params(key, cin, E):
    """conv33(cin,96) LReLU BN Drop conv33(96,48) LReLU BN Drop conv33(48,E)."""
    ks = jax.random.split(key, 14)
    rnd = lambda k, s, sc: sc * jax.random.normal(k, s, dtype=jnp.float32)
    return dict(
        w1=rnd(ks[0], (96, cin, 3, 3), 0.1), b1=rnd(ks[1], (96,), 0.05),
        bn1_gamma=1.0 + rnd(ks[2], (96,), 0.05), bn1_beta=rnd(ks[3], (96,), 0.05),
        bn1_mean=rnd(ks[4], (96,), 0.05),
        bn1_var=1.0 + 0.1 * jnp.abs(jax.random.normal(ks[5], (96,), jnp.float32)),
        w2=rnd(ks[6], (48, 96, 3, 3), 0.1), b2=rnd(ks[7], (48,), 0.05),
        bn2_gamma=1.0 + rnd(ks[8], (48,), 0.05), bn2_beta=rnd(ks[9], (48,), 0.05),
        bn2_mean=rnd(ks[10], (48,), 0.05),
        bn2_var=1.0 + 0.1 * jnp.abs(jax.random.normal(ks[11], (48,), jnp.float32)),
        w3=rnd(ks[12], (E, 48, 3, 3), 0.1), b3=rnd(ks[13], (E,), 0.05),
    )


def make_params(key, band, E):
    ks = jax.random.split(key, 8)
    rnd = lambda k, s, sc: sc * jax.random.normal(k, s, dtype=jnp.float32)
    return dict(
        layer1=make_layer_params(ks[0], band + E, E),
        layer2=make_layer_params(ks[1], band + E, E),
        layer3=make_layer_params(ks[2], band, E),
        transconv_w=rnd(ks[3], (E, E, 1, 1), 0.1),   # 1x1 conv, with bias
        transconv_b=rnd(ks[4], (E,), 0.05),
        dec4_w=rnd(ks[5], (band, E, 1, 1), 0.1),     # 1x1 conv, bias=False
        dec5_w=rnd(ks[6], (band, E, 1, 1), 0.1),
        dec6_w=rnd(ks[7], (band, E, 1, 1), 0.1),
    )


def _prep_layer(lp, eps=1e-5):
    """Kernel-side layouts: conv weights -> (Cout, 9*Cin) bf16 im2col matrix
    (column = (dh*3+dw)*Cin + ci); per-channel vectors -> (Cout, 1) f32;
    eval BatchNorm folded to a post-activation scale+shift (any gamma sign)."""
    def wmat(w):
        cout = w.shape[0]
        return jnp.transpose(w, (0, 2, 3, 1)).reshape(cout, -1).astype(jnp.bfloat16)
    col = lambda v: jnp.reshape(v, (-1, 1)).astype(jnp.float32)
    sc1 = lp["bn1_gamma"] / jnp.sqrt(lp["bn1_var"] + eps)
    sh1 = lp["bn1_beta"] - sc1 * lp["bn1_mean"]
    sc2 = lp["bn2_gamma"] / jnp.sqrt(lp["bn2_var"] + eps)
    sh2 = lp["bn2_beta"] - sc2 * lp["bn2_mean"]
    return [wmat(lp["w1"]), col(lp["b1"]), col(sc1), col(sh1),
            wmat(lp["w2"]), col(lp["b2"]), col(sc2), col(sh2),
            wmat(lp["w3"]), col(lp["b3"])]


# ------------------------------- forward ------------------------------------

def multi_stage_unmixing_forward(x_nchw, params):
    N, band, H, W = x_nchw.shape
    E = params["transconv_w"].shape[0]
    H2, W2 = math.ceil(H / 2), math.ceil(W / 2)
    H4, W4 = math.ceil(H / 4), math.ceil(W / 4)
    P, P2, P4 = H * W, H2 * W2, H4 * W4

    x_cm = x_nchw.reshape(N, band, P).astype(jnp.float32)    # free NCHW view

    # Resampling matrices over flattened row-major pixels (tiny at col=16).
    # TODO(synk): switch to separable row/col matmuls if col grows enough for
    # the O(P^2) kron operands to matter (VMEM/FLOP scaling).
    P2T = jnp.asarray(np.kron(_avgpool_matrix(H, 2), _avgpool_matrix(W, 2)).T)
    P4T = jnp.asarray(np.kron(_avgpool_matrix(H, 4), _avgpool_matrix(W, 4)).T)
    PU34T = jnp.asarray(
        np.kron(_bilinear_matrix(H4, H2), _bilinear_matrix(W4, W2)).T)
    PU2T = jnp.asarray(
        np.kron(_bilinear_matrix(H2, H), _bilinear_matrix(W2, W)).T)

    kf1, kl1 = map(jnp.asarray, _border_keep_masks(W, P))
    kf2, kl2 = map(jnp.asarray, _border_keep_masks(W2, P2))
    kf3, kl3 = map(jnp.asarray, _border_keep_masks(W4, P4))

    wt = params["transconv_w"].reshape(E, E).astype(jnp.float32)
    bt = params["transconv_b"].reshape(E, 1).astype(jnp.float32)
    d4 = params["dec4_w"].reshape(band, E).astype(jnp.float32)
    d5 = params["dec5_w"].reshape(band, E).astype(jnp.float32)
    d6 = params["dec6_w"].reshape(band, E).astype(jnp.float32)

    inputs = ([x_cm, P2T, P4T, PU34T, PU2T, wt, bt, d4, d5, d6,
               kf1, kl1, kf2, kl2, kf3, kl3]
              + _prep_layer(params["layer3"])
              + _prep_layer(params["layer2"])
              + _prep_layer(params["layer1"]))

    in_specs = ([pl.BlockSpec((1, band, P), lambda n: (n, 0, 0))]
                + [_fs(a) for a in inputs[1:]])

    out_shape = (
        jax.ShapeDtypeStruct((N, E, P), jnp.float32),      # en1
        jax.ShapeDtypeStruct((N, band, P), jnp.float32),   # de1
        jax.ShapeDtypeStruct((N, E, P2), jnp.float32),     # en2
        jax.ShapeDtypeStruct((N, band, P2), jnp.float32),  # de2
        jax.ShapeDtypeStruct((N, E, P4), jnp.float32),     # en3
        jax.ShapeDtypeStruct((N, band, P4), jnp.float32),  # de3
        jax.ShapeDtypeStruct((N, band, P2), jnp.float32),  # downsampling22
        jax.ShapeDtypeStruct((N, band, P4), jnp.float32),  # downsampling44
    )
    out_specs = tuple(
        pl.BlockSpec((1,) + s.shape[1:], lambda n: (n, 0, 0)) for s in out_shape)

    kern = functools.partial(_fused_kernel, W=W, W2=W2, W4=W4)
    en1, de1, en2, de2, en3, de3, ds22, ds44 = pl.pallas_call(
        kern,
        out_shape=out_shape,
        grid=(N,),
        in_specs=in_specs,
        out_specs=out_specs,
        compiler_params=pltpu.CompilerParams(
            dimension_semantics=("parallel",)),
    )(*inputs)

    # channel-major flat -> NCHW is a free reshape (no transposes)
    return (en1.reshape(N, E, H, W), de1.reshape(N, band, H, W),
            en2.reshape(N, E, H2, W2), de2.reshape(N, band, H2, W2),
            en3.reshape(N, E, H4, W4), de3.reshape(N, band, H4, W4),
            ds22.reshape(N, band, H2, W2), ds44.reshape(N, band, H4, W4))


# --------------------------------- main --------------------------------------

if __name__ == "__main__":
    band_Number, endmember_number, col, batch = 6, 4, 16, 2
    key = jax.random.PRNGKey(0)
    kx, kp = jax.random.split(key)
    x = jax.random.normal(kx, (batch, band_Number, col, col), dtype=jnp.float32)
    params = make_params(kp, band_Number, endmember_number)

    fwd = jax.jit(multi_stage_unmixing_forward)
    outs = fwd(x, params)
    outs = jax.block_until_ready(outs)

    expected = [(batch, endmember_number, col, col),
                (batch, band_Number, col, col),
                (batch, endmember_number, col // 2, col // 2),
                (batch, band_Number, col // 2, col // 2),
                (batch, endmember_number, col // 4, col // 4),
                (batch, band_Number, col // 4, col // 4),
                (batch, band_Number, col // 2, col // 2),
                (batch, band_Number, col // 4, col // 4)]
    assert [tuple(o.shape) for o in outs] == expected

    # Light sanity checks: softmax outputs sum to ~1 over channels, and the
    # 4x4 average pool matches a direct jnp reference.
    for en in (outs[0], outs[2], outs[4]):
        np.testing.assert_allclose(np.asarray(jnp.sum(en, axis=1)), 1.0,
                                   atol=1e-2)
    ref_ds44 = x.reshape(batch, band_Number, col // 4, 4, col // 4, 4).mean((3, 5))
    np.testing.assert_allclose(np.asarray(outs[7]), np.asarray(ref_ds44),
                               atol=2e-2)
    print("KERNEL_OK")
</pallas_src>

<mosaic_0001>
module attributes {stable_mosaic.version = 11 : i64} {
  func.func @_fused_kernel(%arg0: i32, %arg1: memref<1x6x256xf32, #tpu.memory_space<vmem>>, %arg2: memref<256x64xf32, #tpu.memory_space<vmem>>, %arg3: memref<256x16xf32, #tpu.memory_space<vmem>>, %arg4: memref<16x64xf32, #tpu.memory_space<vmem>>, %arg5: memref<64x256xf32, #tpu.memory_space<vmem>>, %arg6: memref<4x4xf32, #tpu.memory_space<vmem>>, %arg7: memref<4x1xf32, #tpu.memory_space<vmem>>, %arg8: memref<6x4xf32, #tpu.memory_space<vmem>>, %arg9: memref<6x4xf32, #tpu.memory_space<vmem>>, %arg10: memref<6x4xf32, #tpu.memory_space<vmem>>, %arg11: memref<1x256xf32, #tpu.memory_space<vmem>>, %arg12: memref<1x256xf32, #tpu.memory_space<vmem>>, %arg13: memref<1x64xf32, #tpu.memory_space<vmem>>, %arg14: memref<1x64xf32, #tpu.memory_space<vmem>>, %arg15: memref<1x16xf32, #tpu.memory_space<vmem>>, %arg16: memref<1x16xf32, #tpu.memory_space<vmem>>, %arg17: memref<96x54xbf16, #tpu.memory_space<vmem>>, %arg18: memref<96x1xf32, #tpu.memory_space<vmem>>, %arg19: memref<96x1xf32, #tpu.memory_space<vmem>>, %arg20: memref<96x1xf32, #tpu.memory_space<vmem>>, %arg21: memref<48x864xbf16, #tpu.memory_space<vmem>>, %arg22: memref<48x1xf32, #tpu.memory_space<vmem>>, %arg23: memref<48x1xf32, #tpu.memory_space<vmem>>, %arg24: memref<48x1xf32, #tpu.memory_space<vmem>>, %arg25: memref<4x432xbf16, #tpu.memory_space<vmem>>, %arg26: memref<4x1xf32, #tpu.memory_space<vmem>>, %arg27: memref<96x90xbf16, #tpu.memory_space<vmem>>, %arg28: memref<96x1xf32, #tpu.memory_space<vmem>>, %arg29: memref<96x1xf32, #tpu.memory_space<vmem>>, %arg30: memref<96x1xf32, #tpu.memory_space<vmem>>, %arg31: memref<48x864xbf16, #tpu.memory_space<vmem>>, %arg32: memref<48x1xf32, #tpu.memory_space<vmem>>, %arg33: memref<48x1xf32, #tpu.memory_space<vmem>>, %arg34: memref<48x1xf32, #tpu.memory_space<vmem>>, %arg35: memref<4x432xbf16, #tpu.memory_space<vmem>>, %arg36: memref<4x1xf32, #tpu.memory_space<vmem>>, %arg37: memref<96x90xbf16, #tpu.memory_space<vmem>>, %arg38: memref<96x1xf32, #tpu.memory_space<vmem>>, %arg39: memref<96x1xf32, #tpu.memory_space<vmem>>, %arg40: memref<96x1xf32, #tpu.memory_space<vmem>>, %arg41: memref<48x864xbf16, #tpu.memory_space<vmem>>, %arg42: memref<48x1xf32, #tpu.memory_space<vmem>>, %arg43: memref<48x1xf32, #tpu.memory_space<vmem>>, %arg44: memref<48x1xf32, #tpu.memory_space<vmem>>, %arg45: memref<4x432xbf16, #tpu.memory_space<vmem>>, %arg46: memref<4x1xf32, #tpu.memory_space<vmem>>, %arg47: memref<1x4x256xf32, #tpu.memory_space<vmem>>, %arg48: memref<1x6x256xf32, #tpu.memory_space<vmem>>, %arg49: memref<1x4x64xf32, #tpu.memory_space<vmem>>, %arg50: memref<1x6x64xf32, #tpu.memory_space<vmem>>, %arg51: memref<1x4x16xf32, #tpu.memory_space<vmem>>, %arg52: memref<1x6x16xf32, #tpu.memory_space<vmem>>, %arg53: memref<1x6x64xf32, #tpu.memory_space<vmem>>, %arg54: memref<1x6x16xf32, #tpu.memory_space<vmem>>) attributes {dimension_semantics = [#tpu.dimension_semantics<parallel>], iteration_bounds = array<i64: 2>, scalar_prefetch = 0 : i64, scratch_operands = 0 : i64, tpu.core_type = #tpu.core_type<tc>, window_params = [{transform_indices = @transform_0, window_bounds = array<i64: 1, 6, 256>}, {pipeline_mode = #tpu.pipeline_mode<synchronous>, transform_indices = @transform_1, window_bounds = array<i64: 256, 64>}, {pipeline_mode = #tpu.pipeline_mode<synchronous>, transform_indices = @transform_2, window_bounds = array<i64: 256, 16>}, {pipeline_mode = #tpu.pipeline_mode<synchronous>, transform_indices = @transform_3, window_bounds = array<i64: 16, 64>}, {pipeline_mode = #tpu.pipeline_mode<synchronous>, transform_indices = @transform_4, window_bounds = array<i64: 64, 256>}, {pipeline_mode = #tpu.pipeline_mode<synchronous>, transform_indices = @transform_5, window_bounds = array<i64: 4, 4>}, {pipeline_mode = #tpu.pipeline_mode<synchronous>, transform_indices = @transform_6, window_bounds = array<i64: 4, 1>}, {pipeline_mode = #tpu.pipeline_mode<synchronous>, transform_indices = @transform_7, window_bounds = array<i64: 6, 4>}, {pipeline_mode = #tpu.pipeline_mode<synchronous>, transform_indices = @transform_8, window_bounds = array<i64: 6, 4>}, {pipeline_mode = #tpu.pipeline_mode<synchronous>, transform_indices = @transform_9, window_bounds = array<i64: 6, 4>}, {pipeline_mode = #tpu.pipeline_mode<synchronous>, transform_indices = @transform_10, window_bounds = array<i64: 1, 256>}, {pipeline_mode = #tpu.pipeline_mode<synchronous>, transform_indices = @transform_11, window_bounds = array<i64: 1, 256>}, {pipeline_mode = #tpu.pipeline_mode<synchronous>, transform_indices = @transform_12, window_bounds = array<i64: 1, 64>}, {pipeline_mode = #tpu.pipeline_mode<synchronous>, transform_indices = @transform_13, window_bounds = array<i64: 1, 64>}, {pipeline_mode = #tpu.pipeline_mode<synchronous>, transform_indices = @transform_14, window_bounds = array<i64: 1, 16>}, {pipeline_mode = #tpu.pipeline_mode<synchronous>, transform_indices = @transform_15, window_bounds = array<i64: 1, 16>}, {pipeline_mode = #tpu.pipeline_mode<synchronous>, transform_indices = @transform_16, window_bounds = array<i64: 96, 54>}, {pipeline_mode = #tpu.pipeline_mode<synchronous>, transform_indices = @transform_17, window_bounds = array<i64: 96, 1>}, {pipeline_mode = #tpu.pipeline_mode<synchronous>, transform_indices = @transform_18, window_bounds = array<i64: 96, 1>}, {pipeline_mode = #tpu.pipeline_mode<synchronous>, transform_indices = @transform_19, window_bounds = array<i64: 96, 1>}, {pipeline_mode = #tpu.pipeline_mode<synchronous>, transform_indices = @transform_20, window_bounds = array<i64: 48, 864>}, {pipeline_mode = #tpu.pipeline_mode<synchronous>, transform_indices = @transform_21, window_bounds = array<i64: 48, 1>}, {pipeline_mode = #tpu.pipeline_mode<synchronous>, transform_indices = @transform_22, window_bounds = array<i64: 48, 1>}, {pipeline_mode = #tpu.pipeline_mode<synchronous>, transform_indices = @transform_23, window_bounds = array<i64: 48, 1>}, {pipeline_mode = #tpu.pipeline_mode<synchronous>, transform_indices = @transform_24, window_bounds = array<i64: 4, 432>}, {pipeline_mode = #tpu.pipeline_mode<synchronous>, transform_indices = @transform_25, window_bounds = array<i64: 4, 1>}, {pipeline_mode = #tpu.pipeline_mode<synchronous>, transform_indices = @transform_26, window_bounds = array<i64: 96, 90>}, {pipeline_mode = #tpu.pipeline_mode<synchronous>, transform_indices = @transform_27, window_bounds = array<i64: 96, 1>}, {pipeline_mode = #tpu.pipeline_mode<synchronous>, transform_indices = @transform_28, window_bounds = array<i64: 96, 1>}, {pipeline_mode = #tpu.pipeline_mode<synchronous>, transform_indices = @transform_29, window_bounds = array<i64: 96, 1>}, {pipeline_mode = #tpu.pipeline_mode<synchronous>, transform_indices = @transform_30, window_bounds = array<i64: 48, 864>}, {pipeline_mode = #tpu.pipeline_mode<synchronous>, transform_indices = @transform_31, window_bounds = array<i64: 48, 1>}, {pipeline_mode = #tpu.pipeline_mode<synchronous>, transform_indices = @transform_32, window_bounds = array<i64: 48, 1>}, {pipeline_mode = #tpu.pipeline_mode<synchronous>, transform_indices = @transform_33, window_bounds = array<i64: 48, 1>}, {pipeline_mode = #tpu.pipeline_mode<synchronous>, transform_indices = @transform_34, window_bounds = array<i64: 4, 432>}, {pipeline_mode = #tpu.pipeline_mode<synchronous>, transform_indices = @transform_35, window_bounds = array<i64: 4, 1>}, {pipeline_mode = #tpu.pipeline_mode<synchronous>, transform_indices = @transform_36, window_bounds = array<i64: 96, 90>}, {pipeline_mode = #tpu.pipeline_mode<synchronous>, transform_indices = @transform_37, window_bounds = array<i64: 96, 1>}, {pipeline_mode = #tpu.pipeline_mode<synchronous>, transform_indices = @transform_38, window_bounds = array<i64: 96, 1>}, {pipeline_mode = #tpu.pipeline_mode<synchronous>, transform_indices = @transform_39, window_bounds = array<i64: 96, 1>}, {pipeline_mode = #tpu.pipeline_mode<synchronous>, transform_indices = @transform_40, window_bounds = array<i64: 48, 864>}, {pipeline_mode = #tpu.pipeline_mode<synchronous>, transform_indices = @transform_41, window_bounds = array<i64: 48, 1>}, {pipeline_mode = #tpu.pipeline_mode<synchronous>, transform_indices = @transform_42, window_bounds = array<i64: 48, 1>}, {pipeline_mode = #tpu.pipeline_mode<synchronous>, transform_indices = @transform_43, window_bounds = array<i64: 48, 1>}, {pipeline_mode = #tpu.pipeline_mode<synchronous>, transform_indices = @transform_44, window_bounds = array<i64: 4, 432>}, {pipeline_mode = #tpu.pipeline_mode<synchronous>, transform_indices = @transform_45, window_bounds = array<i64: 4, 1>}, {transform_indices = @transform_46, window_bounds = array<i64: 1, 4, 256>}, {transform_indices = @transform_47, window_bounds = array<i64: 1, 6, 256>}, {transform_indices = @transform_48, window_bounds = array<i64: 1, 4, 64>}, {transform_indices = @transform_49, window_bounds = array<i64: 1, 6, 64>}, {transform_indices = @transform_50, window_bounds = array<i64: 1, 4, 16>}, {transform_indices = @transform_51, window_bounds = array<i64: 1, 6, 16>}, {transform_indices = @transform_52, window_bounds = array<i64: 1, 6, 64>}, {transform_indices = @transform_53, window_bounds = array<i64: 1, 6, 16>}]} {
    %c0 = arith.constant 0 : index
    %c0_0 = arith.constant 0 : index
    %c0_1 = arith.constant 0 : index
    %0 = vector.load %arg1[%c0, %c0_0, %c0_1] : memref<1x6x256xf32, #tpu.memory_space<vmem>>, vector<1x6x256xf32>
    %1 = vector.shape_cast %0 : vector<1x6x256xf32> to vector<6x256xf32>
    %c0_2 = arith.constant 0 : index
    %c0_3 = arith.constant 0 : index
    %2 = vector.load %arg2[%c0_2, %c0_3] : memref<256x64xf32, #tpu.memory_space<vmem>>, vector<256x64xf32>
    %cst = arith.constant dense<0.000000e+00> : vector<6x64xf32>
    %3 = tpu.matmul %1, %2, %cst {dimension_numbers = #tpu.dot_dimension_numbers<[1], [0], [0], [1], [0, 0, 1, 1], [], []>} : vector<6x256xf32>, vector<256x64xf32>, vector<6x64xf32> -> vector<6x64xf32>
    %c0_4 = arith.constant 0 : index
    %c0_5 = arith.constant 0 : index
    %4 = vector.load %arg3[%c0_4, %c0_5] : memref<256x16xf32, #tpu.memory_space<vmem>>, vector<256x16xf32>
    %cst_6 = arith.constant dense<0.000000e+00> : vector<6x16xf32>
    %5 = tpu.matmul %1, %4, %cst_6 {dimension_numbers = #tpu.dot_dimension_numbers<[1], [0], [0], [1], [0, 0, 1, 1], [], []>} : vector<6x256xf32>, vector<256x16xf32>, vector<6x16xf32> -> vector<6x16xf32>
    %c0_7 = arith.constant 0 : index
    %c0_8 = arith.constant 0 : index
    %c0_9 = arith.constant 0 : index
    %6 = vector.load %arg53[%c0_7, %c0_8, %c0_9] : memref<1x6x64xf32, #tpu.memory_space<vmem>>, vector<1x6x64xf32>
    %7 = vector.shape_cast %6 : vector<1x6x64xf32> to vector<6x64xf32>
    %8 = vector.shape_cast %3 : vector<6x64xf32> to vector<1x6x64xf32>
    tpu.vector_store %arg53[%c0_7, %c0_8, %c0_9], %8 {strides = array<i32>} : memref<1x6x64xf32, #tpu.memory_space<vmem>>, vector<1x6x64xf32>,
    %c0_10 = arith.constant 0 : index
    %c0_11 = arith.constant 0 : index
    %c0_12 = arith.constant 0 : index
    %9 = vector.load %arg54[%c0_10, %c0_11, %c0_12] : memref<1x6x16xf32, #tpu.memory_space<vmem>>, vector<1x6x16xf32>
    %10 = vector.shape_cast %9 : vector<1x6x16xf32> to vector<6x16xf32>
    %11 = vector.shape_cast %5 : vector<6x16xf32> to vector<1x6x16xf32>
    tpu.vector_store %arg54[%c0_10, %c0_11, %c0_12], %11 {strides = array<i32>} : memref<1x6x16xf32, #tpu.memory_space<vmem>>, vector<1x6x16xf32>,
    %c0_13 = arith.constant 0 : index
    %c0_14 = arith.constant 0 : index
    %12 = vector.load %arg15[%c0_13, %c0_14] : memref<1x16xf32, #tpu.memory_space<vmem>>, vector<1x16xf32>
    %c0_15 = arith.constant 0 : index
    %c0_16 = arith.constant 0 : index
    %13 = vector.load %arg16[%c0_15, %c0_16] : memref<1x16xf32, #tpu.memory_space<vmem>>, vector<1x16xf32>
    %cst_17 = arith.constant 0.000000e+00 : f32
    %14 = vector.broadcast %cst_17 : f32 to vector<6x5xf32>
    %15 = tpu.concatenate %14, %5, %14 in 1 : vector<6x5xf32>, vector<6x16xf32>, vector<6x5xf32> -> vector<6x26xf32>
    %16 = vector.extract_strided_slice %15 {offsets = [0, 0], sizes = [6, 16], strides = [1, 1]} : vector<6x26xf32> to vector<6x16xf32>
    %17 = vector.broadcast %12 : vector<1x16xf32> to vector<6x16xf32>
    %18 = arith.mulf %16, %17 : vector<6x16xf32>
    %19 = arith.truncf %18 : vector<6x16xf32> to vector<6x16xbf16>
    %20 = vector.extract_strided_slice %15 {offsets = [0, 1], sizes = [6, 16], strides = [1, 1]} : vector<6x26xf32> to vector<6x16xf32>
    %21 = arith.truncf %20 : vector<6x16xf32> to vector<6x16xbf16>
    %22 = vector.extract_strided_slice %15 {offsets = [0, 2], sizes = [6, 16], strides = [1, 1]} : vector<6x26xf32> to vector<6x16xf32>
    %23 = vector.broadcast %13 : vector<1x16xf32> to vector<6x16xf32>
    %24 = arith.mulf %22, %23 : vector<6x16xf32>
    %25 = arith.truncf %24 : vector<6x16xf32> to vector<6x16xbf16>
    %26 = vector.extract_strided_slice %15 {offsets = [0, 4], sizes = [6, 16], strides = [1, 1]} : vector<6x26xf32> to vector<6x16xf32>
    %27 = vector.broadcast %12 : vector<1x16xf32> to vector<6x16xf32>
    %28 = arith.mulf %26, %27 : vector<6x16xf32>
    %29 = arith.truncf %28 : vector<6x16xf32> to vector<6x16xbf16>
    %30 = vector.extract_strided_slice %15 {offsets = [0, 5], sizes = [6, 16], strides = [1, 1]} : vector<6x26xf32> to vector<6x16xf32>
    %31 = arith.truncf %30 : vector<6x16xf32> to vector<6x16xbf16>
    %32 = vector.extract_strided_slice %15 {offsets = [0, 6], sizes = [6, 16], strides = [1, 1]} : vector<6x26xf32> to vector<6x16xf32>
    %33 = vector.broadcast %13 : vector<1x16xf32> to vector<6x16xf32>
    %34 = arith.mulf %32, %33 : vector<6x16xf32>
    %35 = arith.truncf %34 : vector<6x16xf32> to vector<6x16xbf16>
    %36 = vector.extract_strided_slice %15 {offsets = [0, 8], sizes = [6, 16], strides = [1, 1]} : vector<6x26xf32> to vector<6x16xf32>
    %37 = vector.broadcast %12 : vector<1x16xf32> to vector<6x16xf32>
    %38 = arith.mulf %36, %37 : vector<6x16xf32>
    %39 = arith.truncf %38 : vector<6x16xf32> to vector<6x16xbf16>
    %40 = vector.extract_strided_slice %15 {offsets = [0, 9], sizes = [6, 16], strides = [1, 1]} : vector<6x26xf32> to vector<6x16xf32>
    %41 = arith.truncf %40 : vector<6x16xf32> to vector<6x16xbf16>
    %42 = vector.extract_strided_slice %15 {offsets = [0, 10], sizes = [6, 16], strides = [1, 1]} : vector<6x26xf32> to vector<6x16xf32>
    %43 = vector.broadcast %13 : vector<1x16xf32> to vector<6x16xf32>
    %44 = arith.mulf %42, %43 : vector<6x16xf32>
    %45 = arith.truncf %44 : vector<6x16xf32> to vector<6x16xbf16>
    %46 = tpu.concatenate %19, %21, %25, %29, %31, %35, %39, %41, %45 in 0 : vector<6x16xbf16>, vector<6x16xbf16>, vector<6x16xbf16>, vector<6x16xbf16>, vector<6x16xbf16>, vector<6x16xbf16>, vector<6x16xbf16>, vector<6x16xbf16>, vector<6x16xbf16> -> vector<54x16xbf16>
    %c0_18 = arith.constant 0 : index
    %c0_19 = arith.constant 0 : index
    %47 = vector.load %arg17[%c0_18, %c0_19] : memref<96x54xbf16, #tpu.memory_space<vmem>>, vector<96x54xbf16>
    %cst_20 = arith.constant dense<0.000000e+00> : vector<96x16xf32>
    %48 = tpu.matmul %47, %46, %cst_20 {dimension_numbers = #tpu.dot_dimension_numbers<[1], [0], [0], [1], [0, 0, 1, 1], [], []>} : vector<96x54xbf16>, vector<54x16xbf16>, vector<96x16xf32> -> vector<96x16xf32>
    %c0_21 = arith.constant 0 : index
    %c0_22 = arith.constant 0 : index
    %49 = vector.load %arg18[%c0_21, %c0_22] : memref<96x1xf32, #tpu.memory_space<vmem>>, vector<96x1xf32>
    %50 = vector.broadcast %49 : vector<96x1xf32> to vector<96x16xf32>
    %51 = arith.addf %48, %50 : vector<96x16xf32>
    %cst_23 = arith.constant 0.000000e+00 : f32
    %52 = vector.broadcast %cst_23 : f32 to vector<96x16xf32>
    %53 = arith.cmpf oge, %51, %52 : vector<96x16xf32>
    %cst_24 = arith.constant 2.000000e-01 : f32
    %54 = vector.broadcast %cst_24 : f32 to vector<96x16xf32>
    %55 = arith.mulf %54, %51 : vector<96x16xf32>
    %56 = arith.select %53, %51, %55 : vector<96x16xi1>, vector<96x16xf32>
    %c0_25 = arith.constant 0 : index
    %c0_26 = arith.constant 0 : index
    %57 = vector.load %arg19[%c0_25, %c0_26] : memref<96x1xf32, #tpu.memory_space<vmem>>, vector<96x1xf32>
    %58 = vector.broadcast %57 : vector<96x1xf32> to vector<96x16xf32>
    %59 = arith.mulf %56, %58 : vector<96x16xf32>
    %c0_27 = arith.constant 0 : index
    %c0_28 = arith.constant 0 : index
    %60 = vector.load %arg20[%c0_27, %c0_28] : memref<96x1xf32, #tpu.memory_space<vmem>>, vector<96x1xf32>
    %61 = vector.broadcast %60 : vector<96x1xf32> to vector<96x16xf32>
    %62 = arith.addf %59, %61 : vector<96x16xf32>
    %cst_29 = arith.constant 0.000000e+00 : f32
    %63 = vector.broadcast %cst_29 : f32 to vector<96x5xf32>
    %64 = tpu.concatenate %63, %62, %63 in 1 : vector<96x5xf32>, vector<96x16xf32>, vector<96x5xf32> -> vector<96x26xf32>
    %65 = vector.extract_strided_slice %64 {offsets = [0, 0], sizes = [96, 16], strides = [1, 1]} : vector<96x26xf32> to vector<96x16xf32>
    %66 = vector.broadcast %12 : vector<1x16xf32> to vector<96x16xf32>
    %67 = arith.mulf %65, %66 : vector<96x16xf32>
    %68 = arith.truncf %67 : vector<96x16xf32> to vector<96x16xbf16>
    %69 = vector.extract_strided_slice %64 {offsets = [0, 1], sizes = [96, 16], strides = [1, 1]} : vector<96x26xf32> to vector<96x16xf32>
    %70 = arith.truncf %69 : vector<96x16xf32> to vector<96x16xbf16>
    %71 = vector.extract_strided_slice %64 {offsets = [0, 2], sizes = [96, 16], strides = [1, 1]} : vector<96x26xf32> to vector<96x16xf32>
    %72 = vector.broadcast %13 : vector<1x16xf32> to vector<96x16xf32>
    %73 = arith.mulf %71, %72 : vector<96x16xf32>
    %74 = arith.truncf %73 : vector<96x16xf32> to vector<96x16xbf16>
    %75 = vector.extract_strided_slice %64 {offsets = [0, 4], sizes = [96, 16], strides = [1, 1]} : vector<96x26xf32> to vector<96x16xf32>
    %76 = vector.broadcast %12 : vector<1x16xf32> to vector<96x16xf32>
    %77 = arith.mulf %75, %76 : vector<96x16xf32>
    %78 = arith.truncf %77 : vector<96x16xf32> to vector<96x16xbf16>
    %79 = vector.extract_strided_slice %64 {offsets = [0, 5], sizes = [96, 16], strides = [1, 1]} : vector<96x26xf32> to vector<96x16xf32>
    %80 = arith.truncf %79 : vector<96x16xf32> to vector<96x16xbf16>
    %81 = vector.extract_strided_slice %64 {offsets = [0, 6], sizes = [96, 16], strides = [1, 1]} : vector<96x26xf32> to vector<96x16xf32>
    %82 = vector.broadcast %13 : vector<1x16xf32> to vector<96x16xf32>
    %83 = arith.mulf %81, %82 : vector<96x16xf32>
    %84 = arith.truncf %83 : vector<96x16xf32> to vector<96x16xbf16>
    %85 = vector.extract_strided_slice %64 {offsets = [0, 8], sizes = [96, 16], strides = [1, 1]} : vector<96x26xf32> to vector<96x16xf32>
    %86 = vector.broadcast %12 : vector<1x16xf32> to vector<96x16xf32>
    %87 = arith.mulf %85, %86 : vector<96x16xf32>
    %88 = arith.truncf %87 : vector<96x16xf32> to vector<96x16xbf16>
    %89 = vector.extract_strided_slice %64 {offsets = [0, 9], sizes = [96, 16], strides = [1, 1]} : vector<96x26xf32> to vector<96x16xf32>
    %90 = arith.truncf %89 : vector<96x16xf32> to vector<96x16xbf16>
    %91 = vector.extract_strided_slice %64 {offsets = [0, 10], sizes = [96, 16], strides = [1, 1]} : vector<96x26xf32> to vector<96x16xf32>
    %92 = vector.broadcast %13 : vector<1x16xf32> to vector<96x16xf32>
    %93 = arith.mulf %91, %92 : vector<96x16xf32>
    %94 = arith.truncf %93 : vector<96x16xf32> to vector<96x16xbf16>
    %95 = tpu.concatenate %68, %70, %74, %78, %80, %84, %88, %90, %94 in 0 : vector<96x16xbf16>, vector<96x16xbf16>, vector<96x16xbf16>, vector<96x16xbf16>, vector<96x16xbf16>, vector<96x16xbf16>, vector<96x16xbf16>, vector<96x16xbf16>, vector<96x16xbf16> -> vector<864x16xbf16>
    %c0_30 = arith.constant 0 : index
    %c0_31 = arith.constant 0 : index
    %96 = vector.load %arg21[%c0_30, %c0_31] : memref<48x864xbf16, #tpu.memory_space<vmem>>, vector<48x864xbf16>
    %cst_32 = arith.constant dense<0.000000e+00> : vector<48x16xf32>
    %97 = tpu.matmul %96, %95, %cst_32 {dimension_numbers = #tpu.dot_dimension_numbers<[1], [0], [0], [1], [0, 0, 1, 1], [], []>} : vector<48x864xbf16>, vector<864x16xbf16>, vector<48x16xf32> -> vector<48x16xf32>
    %c0_33 = arith.constant 0 : index
    %c0_34 = arith.constant 0 : index
    %98 = vector.load %arg22[%c0_33, %c0_34] : memref<48x1xf32, #tpu.memory_space<vmem>>, vector<48x1xf32>
    %99 = vector.broadcast %98 : vector<48x1xf32> to vector<48x16xf32>
    %100 = arith.addf %97, %99 : vector<48x16xf32>
    %cst_35 = arith.constant 0.000000e+00 : f32
    %101 = vector.broadcast %cst_35 : f32 to vector<48x16xf32>
    %102 = arith.cmpf oge, %100, %101 : vector<48x16xf32>
    %cst_36 = arith.constant 2.000000e-01 : f32
    %103 = vector.broadcast %cst_36 : f32 to vector<48x16xf32>
    %104 = arith.mulf %103, %100 : vector<48x16xf32>
    %105 = arith.select %102, %100, %104 : vector<48x16xi1>, vector<48x16xf32>
    %c0_37 = arith.constant 0 : index
    %c0_38 = arith.constant 0 : index
    %106 = vector.load %arg23[%c0_37, %c0_38] : memref<48x1xf32, #tpu.memory_space<vmem>>, vector<48x1xf32>
    %107 = vector.broadcast %106 : vector<48x1xf32> to vector<48x16xf32>
    %108 = arith.mulf %105, %107 : vector<48x16xf32>
    %c0_39 = arith.constant 0 : index
    %c0_40 = arith.constant 0 : index
    %109 = vector.load %arg24[%c0_39, %c0_40] : memref<48x1xf32, #tpu.memory_space<vmem>>, vector<48x1xf32>
    %110 = vector.broadcast %109 : vector<48x1xf32> to vector<48x16xf32>
    %111 = arith.addf %108, %110 : vector<48x16xf32>
    %cst_41 = arith.constant 0.000000e+00 : f32
    %112 = vector.broadcast %cst_41 : f32 to vector<48x5xf32>
    %113 = tpu.concatenate %112, %111, %112 in 1 : vector<48x5xf32>, vector<48x16xf32>, vector<48x5xf32> -> vector<48x26xf32>
    %114 = vector.extract_strided_slice %113 {offsets = [0, 0], sizes = [48, 16], strides = [1, 1]} : vector<48x26xf32> to vector<48x16xf32>
    %115 = vector.broadcast %12 : vector<1x16xf32> to vector<48x16xf32>
    %116 = arith.mulf %114, %115 : vector<48x16xf32>
    %117 = arith.truncf %116 : vector<48x16xf32> to vector<48x16xbf16>
    %118 = vector.extract_strided_slice %113 {offsets = [0, 1], sizes = [48, 16], strides = [1, 1]} : vector<48x26xf32> to vector<48x16xf32>
    %119 = arith.truncf %118 : vector<48x16xf32> to vector<48x16xbf16>
    %120 = vector.extract_strided_slice %113 {offsets = [0, 2], sizes = [48, 16], strides = [1, 1]} : vector<48x26xf32> to vector<48x16xf32>
    %121 = vector.broadcast %13 : vector<1x16xf32> to vector<48x16xf32>
    %122 = arith.mulf %120, %121 : vector<48x16xf32>
    %123 = arith.truncf %122 : vector<48x16xf32> to vector<48x16xbf16>
    %124 = vector.extract_strided_slice %113 {offsets = [0, 4], sizes = [48, 16], strides = [1, 1]} : vector<48x26xf32> to vector<48x16xf32>
    %125 = vector.broadcast %12 : vector<1x16xf32> to vector<48x16xf32>
    %126 = arith.mulf %124, %125 : vector<48x16xf32>
    %127 = arith.truncf %126 : vector<48x16xf32> to vector<48x16xbf16>
    %128 = vector.extract_strided_slice %113 {offsets = [0, 5], sizes = [48, 16], strides = [1, 1]} : vector<48x26xf32> to vector<48x16xf32>
    %129 = arith.truncf %128 : vector<48x16xf32> to vector<48x16xbf16>
    %130 = vector.extract_strided_slice %113 {offsets = [0, 6], sizes = [48, 16], strides = [1, 1]} : vector<48x26xf32> to vector<48x16xf32>
    %131 = vector.broadcast %13 : vector<1x16xf32> to vector<48x16xf32>
    %132 = arith.mulf %130, %131 : vector<48x16xf32>
    %133 = arith.truncf %132 : vector<48x16xf32> to vector<48x16xbf16>
    %134 = vector.extract_strided_slice %113 {offsets = [0, 8], sizes = [48, 16], strides = [1, 1]} : vector<48x26xf32> to vector<48x16xf32>
    %135 = vector.broadcast %12 : vector<1x16xf32> to vector<48x16xf32>
    %136 = arith.mulf %134, %135 : vector<48x16xf32>
    %137 = arith.truncf %136 : vector<48x16xf32> to vector<48x16xbf16>
    %138 = vector.extract_strided_slice %113 {offsets = [0, 9], sizes = [48, 16], strides = [1, 1]} : vector<48x26xf32> to vector<48x16xf32>
    %139 = arith.truncf %138 : vector<48x16xf32> to vector<48x16xbf16>
    %140 = vector.extract_strided_slice %113 {offsets = [0, 10], sizes = [48, 16], strides = [1, 1]} : vector<48x26xf32> to vector<48x16xf32>
    %141 = vector.broadcast %13 : vector<1x16xf32> to vector<48x16xf32>
    %142 = arith.mulf %140, %141 : vector<48x16xf32>
    %143 = arith.truncf %142 : vector<48x16xf32> to vector<48x16xbf16>
    %144 = tpu.concatenate %117, %119, %123, %127, %129, %133, %137, %139, %143 in 0 : vector<48x16xbf16>, vector<48x16xbf16>, vector<48x16xbf16>, vector<48x16xbf16>, vector<48x16xbf16>, vector<48x16xbf16>, vector<48x16xbf16>, vector<48x16xbf16>, vector<48x16xbf16> -> vector<432x16xbf16>
    %c0_42 = arith.constant 0 : index
    %c0_43 = arith.constant 0 : index
    %145 = vector.load %arg25[%c0_42, %c0_43] : memref<4x432xbf16, #tpu.memory_space<vmem>>, vector<4x432xbf16>
    %cst_44 = arith.constant dense<0.000000e+00> : vector<4x16xf32>
    %146 = tpu.matmul %145, %144, %cst_44 {dimension_numbers = #tpu.dot_dimension_numbers<[1], [0], [0], [1], [0, 0, 1, 1], [], []>} : vector<4x432xbf16>, vector<432x16xbf16>, vector<4x16xf32> -> vector<4x16xf32>
    %c0_45 = arith.constant 0 : index
    %c0_46 = arith.constant 0 : index
    %147 = vector.load %arg26[%c0_45, %c0_46] : memref<4x1xf32, #tpu.memory_space<vmem>>, vector<4x1xf32>
    %148 = vector.broadcast %147 : vector<4x1xf32> to vector<4x16xf32>
    %149 = arith.addf %146, %148 : vector<4x16xf32>
    %cst_47 = arith.constant dense<0xFF800000> : vector<16xf32>
    %150 = vector.multi_reduction <maximumf>, %149, %cst_47 [0] : vector<4x16xf32> to vector<16xf32>
    %151 = vector.shape_cast %150 : vector<16xf32> to vector<1x16xf32>
    %152 = vector.broadcast %151 : vector<1x16xf32> to vector<4x16xf32>
    %153 = arith.subf %149, %152 : vector<4x16xf32>
    %154 = math.exp %153 : vector<4x16xf32>
    %cst_48 = arith.constant dense<0.000000e+00> : vector<16xf32>
    %155 = vector.multi_reduction <add>, %154, %cst_48 [0] : vector<4x16xf32> to vector<16xf32>
    %156 = vector.shape_cast %155 : vector<16xf32> to vector<1x16xf32>
    %157 = tpu.reciprocal %156 {approx = true} : vector<1x16xf32> -> vector<1x16xf32>
    %158 = vector.broadcast %157 : vector<1x16xf32> to vector<4x16xf32>
    %159 = arith.mulf %154, %158 : vector<4x16xf32>
    %c0_49 = arith.constant 0 : index
    %c0_50 = arith.constant 0 : index
    %c0_51 = arith.constant 0 : index
    %160 = vector.load %arg51[%c0_49, %c0_50, %c0_51] : memref<1x4x16xf32, #tpu.memory_space<vmem>>, vector<1x4x16xf32>
    %161 = vector.shape_cast %160 : vector<1x4x16xf32> to vector<4x16xf32>
    %162 = vector.shape_cast %159 : vector<4x16xf32> to vector<1x4x16xf32>
    tpu.vector_store %arg51[%c0_49, %c0_50, %c0_51], %162 {strides = array<i32>} : memref<1x4x16xf32, #tpu.memory_space<vmem>>, vector<1x4x16xf32>,
    %c0_52 = arith.constant 0 : index
    %c0_53 = arith.constant 0 : index
    %163 = vector.load %arg10[%c0_52, %c0_53] : memref<6x4xf32, #tpu.memory_space<vmem>>, vector<6x4xf32>
    %cst_54 = arith.constant dense<0.000000e+00> : vector<6x16xf32>
    %164 = tpu.matmul %163, %159, %cst_54 {dimension_numbers = #tpu.dot_dimension_numbers<[1], [0], [0], [1], [0, 0, 1, 1], [], []>} : vector<6x4xf32>, vector<4x16xf32>, vector<6x16xf32> -> vector<6x16xf32>
    %c0_55 = arith.constant 0 : index
    %c0_56 = arith.constant 0 : index
    %c0_57 = arith.constant 0 : index
    %165 = vector.load %arg52[%c0_55, %c0_56, %c0_57] : memref<1x6x16xf32, #tpu.memory_space<vmem>>, vector<1x6x16xf32>
    %166 = vector.shape_cast %165 : vector<1x6x16xf32> to vector<6x16xf32>
    %167 = vector.shape_cast %164 : vector<6x16xf32> to vector<1x6x16xf32>
    tpu.vector_store %arg52[%c0_55, %c0_56, %c0_57], %167 {strides = array<i32>} : memref<1x6x16xf32, #tpu.memory_space<vmem>>, vector<1x6x16xf32>,
    %c0_58 = arith.constant 0 : index
    %c0_59 = arith.constant 0 : index
    %168 = vector.load %arg4[%c0_58, %c0_59] : memref<16x64xf32, #tpu.memory_space<vmem>>, vector<16x64xf32>
    %cst_60 = arith.constant dense<0.000000e+00> : vector<4x64xf32>
    %169 = tpu.matmul %149, %168, %cst_60 {dimension_numbers = #tpu.dot_dimension_numbers<[1], [0], [0], [1], [0, 0, 1, 1], [], []>} : vector<4x16xf32>, vector<16x64xf32>, vector<4x64xf32> -> vector<4x64xf32>
    %c0_61 = arith.constant 0 : index
    %c0_62 = arith.constant 0 : index
    %170 = vector.load %arg6[%c0_61, %c0_62] : memref<4x4xf32, #tpu.memory_space<vmem>>, vector<4x4xf32>
    %cst_63 = arith.constant dense<0.000000e+00> : vector<4x64xf32>
    %171 = tpu.matmul %170, %169, %cst_63 {dimension_numbers = #tpu.dot_dimension_numbers<[1], [0], [0], [1], [0, 0, 1, 1], [], []>} : vector<4x4xf32>, vector<4x64xf32>, vector<4x64xf32> -> vector<4x64xf32>
    %c0_64 = arith.constant 0 : index
    %c0_65 = arith.constant 0 : index
    %172 = vector.load %arg7[%c0_64, %c0_65] : memref<4x1xf32, #tpu.memory_space<vmem>>, vector<4x1xf32>
    %173 = vector.broadcast %172 : vector<4x1xf32> to vector<4x64xf32>
    %174 = arith.addf %171, %173 : vector<4x64xf32>
    %175 = tpu.concatenate %3, %174 in 0 : vector<6x64xf32>, vector<4x64xf32> -> vector<10x64xf32>
    %c0_66 = arith.constant 0 : index
    %c0_67 = arith.constant 0 : index
    %176 = vector.load %arg13[%c0_66, %c0_67] : memref<1x64xf32, #tpu.memory_space<vmem>>, vector<1x64xf32>
    %c0_68 = arith.constant 0 : index
    %c0_69 = arith.constant 0 : index
    %177 = vector.load %arg14[%c0_68, %c0_69] : memref<1x64xf32, #tpu.memory_space<vmem>>, vector<1x64xf32>
    %cst_70 = arith.constant 0.000000e+00 : f32
    %178 = vector.broadcast %cst_70 : f32 to vector<10x9xf32>
    %179 = tpu.concatenate %178, %175, %178 in 1 : vector<10x9xf32>, vector<10x64xf32>, vector<10x9xf32> -> vector<10x82xf32>
    %180 = vector.extract_strided_slice %179 {offsets = [0, 0], sizes = [10, 64], strides = [1, 1]} : vector<10x82xf32> to vector<10x64xf32>
    %181 = vector.broadcast %176 : vector<1x64xf32> to vector<10x64xf32>
    %182 = arith.mulf %180, %181 : vector<10x64xf32>
    %183 = arith.truncf %182 : vector<10x64xf32> to vector<10x64xbf16>
    %184 = vector.extract_strided_slice %179 {offsets = [0, 1], sizes = [10, 64], strides = [1, 1]} : vector<10x82xf32> to vector<10x64xf32>
    %185 = arith.truncf %184 : vector<10x64xf32> to vector<10x64xbf16>
    %186 = vector.extract_strided_slice %179 {offsets = [0, 2], sizes = [10, 64], strides = [1, 1]} : vector<10x82xf32> to vector<10x64xf32>
    %187 = vector.broadcast %177 : vector<1x64xf32> to vector<10x64xf32>
    %188 = arith.mulf %186, %187 : vector<10x64xf32>
    %189 = arith.truncf %188 : vector<10x64xf32> to vector<10x64xbf16>
    %190 = vector.extract_strided_slice %179 {offsets = [0, 8], sizes = [10, 64], strides = [1, 1]} : vector<10x82xf32> to vector<10x64xf32>
    %191 = vector.broadcast %176 : vector<1x64xf32> to vector<10x64xf32>
    %192 = arith.mulf %190, %191 : vector<10x64xf32>
    %193 = arith.truncf %192 : vector<10x64xf32> to vector<10x64xbf16>
    %194 = vector.extract_strided_slice %179 {offsets = [0, 9], sizes = [10, 64], strides = [1, 1]} : vector<10x82xf32> to vector<10x64xf32>
    %195 = arith.truncf %194 : vector<10x64xf32> to vector<10x64xbf16>
    %196 = vector.extract_strided_slice %179 {offsets = [0, 10], sizes = [10, 64], strides = [1, 1]} : vector<10x82xf32> to vector<10x64xf32>
    %197 = vector.broadcast %177 : vector<1x64xf32> to vector<10x64xf32>
    %198 = arith.mulf %196, %197 : vector<10x64xf32>
    %199 = arith.truncf %198 : vector<10x64xf32> to vector<10x64xbf16>
    %200 = vector.extract_strided_slice %179 {offsets = [0, 16], sizes = [10, 64], strides = [1, 1]} : vector<10x82xf32> to vector<10x64xf32>
    %201 = vector.broadcast %176 : vector<1x64xf32> to vector<10x64xf32>
    %202 = arith.mulf %200, %201 : vector<10x64xf32>
    %203 = arith.truncf %202 : vector<10x64xf32> to vector<10x64xbf16>
    %204 = vector.extract_strided_slice %179 {offsets = [0, 17], sizes = [10, 64], strides = [1, 1]} : vector<10x82xf32> to vector<10x64xf32>
    %205 = arith.truncf %204 : vector<10x64xf32> to vector<10x64xbf16>
    %206 = vector.extract_strided_slice %179 {offsets = [0, 18], sizes = [10, 64], strides = [1, 1]} : vector<10x82xf32> to vector<10x64xf32>
    %207 = vector.broadcast %177 : vector<1x64xf32> to vector<10x64xf32>
    %208 = arith.mulf %206, %207 : vector<10x64xf32>
    %209 = arith.truncf %208 : vector<10x64xf32> to vector<10x64xbf16>
    %210 = tpu.concatenate %183, %185, %189, %193, %195, %199, %203, %205, %209 in 0 : vector<10x64xbf16>, vector<10x64xbf16>, vector<10x64xbf16>, vector<10x64xbf16>, vector<10x64xbf16>, vector<10x64xbf16>, vector<10x64xbf16>, vector<10x64xbf16>, vector<10x64xbf16> -> vector<90x64xbf16>
    %c0_71 = arith.constant 0 : index
    %c0_72 = arith.constant 0 : index
    %211 = vector.load %arg27[%c0_71, %c0_72] : memref<96x90xbf16, #tpu.memory_space<vmem>>, vector<96x90xbf16>
    %cst_73 = arith.constant dense<0.000000e+00> : vector<96x64xf32>
    %212 = tpu.matmul %211, %210, %cst_73 {dimension_numbers = #tpu.dot_dimension_numbers<[1], [0], [0], [1], [0, 0, 1, 1], [], []>} : vector<96x90xbf16>, vector<90x64xbf16>, vector<96x64xf32> -> vector<96x64xf32>
    %c0_74 = arith.constant 0 : index
    %c0_75 = arith.constant 0 : index
    %213 = vector.load %arg28[%c0_74, %c0_75] : memref<96x1xf32, #tpu.memory_space<vmem>>, vector<96x1xf32>
    %214 = vector.broadcast %213 : vector<96x1xf32> to vector<96x64xf32>
    %215 = arith.addf %212, %214 : vector<96x64xf32>
    %cst_76 = arith.constant 0.000000e+00 : f32
    %216 = vector.broadcast %cst_76 : f32 to vector<96x64xf32>
    %217 = arith.cmpf oge, %215, %216 : vector<96x64xf32>
    %cst_77 = arith.constant 2.000000e-01 : f32
    %218 = vector.broadcast %cst_77 : f32 to vector<96x64xf32>
    %219 = arith.mulf %218, %215 : vector<96x64xf32>
    %220 = arith.select %217, %215, %219 : vector<96x64xi1>, vector<96x64xf32>
    %c0_78 = arith.constant 0 : index
    %c0_79 = arith.constant 0 : index
    %221 = vector.load %arg29[%c0_78, %c0_79] : memref<96x1xf32, #tpu.memory_space<vmem>>, vector<96x1xf32>
    %222 = vector.broadcast %221 : vector<96x1xf32> to vector<96x64xf32>
    %223 = arith.mulf %220, %222 : vector<96x64xf32>
    %c0_80 = arith.constant 0 : index
    %c0_81 = arith.constant 0 : index
    %224 = vector.load %arg30[%c0_80, %c0_81] : memref<96x1xf32, #tpu.memory_space<vmem>>, vector<96x1xf32>
    %225 = vector.broadcast %224 : vector<96x1xf32> to vector<96x64xf32>
    %226 = arith.addf %223, %225 : vector<96x64xf32>
    %cst_82 = arith.constant 0.000000e+00 : f32
    %227 = vector.broadcast %cst_82 : f32 to vector<96x9xf32>
    %228 = tpu.concatenate %227, %226, %227 in 1 : vector<96x9xf32>, vector<96x64xf32>, vector<96x9xf32> -> vector<96x82xf32>
    %229 = vector.extract_strided_slice %228 {offsets = [0, 0], sizes = [96, 64], strides = [1, 1]} : vector<96x82xf32> to vector<96x64xf32>
    %230 = vector.broadcast %176 : vector<1x64xf32> to vector<96x64xf32>
    %231 = arith.mulf %229, %230 : vector<96x64xf32>
    %232 = arith.truncf %231 : vector<96x64xf32> to vector<96x64xbf16>
    %233 = vector.extract_strided_slice %228 {offsets = [0, 1], sizes = [96, 64], strides = [1, 1]} : vector<96x82xf32> to vector<96x64xf32>
    %234 = arith.truncf %233 : vector<96x64xf32> to vector<96x64xbf16>
    %235 = vector.extract_strided_slice %228 {offsets = [0, 2], sizes = [96, 64], strides = [1, 1]} : vector<96x82xf32> to vector<96x64xf32>
    %236 = vector.broadcast %177 : vector<1x64xf32> to vector<96x64xf32>
    %237 = arith.mulf %235, %236 : vector<96x64xf32>
    %238 = arith.truncf %237 : vector<96x64xf32> to vector<96x64xbf16>
    %239 = vector.extract_strided_slice %228 {offsets = [0, 8], sizes = [96, 64], strides = [1, 1]} : vector<96x82xf32> to vector<96x64xf32>
    %240 = vector.broadcast %176 : vector<1x64xf32> to vector<96x64xf32>
    %241 = arith.mulf %239, %240 : vector<96x64xf32>
    %242 = arith.truncf %241 : vector<96x64xf32> to vector<96x64xbf16>
    %243 = vector.extract_strided_slice %228 {offsets = [0, 9], sizes = [96, 64], strides = [1, 1]} : vector<96x82xf32> to vector<96x64xf32>
    %244 = arith.truncf %243 : vector<96x64xf32> to vector<96x64xbf16>
    %245 = vector.extract_strided_slice %228 {offsets = [0, 10], sizes = [96, 64], strides = [1, 1]} : vector<96x82xf32> to vector<96x64xf32>
    %246 = vector.broadcast %177 : vector<1x64xf32> to vector<96x64xf32>
    %247 = arith.mulf %245, %246 : vector<96x64xf32>
    %248 = arith.truncf %247 : vector<96x64xf32> to vector<96x64xbf16>
    %249 = vector.extract_strided_slice %228 {offsets = [0, 16], sizes = [96, 64], strides = [1, 1]} : vector<96x82xf32> to vector<96x64xf32>
    %250 = vector.broadcast %176 : vector<1x64xf32> to vector<96x64xf32>
    %251 = arith.mulf %249, %250 : vector<96x64xf32>
    %252 = arith.truncf %251 : vector<96x64xf32> to vector<96x64xbf16>
    %253 = vector.extract_strided_slice %228 {offsets = [0, 17], sizes = [96, 64], strides = [1, 1]} : vector<96x82xf32> to vector<96x64xf32>
    %254 = arith.truncf %253 : vector<96x64xf32> to vector<96x64xbf16>
    %255 = vector.extract_strided_slice %228 {offsets = [0, 18], sizes = [96, 64], strides = [1, 1]} : vector<96x82xf32> to vector<96x64xf32>
    %256 = vector.broadcast %177 : vector<1x64xf32> to vector<96x64xf32>
    %257 = arith.mulf %255, %256 : vector<96x64xf32>
    %258 = arith.truncf %257 : vector<96x64xf32> to vector<96x64xbf16>
    %259 = tpu.concatenate %232, %234, %238, %242, %244, %248, %252, %254, %258 in 0 : vector<96x64xbf16>, vector<96x64xbf16>, vector<96x64xbf16>, vector<96x64xbf16>, vector<96x64xbf16>, vector<96x64xbf16>, vector<96x64xbf16>, vector<96x64xbf16>, vector<96x64xbf16> -> vector<864x64xbf16>
    %c0_83 = arith.constant 0 : index
    %c0_84 = arith.constant 0 : index
    %260 = vector.load %arg31[%c0_83, %c0_84] : memref<48x864xbf16, #tpu.memory_space<vmem>>, vector<48x864xbf16>
    %cst_85 = arith.constant dense<0.000000e+00> : vector<48x64xf32>
    %261 = tpu.matmul %260, %259, %cst_85 {dimension_numbers = #tpu.dot_dimension_numbers<[1], [0], [0], [1], [0, 0, 1, 1], [], []>} : vector<48x864xbf16>, vector<864x64xbf16>, vector<48x64xf32> -> vector<48x64xf32>
    %c0_86 = arith.constant 0 : index
    %c0_87 = arith.constant 0 : index
    %262 = vector.load %arg32[%c0_86, %c0_87] : memref<48x1xf32, #tpu.memory_space<vmem>>, vector<48x1xf32>
    %263 = vector.broadcast %262 : vector<48x1xf32> to vector<48x64xf32>
    %264 = arith.addf %261, %263 : vector<48x64xf32>
    %cst_88 = arith.constant 0.000000e+00 : f32
    %265 = vector.broadcast %cst_88 : f32 to vector<48x64xf32>
    %266 = arith.cmpf oge, %264, %265 : vector<48x64xf32>
    %cst_89 = arith.constant 2.000000e-01 : f32
    %267 = vector.broadcast %cst_89 : f32 to vector<48x64xf32>
    %268 = arith.mulf %267, %264 : vector<48x64xf32>
    %269 = arith.select %266, %264, %268 : vector<48x64xi1>, vector<48x64xf32>
    %c0_90 = arith.constant 0 : index
    %c0_91 = arith.constant 0 : index
    %270 = vector.load %arg33[%c0_90, %c0_91] : memref<48x1xf32, #tpu.memory_space<vmem>>, vector<48x1xf32>
    %271 = vector.broadcast %270 : vector<48x1xf32> to vector<48x64xf32>
    %272 = arith.mulf %269, %271 : vector<48x64xf32>
    %c0_92 = arith.constant 0 : index
    %c0_93 = arith.constant 0 : index
    %273 = vector.load %arg34[%c0_92, %c0_93] : memref<48x1xf32, #tpu.memory_space<vmem>>, vector<48x1xf32>
    %274 = vector.broadcast %273 : vector<48x1xf32> to vector<48x64xf32>
    %275 = arith.addf %272, %274 : vector<48x64xf32>
    %cst_94 = arith.constant 0.000000e+00 : f32
    %276 = vector.broadcast %cst_94 : f32 to vector<48x9xf32>
    %277 = tpu.concatenate %276, %275, %276 in 1 : vector<48x9xf32>, vector<48x64xf32>, vector<48x9xf32> -> vector<48x82xf32>
    %278 = vector.extract_strided_slice %277 {offsets = [0, 0], sizes = [48, 64], strides = [1, 1]} : vector<48x82xf32> to vector<48x64xf32>
    %279 = vector.broadcast %176 : vector<1x64xf32> to vector<48x64xf32>
    %280 = arith.mulf %278, %279 : vector<48x64xf32>
    %281 = arith.truncf %280 : vector<48x64xf32> to vector<48x64xbf16>
    %282 = vector.extract_strided_slice %277 {offsets = [0, 1], sizes = [48, 64], strides = [1, 1]} : vector<48x82xf32> to vector<48x64xf32>
    %283 = arith.truncf %282 : vector<48x64xf32> to vector<48x64xbf16>
    %284 = vector.extract_strided_slice %277 {offsets = [0, 2], sizes = [48, 64], strides = [1, 1]} : vector<48x82xf32> to vector<48x64xf32>
    %285 = vector.broadcast %177 : vector<1x64xf32> to vector<48x64xf32>
    %286 = arith.mulf %284, %285 : vector<48x64xf32>
    %287 = arith.truncf %286 : vector<48x64xf32> to vector<48x64xbf16>
    %288 = vector.extract_strided_slice %277 {offsets = [0, 8], sizes = [48, 64], strides = [1, 1]} : vector<48x82xf32> to vector<48x64xf32>
    %289 = vector.broadcast %176 : vector<1x64xf32> to vector<48x64xf32>
    %290 = arith.mulf %288, %289 : vector<48x64xf32>
    %291 = arith.truncf %290 : vector<48x64xf32> to vector<48x64xbf16>
    %292 = vector.extract_strided_slice %277 {offsets = [0, 9], sizes = [48, 64], strides = [1, 1]} : vector<48x82xf32> to vector<48x64xf32>
    %293 = arith.truncf %292 : vector<48x64xf32> to vector<48x64xbf16>
    %294 = vector.extract_strided_slice %277 {offsets = [0, 10], sizes = [48, 64], strides = [1, 1]} : vector<48x82xf32> to vector<48x64xf32>
    %295 = vector.broadcast %177 : vector<1x64xf32> to vector<48x64xf32>
    %296 = arith.mulf %294, %295 : vector<48x64xf32>
    %297 = arith.truncf %296 : vector<48x64xf32> to vector<48x64xbf16>
    %298 = vector.extract_strided_slice %277 {offsets = [0, 16], sizes = [48, 64], strides = [1, 1]} : vector<48x82xf32> to vector<48x64xf32>
    %299 = vector.broadcast %176 : vector<1x64xf32> to vector<48x64xf32>
    %300 = arith.mulf %298, %299 : vector<48x64xf32>
    %301 = arith.truncf %300 : vector<48x64xf32> to vector<48x64xbf16>
    %302 = vector.extract_strided_slice %277 {offsets = [0, 17], sizes = [48, 64], strides = [1, 1]} : vector<48x82xf32> to vector<48x64xf32>
    %303 = arith.truncf %302 : vector<48x64xf32> to vector<48x64xbf16>
    %304 = vector.extract_strided_slice %277 {offsets = [0, 18], sizes = [48, 64], strides = [1, 1]} : vector<48x82xf32> to vector<48x64xf32>
    %305 = vector.broadcast %177 : vector<1x64xf32> to vector<48x64xf32>
    %306 = arith.mulf %304, %305 : vector<48x64xf32>
    %307 = arith.truncf %306 : vector<48x64xf32> to vector<48x64xbf16>
    %308 = tpu.concatenate %281, %283, %287, %291, %293, %297, %301, %303, %307 in 0 : vector<48x64xbf16>, vector<48x64xbf16>, vector<48x64xbf16>, vector<48x64xbf16>, vector<48x64xbf16>, vector<48x64xbf16>, vector<48x64xbf16>, vector<48x64xbf16>, vector<48x64xbf16> -> vector<432x64xbf16>
    %c0_95 = arith.constant 0 : index
    %c0_96 = arith.constant 0 : index
    %309 = vector.load %arg35[%c0_95, %c0_96] : memref<4x432xbf16, #tpu.memory_space<vmem>>, vector<4x432xbf16>
    %cst_97 = arith.constant dense<0.000000e+00> : vector<4x64xf32>
    %310 = tpu.matmul %309, %308, %cst_97 {dimension_numbers = #tpu.dot_dimension_numbers<[1], [0], [0], [1], [0, 0, 1, 1], [], []>} : vector<4x432xbf16>, vector<432x64xbf16>, vector<4x64xf32> -> vector<4x64xf32>
    %c0_98 = arith.constant 0 : index
    %c0_99 = arith.constant 0 : index
    %311 = vector.load %arg36[%c0_98, %c0_99] : memref<4x1xf32, #tpu.memory_space<vmem>>, vector<4x1xf32>
    %312 = vector.broadcast %311 : vector<4x1xf32> to vector<4x64xf32>
    %313 = arith.addf %310, %312 : vector<4x64xf32>
    %cst_100 = arith.constant dense<0xFF800000> : vector<64xf32>
    %314 = vector.multi_reduction <maximumf>, %313, %cst_100 [0] : vector<4x64xf32> to vector<64xf32>
    %315 = vector.shape_cast %314 : vector<64xf32> to vector<1x64xf32>
    %316 = vector.broadcast %315 : vector<1x64xf32> to vector<4x64xf32>
    %317 = arith.subf %313, %316 : vector<4x64xf32>
    %318 = math.exp %317 : vector<4x64xf32>
    %cst_101 = arith.constant dense<0.000000e+00> : vector<64xf32>
    %319 = vector.multi_reduction <add>, %318, %cst_101 [0] : vector<4x64xf32> to vector<64xf32>
    %320 = vector.shape_cast %319 : vector<64xf32> to vector<1x64xf32>
    %321 = tpu.reciprocal %320 {approx = true} : vector<1x64xf32> -> vector<1x64xf32>
    %322 = vector.broadcast %321 : vector<1x64xf32> to vector<4x64xf32>
    %323 = arith.mulf %318, %322 : vector<4x64xf32>
    %c0_102 = arith.constant 0 : index
    %c0_103 = arith.constant 0 : index
    %c0_104 = arith.constant 0 : index
    %324 = vector.load %arg49[%c0_102, %c0_103, %c0_104] : memref<1x4x64xf32, #tpu.memory_space<vmem>>, vector<1x4x64xf32>
    %325 = vector.shape_cast %324 : vector<1x4x64xf32> to vector<4x64xf32>
    %326 = vector.shape_cast %323 : vector<4x64xf32> to vector<1x4x64xf32>
    tpu.vector_store %arg49[%c0_102, %c0_103, %c0_104], %326 {strides = array<i32>} : memref<1x4x64xf32, #tpu.memory_space<vmem>>, vector<1x4x64xf32>,
    %c0_105 = arith.constant 0 : index
    %c0_106 = arith.constant 0 : index
    %327 = vector.load %arg9[%c0_105, %c0_106] : memref<6x4xf32, #tpu.memory_space<vmem>>, vector<6x4xf32>
    %cst_107 = arith.constant dense<0.000000e+00> : vector<6x64xf32>
    %328 = tpu.matmul %327, %323, %cst_107 {dimension_numbers = #tpu.dot_dimension_numbers<[1], [0], [0], [1], [0, 0, 1, 1], [], []>} : vector<6x4xf32>, vector<4x64xf32>, vector<6x64xf32> -> vector<6x64xf32>
    %c0_108 = arith.constant 0 : index
    %c0_109 = arith.constant 0 : index
    %c0_110 = arith.constant 0 : index
    %329 = vector.load %arg50[%c0_108, %c0_109, %c0_110] : memref<1x6x64xf32, #tpu.memory_space<vmem>>, vector<1x6x64xf32>
    %330 = vector.shape_cast %329 : vector<1x6x64xf32> to vector<6x64xf32>
    %331 = vector.shape_cast %328 : vector<6x64xf32> to vector<1x6x64xf32>
    tpu.vector_store %arg50[%c0_108, %c0_109, %c0_110], %331 {strides = array<i32>} : memref<1x6x64xf32, #tpu.memory_space<vmem>>, vector<1x6x64xf32>,
    %c0_111 = arith.constant 0 : index
    %c0_112 = arith.constant 0 : index
    %332 = vector.load %arg5[%c0_111, %c0_112] : memref<64x256xf32, #tpu.memory_space<vmem>>, vector<64x256xf32>
    %cst_113 = arith.constant dense<0.000000e+00> : vector<4x256xf32>
    %333 = tpu.matmul %313, %332, %cst_113 {dimension_numbers = #tpu.dot_dimension_numbers<[1], [0], [0], [1], [0, 0, 1, 1], [], []>} : vector<4x64xf32>, vector<64x256xf32>, vector<4x256xf32> -> vector<4x256xf32>
    %c0_114 = arith.constant 0 : index
    %c0_115 = arith.constant 0 : index
    %334 = vector.load %arg6[%c0_114, %c0_115] : memref<4x4xf32, #tpu.memory_space<vmem>>, vector<4x4xf32>
    %cst_116 = arith.constant dense<0.000000e+00> : vector<4x256xf32>
    %335 = tpu.matmul %334, %333, %cst_116 {dimension_numbers = #tpu.dot_dimension_numbers<[1], [0], [0], [1], [0, 0, 1, 1], [], []>} : vector<4x4xf32>, vector<4x256xf32>, vector<4x256xf32> -> vector<4x256xf32>
    %c0_117 = arith.constant 0 : index
    %c0_118 = arith.constant 0 : index
    %336 = vector.load %arg7[%c0_117, %c0_118] : memref<4x1xf32, #tpu.memory_space<vmem>>, vector<4x1xf32>
    %337 = vector.broadcast %336 : vector<4x1xf32> to vector<4x256xf32>
    %338 = arith.addf %335, %337 : vector<4x256xf32>
    %339 = tpu.concatenate %1, %338 in 0 : vector<6x256xf32>, vector<4x256xf32> -> vector<10x256xf32>
    %c0_119 = arith.constant 0 : index
    %c0_120 = arith.constant 0 : index
    %340 = vector.load %arg11[%c0_119, %c0_120] : memref<1x256xf32, #tpu.memory_space<vmem>>, vector<1x256xf32>
    %c0_121 = arith.constant 0 : index
    %c0_122 = arith.constant 0 : index
    %341 = vector.load %arg12[%c0_121, %c0_122] : memref<1x256xf32, #tpu.memory_space<vmem>>, vector<1x256xf32>
    %cst_123 = arith.constant 0.000000e+00 : f32
    %342 = vector.broadcast %cst_123 : f32 to vector<10x17xf32>
    %343 = tpu.concatenate %342, %339, %342 in 1 : vector<10x17xf32>, vector<10x256xf32>, vector<10x17xf32> -> vector<10x290xf32>
    %344 = vector.extract_strided_slice %343 {offsets = [0, 0], sizes = [10, 256], strides = [1, 1]} : vector<10x290xf32> to vector<10x256xf32>
    %345 = vector.broadcast %340 : vector<1x256xf32> to vector<10x256xf32>
    %346 = arith.mulf %344, %345 : vector<10x256xf32>
    %347 = arith.truncf %346 : vector<10x256xf32> to vector<10x256xbf16>
    %348 = vector.extract_strided_slice %343 {offsets = [0, 1], sizes = [10, 256], strides = [1, 1]} : vector<10x290xf32> to vector<10x256xf32>
    %349 = arith.truncf %348 : vector<10x256xf32> to vector<10x256xbf16>
    %350 = vector.extract_strided_slice %343 {offsets = [0, 2], sizes = [10, 256], strides = [1, 1]} : vector<10x290xf32> to vector<10x256xf32>
    %351 = vector.broadcast %341 : vector<1x256xf32> to vector<10x256xf32>
    %352 = arith.mulf %350, %351 : vector<10x256xf32>
    %353 = arith.truncf %352 : vector<10x256xf32> to vector<10x256xbf16>
    %354 = vector.extract_strided_slice %343 {offsets = [0, 16], sizes = [10, 256], strides = [1, 1]} : vector<10x290xf32> to vector<10x256xf32>
    %355 = vector.broadcast %340 : vector<1x256xf32> to vector<10x256xf32>
    %356 = arith.mulf %354, %355 : vector<10x256xf32>
    %357 = arith.truncf %356 : vector<10x256xf32> to vector<10x256xbf16>
    %358 = vector.extract_strided_slice %343 {offsets = [0, 17], sizes = [10, 256], strides = [1, 1]} : vector<10x290xf32> to vector<10x256xf32>
    %359 = arith.truncf %358 : vector<10x256xf32> to vector<10x256xbf16>
    %360 = vector.extract_strided_slice %343 {offsets = [0, 18], sizes = [10, 256], strides = [1, 1]} : vector<10x290xf32> to vector<10x256xf32>
    %361 = vector.broadcast %341 : vector<1x256xf32> to vector<10x256xf32>
    %362 = arith.mulf %360, %361 : vector<10x256xf32>
    %363 = arith.truncf %362 : vector<10x256xf32> to vector<10x256xbf16>
    %364 = vector.extract_strided_slice %343 {offsets = [0, 32], sizes = [10, 256], strides = [1, 1]} : vector<10x290xf32> to vector<10x256xf32>
    %365 = vector.broadcast %340 : vector<1x256xf32> to vector<10x256xf32>
    %366 = arith.mulf %364, %365 : vector<10x256xf32>
    %367 = arith.truncf %366 : vector<10x256xf32> to vector<10x256xbf16>
    %368 = vector.extract_strided_slice %343 {offsets = [0, 33], sizes = [10, 256], strides = [1, 1]} : vector<10x290xf32> to vector<10x256xf32>
    %369 = arith.truncf %368 : vector<10x256xf32> to vector<10x256xbf16>
    %370 = vector.extract_strided_slice %343 {offsets = [0, 34], sizes = [10, 256], strides = [1, 1]} : vector<10x290xf32> to vector<10x256xf32>
    %371 = vector.broadcast %341 : vector<1x256xf32> to vector<10x256xf32>
    %372 = arith.mulf %370, %371 : vector<10x256xf32>
    %373 = arith.truncf %372 : vector<10x256xf32> to vector<10x256xbf16>
    %374 = tpu.concatenate %347, %349, %353, %357, %359, %363, %367, %369, %373 in 0 : vector<10x256xbf16>, vector<10x256xbf16>, vector<10x256xbf16>, vector<10x256xbf16>, vector<10x256xbf16>, vector<10x256xbf16>, vector<10x256xbf16>, vector<10x256xbf16>, vector<10x256xbf16> -> vector<90x256xbf16>
    %c0_124 = arith.constant 0 : index
    %c0_125 = arith.constant 0 : index
    %375 = vector.load %arg37[%c0_124, %c0_125] : memref<96x90xbf16, #tpu.memory_space<vmem>>, vector<96x90xbf16>
    %cst_126 = arith.constant dense<0.000000e+00> : vector<96x256xf32>
    %376 = tpu.matmul %375, %374, %cst_126 {dimension_numbers = #tpu.dot_dimension_numbers<[1], [0], [0], [1], [0, 0, 1, 1], [], []>} : vector<96x90xbf16>, vector<90x256xbf16>, vector<96x256xf32> -> vector<96x256xf32>
    %c0_127 = arith.constant 0 : index
    %c0_128 = arith.constant 0 : index
    %377 = vector.load %arg38[%c0_127, %c0_128] : memref<96x1xf32, #tpu.memory_space<vmem>>, vector<96x1xf32>
    %378 = vector.broadcast %377 : vector<96x1xf32> to vector<96x256xf32>
    %379 = arith.addf %376, %378 : vector<96x256xf32>
    %cst_129 = arith.constant 0.000000e+00 : f32
    %380 = vector.broadcast %cst_129 : f32 to vector<96x256xf32>
    %381 = arith.cmpf oge, %379, %380 : vector<96x256xf32>
    %cst_130 = arith.constant 2.000000e-01 : f32
    %382 = vector.broadcast %cst_130 : f32 to vector<96x256xf32>
    %383 = arith.mulf %382, %379 : vector<96x256xf32>
    %384 = arith.select %381, %379, %383 : vector<96x256xi1>, vector<96x256xf32>
    %c0_131 = arith.constant 0 : index
    %c0_132 = arith.constant 0 : index
    %385 = vector.load %arg39[%c0_131, %c0_132] : memref<96x1xf32, #tpu.memory_space<vmem>>, vector<96x1xf32>
    %386 = vector.broadcast %385 : vector<96x1xf32> to vector<96x256xf32>
    %387 = arith.mulf %384, %386 : vector<96x256xf32>
    %c0_133 = arith.constant 0 : index
    %c0_134 = arith.constant 0 : index
    %388 = vector.load %arg40[%c0_133, %c0_134] : memref<96x1xf32, #tpu.memory_space<vmem>>, vector<96x1xf32>
    %389 = vector.broadcast %388 : vector<96x1xf32> to vector<96x256xf32>
    %390 = arith.addf %387, %389 : vector<96x256xf32>
    %cst_135 = arith.constant 0.000000e+00 : f32
    %391 = vector.broadcast %cst_135 : f32 to vector<96x17xf32>
    %392 = tpu.concatenate %391, %390, %391 in 1 : vector<96x17xf32>, vector<96x256xf32>, vector<96x17xf32> -> vector<96x290xf32>
    %393 = vector.extract_strided_slice %392 {offsets = [0, 0], sizes = [96, 256], strides = [1, 1]} : vector<96x290xf32> to vector<96x256xf32>
    %394 = vector.broadcast %340 : vector<1x256xf32> to vector<96x256xf32>
    %395 = arith.mulf %393, %394 : vector<96x256xf32>
    %396 = arith.truncf %395 : vector<96x256xf32> to vector<96x256xbf16>
    %397 = vector.extract_strided_slice %392 {offsets = [0, 1], sizes = [96, 256], strides = [1, 1]} : vector<96x290xf32> to vector<96x256xf32>
    %398 = arith.truncf %397 : vector<96x256xf32> to vector<96x256xbf16>
    %399 = vector.extract_strided_slice %392 {offsets = [0, 2], sizes = [96, 256], strides = [1, 1]} : vector<96x290xf32> to vector<96x256xf32>
    %400 = vector.broadcast %341 : vector<1x256xf32> to vector<96x256xf32>
    %401 = arith.mulf %399, %400 : vector<96x256xf32>
    %402 = arith.truncf %401 : vector<96x256xf32> to vector<96x256xbf16>
    %403 = vector.extract_strided_slice %392 {offsets = [0, 16], sizes = [96, 256], strides = [1, 1]} : vector<96x290xf32> to vector<96x256xf32>
    %404 = vector.broadcast %340 : vector<1x256xf32> to vector<96x256xf32>
    %405 = arith.mulf %403, %404 : vector<96x256xf32>
    %406 = arith.truncf %405 : vector<96x256xf32> to vector<96x256xbf16>
    %407 = vector.extract_strided_slice %392 {offsets = [0, 17], sizes = [96, 256], strides = [1, 1]} : vector<96x290xf32> to vector<96x256xf32>
    %408 = arith.truncf %407 : vector<96x256xf32> to vector<96x256xbf16>
    %409 = vector.extract_strided_slice %392 {offsets = [0, 18], sizes = [96, 256], strides = [1, 1]} : vector<96x290xf32> to vector<96x256xf32>
    %410 = vector.broadcast %341 : vector<1x256xf32> to vector<96x256xf32>
    %411 = arith.mulf %409, %410 : vector<96x256xf32>
    %412 = arith.truncf %411 : vector<96x256xf32> to vector<96x256xbf16>
    %413 = vector.extract_strided_slice %392 {offsets = [0, 32], sizes = [96, 256], strides = [1, 1]} : vector<96x290xf32> to vector<96x256xf32>
    %414 = vector.broadcast %340 : vector<1x256xf32> to vector<96x256xf32>
    %415 = arith.mulf %413, %414 : vector<96x256xf32>
    %416 = arith.truncf %415 : vector<96x256xf32> to vector<96x256xbf16>
    %417 = vector.extract_strided_slice %392 {offsets = [0, 33], sizes = [96, 256], strides = [1, 1]} : vector<96x290xf32> to vector<96x256xf32>
    %418 = arith.truncf %417 : vector<96x256xf32> to vector<96x256xbf16>
    %419 = vector.extract_strided_slice %392 {offsets = [0, 34], sizes = [96, 256], strides = [1, 1]} : vector<96x290xf32> to vector<96x256xf32>
    %420 = vector.broadcast %341 : vector<1x256xf32> to vector<96x256xf32>
    %421 = arith.mulf %419, %420 : vector<96x256xf32>
    %422 = arith.truncf %421 : vector<96x256xf32> to vector<96x256xbf16>
    %423 = tpu.concatenate %396, %398, %402, %406, %408, %412, %416, %418, %422 in 0 : vector<96x256xbf16>, vector<96x256xbf16>, vector<96x256xbf16>, vector<96x256xbf16>, vector<96x256xbf16>, vector<96x256xbf16>, vector<96x256xbf16>, vector<96x256xbf16>, vector<96x256xbf16> -> vector<864x256xbf16>
    %c0_136 = arith.constant 0 : index
    %c0_137 = arith.constant 0 : index
    %424 = vector.load %arg41[%c0_136, %c0_137] : memref<48x864xbf16, #tpu.memory_space<vmem>>, vector<48x864xbf16>
    %cst_138 = arith.constant dense<0.000000e+00> : vector<48x256xf32>
    %425 = tpu.matmul %424, %423, %cst_138 {dimension_numbers = #tpu.dot_dimension_numbers<[1], [0], [0], [1], [0, 0, 1, 1], [], []>} : vector<48x864xbf16>, vector<864x256xbf16>, vector<48x256xf32> -> vector<48x256xf32>
    %c0_139 = arith.constant 0 : index
    %c0_140 = arith.constant 0 : index
    %426 = vector.load %arg42[%c0_139, %c0_140] : memref<48x1xf32, #tpu.memory_space<vmem>>, vector<48x1xf32>
    %427 = vector.broadcast %426 : vector<48x1xf32> to vector<48x256xf32>
    %428 = arith.addf %425, %427 : vector<48x256xf32>
    %cst_141 = arith.constant 0.000000e+00 : f32
    %429 = vector.broadcast %cst_141 : f32 to vector<48x256xf32>
    %430 = arith.cmpf oge, %428, %429 : vector<48x256xf32>
    %cst_142 = arith.constant 2.000000e-01 : f32
    %431 = vector.broadcast %cst_142 : f32 to vector<48x256xf32>
    %432 = arith.mulf %431, %428 : vector<48x256xf32>
    %433 = arith.select %430, %428, %432 : vector<48x256xi1>, vector<48x256xf32>
    %c0_143 = arith.constant 0 : index
    %c0_144 = arith.constant 0 : index
    %434 = vector.load %arg43[%c0_143, %c0_144] : memref<48x1xf32, #tpu.memory_space<vmem>>, vector<48x1xf32>
    %435 = vector.broadcast %434 : vector<48x1xf32> to vector<48x256xf32>
    %436 = arith.mulf %433, %435 : vector<48x256xf32>
    %c0_145 = arith.constant 0 : index
    %c0_146 = arith.constant 0 : index
    %437 = vector.load %arg44[%c0_145, %c0_146] : memref<48x1xf32, #tpu.memory_space<vmem>>, vector<48x1xf32>
    %438 = vector.broadcast %437 : vector<48x1xf32> to vector<48x256xf32>
    %439 = arith.addf %436, %438 : vector<48x256xf32>
    %cst_147 = arith.constant 0.000000e+00 : f32
    %440 = vector.broadcast %cst_147 : f32 to vector<48x17xf32>
    %441 = tpu.concatenate %440, %439, %440 in 1 : vector<48x17xf32>, vector<48x256xf32>, vector<48x17xf32> -> vector<48x290xf32>
    %442 = vector.extract_strided_slice %441 {offsets = [0, 0], sizes = [48, 256], strides = [1, 1]} : vector<48x290xf32> to vector<48x256xf32>
    %443 = vector.broadcast %340 : vector<1x256xf32> to vector<48x256xf32>
    %444 = arith.mulf %442, %443 : vector<48x256xf32>
    %445 = arith.truncf %444 : vector<48x256xf32> to vector<48x256xbf16>
    %446 = vector.extract_strided_slice %441 {offsets = [0, 1], sizes = [48, 256], strides = [1, 1]} : vector<48x290xf32> to vector<48x256xf32>
    %447 = arith.truncf %446 : vector<48x256xf32> to vector<48x256xbf16>
    %448 = vector.extract_strided_slice %441 {offsets = [0, 2], sizes = [48, 256], strides = [1, 1]} : vector<48x290xf32> to vector<48x256xf32>
    %449 = vector.broadcast %341 : vector<1x256xf32> to vector<48x256xf32>
    %450 = arith.mulf %448, %449 : vector<48x256xf32>
    %451 = arith.truncf %450 : vector<48x256xf32> to vector<48x256xbf16>
    %452 = vector.extract_strided_slice %441 {offsets = [0, 16], sizes = [48, 256], strides = [1, 1]} : vector<48x290xf32> to vector<48x256xf32>
    %453 = vector.broadcast %340 : vector<1x256xf32> to vector<48x256xf32>
    %454 = arith.mulf %452, %453 : vector<48x256xf32>
    %455 = arith.truncf %454 : vector<48x256xf32> to vector<48x256xbf16>
    %456 = vector.extract_strided_slice %441 {offsets = [0, 17], sizes = [48, 256], strides = [1, 1]} : vector<48x290xf32> to vector<48x256xf32>
    %457 = arith.truncf %456 : vector<48x256xf32> to vector<48x256xbf16>
    %458 = vector.extract_strided_slice %441 {offsets = [0, 18], sizes = [48, 256], strides = [1, 1]} : vector<48x290xf32> to vector<48x256xf32>
    %459 = vector.broadcast %341 : vector<1x256xf32> to vector<48x256xf32>
    %460 = arith.mulf %458, %459 : vector<48x256xf32>
    %461 = arith.truncf %460 : vector<48x256xf32> to vector<48x256xbf16>
    %462 = vector.extract_strided_slice %441 {offsets = [0, 32], sizes = [48, 256], strides = [1, 1]} : vector<48x290xf32> to vector<48x256xf32>
    %463 = vector.broadcast %340 : vector<1x256xf32> to vector<48x256xf32>
    %464 = arith.mulf %462, %463 : vector<48x256xf32>
    %465 = arith.truncf %464 : vector<48x256xf32> to vector<48x256xbf16>
    %466 = vector.extract_strided_slice %441 {offsets = [0, 33], sizes = [48, 256], strides = [1, 1]} : vector<48x290xf32> to vector<48x256xf32>
    %467 = arith.truncf %466 : vector<48x256xf32> to vector<48x256xbf16>
    %468 = vector.extract_strided_slice %441 {offsets = [0, 34], sizes = [48, 256], strides = [1, 1]} : vector<48x290xf32> to vector<48x256xf32>
    %469 = vector.broadcast %341 : vector<1x256xf32> to vector<48x256xf32>
    %470 = arith.mulf %468, %469 : vector<48x256xf32>
    %471 = arith.truncf %470 : vector<48x256xf32> to vector<48x256xbf16>
    %472 = tpu.concatenate %445, %447, %451, %455, %457, %461, %465, %467, %471 in 0 : vector<48x256xbf16>, vector<48x256xbf16>, vector<48x256xbf16>, vector<48x256xbf16>, vector<48x256xbf16>, vector<48x256xbf16>, vector<48x256xbf16>, vector<48x256xbf16>, vector<48x256xbf16> -> vector<432x256xbf16>
    %c0_148 = arith.constant 0 : index
    %c0_149 = arith.constant 0 : index
    %473 = vector.load %arg45[%c0_148, %c0_149] : memref<4x432xbf16, #tpu.memory_space<vmem>>, vector<4x432xbf16>
    %cst_150 = arith.constant dense<0.000000e+00> : vector<4x256xf32>
    %474 = tpu.matmul %473, %472, %cst_150 {dimension_numbers = #tpu.dot_dimension_numbers<[1], [0], [0], [1], [0, 0, 1, 1], [], []>} : vector<4x432xbf16>, vector<432x256xbf16>, vector<4x256xf32> -> vector<4x256xf32>
    %c0_151 = arith.constant 0 : index
    %c0_152 = arith.constant 0 : index
    %475 = vector.load %arg46[%c0_151, %c0_152] : memref<4x1xf32, #tpu.memory_space<vmem>>, vector<4x1xf32>
    %476 = vector.broadcast %475 : vector<4x1xf32> to vector<4x256xf32>
    %477 = arith.addf %474, %476 : vector<4x256xf32>
    %cst_153 = arith.constant dense<0xFF800000> : vector<256xf32>
    %478 = vector.multi_reduction <maximumf>, %477, %cst_153 [0] : vector<4x256xf32> to vector<256xf32>
    %479 = vector.shape_cast %478 : vector<256xf32> to vector<1x256xf32>
    %480 = vector.broadcast %479 : vector<1x256xf32> to vector<4x256xf32>
    %481 = arith.subf %477, %480 : vector<4x256xf32>
    %482 = math.exp %481 : vector<4x256xf32>
    %cst_154 = arith.constant dense<0.000000e+00> : vector<256xf32>
    %483 = vector.multi_reduction <add>, %482, %cst_154 [0] : vector<4x256xf32> to vector<256xf32>
    %484 = vector.shape_cast %483 : vector<256xf32> to vector<1x256xf32>
    %485 = tpu.reciprocal %484 {approx = true} : vector<1x256xf32> -> vector<1x256xf32>
    %486 = vector.broadcast %485 : vector<1x256xf32> to vector<4x256xf32>
    %487 = arith.mulf %482, %486 : vector<4x256xf32>
    %c0_155 = arith.constant 0 : index
    %c0_156 = arith.constant 0 : index
    %c0_157 = arith.constant 0 : index
    %488 = vector.load %arg47[%c0_155, %c0_156, %c0_157] : memref<1x4x256xf32, #tpu.memory_space<vmem>>, vector<1x4x256xf32>
    %489 = vector.shape_cast %488 : vector<1x4x256xf32> to vector<4x256xf32>
    %490 = vector.shape_cast %487 : vector<4x256xf32> to vector<1x4x256xf32>
    tpu.vector_store %arg47[%c0_155, %c0_156, %c0_157], %490 {strides = array<i32>} : memref<1x4x256xf32, #tpu.memory_space<vmem>>, vector<1x4x256xf32>,
    %c0_158 = arith.constant 0 : index
    %c0_159 = arith.constant 0 : index
    %491 = vector.load %arg8[%c0_158, %c0_159] : memref<6x4xf32, #tpu.memory_space<vmem>>, vector<6x4xf32>
    %cst_160 = arith.constant dense<0.000000e+00> : vector<6x256xf32>
    %492 = tpu.matmul %491, %487, %cst_160 {dimension_numbers = #tpu.dot_dimension_numbers<[1], [0], [0], [1], [0, 0, 1, 1], [], []>} : vector<6x4xf32>, vector<4x256xf32>, vector<6x256xf32> -> vector<6x256xf32>
    %c0_161 = arith.constant 0 : index
    %c0_162 = arith.constant 0 : index
    %c0_163 = arith.constant 0 : index
    %493 = vector.load %arg48[%c0_161, %c0_162, %c0_163] : memref<1x6x256xf32, #tpu.memory_space<vmem>>, vector<1x6x256xf32>
    %494 = vector.shape_cast %493 : vector<1x6x256xf32> to vector<6x256xf32>
    %495 = vector.shape_cast %492 : vector<6x256xf32> to vector<1x6x256xf32>
    tpu.vector_store %arg48[%c0_161, %c0_162, %c0_163], %495 {strides = array<i32>} : memref<1x6x256xf32, #tpu.memory_space<vmem>>, vector<1x6x256xf32>,
    return
  }
  func.func @transform_0(%arg0: i32) -> (i32, i32, i32) {
    %c0_i32 = arith.constant 0 : i32
    %c0_i32_0 = arith.constant 0 : i32
    %c0_i32_1 = arith.constant 0 : i32
    return %arg0, %c0_i32, %c0_i32_0 : i32, i32, i32
  }
  func.func @transform_1(%arg0: i32) -> (i32, i32) {
    %c0_i32 = arith.constant 0 : i32
    %c0_i32_0 = arith.constant 0 : i32
    %c0_i32_1 = arith.constant 0 : i32
    return %c0_i32, %c0_i32_0 : i32, i32
  }
  func.func @transform_2(%arg0: i32) -> (i32, i32) {
    %c0_i32 = arith.constant 0 : i32
    %c0_i32_0 = arith.constant 0 : i32
    %c0_i32_1 = arith.constant 0 : i32
    return %c0_i32, %c0_i32_0 : i32, i32
  }
  func.func @transform_3(%arg0: i32) -> (i32, i32) {
    %c0_i32 = arith.constant 0 : i32
    %c0_i32_0 = arith.constant 0 : i32
    %c0_i32_1 = arith.constant 0 : i32
    return %c0_i32, %c0_i32_0 : i32, i32
  }
  func.func @transform_4(%arg0: i32) -> (i32, i32) {
    %c0_i32 = arith.constant 0 : i32
    %c0_i32_0 = arith.constant 0 : i32
    %c0_i32_1 = arith.constant 0 : i32
    return %c0_i32, %c0_i32_0 : i32, i32
  }
  func.func @transform_5(%arg0: i32) -> (i32, i32) {
    %c0_i32 = arith.constant 0 : i32
    %c0_i32_0 = arith.constant 0 : i32
    %c0_i32_1 = arith.constant 0 : i32
    return %c0_i32, %c0_i32_0 : i32, i32
  }
  func.func @transform_6(%arg0: i32) -> (i32, i32) {
    %c0_i32 = arith.constant 0 : i32
    %c0_i32_0 = arith.constant 0 : i32
    %c0_i32_1 = arith.constant 0 : i32
    return %c0_i32, %c0_i32_0 : i32, i32
  }
  func.func @transform_7(%arg0: i32) -> (i32, i32) {
    %c0_i32 = arith.constant 0 : i32
    %c0_i32_0 = arith.constant 0 : i32
    %c0_i32_1 = arith.constant 0 : i32
    return %c0_i32, %c0_i32_0 : i32, i32
  }
  func.func @transform_8(%arg0: i32) -> (i32, i32) {
    %c0_i32 = arith.constant 0 : i32
    %c0_i32_0 = arith.constant 0 : i32
    %c0_i32_1 = arith.constant 0 : i32
    return %c0_i32, %c0_i32_0 : i32, i32
  }
  func.func @transform_9(%arg0: i32) -> (i32, i32) {
    %c0_i32 = arith.constant 0 : i32
    %c0_i32_0 = arith.constant 0 : i32
    %c0_i32_1 = arith.constant 0 : i32
    return %c0_i32, %c0_i32_0 : i32, i32
  }
  func.func @transform_10(%arg0: i32) -> (i32, i32) {
    %c0_i32 = arith.constant 0 : i32
    %c0_i32_0 = arith.constant 0 : i32
    %c0_i32_1 = arith.constant 0 : i32
    return %c0_i32, %c0_i32_0 : i32, i32
  }
  func.func @transform_11(%arg0: i32) -> (i32, i32) {
    %c0_i32 = arith.constant 0 : i32
    %c0_i32_0 = arith.constant 0 : i32
    %c0_i32_1 = arith.constant 0 : i32
    return %c0_i32, %c0_i32_0 : i32, i32
  }
  func.func @transform_12(%arg0: i32) -> (i32, i32) {
    %c0_i32 = arith.constant 0 : i32
    %c0_i32_0 = arith.constant 0 : i32
    %c0_i32_1 = arith.constant 0 : i32
    return %c0_i32, %c0_i32_0 : i32, i32
  }
  func.func @transform_13(%arg0: i32) -> (i32, i32) {
    %c0_i32 = arith.constant 0 : i32
    %c0_i32_0 = arith.constant 0 : i32
    %c0_i32_1 = arith.constant 0 : i32
    return %c0_i32, %c0_i32_0 : i32, i32
  }
  func.func @transform_14(%arg0: i32) -> (i32, i32) {
    %c0_i32 = arith.constant 0 : i32
    %c0_i32_0 = arith.constant 0 : i32
    %c0_i32_1 = arith.constant 0 : i32
    return %c0_i32, %c0_i32_0 : i32, i32
  }
  func.func @transform_15(%arg0: i32) -> (i32, i32) {
    %c0_i32 = arith.constant 0 : i32
    %c0_i32_0 = arith.constant 0 : i32
    %c0_i32_1 = arith.constant 0 : i32
    return %c0_i32, %c0_i32_0 : i32, i32
  }
  func.func @transform_16(%arg0: i32) -> (i32, i32) {
    %c0_i32 = arith.constant 0 : i32
    %c0_i32_0 = arith.constant 0 : i32
    %c0_i32_1 = arith.constant 0 : i32
    return %c0_i32, %c0_i32_0 : i32, i32
  }
  func.func @transform_17(%arg0: i32) -> (i32, i32) {
    %c0_i32 = arith.constant 0 : i32
    %c0_i32_0 = arith.constant 0 : i32
    %c0_i32_1 = arith.constant 0 : i32
    return %c0_i32, %c0_i32_0 : i32, i32
  }
  func.func @transform_18(%arg0: i32) -> (i32, i32) {
    %c0_i32 = arith.constant 0 : i32
    %c0_i32_0 = arith.constant 0 : i32
    %c0_i32_1 = arith.constant 0 : i32
    return %c0_i32, %c0_i32_0 : i32, i32
  }
  func.func @transform_19(%arg0: i32) -> (i32, i32) {
    %c0_i32 = arith.constant 0 : i32
    %c0_i32_0 = arith.constant 0 : i32
    %c0_i32_1 = arith.constant 0 : i32
    return %c0_i32, %c0_i32_0 : i32, i32
  }
  func.func @transform_20(%arg0: i32) -> (i32, i32) {
    %c0_i32 = arith.constant 0 : i32
    %c0_i32_0 = arith.constant 0 : i32
    %c0_i32_1 = arith.constant 0 : i32
    return %c0_i32, %c0_i32_0 : i32, i32
  }
  func.func @transform_21(%arg0: i32) -> (i32, i32) {
    %c0_i32 = arith.constant 0 : i32
    %c0_i32_0 = arith.constant 0 : i32
    %c0_i32_1 = arith.constant 0 : i32
    return %c0_i32, %c0_i32_0 : i32, i32
  }
  func.func @transform_22(%arg0: i32) -> (i32, i32) {
    %c0_i32 = arith.constant 0 : i32
    %c0_i32_0 = arith.constant 0 : i32
    %c0_i32_1 = arith.constant 0 : i32
    return %c0_i32, %c0_i32_0 : i32, i32
  }
  func.func @transform_23(%arg0: i32) -> (i32, i32) {
    %c0_i32 = arith.constant 0 : i32
    %c0_i32_0 = arith.constant 0 : i32
    %c0_i32_1 = arith.constant 0 : i32
    return %c0_i32, %c0_i32_0 : i32, i32
  }
  func.func @transform_24(%arg0: i32) -> (i32, i32) {
    %c0_i32 = arith.constant 0 : i32
    %c0_i32_0 = arith.constant 0 : i32
    %c0_i32_1 = arith.constant 0 : i32
    return %c0_i32, %c0_i32_0 : i32, i32
  }
  func.func @transform_25(%arg0: i32) -> (i32, i32) {
    %c0_i32 = arith.constant 0 : i32
    %c0_i32_0 = arith.constant 0 : i32
    %c0_i32_1 = arith.constant 0 : i32
    return %c0_i32, %c0_i32_0 : i32, i32
  }
  func.func @transform_26(%arg0: i32) -> (i32, i32) {
    %c0_i32 = arith.constant 0 : i32
    %c0_i32_0 = arith.constant 0 : i32
    %c0_i32_1 = arith.constant 0 : i32
    return %c0_i32, %c0_i32_0 : i32, i32
  }
  func.func @transform_27(%arg0: i32) -> (i32, i32) {
    %c0_i32 = arith.constant 0 : i32
    %c0_i32_0 = arith.constant 0 : i32
    %c0_i32_1 = arith.constant 0 : i32
    return %c0_i32, %c0_i32_0 : i32, i32
  }
  func.func @transform_28(%arg0: i32) -> (i32, i32) {
    %c0_i32 = arith.constant 0 : i32
    %c0_i32_0 = arith.constant 0 : i32
    %c0_i32_1 = arith.constant 0 : i32
    return %c0_i32, %c0_i32_0 : i32, i32
  }
  func.func @transform_29(%arg0: i32) -> (i32, i32) {
    %c0_i32 = arith.constant 0 : i32
    %c0_i32_0 = arith.constant 0 : i32
    %c0_i32_1 = arith.constant 0 : i32
    return %c0_i32, %c0_i32_0 : i32, i32
  }
  func.func @transform_30(%arg0: i32) -> (i32, i32) {
    %c0_i32 = arith.constant 0 : i32
    %c0_i32_0 = arith.constant 0 : i32
    %c0_i32_1 = arith.constant 0 : i32
    return %c0_i32, %c0_i32_0 : i32, i32
  }
  func.func @transform_31(%arg0: i32) -> (i32, i32) {
    %c0_i32 = arith.constant 0 : i32
    %c0_i32_0 = arith.constant 0 : i32
    %c0_i32_1 = arith.constant 0 : i32
    return %c0_i32, %c0_i32_0 : i32, i32
  }
  func.func @transform_32(%arg0: i32) -> (i32, i32) {
    %c0_i32 = arith.constant 0 : i32
    %c0_i32_0 = arith.constant 0 : i32
    %c0_i32_1 = arith.constant 0 : i32
    return %c0_i32, %c0_i32_0 : i32, i32
  }
  func.func @transform_33(%arg0: i32) -> (i32, i32) {
    %c0_i32 = arith.constant 0 : i32
    %c0_i32_0 = arith.constant 0 : i32
    %c0_i32_1 = arith.constant 0 : i32
    return %c0_i32, %c0_i32_0 : i32, i32
  }
  func.func @transform_34(%arg0: i32) -> (i32, i32) {
    %c0_i32 = arith.constant 0 : i32
    %c0_i32_0 = arith.constant 0 : i32
    %c0_i32_1 = arith.constant 0 : i32
    return %c0_i32, %c0_i32_0 : i32, i32
  }
  func.func @transform_35(%arg0: i32) -> (i32, i32) {
    %c0_i32 = arith.constant 0 : i32
    %c0_i32_0 = arith.constant 0 : i32
    %c0_i32_1 = arith.constant 0 : i32
    return %c0_i32, %c0_i32_0 : i32, i32
  }
  func.func @transform_36(%arg0: i32) -> (i32, i32) {
    %c0_i32 = arith.constant 0 : i32
    %c0_i32_0 = arith.constant 0 : i32
    %c0_i32_1 = arith.constant 0 : i32
    return %c0_i32, %c0_i32_0 : i32, i32
  }
  func.func @transform_37(%arg0: i32) -> (i32, i32) {
    %c0_i32 = arith.constant 0 : i32
    %c0_i32_0 = arith.constant 0 : i32
    %c0_i32_1 = arith.constant 0 : i32
    return %c0_i32, %c0_i32_0 : i32, i32
  }
  func.func @transform_38(%arg0: i32) -> (i32, i32) {
    %c0_i32 = arith.constant 0 : i32
    %c0_i32_0 = arith.constant 0 : i32
    %c0_i32_1 = arith.constant 0 : i32
    return %c0_i32, %c0_i32_0 : i32, i32
  }
  func.func @transform_39(%arg0: i32) -> (i32, i32) {
    %c0_i32 = arith.constant 0 : i32
    %c0_i32_0 = arith.constant 0 : i32
    %c0_i32_1 = arith.constant 0 : i32
    return %c0_i32, %c0_i32_0 : i32, i32
  }
  func.func @transform_40(%arg0: i32) -> (i32, i32) {
    %c0_i32 = arith.constant 0 : i32
    %c0_i32_0 = arith.constant 0 : i32
    %c0_i32_1 = arith.constant 0 : i32
    return %c0_i32, %c0_i32_0 : i32, i32
  }
  func.func @transform_41(%arg0: i32) -> (i32, i32) {
    %c0_i32 = arith.constant 0 : i32
    %c0_i32_0 = arith.constant 0 : i32
    %c0_i32_1 = arith.constant 0 : i32
    return %c0_i32, %c0_i32_0 : i32, i32
  }
  func.func @transform_42(%arg0: i32) -> (i32, i32) {
    %c0_i32 = arith.constant 0 : i32
    %c0_i32_0 = arith.constant 0 : i32
    %c0_i32_1 = arith.constant 0 : i32
    return %c0_i32, %c0_i32_0 : i32, i32
  }
  func.func @transform_43(%arg0: i32) -> (i32, i32) {
    %c0_i32 = arith.constant 0 : i32
    %c0_i32_0 = arith.constant 0 : i32
    %c0_i32_1 = arith.constant 0 : i32
    return %c0_i32, %c0_i32_0 : i32, i32
  }
  func.func @transform_44(%arg0: i32) -> (i32, i32) {
    %c0_i32 = arith.constant 0 : i32
    %c0_i32_0 = arith.constant 0 : i32
    %c0_i32_1 = arith.constant 0 : i32
    return %c0_i32, %c0_i32_0 : i32, i32
  }
  func.func @transform_45(%arg0: i32) -> (i32, i32) {
    %c0_i32 = arith.constant 0 : i32
    %c0_i32_0 = arith.constant 0 : i32
    %c0_i32_1 = arith.constant 0 : i32
    return %c0_i32, %c0_i32_0 : i32, i32
  }
  func.func @transform_46(%arg0: i32) -> (i32, i32, i32) {
    %c0_i32 = arith.constant 0 : i32
    %c0_i32_0 = arith.constant 0 : i32
    %c0_i32_1 = arith.constant 0 : i32
    return %arg0, %c0_i32, %c0_i32_0 : i32, i32, i32
  }
  func.func @transform_47(%arg0: i32) -> (i32, i32, i32) {
    %c0_i32 = arith.constant 0 : i32
    %c0_i32_0 = arith.constant 0 : i32
    %c0_i32_1 = arith.constant 0 : i32
    return %arg0, %c0_i32, %c0_i32_0 : i32, i32, i32
  }
  func.func @transform_48(%arg0: i32) -> (i32, i32, i32) {
    %c0_i32 = arith.constant 0 : i32
    %c0_i32_0 = arith.constant 0 : i32
    %c0_i32_1 = arith.constant 0 : i32
    return %arg0, %c0_i32, %c0_i32_0 : i32, i32, i32
  }
  func.func @transform_49(%arg0: i32) -> (i32, i32, i32) {
    %c0_i32 = arith.constant 0 : i32
    %c0_i32_0 = arith.constant 0 : i32
    %c0_i32_1 = arith.constant 0 : i32
    return %arg0, %c0_i32, %c0_i32_0 : i32, i32, i32
  }
  func.func @transform_50(%arg0: i32) -> (i32, i32, i32) {
    %c0_i32 = arith.constant 0 : i32
    %c0_i32_0 = arith.constant 0 : i32
    %c0_i32_1 = arith.constant 0 : i32
    return %arg0, %c0_i32, %c0_i32_0 : i32, i32, i32
  }
  func.func @transform_51(%arg0: i32) -> (i32, i32, i32) {
    %c0_i32 = arith.constant 0 : i32
    %c0_i32_0 = arith.constant 0 : i32
    %c0_i32_1 = arith.constant 0 : i32
    return %arg0, %c0_i32, %c0_i32_0 : i32, i32, i32
  }
  func.func @transform_52(%arg0: i32) -> (i32, i32, i32) {
    %c0_i32 = arith.constant 0 : i32
    %c0_i32_0 = arith.constant 0 : i32
    %c0_i32_1 = arith.constant 0 : i32
    return %arg0, %c0_i32, %c0_i32_0 : i32, i32, i32
  }
  func.func @transform_53(%arg0: i32) -> (i32, i32, i32) {
    %c0_i32 = arith.constant 0 : i32
    %c0_i32_0 = arith.constant 0 : i32
    %c0_i32_1 = arith.constant 0 : i32
    return %arg0, %c0_i32, %c0_i32_0 : i32, i32, i32
  }
}

</mosaic_0001>

<bundles_post_ra>
// kernel: multi_stage_unmixing_forward.1
= control target key start
LH: loop header
LB: loop body
LE: loop exit
PB: predicated region body
PF: predicated region fallthrough
CT: control target
= control target key end

     0   :  { %s10154_s6 = smov 1   ;;  %s10155_s10 = smov 2   ;;  %s14852_s0 = inlined_call_operand.smem [shape: u32[54], index: -1, kind: input, shape index: {}] }
   0x1   :  { %s10245_s5 = sld [smem:[%s14852_s0]]   ;;  %s10156_s14 = smov 3  }
   0x2   :  { %s10250_s9 = sld [smem:[%s14852_s0 + %s10154_s6]]   ;;  %s10157_s18 = smov 4  }
   0x3   :  { %s10255_s13 = sld [smem:[%s14852_s0 + %s10155_s10]]   ;;  %s10158_s22 = smov 5  }
   0x4   :  { %s10260_s17 = sld [smem:[%s14852_s0 + %s10156_s14]]   ;;  %s10159_s26 = smov 6  }
   0x5   :  { %s10265_s21 = sld [smem:[%s14852_s0 + %s10157_s18]]   ;;  %s10160_s30 = smov 7  }
   0x6   :  { %s10270_s25 = sld [smem:[%s14852_s0 + %s10158_s22]]   ;;  %s10161_s4 = smov 8  }
   0x7   :  { %15042 = sst [smem:[#allocation2_spill]] %s10245_s5  ;;  %s10162_s10 = smov 9  }
   0x8   :  { %15043 = sst [smem:[#allocation3_spill]] %s10250_s9  ;;  %s10163_s15 = smov 10  }
   0x9   :  { %15044 = sst [smem:[#allocation4_spill]] %s10255_s13  ;;  %s10164_s20 = smov 11  }
   0xa   :  { %15045 = sst [smem:[#allocation5_spill]] %s10260_s17  ;;  %s10166_s1 = smov 13  }
   0xb   :  { %15046 = sst [smem:[#allocation6_spill]] %s10265_s21  ;;  %s10167_s7 = smov 14  }
   0xc   :  { %15047 = sst [smem:[#allocation7_spill]] %s10270_s25  ;;  %s10169_s22 = smov 16  }
   0xd   :  { %s10275_s29 = sld [smem:[%s14852_s0 + %s10159_s26]]   ;;  %s10165_s26 = smov 12  }
   0xe   :  { %s10280_s3 = sld [smem:[%s14852_s0 + %s10160_s30]]   ;;  %s10170_s28 = smov 17  }
   0xf   :  { %s10285_s8 = sld [smem:[%s14852_s0 + %s10161_s4]]  }
  0x10   :  { %s10290_s14 = sld [smem:[%s14852_s0 + %s10162_s10]]  }
  0x11   :  { %s10295_s19 = sld [smem:[%s14852_s0 + %s10163_s15]]   ;;  %s10168_s15 = smov 15  }
  0x12   :  { %s10300_s24 = sld [smem:[%s14852_s0 + %s10164_s20]]  }
  0x13   :  { %15048 = sst [smem:[#allocation8_spill]] %s10275_s29 }
  0x14   :  { %15049 = sst [smem:[#allocation9_spill]] %s10280_s3 }
  0x15   :  { %15050 = sst [smem:[#allocation10_spill]] %s10285_s8 }
  0x16   :  { %15051 = sst [smem:[#allocation11_spill]] %s10290_s14 }
  0x17   :  { %15052 = sst [smem:[#allocation12_spill]] %s10295_s19 }
  0x18   :  { %15053 = sst [smem:[#allocation13_spill]] %s10300_s24 }
  0x19   :  { %s10305_s30 = sld [smem:[%s14852_s0 + %s10165_s26]]  }
  0x1a   :  { %s10310_s6 = sld [smem:[%s14852_s0 + %s10166_s1]]  }
  0x1b   :  { %s10315_s12 = sld [smem:[%s14852_s0 + %s10167_s7]]   ;;  %s10171_s7 = smov 18  }
  0x1c   :  { %s10320_s20 = sld [smem:[%s14852_s0 + %s10168_s15]]   ;;  %s10172_s15 = smov 19  }
  0x1d   :  { %s10325_s27 = sld [smem:[%s14852_s0 + %s10169_s22]]   ;;  %s10173_s22 = smov 20  }
  0x1e   :  { %s10330_s4 = sld [smem:[%s14852_s0 + %s10170_s28]]   ;;  %s10174_s28 = smov 21  }
  0x1f   :  { %15054 = sst [smem:[#allocation14_spill]] %s10305_s30 }
  0x20   :  { %15055 = sst [smem:[#allocation15_spill]] %s10310_s6 }
  0x21   :  { %15056 = sst [smem:[#allocation16_spill]] %s10315_s12 }
  0x22   :  { %s10335_s3 = sld [smem:[%s14852_s0 + %s10171_s7]]   ;;  %s10175_s7 = smov 22  }
  0x23   :  { %s10340_s19 = sld [smem:[%s14852_s0 + %s10172_s15]]   ;;  %s10176_s15 = smov 23  }
  0x24   :  { %15057 = sst [smem:[#allocation17_spill]] %s10330_s4 }
  0x25   :  { %s10345_s24 = sld [smem:[%s14852_s0 + %s10173_s22]]   ;;  %s10177_s22 = smov 24  }
  0x26   :  { %s10350_s21 = sld [smem:[%s14852_s0 + %s10174_s28]]   ;;  %s10178_s28 = smov 25  }
  0x27   :  { %s10355_s8 = sld [smem:[%s14852_s0 + %s10175_s7]]   ;;  %s10179_s7 = smov 26  }
  0x28   :  { %15058 = sst [smem:[#allocation18_spill]] %s10335_s3 }
  0x29   :  { %s10360_s6 = sld [smem:[%s14852_s0 + %s10176_s15]]   ;;  %s10180_s15 = smov 27  }
  0x2a   :  { %s10365_s30 = sld [smem:[%s14852_s0 + %s10177_s22]]   ;;  %s10181_s22 = smov 28  }
  0x2b   :  { %s10370_s25 = sld [smem:[%s14852_s0 + %s10178_s28]]   ;;  %s10182_s28 = smov 29  }
  0x2c   :  { %s10375_s17 = sld [smem:[%s14852_s0 + %s10179_s7]]   ;;  %s10183_s7 = smov 30  }
  0x2d   :  { %15059 = sst [smem:[#allocation19_spill]] %s10355_s8 }
  0x2e   :  { %s10380_s14 = sld [smem:[%s14852_s0 + %s10180_s15]]   ;;  %s10184_s15 = smov 31  }
  0x2f   :  { %15060 = sst [smem:[#allocation20_spill]] %s10360_s6 }
  0x30   :  { %s10385_s29 = sld [smem:[%s14852_s0 + %s10181_s22]]   ;;  %s10185_s22 = smov 32  }
  0x31   :  { %15061 = sst [smem:[#allocation21_spill]] %s10370_s25 }
  0x32   :  { %15062 = sst [smem:[#allocation22_spill]] %s10375_s17 }
  0x33   :  { %s10390_s25 = sld [smem:[%s14852_s0 + %s10182_s28]]   ;;  %s10186_s28 = smov 33  }
  0x34   :  { %15063 = sst [smem:[#allocation23_spill]] %s10380_s14 }
  0x35   :  { %s10395_s17 = sld [smem:[%s14852_s0 + %s10183_s7]]   ;;  %s10187_s7 = smov 34  }
  0x36   :  { %15064 = sst [smem:[#allocation24_spill]] %s10385_s29 }
  0x37   :  { %s10400_s14 = sld [smem:[%s14852_s0 + %s10184_s15]]   ;;  %s10188_s15 = smov 35  }
  0x38   :  { %s10405_s29 = sld [smem:[%s14852_s0 + %s10185_s22]]   ;;  %s10189_s22 = smov 36  }
  0x39   :  { %15065 = sst [smem:[#allocation25_spill]] %s10390_s25 }
  0x3a   :  { %s10410_s25 = sld [smem:[%s14852_s0 + %s10186_s28]]   ;;  %s10190_s28 = smov 37  }
  0x3b   :  { %15066 = sst [smem:[#allocation26_spill]] %s10395_s17 }
  0x3c   :  { %s10415_s17 = sld [smem:[%s14852_s0 + %s10187_s7]]   ;;  %s10191_s7 = smov 38  }
  0x3d   :  { %15067 = sst [smem:[#allocation27_spill]] %s10400_s14 }
  0x3e   :  { %15068 = sst [smem:[#allocation28_spill]] %s10405_s29 }
  0x3f   :  { %s10420_s14 = sld [smem:[%s14852_s0 + %s10188_s15]]   ;;  %s10192_s15 = smov 39  }
  0x40   :  { %15069 = sst [smem:[#allocation29_spill]] %s10410_s25 }
  0x41   :  { %s10425_s29 = sld [smem:[%s14852_s0 + %s10189_s22]]   ;;  %s10193_s22 = smov 40  }
  0x42   :  { %15070 = sst [smem:[#allocation30_spill]] %s10415_s17 }
  0x43   :  { %s10430_s25 = sld [smem:[%s14852_s0 + %s10190_s28]]   ;;  %s10194_s28 = smov 41  }
  0x44   :  { %s10435_s17 = sld [smem:[%s14852_s0 + %s10191_s7]]   ;;  %s10195_s7 = smov 42  }
  0x45   :  { %15071 = sst [smem:[#allocation31_spill]] %s10420_s14 }
  0x46   :  { %s10440_s14 = sld [smem:[%s14852_s0 + %s10192_s15]]   ;;  %s10196_s15 = smov 43  }
  0x47   :  { %15072 = sst [smem:[#allocation32_spill]] %s10425_s29 }
  0x48   :  { %s10445_s29 = sld [smem:[%s14852_s0 + %s10193_s22]]   ;;  %s10197_s22 = smov 44  }
  0x49   :  { %15073 = sst [smem:[#allocation33_spill]] %s10430_s25 }
  0x4a   :  { %15074 = sst [smem:[#allocation34_spill]] %s10435_s17 }
  0x4b   :  { %s10450_s25 = sld [smem:[%s14852_s0 + %s10194_s28]]   ;;  %s10198_s28 = smov 45  }
  0x4c   :  { %15075 = sst [smem:[#allocation35_spill]] %s10440_s14 }
  0x4d   :  { %s10455_s17 = sld [smem:[%s14852_s0 + %s10195_s7]]   ;;  %s10199_s7 = smov 46  }
  0x4e   :  { %15076 = sst [smem:[#allocation36_spill]] %s10445_s29 }
  0x4f   :  { %s10460_s14 = sld [smem:[%s14852_s0 + %s10196_s15]]   ;;  %s10200_s15 = smov 47  }
  0x50   :  { %s10465_s29 = sld [smem:[%s14852_s0 + %s10197_s22]]   ;;  %s10201_s22 = smov 48  }
  0x51   :  { %15077 = sst [smem:[#allocation37_spill]] %s10450_s25 }
  0x52   :  { %s10470_s25 = sld [smem:[%s14852_s0 + %s10198_s28]]   ;;  %s10202_s28 = smov 49  }
  0x53   :  { %15078 = sst [smem:[#allocation38_spill]] %s10455_s17 }
  0x54   :  { %s10475_s17 = sld [smem:[%s14852_s0 + %s10199_s7]]   ;;  %s10203_s7 = smov 50  }
  0x55   :  { %15079 = sst [smem:[#allocation39_spill]] %s10460_s14 }
  0x56   :  { %15080 = sst [smem:[#allocation40_spill]] %s10465_s29 }
  0x57   :  { %s10480_s14 = sld [smem:[%s14852_s0 + %s10200_s15]]   ;;  %s10204_s15 = smov 51  }
  0x58   :  { %15081 = sst [smem:[#allocation41_spill]] %s10470_s25 }
  0x59   :  { %s10485_s29 = sld [smem:[%s14852_s0 + %s10201_s22]]   ;;  %s10205_s22 = smov 52  }
  0x5a   :  { %15082 = sst [smem:[#allocation42_spill]] %s10475_s17 }
  0x5b   :  { %s10490_s25 = sld [smem:[%s14852_s0 + %s10202_s28]]   ;;  %s10206_s28 = smov 53  }
  0x5c   :  { %s10495_s17 = sld [smem:[%s14852_s0 + %s10203_s7]]   ;;  %s10512_s7 = smov 0  }
  0x5d   :  { %15083 = sst [smem:[#allocation43_spill]] %s10480_s14 }
  0x5e   :  { %s10500_s14 = sld [smem:[%s14852_s0 + %s10204_s15]]  }
  0x5f   :  { %15084 = sst [smem:[#allocation44_spill]] %s10485_s29 }
  0x60   :  { %s10505_s29 = sld [smem:[%s14852_s0 + %s10205_s22]]  }
  0x61   :  { %15085 = sst [smem:[#allocation45_spill]] %s10490_s25 }
  0x62   :  { %15086 = sst [smem:[#allocation46_spill]] %s10495_s17 }
  0x63   :  { %s10510_s25 = sld [smem:[%s14852_s0 + %s10206_s28]]  }
  0x64   :  { %15087 = sst [smem:[#allocation47_spill]] %s10500_s14 }
  0x65 LB: > { %s15088_s13 = sld [smem:[#allocation4_spill]]  ;;  %s9286_s10 = sadd.s32 4294967295, %s10152_s7   ;;  %s10152_s7 = sphi %s10512_s7, %s118_s7  }
  0x66   : > { %s15089_s12 = sld [smem:[#allocation16_spill]]  ;;  %p9290_p0 = scmp.ge.s32.totalorder %s10152_s7, 1 }
  0x67   : > { %s15090_s9 = sld [smem:[#allocation3_spill]]  ;;  %p1456_p1 = scmp.lt.s32.totalorder %s10152_s7, 3 }
  0x68   : > { %s15091_s8 = sld [smem:[#allocation19_spill]] }
  0x69   : > { %s15092_s6 = sld [smem:[#allocation20_spill]]  ;;  %p1457_p2 = pnand %p9290_p0, %p1456_p1 }
  0x6a   : > { %s15093_s4 = sld [smem:[#allocation17_spill]] }
  0x6b   : > { %s15094_s3 = sld [smem:[#allocation18_spill]]  ;;  %1460 = sbr.rel (%p1457_p2) target bundleno = 6363 (0x18db), region = 204 }
  0x70   : > { %v1784_v0 = vld [vmem:[%s15088_s13 + $0xf8] sm:$0xff]  ;;  %v1783_v2 = vld [vmem:[%s15088_s13 + $0xf0] sm:$0xff]  ;;  %p1609_p3 = scmp.lt.s32.totalorder %s9286_s10, 1  ;;  %s15095_s5 = sld [smem:[#allocation2_spill]]  ;;  %v1782_v4 = vld [vmem:[%s15088_s13 + $0xe8] sm:$0xff]  ;;  %vm1857_vm0 = vcmask 128000  }
  0x71   : > { %v1768_v1 = vld [vmem:[%s15088_s13 + $0x78] sm:$0xff]  ;;  %9473 = vmatprep.subr.mxu1 %v1784_v0  ;;  %v1767_v3 = vld [vmem:[%s15088_s13 + $0x70] sm:$0xff]  ;;  %v1766_v5 = vld [vmem:[%s15088_s13 + $0x68] sm:$0xff]  ;;  %s14878_s15 = smov 8   ;;  %s14877_s16 = smov 10   ;;  %vm1865_vm1 = vcmask 39936  }
  0x72   : > { %9474 = vmatpush3.msra.mxu1 %v1768_v1  ;;  %s15401_s10 = smov (!%p1609_p3, %s9286_s10), 1  ;;  %v1781_v6 = vld [vmem:[%s15088_s13 + $0xe0] sm:$0xff]  ;;  %v1780_v8 = vld [vmem:[%s15088_s13 + $0xd8] sm:$0xff]  ;;  %v1779_v10 = vld [vmem:[%s15088_s13 + $0xd0] sm:$0xff]  ;;  %s10209_s18 = smov 4   ;;  %vm1867_vm2 = vcmask 171008  }
  0x73   : > { %9475 = vmatprep.subr.mxu1 %v1783_v2  ;;  %s14874_s0 = sshll.u32 %s15401_s10, 4  ;;  %v1765_v7 = vld [vmem:[%s15088_s13 + $0x60] sm:$0xff]  ;;  %v1764_v9 = vld [vmem:[%s15088_s13 + $0x58] sm:$0xff]  ;;  %v1763_v11 = vld [vmem:[%s15088_s13 + $0x50] sm:$0xff]  ;;  %s10574_s22 = sshll.u32 %s15401_s10, 3  ;;  %vm2076_vm3 = vcmask 441344  }
  0x74   : > { %9476 = vmatpush3.msra.mxu1 %v1767_v3  ;;  %v1778_v12 = vld [vmem:[%s15088_s13 + $0xc8] sm:$0xff]  ;;  %v1777_v14 = vld [vmem:[%s15088_s13 + $0xc0] sm:$0xff]  ;;  %v1776_v18 = vld [vmem:[%s15088_s13 + $0xb8] sm:$0xff]  ;;  %s1647_s23 = scalar_lea.vmem %s10510_s25, %s10574_s22  ;;  %s10210_s26 = smov 5   ;;  %vm1937_vm4 = vcmask 1042432   ;;  %vm14912_vm5 = vcmask 1041408  }
  0x75   : > { %9477 = vmatprep.subr.mxu1 %v1782_v4  ;;  %v1762_v13 = vld [vmem:[%s15088_s13 + $0x48] sm:$0xff]  ;;  %v1761_v16 = vld [vmem:[%s15088_s13 + $0x40] sm:$0xff]  ;;  %v1760_v19 = vld [vmem:[%s15088_s13 + $0x38] sm:$0xff]  ;;  %s10211_s28 = smov 6   ;;  %s14875_s1 = smov 2   ;;  %vm1958_vm6 = vcmask 1044480  }
  0x76   : > { %9478 = vmatpush3.msra.mxu1 %v1766_v5  ;;  %s10536_s11 = scalar_lea.vmem %s15095_s5, %s14874_s0  ;;  %v10546_v17 = vld [vmem:[%s15089_s12] ss:$0 sm:$0xff]  ;;  %v1775_v20 = vld [vmem:[%s15088_s13 + $0xb0] sm:$0xff]  ;;  %v1774_v22 = vld [vmem:[%s15088_s13 + $0xa8] sm:$0xff]  ;;  %s14879_s2 = smov 118   ;;  %vm14913_vm7 = vcmask 1040384  }
  0x77   : > { %9479 = vmatprep.subr.mxu1 %v1781_v6  ;;  %v1650_v15 = vld [vmem:[%s10536_s11 + $0x8] sm:$0x3f]  ;;  %1898 = vrot.lane.b32.xlu1 %v10546_v17, %s14878_s15  ;;  %v1759_v21 = vld [vmem:[%s15088_s13 + $0x30] sm:$0xff]  ;;  %v1773_v24 = vld [vmem:[%s15088_s13 + $0xa0] sm:$0xff]  ;;  %s10218_s0 = smov 124   ;;  %s10221_s15 = smov 123  }
  0x78   : > { %9480 = vmatpush3.msra.mxu1 %v1765_v7  ;;  %1849 = vmatprep.mubr.f32.mxu1 %v1650_v15  ;;  %v1758_v23 = vld [vmem:[%s15088_s13 + $0x28] sm:$0xff]  ;;  %v1757_v25 = vld [vmem:[%s15088_s13 + $0x20] sm:$0xff]  ;;  %v1772_v26 = vld [vmem:[%s15088_s13 + $0x98] sm:$0xff]  ;;  %vm1948_vm8 = vcmask 1043456   ;;  %vm14911_vm9 = vcmask 1046528   ;;  %vm1941_vm10 = vcmask 1045504  }
  0x79   : > { %9481 = vmatprep.subr.mxu1 %v1780_v8  ;;  %1747 = vmatprep.mubr.f32.mxu0 %v1650_v15  ;;  %v1756_v27 = vld [vmem:[%s15088_s13 + $0x18] sm:$0xff]  ;;  %v1771_v28 = vld [vmem:[%s15088_s13 + $0x90] sm:$0xff]  ;;  %v1770_v30 = vld [vmem:[%s15088_s13 + $0x88] sm:$0xff]  ;;  %vm14883_vm11 = vcmask 521216   ;;  %s15103_s17 = sld [smem:[#allocation46_spill]]  ;;  %s15112_s5 = smov 2  }
  0x7a   : > { %9482 = vmatpush3.msra.mxu1 %v1764_v9  ;;  %v1755_v29 = vld [vmem:[%s15088_s13 + $0x10] sm:$0xff]  ;;  %v1754_v31 = vld [vmem:[%s15088_s13 + $0x8] sm:$0xff]  ;;  %v1769_v32 = vld [vmem:[%s15088_s13 + $0x80] sm:$0xff]  ;;  %v14881_v9 = vmov 0   ;;  %s15106_s14 = sld [smem:[#allocation47_spill]] }
  0x7b   : > { %9483 = vmatprep.subr.mxu1 %v1779_v10  ;;  %v1753_v33 = vld [vmem:[%s15088_s13] sm:$0xff]  ;;  %v1682_v39 = vld [vmem:[%s15090_s9 + $0xf8] sm:$0xff]  ;;  %v1681_v41 = vld [vmem:[%s15090_s9 + $0xf0] sm:$0xff]  ;;  %10013 = vset.pattern.permute.xlu1 %v14881_v9  ;;  %s15124_s13 = smov 112  }
  0x7c   : > { %9484 = vmatpush3.msra.mxu1 %v1763_v11  ;;  %v10567_v34 = vld [vmem:[%s10536_s11] sm:$0x3f]  ;;  %v1666_v40 = vld [vmem:[%s15090_s9 + $0x78] sm:$0xff]  ;;  %9438 = vmatprep.subr.mxu0 %v1682_v39  ;;  %v1665_v42 = vld [vmem:[%s15090_s9 + $0x70] sm:$0xff] }
  0x7d   : > { %9485 = vmatprep.subr.mxu1 %v1778_v12  ;;  %v9304_v35 = vld [vmem:[%s10320_s20] ss:$0 sm:$0xff]  ;;  %9439 = vmatpush3.msra.mxu0 %v1666_v40  ;;  %v1680_v43 = vld [vmem:[%s15090_s9 + $0xe8] sm:$0xff]  ;;  %v1678_v47 = vld [vmem:[%s15090_s9 + $0xd8] sm:$0xff] }
  0x7e   : > { %9486 = vmatpush3.msra.mxu1 %v1762_v13  ;;  %1903 = vrot.lane.b32.xlu1 %v9304_v35, %s14877_s16  ;;  %v1664_v44 = vld [vmem:[%s15090_s9 + $0x68] sm:$0xff]  ;;  %v1679_v45 = vld [vmem:[%s15090_s9 + $0xe0] sm:$0xff]  ;;  %v1662_v48 = vld [vmem:[%s15090_s9 + $0x58] sm:$0xff]  ;;  %s14886_s16 = smov 127  }
  0x7f   : > { %9487 = vmatprep.subr.mxu1 %v1777_v14  ;;  %9440 = vmatprep.subr.mxu0 %v1681_v41  ;;  %v1663_v46 = vld [vmem:[%s15090_s9 + $0x60] sm:$0xff]  ;;  %v1677_v49 = vld [vmem:[%s15090_s9 + $0xd0] sm:$0xff]  ;;  %v1676_v51 = vld [vmem:[%s15090_s9 + $0xc8] sm:$0xff] }
  0x80   : > { %9488 = vmatpush3.msra.mxu1 %v1761_v16  ;;  %9441 = vmatpush3.msra.mxu0 %v1665_v42  ;;  %v1661_v50 = vld [vmem:[%s15090_s9 + $0x50] sm:$0xff]  ;;  %v1660_v52 = vld [vmem:[%s15090_s9 + $0x48] sm:$0xff]  ;;  %v1675_v53 = vld [vmem:[%s15090_s9 + $0xc0] sm:$0xff] }
  0x81   : > { %9489 = vmatprep.subr.mxu1 %v1776_v18  ;;  %9442 = vmatprep.subr.mxu0 %v1680_v43  ;;  %v1659_v54 = vld [vmem:[%s15090_s9 + $0x40] sm:$0xff]  ;;  %v1674_v55 = vld [vmem:[%s15090_s9 + $0xb8] sm:$0xff]  ;;  %v1673_v57 = vld [vmem:[%s15090_s9 + $0xb0] sm:$0xff] }
  0x82   : > { %9490 = vmatpush3.msra.mxu1 %v1760_v19  ;;  %1888 = vrot.lane.b32.xlu1 %v10546_v17, %s10209_s18  ;;  %v1658_v56 = vld [vmem:[%s15090_s9 + $0x38] sm:$0xff]  ;;  %v1657_v58 = vld [vmem:[%s15090_s9 + $0x30] sm:$0xff]  ;;  %v1672_v59 = vld [vmem:[%s15090_s9 + $0xa8] sm:$0xff]  ;;  %s14891_s18 = smov 119  }
  0x83   : > { %9491 = vmatprep.subr.mxu1 %v1775_v20  ;;  %9443 = vmatpush3.msra.mxu0 %v1664_v44  ;;  %v1656_v60 = vld [vmem:[%s15090_s9 + $0x28] sm:$0xff]  ;;  %v1671_v61 = vld [vmem:[%s15090_s9 + $0xa0] sm:$0xff]  ;;  %v1670_v63 = vld [vmem:[%s15090_s9 + $0x98] sm:$0xff] }
  0x84   : > { %9492 = vmatpush3.msra.mxu1 %v1759_v21  ;;  %9444 = vmatprep.subr.mxu0 %v1679_v45  ;;  %v1655_v62 = vld [vmem:[%s15090_s9 + $0x20] sm:$0xff]  ;;  %v1654_v0 = vld [vmem:[%s15090_s9 + $0x18] sm:$0xff]  ;;  %v1669_v1 = vld [vmem:[%s15090_s9 + $0x90] sm:$0xff] }
  0x85   : > { %9493 = vmatprep.subr.mxu1 %v1774_v22  ;;  %9445 = vmatpush3.msra.mxu0 %v1663_v46  ;;  %v1653_v2 = vld [vmem:[%s15090_s9 + $0x10] sm:$0xff]  ;;  %v1668_v3 = vld [vmem:[%s15090_s9 + $0x88] sm:$0xff]  ;;  %v1667_v5 = vld [vmem:[%s15090_s9 + $0x80] sm:$0xff] }
  0x86   : > { %9494 = vmatpush3.msra.mxu1 %v1758_v23  ;;  %9446 = vmatprep.subr.mxu0 %v1678_v47  ;;  %v1652_v4 = vld [vmem:[%s15090_s9 + $0x8] sm:$0xff]  ;;  %v1651_v6 = vld [vmem:[%s15090_s9] sm:$0xff]  ;;  %v1977_v39 = vld [vmem:[%s15093_s4 + $0x18] sm:$0xff]  ;;  %s15122_s9 = smov 111  }
  0x87   : > { %9495 = vmatprep.subr.mxu1 %v1773_v24  ;;  %9447 = vmatpush3.msra.mxu0 %v1662_v48  ;;  %v1978_v40 = vld [vmem:[%s15093_s4 + $0x20] sm:$0xff]  ;;  %v1979_v41 = vld [vmem:[%s15093_s4 + $0x28] sm:$0xff]  ;;  %v2221_v42 = vld [vmem:[%s15094_s3 + $0x30] sm:$0xff] }
  0x88   : > { %9496 = vmatpush3.msra.mxu1 %v1757_v25  ;;  %9448 = vmatprep.subr.mxu0 %v1677_v49  ;;  %v2222_v43 = vld [vmem:[%s15094_s3 + $0x38] sm:$0xff]  ;;  %v1974_v44 = vld [vmem:[%s15093_s4] sm:$0xff]  ;;  %v1975_v45 = vld [vmem:[%s15093_s4 + $0x8] sm:$0xff] }
  0x89   : > { %9497 = vmatprep.subr.mxu1 %v1772_v26  ;;  %9449 = vmatpush3.msra.mxu0 %v1661_v50  ;;  %v2305_v46 = vld [vmem:[%s10340_s19 + $0x30] sm:$0xff]  ;;  %v2306_v47 = vld [vmem:[%s10340_s19 + $0x38] sm:$0xff]  ;;  %v2219_v50 = vld [vmem:[%s15094_s3 + $0x20] sm:$0xff] }
  0x8a   : > { %9498 = vmatpush3.msra.mxu1 %v1756_v27  ;;  %9450 = vmatprep.subr.mxu0 %v1676_v51  ;;  %v2217_v48 = vld [vmem:[%s15094_s3 + $0x10] sm:$0xff]  ;;  %v2218_v49 = vld [vmem:[%s15094_s3 + $0x18] sm:$0xff]  ;;  %v2220_v51 = vld [vmem:[%s15094_s3 + $0x28] sm:$0xff] }
  0x8b   : > { %9499 = vmatprep.subr.mxu1 %v1771_v28  ;;  %9451 = vmatpush3.msra.mxu0 %v1660_v52  ;;  %v2301_v52 = vld [vmem:[%s10340_s19 + $0x10] sm:$0xff] }
  0x8c   : > { %9500 = vmatpush3.msra.mxu1 %v1755_v29  ;;  %9452 = vmatprep.subr.mxu0 %v1675_v53  ;;  %v2302_v53 = vld [vmem:[%s10340_s19 + $0x18] sm:$0xff] }
  0x8d   : > { %9501 = vmatprep.subr.mxu1 %v1770_v30  ;;  %9453 = vmatpush3.msra.mxu0 %v1659_v54  ;;  %v2303_v54 = vld [vmem:[%s10340_s19 + $0x20] sm:$0xff] }
  0x8e   : > { %9502 = vmatpush3.msra.mxu1 %v1754_v31  ;;  %9454 = vmatprep.subr.mxu0 %v1674_v55  ;;  %v2304_v55 = vld [vmem:[%s10340_s19 + $0x28] sm:$0xff] }
  0x8f   : > { %9503 = vmatprep.subr.mxu1 %v1769_v32  ;;  %9455 = vmatpush3.msra.mxu0 %v1658_v56  ;;  %v2215_v56 = vld [vmem:[%s15094_s3] sm:$0xff] }
  0x90   : > { %9504 = vmatpush3.msra.mxu1 %v1753_v33  ;;  %9456 = vmatprep.subr.mxu0 %v1673_v57  ;;  %v10014_v33 = vld [vmem:[%s10325_s27] sm:$0xff]   ;;  %v2216_v57 = vld [vmem:[%s15094_s3 + $0x8] sm:$0xff] }
  0x91   : > { %1850 = vmatmul.mubr.f32.vlgmr.msra.gmra.mxu1 %v10567_v34  ;;  %9457 = vmatpush3.msra.mxu0 %v1657_v58  ;;  %v2299_v58 = vld [vmem:[%s10340_s19] sm:$0xff] }
  0x92   : > { %9458 = vmatprep.subr.mxu0 %v1672_v59  ;;  %10012 = vset.pattern.permute.xlu0 %v14881_v9  ;;  %v2300_v59 = vld [vmem:[%s10340_s19 + $0x8] sm:$0xff] }
  0x93   : > { %9459 = vmatpush3.msra.mxu0 %v1656_v60  ;;  %v1984_v60 = vld [vmem:[%s15093_s4 + $0x50] sm:$0xff] }
  0x94   : > { %9460 = vmatprep.subr.mxu0 %v1671_v61  ;;  %v1985_v61 = vld [vmem:[%s15093_s4 + $0x58] sm:$0xff] }
  0x95   : > { %9461 = vmatpush3.msra.mxu0 %v1655_v62  ;;  %v1982_v62 = vld [vmem:[%s15093_s4 + $0x40] sm:$0xff] }
  0x96   : > { %9462 = vmatprep.subr.mxu0 %v1670_v63  ;;  %v1983_v63 = vld [vmem:[%s15093_s4 + $0x48] sm:$0xff] }
  0x97   : > { %9463 = vmatpush3.msra.mxu0 %v1654_v0  ;;  %v2225_v0 = vld [vmem:[%s15094_s3 + $0x50] sm:$0xff] }
  0x98   : > { %9464 = vmatprep.subr.mxu0 %v1669_v1  ;;  %v2226_v1 = vld [vmem:[%s15094_s3 + $0x58] sm:$0xff] }
  0x99   : > { %9465 = vmatpush3.msra.mxu0 %v1653_v2  ;;  %v2309_v2 = vld [vmem:[%s10340_s19 + $0x50] sm:$0xff] }
  0x9a   : > { %9466 = vmatprep.subr.mxu0 %v1668_v3  ;;  %v2310_v3 = vld [vmem:[%s10340_s19 + $0x58] sm:$0xff] }
  0x9b   : > { %9467 = vmatpush3.msra.mxu0 %v1652_v4  ;;  %v2223_v4 = vld [vmem:[%s15094_s3 + $0x40] sm:$0xff] }
  0x9c   : > { %9468 = vmatprep.subr.mxu0 %v1667_v5  ;;  %v2224_v5 = vld [vmem:[%s15094_s3 + $0x48] sm:$0xff]  ;;  %s15110_s3 = smov 8  }
  0x9d   : > { %9469 = vmatpush3.msra.mxu0 %v1651_v6  ;;  %v2307_v6 = vld [vmem:[%s10340_s19 + $0x40] sm:$0xff] }
  0x9e   : > { %1748 = vmatmul.mubr.f32.vlgmr.msra.gmra.mxu0 %v10567_v34 }
  0x9f   : > { %9813 = vmatprep.mubr.msk.bf16.mxu0 %vm2076_vm3, %v10014_v33  ;;  %v10016_v33 = vld [vmem:[%s10325_s27 + $0x10] sm:$0xff]  }
  0xe9   : > { %v10614_v7 = vpop.permute.xlu1 %1898 }
  0xf0   : > { %v10616_v8 = vpop.permute.xlu1 %1903 }
  0xf4   : > { %v10621_v12 = vpop.permute.xlu1 %1888 }
 0x151   : > { %v9505_v36 = vpop.f32.mrf.mxu1 }
 0x153   : > { %v9506_v37 = vpop.f32.mrf.mxu1 }
 0x154   : > { %v9507_v38 = vadd.f32 %v9506_v37, %v9505_v36  ;;  %v1981_v36 = vld [vmem:[%s15093_s4 + $0x38] sm:$0xff]  ;;  %v1980_v37 = vld [vmem:[%s15093_s4 + $0x30] sm:$0xff] }
 0x156   : > { %1862 = vrot.lane.b32.xlu0 %v9507_v38, %s10210_s26  ;;  %1858 = vst.msk [vmem:[%s1647_s23] sm:$0x3f] %vm1857_vm0, %v9507_v38  ;;  %s14889_s23 = smov 120   ;;  %v1976_v38 = vld [vmem:[%s15093_s4 + $0x10] sm:$0xff]  ;;  %s15111_s4 = smov 10  }
 0x15a   : > { %1893 = vrot.lane.b32.xlu0 %v9304_v35, %s10211_s28  ;;  %s10217_s28 = smov 122  }
 0x15e   : > { %1883 = vrot.lane.b32.xlu0 %v9304_v35, %s14875_s1  ;;  %s14884_s1 = smov 126  }
 0x1c8   : > { %v1863_v10 = vpop.permute.xlu0 %1862 }
 0x1c9   : > { %v1866_v11 = vsel %vm1865_vm1, 0.0, %v1863_v10  ;;  %v2308_v10 = vld [vmem:[%s10340_s19 + $0x48] sm:$0xff] }
 0x1ca   : > { %v10624_v13 = vsel %vm1867_vm2, %v1866_v11, 0.0 }
 0x1cb   : > { %v1906_v14 = vmul.f32 %v10616_v8, %v10624_v13  ;;  %v1877_v15 = vpack.c.bf16 %v10624_v13, %v10624_v13  ;;  %v1901_v16 = vmul.f32 %v10614_v7, %v10624_v13  ;;  %v1891_v19 = vmul.f32 %v10621_v12, %v10624_v13 }
 0x1cc   : > { %v10632_v18 = vpop.permute.xlu0 %1893 }
 0x1cd   : > { %v1907_v20 = vpack.c.bf16 %v1906_v14, %v1906_v14  ;;  %v1931_v21 = vrot.slane %v1877_v15, 3  ;;  %v1902_v22 = vpack.c.bf16 %v1901_v16, %v1901_v16  ;;  %v1896_v23 = vmul.f32 %v10632_v18, %v10624_v13 }
 0x1ce   : > { %v1892_v28 = vpack.c.bf16 %v1891_v19, %v1891_v19  ;;  %v1909_v34 = vrot.slane %v1877_v15, 5  ;;  %v1920_v35 = vrot.slane %v1877_v15, 4 }
 0x1cf   : > { %1935 = vrot.lane.b32.xlu0 %v1907_v20, %s14879_s2  ;;  %1932 = vrot.lane.b32.xlu1 %v1931_v21, %s14891_s18  ;;  %v1897_v24 = vpack.c.bf16 %v1896_v23, %v1896_v23  ;;  %v1928_v26 = vrot.slane %v1902_v22, 6  ;;  %v1875_v22 = vmul.f32 %v10546_v17, %v10624_v13  ;;  %s1643_s2 = scalar_lea.vmem %s10505_s29, %s10574_s22 }
 0x1d0   : > { %v10640_v25 = vpop.permute.xlu0 %1883  ;;  %v1917_v31 = vrot.slane %v1892_v28, 7 }
 0x1d1   : > { %v1924_v27 = vrot.slane %v1897_v24, 1  ;;  %v1886_v29 = vmul.f32 %v10640_v25, %v10624_v13 }
 0x1d3   : > { %1929 = vrot.lane.b32.xlu0 %v1928_v26, %s14889_s23  ;;  %1925 = vrot.lane.b32.xlu1 %v1924_v27, %s10217_s28  ;;  %v1887_v30 = vpack.c.bf16 %v1886_v29, %v1886_v29  ;;  %v1876_v26 = vpack.c.bf16 %v1875_v22, %v1875_v22 }
 0x1d5   : > { %v1913_v32 = vrot.slane %v1887_v30, 2 }
 0x1d7   : > { %1918 = vrot.lane.b32.xlu1 %v1917_v31, %s10218_s0  ;;  %1914 = vrot.lane.b32.xlu0 %v1913_v32, %s14884_s1  ;;  %v10015_v32 = vld [vmem:[%s10325_s27 + $0x8] sm:$0xff]  }
 0x1db   : > { %1910 = vrot.lane.b32.xlu1 %v1909_v34, %s14886_s16  ;;  %1921 = vrot.lane.b32.xlu0 %v1920_v35, %s10221_s15  ;;  %v10017_v34 = vld [vmem:[%s10325_s27 + $0x18] sm:$0xff]   ;;  %v10018_v35 = vld [vmem:[%s10325_s27 + $0x20] sm:$0xff]  }
 0x1df   : > { %2023 = vperm.xlu1 %10013, %v1981_v36   ;;  %2018 = vperm.xlu0 %10012, %v1980_v37   ;;  %v10019_v36 = vld [vmem:[%s10325_s27 + $0x28] sm:$0xff]   ;;  %v9470_v37 = vpop.f32.mrf.mxu0 }
 0x1e3   : > { %1998 = vperm.xlu1 %10013, %v1976_v38   ;;  %2003 = vperm.xlu0 %10012, %v1977_v39   ;;  %v9471_v38 = vpop.f32.mrf.mxu0 }
 0x1e4   : > { %v10709_v39 = vadd.f32 %v9471_v38, %v9470_v37 }
 0x1e6   : > { %1856 = vst.msk [vmem:[%s1643_s2] sm:$0x3f] %vm14883_vm11, %v10709_v39  ;;  %s15096_s2 = smov 118  }
 0x1e7   : > { %2008 = vperm.xlu1 %10013, %v1978_v40   ;;  %2013 = vperm.xlu0 %10012, %v1979_v41  }
 0x1eb   : > { %2259 = vperm.xlu1 %10013, %v2221_v42   ;;  %2264 = vperm.xlu0 %10012, %v2222_v43  }
 0x1ef   : > { %1988 = vperm.xlu1 %10013, %v1974_v44   ;;  %1993 = vperm.xlu0 %10012, %v1975_v45  }
 0x1f3   : > { %2343 = vperm.xlu1 %10013, %v2305_v46   ;;  %2348 = vperm.xlu0 %10012, %v2306_v47  }
 0x1f7   : > { %2239 = vperm.xlu1 %10013, %v2217_v48   ;;  %2244 = vperm.xlu0 %10012, %v2218_v49  }
 0x1fb   : > { %2249 = vperm.xlu1 %10013, %v2219_v50   ;;  %2254 = vperm.xlu0 %10012, %v2220_v51  }
 0x1ff   : > { %2323 = vperm.xlu1 %10013, %v2301_v52   ;;  %2328 = vperm.xlu0 %10012, %v2302_v53  }
 0x203   : > { %2333 = vperm.xlu1 %10013, %v2303_v54   ;;  %2338 = vperm.xlu0 %10012, %v2304_v55  }
 0x207   : > { %2229 = vperm.xlu1 %10013, %v2215_v56   ;;  %2234 = vperm.xlu0 %10012, %v2216_v57  }
 0x20b   : > { %2313 = vperm.xlu1 %10013, %v2299_v58   ;;  %2318 = vperm.xlu0 %10012, %v2300_v59  }
 0x20f   : > { %2038 = vperm.xlu1 %10013, %v1984_v60   ;;  %2043 = vperm.xlu0 %10012, %v1985_v61  }
 0x213   : > { %2028 = vperm.xlu1 %10013, %v1982_v62   ;;  %2033 = vperm.xlu0 %10012, %v1983_v63  }
 0x217   : > { %2279 = vperm.xlu1 %10013, %v2225_v0   ;;  %2284 = vperm.xlu0 %10012, %v2226_v1  }
 0x21b   : > { %2363 = vperm.xlu1 %10013, %v2309_v2   ;;  %2368 = vperm.xlu0 %10012, %v2310_v3  }
 0x21f   : > { %2269 = vperm.xlu1 %10013, %v2223_v4   ;;  %2274 = vperm.xlu0 %10012, %v2224_v5  }
 0x223   : > { %2353 = vperm.xlu1 %10013, %v2307_v6   ;;  %2358 = vperm.xlu0 %10012, %v2308_v10  }
 0x241   : > { %v1933_v11 = vpop.permute.xlu1 %1932  ;;  %v1936_v14 = vpop.permute.xlu0 %1935 }
 0x242   : > { %9919 = vmatprep.subr.msk.bf16.mxu0 %vm1937_vm4, %v1936_v14  ;;  %v2096_v15 = vsel %vm1937_vm4, %v1936_v14, 0 }
 0x243   : > { %9806 = vmatpush3.bf16.msra.mxu0 %v2096_v15 }
 0x245   : > { %v1926_v16 = vpop.permute.xlu1 %1925  ;;  %v1930_v19 = vpop.permute.xlu0 %1929 }
 0x246   : > { %v1957_v20 = vsel %vm14912_vm5, %v1926_v16, %v1930_v19 }
 0x247   : > { %v1960_v21 = vsel %vm1958_vm6, %v1957_v20, %v1933_v11 }
 0x248   : > { %9807 = vmatprep.subr.bf16.mxu0 %v1960_v21 }
 0x249   : > { %v1919_v23 = vpop.permute.xlu1 %1918  ;;  %v1915_v24 = vpop.permute.xlu0 %1914  ;;  %9808 = vmatpush3.bf16.msra.mxu0 %v1960_v21 }
 0x24a   : > { %v1947_v27 = vsel %vm14913_vm7, %v1915_v24, %v1919_v23 }
 0x24d   : > { %v1911_v28 = vpop.permute.xlu1 %1910  ;;  %v1922_v29 = vpop.permute.xlu0 %1921 }
 0x24e   : > { %v1940_v30 = vsel %vm1937_vm4, %v1876_v26, %v1911_v28  ;;  %v1950_v31 = vsel %vm1948_vm8, %v1947_v27, %v1922_v29 }
 0x24f   : > { %v1953_v17 = vsel %vm14911_vm9, %v1950_v31, %v1926_v16  ;;  %v1943_v13 = vsel %vm1941_vm10, %v1940_v30, %v1915_v24 }
 0x250   : > { %9809 = vmatprep.subr.bf16.mxu0 %v1953_v17 }
 0x251   : > { %9810 = vmatpush3.bf16.msra.mxu0 %v1953_v17 }
 0x252   : > { %9811 = vmatprep.subr.bf16.mxu0 %v1943_v13 }
 0x255   : > { %9812 = vmatpush3.bf16.msra.mxu0 %v1943_v13 }
 0x258   : > { %9814 = vmatmul.mubr.msk.bf16.vlgmr.msra.gmra.mxu0 %vm2076_vm3, %v10015_v32 }
 0x259   : > { %9817 = vmatprep.mubr.msk.bf16.mxu0 %vm2076_vm3, %v10016_v33 }
 0x25a   : > { %v2024_v40 = vpop.permute.xlu1 %2023  ;;  %v2019_v41 = vpop.permute.xlu0 %2018 }
 0x25e   : > { %v1999_v42 = vpop.permute.xlu1 %1998  ;;  %v2004_v43 = vpop.permute.xlu0 %2003 }
 0x260   : > { %9818 = vmatmul.mubr.msk.bf16.gmra.mxu0 %vm2076_vm3, %v10017_v34 }
 0x261   : > { %9821 = vmatprep.mubr.msk.bf16.mxu0 %vm2076_vm3, %v10018_v35 }
 0x262   : > { %v2009_v44 = vpop.permute.xlu1 %2008  ;;  %v2014_v45 = vpop.permute.xlu0 %2013 }
 0x266   : > { %v2260_v46 = vpop.permute.xlu1 %2259  ;;  %v10715_v47 = vpop.permute.xlu0 %2264 }
 0x268   : > { %9822 = vmatmul.mubr.msk.bf16.gmra.mxu0 %vm2076_vm3, %v10019_v36 }
 0x26a   : > { %v1989_v48 = vpop.permute.xlu1 %1988  ;;  %v1994_v49 = vpop.permute.xlu0 %1993 }
 0x26e   : > { %v2344_v50 = vpop.permute.xlu1 %2343  ;;  %v10717_v51 = vpop.permute.xlu0 %2348 }
 0x272   : > { %v2240_v52 = vpop.permute.xlu1 %2239  ;;  %v2245_v53 = vpop.permute.xlu0 %2244 }
 0x276   : > { %v2250_v54 = vpop.permute.xlu1 %2249  ;;  %v10719_v55 = vpop.permute.xlu0 %2254 }
 0x27a   : > { %v2324_v56 = vpop.permute.xlu1 %2323  ;;  %v2329_v57 = vpop.permute.xlu0 %2328 }
 0x27e   : > { %v10721_v58 = vpop.permute.xlu1 %2333  ;;  %v10723_v59 = vpop.permute.xlu0 %2338 }
 0x282   : > { %v10725_v60 = vpop.permute.xlu1 %2229  ;;  %v10727_v61 = vpop.permute.xlu0 %2234 }
 0x286   : > { %v10729_v62 = vpop.permute.xlu1 %2313  ;;  %v10731_v63 = vpop.permute.xlu0 %2318 }
 0x28a   : > { %v2039_v1 = vpop.permute.xlu1 %2038  ;;  %v10733_v6 = vpop.permute.xlu0 %2043 }
 0x28e   : > { %v2029_v16 = vpop.permute.xlu1 %2028  ;;  %v2034_v28 = vpop.permute.xlu0 %2033 }
 0x292   : > { %v2280_v33 = vpop.permute.xlu1 %2279 }
 0x318   : > { %v9815_v0 = vpop.f32.mrf.mxu0 }
 0x319   : > { %v2141_v2 = vadd.f32 %v9815_v0, %v1999_v42 }
 0x31a   : > { %v2132_v3 = vpop.f32.mrf.mxu0 }
 0x31b   : > { %vm2181_vm12 = vcmp.ge.f32.partialorder %v2141_v2, 0.0  ;;  %v2193_v4 = vmul.f32 0.2, %v2141_v2  ;;  %v2133_v20 = vadd.f32 %v2132_v3, %v1989_v48  ;;  %v2364_v3 = vpop.permute.xlu1 %2363 }
 0x31c   : > { %v9816_v5 = vpop.f32.mrf.mxu0 }
 0x31d   : > { %v2205_v10 = vsel %vm2181_vm12, %v2141_v2, %v2193_v4  ;;  %v2144_v11 = vadd.f32 %v9816_v5, %v2004_v43  ;;  %vm2179_vm15 = vcmp.ge.f32.partialorder %v2133_v20, 0.0  ;;  %v2191_v31 = vmul.f32 0.2, %v2133_v20 }
 0x31e   : > { %v2135_v14 = vpop.f32.mrf.mxu0  ;;  %v2289_v15 = vmul.f32 %v2240_v52, %v2205_v10 }
 0x31f   : > { %vm2182_vm13 = vcmp.ge.f32.partialorder %v2144_v11, 0.0  ;;  %v2194_v19 = vmul.f32 0.2, %v2144_v11  ;;  %v2136_v17 = vadd.f32 %v2135_v14, %v1994_v49 }
 0x320   : > { %v9819_v21 = vpop.f32.mrf.mxu0  ;;  %v2373_v22 = vadd.f32 %v2324_v56, %v2289_v15  ;;  %v2285_v56 = vpop.permute.xlu0 %2284 }
 0x321   : > { %v2206_v23 = vsel %vm2182_vm13, %v2144_v11, %v2194_v19  ;;  %v2157_v24 = vadd.f32 %v9819_v21, %v2019_v41  ;;  %v2192_v48 = vmul.f32 0.2, %v2136_v17 }
 0x322   : > { %2399 = vrot.lane.b32.xlu1 %v2373_v22, %s10210_s26  ;;  %v2148_v26 = vpop.f32.mrf.mxu0  ;;  %v2290_v27 = vmul.f32 %v2245_v53, %v2206_v23  ;;  %v2270_v23 = vpop.permute.xlu1 %2269 }
 0x323   : > { %vm2185_vm14 = vcmp.ge.f32.partialorder %v2157_v24, 0.0  ;;  %v2197_v29 = vmul.f32 0.2, %v2157_v24  ;;  %v2149_v30 = vadd.f32 %v2148_v26, %v2009_v44  ;;  %v2203_v44 = vsel %vm2179_vm15, %v2133_v20, %v2191_v31 }
 0x324   : > { %v9820_v13 = vpop.f32.mrf.mxu0  ;;  %v2374_v32 = vadd.f32 %v2329_v57, %v2290_v27 }
 0x325   : > { %v2209_v34 = vsel %vm2185_vm14, %v2157_v24, %v2197_v29  ;;  %vm2183_vm3 = vcmp.ge.f32.partialorder %v2149_v30, 0.0  ;;  %v2195_v35 = vmul.f32 0.2, %v2149_v30  ;;  %v2160_v36 = vadd.f32 %v9820_v13, %v2024_v40 }
 0x326   : > { %2401 = vrot.lane.b32.xlu0 %v2374_v32, %s10210_s26  ;;  %v2151_v37 = vpop.f32.mrf.mxu0  ;;  %v2293_v38 = vmul.f32 %v2260_v46, %v2209_v34  ;;  %vm2180_vm14 = vcmp.ge.f32.partialorder %v2136_v17, 0.0 }
 0x327   : > { %v2207_v41 = vsel %vm2183_vm3, %v2149_v30, %v2195_v35  ;;  %vm2186_vm12 = vcmp.ge.f32.partialorder %v2160_v36, 0.0  ;;  %v2198_v42 = vmul.f32 0.2, %v2160_v36  ;;  %v2152_v43 = vadd.f32 %v2151_v37, %v2014_v45 }
 0x328   : > { %v9823_v52 = vpop.f32.mrf.mxu0  ;;  %v2377_v49 = vadd.f32 %v2344_v50, %v2293_v38  ;;  %v2291_v53 = vmul.f32 %v2250_v54, %v2207_v41  ;;  %v2204_v14 = vsel %vm2180_vm14, %v2136_v17, %v2192_v48  ;;  %vm10223_vm14 = vmmov 0  }
 0x329   : > { %v2210_v57 = vsel %vm2186_vm12, %v2160_v36, %v2198_v42  ;;  %vm2184_vm13 = vcmp.ge.f32.partialorder %v2152_v43, 0.0  ;;  %v2196_v0 = vmul.f32 0.2, %v2152_v43  ;;  %v2173_v2 = vadd.f32 %v9823_v52, %v2039_v1 }
 0x32a   : > { %2407 = vrot.lane.b32.xlu1 %v2377_v49, %s10210_s26  ;;  %v2164_v40 = vpop.f32.mrf.mxu0  ;;  %v2294_v46 = vmul.f32 %v10715_v47, %v2210_v57  ;;  %v2375_v54 = vadd.f32 %v10721_v58, %v2291_v53  ;;  %v2287_v1 = vmul.f32 %v10725_v60, %v2203_v44  ;;  %v2288_v60 = vmul.f32 %v10727_v61, %v2204_v14  ;;  %v2354_v61 = vpop.permute.xlu1 %2353 }
 0x32b   : > { %v2208_v4 = vsel %vm2184_vm13, %v2152_v43, %v2196_v0  ;;  %vm2189_vm3 = vcmp.ge.f32.partialorder %v2173_v2, 0.0  ;;  %v2201_v45 = vmul.f32 0.2, %v2173_v2  ;;  %v2165_v5 = vadd.f32 %v2164_v40, %v2029_v16  ;;  %v2369_v16 = vpop.permute.xlu0 %2368 }
 0x32c   : > { %v9824_v10 = vpop.f32.mrf.mxu0  ;;  %v2378_v50 = vadd.f32 %v10717_v51, %v2294_v46  ;;  %v2292_v11 = vmul.f32 %v10719_v55, %v2208_v4  ;;  %v2371_v55 = vadd.f32 %v10729_v62, %v2287_v1  ;;  %v2372_v27 = vadd.f32 %v10731_v63, %v2288_v60 }
 0x32d   : > { %v2213_v15 = vsel %vm2189_vm3, %v2173_v2, %v2201_v45  ;;  %v2199_v19 = vmul.f32 0.2, %v2165_v5  ;;  %v2176_v20 = vadd.f32 %v9824_v10, %v10733_v6  ;;  %vm2187_vm15 = vcmp.ge.f32.partialorder %v2165_v5, 0.0 }
 0x32e   : > { %2409 = vrot.lane.b32.xlu0 %v2378_v50, %s10210_s26  ;;  %v2167_v47 = vpop.f32.mrf.mxu0  ;;  %2403 = vrot.lane.b32.xlu1 %v2375_v54, %s10210_s26  ;;  %v2376_v58 = vadd.f32 %v10723_v59, %v2292_v11  ;;  %v2297_v22 = vmul.f32 %v2280_v33, %v2213_v15  ;;  %vm2914_vm3 = vcmask 785408  }
 0x32f   : > { %vm2190_vm12 = vcmp.ge.f32.partialorder %v2176_v20, 0.0  ;;  %v2202_v51 = vmul.f32 0.2, %v2176_v20  ;;  %v2168_v21 = vadd.f32 %v2167_v47, %v2034_v28  ;;  %v2211_v24 = vsel %vm2187_vm15, %v2165_v5, %v2199_v19  ;;  %v2275_v59 = vpop.permute.xlu0 %2274 }
 0x330   : > { %v2381_v29 = vadd.f32 %v2364_v3, %v2297_v22  ;;  %v2295_v30 = vmul.f32 %v2270_v23, %v2211_v24 }
 0x331   : > { %v2214_v6 = vsel %vm2190_vm12, %v2176_v20, %v2202_v51  ;;  %v2200_v26 = vmul.f32 0.2, %v2168_v21  ;;  %vm2188_vm13 = vcmp.ge.f32.partialorder %v2168_v21, 0.0 }
 0x332   : > { %2405 = vrot.lane.b32.xlu0 %v2376_v58, %s10210_s26  ;;  %2395 = vrot.lane.b32.xlu1 %v2371_v55, %s10210_s26  ;;  %v2298_v28 = vmul.f32 %v2285_v56, %v2214_v6  ;;  %v2379_v17 = vadd.f32 %v2354_v61, %v2295_v30  ;;  %v10779_v56 = vld [vmem:[%s15089_s12] ss:$0 sm:$0xff] }
 0x333   : > { %v2212_v31 = vsel %vm2188_vm13, %v2168_v21, %v2200_v26  ;;  %v2359_v32 = vpop.permute.xlu0 %2358 }
 0x334   : > { %v2382_v62 = vadd.f32 %v2369_v16, %v2298_v28  ;;  %v2296_v13 = vmul.f32 %v2275_v59, %v2212_v31 }
 0x336   : > { %2397 = vrot.lane.b32.xlu0 %v2372_v27, %s10210_s26  ;;  %2415 = vrot.lane.b32.xlu1 %v2381_v29, %s10210_s26  ;;  %v2380_v33 = vadd.f32 %v2359_v32, %v2296_v13 }
 0x33a   : > { %2417 = vrot.lane.b32.xlu0 %v2382_v62, %s10210_s26  ;;  %2411 = vrot.lane.b32.xlu1 %v2379_v17, %s10210_s26 }
 0x33e   : > { %2413 = vrot.lane.b32.xlu0 %v2380_v33, %s10210_s26 }
 0x394   : > { %v2400_v63 = vpop.permute.xlu1 %2399 }
 0x395   : > { %v2433_v34 = vsel %vm1865_vm1, 0.0, %v2400_v63 }
 0x396   : > { %v2445_v35 = vsel %vm1867_vm2, %v2433_v34, 0.0 }
 0x397   : > { %v2481_v41 = vmul.f32 %v2445_v35, %v10640_v25  ;;  %v10767_v44 = vmul.f32 %v2445_v35, %v10614_v7  ;;  %v10770_v48 = vmul.f32 %v2445_v35, %v10616_v8  ;;  %v10782_v57 = vmul.f32 %v10779_v56, %v2445_v35 }
 0x398   : > { %v2402_v36 = vpop.permute.xlu0 %2401  ;;  %v2517_v45 = vmul.f32 %v2445_v35, %v10632_v18  ;;  %v2499_v61 = vmul.f32 %v2445_v35, %v10621_v12 }
 0x399   : > { %v2434_v37 = vsel %vm1865_vm1, 0.0, %v2402_v36 }
 0x39a   : > { %v2446_v38 = vsel %vm1867_vm2, %v2434_v37, 0.0 }
 0x39b   : > { %v10763_v42 = vpack.c.bf16 %v2446_v38, %v2445_v35  ;;  %v2482_v43 = vmul.f32 %v2446_v38, %v10640_v25  ;;  %v10773_v49 = vmul.f32 %v2446_v38, %v10614_v7  ;;  %v10776_v53 = vmul.f32 %v2446_v38, %v10616_v8 }
 0x39c   : > { %v2408_v52 = vpop.permute.xlu1 %2407  ;;  %v10785_v0 = vmul.f32 %v10779_v56, %v2446_v38  ;;  %v2518_v40 = vmul.f32 %v2446_v38, %v10632_v18  ;;  %v2500_v28 = vmul.f32 %v2446_v38, %v10621_v12 }
 0x39d   : > { %2577 = vrot.lane.b32.xlu0 %v10763_v42, %s14886_s16  ;;  %v2492_v2 = vpack.c.bf16 %v2482_v43, %v2481_v41  ;;  %v2546_v46 = vpack.c.bf16 %v10773_v49, %v10767_v44  ;;  %v2564_v3 = vpack.c.bf16 %v10776_v53, %v10770_v48  ;;  %v2437_v50 = vsel %vm1865_vm1, 0.0, %v2408_v52  ;;  %v2775_v48 = vld [vmem:[%s10350_s21 + $0x10] sm:$0xff]  ;;  %v2778_v53 = vld [vmem:[%s10350_s21 + $0x28] sm:$0xff] }
 0x39e   : > { %v2528_v11 = vpack.c.bf16 %v2518_v40, %v2517_v45  ;;  %v10805_v14 = vsel %vm1867_vm2, %v2437_v50, 0.0  ;;  %v2510_v17 = vpack.c.bf16 %v2500_v28, %v2499_v61 }
 0x39f   : > { %2601 = vrot.lane.b32.xlu1 %v2492_v2, %s14884_s1  ;;  %v10820_v51 = vmul.f32 %v10805_v14, %v10616_v8  ;;  %v2485_v29 = vmul.f32 %v10805_v14, %v10640_v25  ;;  %v10866_v36 = vmul.f32 %v10805_v14, %v10632_v18 }
 0x3a0   : > { %v2410_v5 = vpop.permute.xlu0 %2409  ;;  %v2404_v10 = vpop.permute.xlu1 %2403 }
 0x3a1   : > { %v2438_v54 = vsel %vm1865_vm1, 0.0, %v2410_v5  ;;  %v2435_v22 = vsel %vm1865_vm1, 0.0, %v2404_v10 }
 0x3a2   : > { %v10801_v1 = vsel %vm1867_vm2, %v2438_v54, 0.0  ;;  %v10845_v59 = vsel %vm1867_vm2, %v2435_v22, 0.0 }
 0x3a3   : > { %2667 = vrot.lane.b32.xlu1 %v2528_v11, %s10217_s28  ;;  %v10809_v20 = vpack.c.bf16 %v10801_v1, %v10805_v14  ;;  %v10813_v47 = vmul.f32 %v10801_v1, %v10616_v8  ;;  %v2486_v55 = vmul.f32 %v10801_v1, %v10640_v25  ;;  %v10858_v32 = vmul.f32 %v10801_v1, %v10632_v18 }
 0x3a4   : > { %v2406_v15 = vpop.permute.xlu0 %2405  ;;  %v2396_v19 = vpop.permute.xlu1 %2395  ;;  %v2483_v34 = vmul.f32 %v10845_v59, %v10640_v25  ;;  %v2501_v35 = vmul.f32 %v10845_v59, %v10621_v12  ;;  %v10925_v61 = vmul.f32 %v10845_v59, %v10632_v18  ;;  %v2540_v4 = vmul.f32 %v10801_v1, %v10614_v7 }
 0x3a5   : > { %v2431_v16 = vsel %vm1865_vm1, 0.0, %v2396_v19  ;;  %v2566_v60 = vpack.c.bf16 %v10813_v47, %v10820_v51  ;;  %v2436_v26 = vsel %vm1865_vm1, 0.0, %v2406_v15  ;;  %v2494_v31 = vpack.c.bf16 %v2486_v55, %v2485_v29 }
 0x3a6   : > { %v10829_v23 = vsel %vm1867_vm2, %v2431_v16, 0.0  ;;  %v10851_v62 = vsel %vm1867_vm2, %v2436_v26, 0.0  ;;  %v2530_v54 = vpack.c.bf16 %v10858_v32, %v10866_v36  ;;  %v2504_v19 = vmul.f32 %v10801_v1, %v10621_v12  ;;  %v2777_v36 = vld [vmem:[%s10350_s21 + $0x20] sm:$0xff] }
 0x3a7   : > { %2581 = vrot.lane.b32.xlu1 %v10809_v20, %s14886_s16  ;;  %v10871_v37 = vpack.c.bf16 %v10851_v62, %v10845_v59  ;;  %v2479_v38 = vmul.f32 %v10829_v23, %v10640_v25  ;;  %v2484_v41 = vmul.f32 %v10851_v62, %v10640_v25  ;;  %v2502_v43 = vmul.f32 %v10851_v62, %v10621_v12 }
 0x3a8   : > { %v2398_v21 = vpop.permute.xlu0 %2397  ;;  %v2416_v6 = vpop.permute.xlu1 %2415  ;;  %v2515_v11 = vmul.f32 %v10829_v23, %v10632_v18  ;;  %v2497_v15 = vmul.f32 %v10829_v23, %v10621_v12  ;;  %v10899_v16 = vmul.f32 %v10779_v56, %v10805_v14  ;;  %v10916_v29 = vmul.f32 %v10845_v59, %v10616_v8 }
 0x3a9   : > { %v2432_v58 = vsel %vm1865_vm1, 0.0, %v2398_v21  ;;  %v2441_v52 = vsel %vm1865_vm1, 0.0, %v2416_v6  ;;  %v2493_v55 = vpack.c.bf16 %v2484_v41, %v2483_v34  ;;  %v2511_v22 = vpack.c.bf16 %v2502_v43, %v2501_v35 }
 0x3aa   : > { %v10832_v24 = vsel %vm1867_vm2, %v2432_v58, 0.0  ;;  %v10902_v21 = vsel %vm1867_vm2, %v2441_v52, 0.0  ;;  %v10920_v28 = vmul.f32 %v10851_v62, %v10616_v8 }
 0x3ab   : > { %2647 = vrot.lane.b32.xlu1 %v10809_v20, %s10221_s15  ;;  %v10839_v27 = vpack.c.bf16 %v10832_v24, %v10829_v23  ;;  %v2480_v13 = vmul.f32 %v10832_v24, %v10640_v25  ;;  %v2516_v40 = vmul.f32 %v10832_v24, %v10632_v18  ;;  %v2498_v45 = vmul.f32 %v10832_v24, %v10621_v12 }
 0x3ac   : > { %v2418_v30 = vpop.permute.xlu0 %2417  ;;  %v2412_v33 = vpop.permute.xlu1 %2411  ;;  %v10943_v34 = vmul.f32 %v10779_v56, %v10902_v21 }
 0x3ad   : > { %2575 = vrot.lane.b32.xlu0 %v10839_v27, %s14886_s16  ;;  %v2442_v2 = vsel %vm1865_vm1, 0.0, %v2418_v30  ;;  %v2439_v5 = vsel %vm1865_vm1, 0.0, %v2412_v33  ;;  %v2491_v50 = vpack.c.bf16 %v2480_v13, %v2479_v38  ;;  %v2527_v30 = vpack.c.bf16 %v2516_v40, %v2515_v11 }
 0x3ae   : > { %v10905_v58 = vsel %vm1867_vm2, %v2442_v2, 0.0  ;;  %v10909_v6 = vsel %vm1867_vm2, %v2439_v5, 0.0  ;;  %v2565_v13 = vpack.c.bf16 %v10920_v28, %v10916_v29  ;;  %v10935_v33 = vmul.f32 %v10829_v23, %v10616_v8  ;;  %v2776_v29 = vld [vmem:[%s10350_s21 + $0x18] sm:$0xff]  ;;  %v3170_v28 = vld [vmem:[%s15091_s8] sm:$0xff] }
 0x3af   : > { %2605 = vrot.lane.b32.xlu1 %v2494_v31, %s14884_s1  ;;  %v2509_v31 = vpack.c.bf16 %v2498_v45, %v2497_v15  ;;  %v10950_v38 = vmul.f32 %v10779_v56, %v10905_v58  ;;  %v10954_v41 = vmul.f32 %v10779_v56, %v10909_v6  ;;  %v10964_v2 = vmul.f32 %v10779_v56, %v10801_v1 }
 0x3b0   : > { %v2414_v63 = vpop.permute.xlu0 %2413  ;;  %v10968_v40 = vmul.f32 %v10779_v56, %v10845_v59  ;;  %v10972_v45 = vmul.f32 %v10779_v56, %v10851_v62  ;;  %v10985_v11 = vmul.f32 %v10779_v56, %v10832_v24  ;;  %v2537_v1 = vmul.f32 %v10845_v59, %v10614_v7 }
 0x3b1   : > { %2625 = vrot.lane.b32.xlu0 %v2510_v17, %s10218_s0  ;;  %v2440_v10 = vsel %vm1865_vm1, 0.0, %v2414_v63  ;;  %v10929_v17 = vmul.f32 %v10851_v62, %v10632_v18  ;;  %v10939_v63 = vmul.f32 %v10832_v24, %v10616_v8  ;;  %v2472_v5 = vpack.c.bf16 %v10950_v38, %v10943_v34 }
 0x3b2   : > { %v10912_v26 = vsel %vm1867_vm2, %v2440_v10, 0.0  ;;  %v2470_v15 = vpack.c.bf16 %v10964_v2, %v10899_v16  ;;  %v2487_v49 = vmul.f32 %v10909_v6, %v10640_v25  ;;  %v2541_v51 = vmul.f32 %v10909_v6, %v10614_v7 }
 0x3b3   : > { %2645 = vrot.lane.b32.xlu1 %v10871_v37, %s10221_s15  ;;  %v2529_v35 = vpack.c.bf16 %v10929_v17, %v10925_v61  ;;  %v10958_v43 = vmul.f32 %v10779_v56, %v10912_v26  ;;  %v2563_v52 = vpack.c.bf16 %v10939_v63, %v10935_v33  ;;  %v2488_v44 = vmul.f32 %v10912_v26, %v10640_v25  ;;  %v3175_v17 = vld [vmem:[%s15091_s8 + $0x28] sm:$0xff] }
 0x3b4   : > { %v3217_v63 = vld [vmem:[%s15092_s6 + $0x28] sm:$0xff]  ;;  %v15098_v2 = vpack.c.bf16 %v10785_v0, %v10782_v57 }
 0x3b5   : > { %2599 = vrot.lane.b32.xlu0 %v2491_v50, %s14884_s1  ;;  %v2471_v10 = vpack.c.bf16 %v10958_v43, %v10954_v41  ;;  %v10981_v50 = vmul.f32 %v10779_v56, %v10829_v23  ;;  %v15097_v41 = vpack.c.bf16 %v10972_v45, %v10968_v40  ;;  %v10023_v45 = vld [vmem:[%s10345_s24 + $0x3c] ss:$28 sps:$4 sm:$0xff]  }
 0x3b7   : > { %2603 = vrot.lane.b32.xlu1 %v2493_v55, %s14884_s1  ;;  %v2467_v9 = vpack.c.bf16 %v10985_v11, %v10981_v50  ;;  %v10029_v50 = vld [vmem:[%s10345_s24 + $0x74] ss:$28 sps:$4 sm:$0xff]  }
 0x3b9   : > { %2665 = vrot.lane.b32.xlu0 %v2527_v30, %s10217_s28  ;;  %v2503_v30 = vmul.f32 %v10805_v14, %v10621_v12 }
 0x3bb   : > { %2627 = vrot.lane.b32.xlu1 %v2511_v22, %s10218_s0  ;;  %v2478_v22 = vpack.c.bf16 %v10905_v58, %v10902_v21  ;;  %v2512_v56 = vpack.c.bf16 %v2504_v19, %v2503_v30  ;;  %v2538_v19 = vmul.f32 %v10851_v62, %v10614_v7  ;;  %v2477_v30 = vpack.c.bf16 %v10912_v26, %v10909_v6 }
 0x3bc   : > { %v2508_v62 = vmul.f32 %v10905_v58, %v10621_v12 }
 0x3bd   : > { %2623 = vrot.lane.b32.xlu0 %v2509_v31, %s10218_s0  ;;  %v2539_v31 = vmul.f32 %v10805_v14, %v10614_v7  ;;  %v2547_v14 = vpack.c.bf16 %v2538_v19, %v2537_v1  ;;  %v2490_v19 = vmul.f32 %v10905_v58, %v10640_v25  ;;  %v2489_v1 = vmul.f32 %v10902_v21, %v10640_v25 }
 0x3bf   : > { %2585 = vrot.lane.b32.xlu1 %v2478_v22, %s14886_s16  ;;  %v2548_v55 = vpack.c.bf16 %v2540_v4, %v2539_v31  ;;  %v2505_v4 = vmul.f32 %v10909_v6, %v10621_v12  ;;  %v10022_v31 = vld [vmem:[%s10345_s24 + $0x4] ss:$28 sps:$4 sm:$0xff]  }
 0x3c0   : > { %2956 = vmatprep.mubr.bf16.mxu1 %v10022_v31  ;;  %v2543_v31 = vmul.f32 %v10902_v21, %v10614_v7 }
 0x3c1   : > { %2629 = vrot.lane.b32.xlu0 %v2512_v56, %s10218_s0  ;;  %v2506_v56 = vmul.f32 %v10912_v26, %v10621_v12 }
 0x3c3   : > { %2651 = vrot.lane.b32.xlu1 %v2478_v22, %s10221_s15 }
 0x3c5   : > { %2579 = vrot.lane.b32.xlu0 %v10871_v37, %s14886_s16 }
 0x3c7   : > { %2717 = vrot.lane.b32.xlu1 %v2478_v22, %s14891_s18  ;;  %v2507_v22 = vmul.f32 %v10902_v21, %v10621_v12 }
 0x3c9   : > { %2695 = vrot.lane.b32.xlu0 %v2548_v55, %s14889_s23  ;;  %v2513_v55 = vpack.c.bf16 %v2506_v56, %v2505_v4  ;;  %v2514_v59 = vpack.c.bf16 %v2508_v62, %v2507_v22  ;;  %v2496_v56 = vpack.c.bf16 %v2490_v19, %v2489_v1  ;;  %v2533_v62 = vmul.f32 %v10829_v23, %v10614_v7  ;;  %v10028_v22 = vld [vmem:[%s10345_s24 + $0xc] ss:$28 sps:$4 sm:$0xff]  }
 0x3ca   : > { %3013 = vmatprep.mubr.bf16.mxu0 %v10028_v22  ;;  %v2544_v23 = vmul.f32 %v10905_v58, %v10614_v7  ;;  %v2560_v19 = vmul.f32 %v10912_v26, %v10616_v8  ;;  %v2523_v1 = vmul.f32 %v10909_v6, %v10632_v18  ;;  %v3213_v22 = vld [vmem:[%s15092_s6 + $0x8] sm:$0xff] }
 0x3cb   : > { %2715 = vrot.lane.b32.xlu1 %v2477_v30, %s14891_s18 }
 0x3cd   : > { %2693 = vrot.lane.b32.xlu0 %v2547_v14, %s14889_s23  ;;  %v2562_v14 = vmul.f32 %v10905_v58, %v10616_v8 }
 0x3cf   : > { %2631 = vrot.lane.b32.xlu1 %v2513_v55, %s10218_s0  ;;  %v2526_v55 = vmul.f32 %v10905_v58, %v10632_v18  ;;  %v2542_v58 = vmul.f32 %v10912_v26, %v10614_v7 }
 0x3d1   : > { %2633 = vrot.lane.b32.xlu0 %v2514_v59, %s10218_s0  ;;  %v2525_v59 = vmul.f32 %v10902_v21, %v10632_v18 }
 0x3d3   : > { %2643 = vrot.lane.b32.xlu1 %v10763_v42, %s10221_s15 }
 0x3d5   : > { %2583 = vrot.lane.b32.xlu0 %v2477_v30, %s14886_s16 }
 0x3d7   : > { %2713 = vrot.lane.b32.xlu1 %v10809_v20, %s14891_s18  ;;  %v2561_v20 = vmul.f32 %v10902_v21, %v10616_v8  ;;  %v2549_v21 = vpack.c.bf16 %v2542_v58, %v2541_v51 }
 0x3d9   : > { %2649 = vrot.lane.b32.xlu0 %v2477_v30, %s10221_s15  ;;  %v2534_v30 = vmul.f32 %v10832_v24, %v10614_v7  ;;  %v2568_v4 = vpack.c.bf16 %v2562_v14, %v2561_v20  ;;  %v2532_v24 = vpack.c.bf16 %v2526_v55, %v2525_v59  ;;  %v3214_v20 = vld [vmem:[%s15092_s6 + $0x10] sm:$0xff] }
 0x3db   : > { %2641 = vrot.lane.b32.xlu1 %v10839_v27, %s10221_s15 }
 0x3dd   : > { %2609 = vrot.lane.b32.xlu0 %v2496_v56, %s14884_s1  ;;  %v3171_v56 = vld [vmem:[%s15091_s8 + $0x8] sm:$0xff] }
 0x3df   : > { %2711 = vrot.lane.b32.xlu1 %v10871_v37, %s14891_s18  ;;  %v2545_v37 = vpack.c.bf16 %v2534_v30, %v2533_v62 }
 0x3e1   : > { %2691 = vrot.lane.b32.xlu0 %v2546_v46, %s14889_s23  ;;  %v2495_v46 = vpack.c.bf16 %v2488_v44, %v2487_v49 }
 0x3e3   : > { %2741 = vrot.lane.b32.xlu1 %v2568_v4, %s15096_s2  ;;  %v3173_v4 = vld [vmem:[%s15091_s8 + $0x18] sm:$0xff] }
 0x3e5   : > { %2689 = vrot.lane.b32.xlu0 %v2545_v37, %s14889_s23 }
 0x3e7   : > { %2675 = vrot.lane.b32.xlu1 %v2532_v24, %s10217_s28  ;;  %v3215_v24 = vld [vmem:[%s15092_s6 + $0x18] sm:$0xff] }
 0x3e9   : > { %2709 = vrot.lane.b32.xlu0 %v10763_v42, %s14891_s18  ;;  %v2550_v42 = vpack.c.bf16 %v2544_v23, %v2543_v31 }
 0x3eb   : > { %2707 = vrot.lane.b32.xlu1 %v10839_v27, %s14891_s18  ;;  %v2559_v27 = vmul.f32 %v10909_v6, %v10616_v8  ;;  %v2774_v6 = vld [vmem:[%s10350_s21 + $0x8] sm:$0xff] }
 0x3ed   : > { %2607 = vrot.lane.b32.xlu0 %v2495_v46, %s14884_s1  ;;  %v2567_v47 = vpack.c.bf16 %v2560_v19, %v2559_v27 }
 0x3ef   : > { %2737 = vrot.lane.b32.xlu1 %v2566_v60, %s15096_s2  ;;  %v2524_v60 = vmul.f32 %v10912_v26, %v10632_v18  ;;  %v3216_v26 = vld [vmem:[%s15092_s6 + $0x20] sm:$0xff] }
 0x3f1   : > { %2699 = vrot.lane.b32.xlu0 %v2550_v42, %s14889_s23  ;;  %v2531_v32 = vpack.c.bf16 %v2524_v60, %v2523_v1 }
 0x3f3   : > { %2671 = vrot.lane.b32.xlu1 %v2530_v54, %s10217_s28  ;;  %v2773_v54 = vld [vmem:[%s10350_s21] sm:$0xff] }
 0x3f5   : > { %2739 = vrot.lane.b32.xlu0 %v2567_v47, %s15096_s2 }
 0x3f7   : > { %2697 = vrot.lane.b32.xlu1 %v2549_v21, %s14889_s23 }
 0x3f9   : > { %2673 = vrot.lane.b32.xlu0 %v2531_v32, %s10217_s28  ;;  %v10020_v32 = vld [vmem:[%s10345_s24] ss:$28 sps:$4 sm:$0xff]  }
 0x3fb   : > { %2733 = vrot.lane.b32.xlu1 %v2564_v3, %s15096_s2  ;;  %v3174_v3 = vld [vmem:[%s15091_s8 + $0x20] sm:$0xff] }
 0x3fd   : > { %2735 = vrot.lane.b32.xlu0 %v2565_v13, %s15096_s2  ;;  %v3172_v13 = vld [vmem:[%s15091_s8 + $0x10] sm:$0xff]  ;;  %s15120_s8 = sld [smem:[#allocation25_spill]] }
 0x3ff   : > { %2801 = vperm.xlu1 %10013, %v2777_v36  }
 0x401   : > { %2669 = vrot.lane.b32.xlu0 %v2529_v35, %s10217_s28  ;;  %v3212_v35 = vld [vmem:[%s15092_s6] sm:$0xff]  ;;  %s15119_s6 = smov 126  }
 0x403   : > { %2781 = vperm.xlu1 %10013, %v2773_v54   ;;  %v10025_v54 = vld [vmem:[%s10345_s24 + $0x38] ss:$28 sps:$4 sm:$0xff]  }
 0x405   : > { %2731 = vrot.lane.b32.xlu0 %v2563_v52, %s15096_s2 }
 0x407   : > { %2791 = vperm.xlu1 %10013, %v2775_v48  }
 0x409   : > { %2806 = vperm.xlu0 %10012, %v2778_v53  }
 0x40b   : > { %3198 = vperm.xlu1 %10013, %v3174_v3   ;;  %v10026_v3 = vld [vmem:[%s10345_s24 + $0x8] ss:$28 sps:$4 sm:$0xff]  }
 0x40d   : > { %2786 = vperm.xlu0 %10012, %v2774_v6   ;;  %v10031_v6 = vld [vmem:[%s10345_s24 + $0x70] ss:$28 sps:$4 sm:$0xff]  }
 0x40f   : > { %3240 = vperm.xlu1 %10013, %v3216_v26   ;;  %v2578_v14 = vpop.permute.xlu0 %2577 }
 0x411   : > { %2796 = vperm.xlu0 %10012, %v2776_v29   ;;  %v2602_v61 = vpop.permute.xlu1 %2601  ;;  %v14914_v29 = vmov 0.0  }
 0x413   : > { %3178 = vperm.xlu1 %10013, %v3170_v28   ;;  %v10032_v28 = vld [vmem:[%s10345_s24 + $0x44] ss:$28 sps:$4 sm:$0xff]  }
 0x415   : > { %3203 = vperm.xlu0 %10012, %v3175_v17   ;;  %v2668_v33 = vpop.permute.xlu1 %2667  ;;  %v10040_v17 = vld [vmem:[%s10345_s24 + $0x14] ss:$28 sps:$4 sm:$0xff]  }
 0x416   : > { %9552 = vmatprep.subr.bf16.mxu0 %v2668_v33 }
 0x417   : > { %3188 = vperm.xlu1 %10013, %v3172_v13  }
 0x419   : > { %3245 = vperm.xlu0 %10012, %v3217_v63   ;;  %v2582_v52 = vpop.permute.xlu1 %2581  ;;  %v10034_v63 = vld [vmem:[%s10345_s24 + $0x40] ss:$28 sps:$4 sm:$0xff]  }
 0x41b   : > { %3220 = vperm.xlu1 %10013, %v3212_v35   ;;  %v10035_v35 = vld [vmem:[%s10345_s24 + $0x7c] ss:$28 sps:$4 sm:$0xff]  }
 0x41d   : > { %3183 = vperm.xlu0 %10012, %v3171_v56   ;;  %v2648_v30 = vpop.permute.xlu1 %2647 }
 0x41f   : > { %v2576_v62 = vpop.permute.xlu0 %2575  ;;  %3230 = vperm.xlu1 %10013, %v3214_v20   ;;  %v10037_v20 = vld [vmem:[%s10345_s24 + $0x78] ss:$28 sps:$4 sm:$0xff]  }
 0x421   : > { %3193 = vperm.xlu0 %10012, %v3173_v4   ;;  %v2606_v55 = vpop.permute.xlu1 %2605 }
 0x422   : > { %9518 = vmatprep.subr.bf16.mxu1 %v2606_v55  ;;  %v10042_v55 = vld [vmem:[%s10345_s24 + $0x4c] ss:$28 sps:$4 sm:$0xff]  }
 0x423   : > { %v2626_v37 = vpop.permute.xlu0 %2625  ;;  %9519 = vmatpush3.bf16.msra.mxu1 %v2578_v14 }
 0x425   : > { %3225 = vperm.xlu0 %10012, %v3213_v22   ;;  %v2646_v59 = vpop.permute.xlu1 %2645 }
 0x427   : > { %v2600_v44 = vpop.permute.xlu0 %2599 }
 0x429   : > { %3235 = vperm.xlu0 %10012, %v3215_v24   ;;  %v2604_v49 = vpop.permute.xlu1 %2603  ;;  %v10044_v24 = vld [vmem:[%s10345_s24 + $0x48] ss:$28 sps:$4 sm:$0xff]  }
 0x42a   : > { %9520 = vmatprep.subr.bf16.mxu1 %v2604_v49  ;;  %v10045_v49 = vld [vmem:[%s10345_s24 + $0x50] ss:$28 sps:$4 sm:$0xff]  }
 0x42b   : > { %v2666_v46 = vpop.permute.xlu0 %2665  ;;  %9521 = vmatpush3.bf16.msra.mxu1 %v2576_v62  ;;  %v10038_v62 = vld [vmem:[%s10345_s24 + $0x10] ss:$28 sps:$4 sm:$0xff]  }
 0x42c   : > { %9522 = vmatprep.subr.bf16.mxu1 %v2602_v61 }
 0x42d   : > { %v2628_v23 = vpop.permute.xlu1 %2627 }
 0x42f   : > { %v2624_v31 = vpop.permute.xlu0 %2623  ;;  %9523 = vmatpush3.bf16.msra.mxu1 %v2472_v5 }
 0x430   : > { %9524 = vmatprep.subr.bf16.mxu1 %v2600_v44  ;;  %v10046_v44 = vld [vmem:[%s10345_s24 + $0x84] ss:$28 sps:$4 sm:$0xff]  }
 0x431   : > { %v2586_v42 = vpop.permute.xlu1 %2585 }
 0x433   : > { %v2630_v19 = vpop.permute.xlu0 %2629  ;;  %9525 = vmatpush3.bf16.msra.mxu1 %v2471_v10 }
 0x434   : > { %9526 = vmatprep.subr.bf16.mxu1 %v2586_v42 }
 0x435   : > { %v2652_v27 = vpop.permute.xlu1 %2651 }
 0x437   : > { %v2580_v58 = vpop.permute.xlu0 %2579  ;;  %9527 = vmatpush3.bf16.msra.mxu1 %v2470_v15 }
 0x439   : > { %v2718_v47 = vpop.permute.xlu1 %2717 }
 0x43b   : > { %v2696_v51 = vpop.permute.xlu0 %2695 }
 0x43d   : > { %v2716_v60 = vpop.permute.xlu1 %2715 }
 0x43f   : > { %v2694_v21 = vpop.permute.xlu0 %2693 }
 0x441   : > { %v2632_v34 = vpop.permute.xlu1 %2631 }
 0x443   : > { %v2634_v38 = vpop.permute.xlu0 %2633 }
 0x444   : > { %9553 = vmatpush3.bf16.msra.mxu0 %v2634_v38 }
 0x445   : > { %9554 = vmatprep.subr.bf16.mxu0 %v2666_v46  ;;  %v2644_v5 = vpop.permute.xlu1 %2643  ;;  %v10048_v46 = vld [vmem:[%s10345_s24 + $0x80] ss:$28 sps:$4 sm:$0xff]  }
 0x447   : > { %v2584_v1 = vpop.permute.xlu0 %2583 }
 0x448   : > { %9528 = vmatprep.subr.bf16.mxu1 %v2584_v1  ;;  %9555 = vmatpush3.bf16.msra.mxu0 %v2632_v34 }
 0x449   : > { %9529 = vmatpush3.bf16.msra.mxu1 %v15097_v41  ;;  %9556 = vmatprep.subr.bf16.mxu0 %v2652_v27  ;;  %v2714_v16 = vpop.permute.xlu1 %2713 }
 0x44a   : > { %9530 = vmatprep.subr.bf16.mxu1 %v2582_v52 }
 0x44b   : > { %v2650_v43 = vpop.permute.xlu0 %2649 }
 0x44c   : > { %9557 = vmatpush3.bf16.msra.mxu0 %v2630_v19 }
 0x44d   : > { %9531 = vmatpush3.bf16.msra.mxu1 %v15098_v2  ;;  %9558 = vmatprep.subr.bf16.mxu0 %v2650_v43  ;;  %v2642_v10 = vpop.permute.xlu1 %2641 }
 0x44e   : > { %9532 = vmatprep.subr.bf16.mxu1 %v2580_v58 }
 0x44f   : > { %v2610_v15 = vpop.permute.xlu0 %2609 }
 0x450   : > { %9559 = vmatpush3.bf16.msra.mxu0 %v2628_v23  ;;  %v10049_v23 = vld [vmem:[%s10345_s24 + $0x88] ss:$28 sps:$4 sm:$0xff]  }
 0x451   : > { %9533 = vmatpush3.bf16.msra.mxu1 %v2467_v9  ;;  %9560 = vmatprep.subr.bf16.mxu0 %v2648_v30  ;;  %v2712_v40 = vpop.permute.xlu1 %2711 }
 0x452   : > { %9586 = vmatprep.subr.bf16.mxu1 %v2718_v47 }
 0x453   : > { %v2692_v36 = vpop.permute.xlu0 %2691 }
 0x454   : > { %2957 = vmatmul.mubr.bf16.vlgmr.msra.gmra.mxu1 %v10020_v32  ;;  %9561 = vmatpush3.bf16.msra.mxu0 %v2626_v37  ;;  %v10041_v37 = vld [vmem:[%s10345_s24 + $0x18] ss:$28 sps:$4 sm:$0xff]  }
 0x455   : > { %9562 = vmatprep.subr.bf16.mxu0 %v2646_v59  ;;  %9587 = vmatpush3.bf16.msra.mxu1 %v2696_v51  ;;  %v2742_v57 = vpop.permute.xlu1 %2741  ;;  %v15099_v59 = vmov 0  }
 0x456   : > { %9588 = vmatprep.subr.bf16.mxu1 %v2716_v60  ;;  %2964 = vmatprep.mubr.bf16.mxu1 %v10023_v45 }
 0x457   : > { %v2690_v0 = vpop.permute.xlu0 %2689 }
 0x458   : > { %9563 = vmatpush3.bf16.msra.mxu0 %v2624_v31 }
 0x459   : > { %9564 = vmatprep.subr.bf16.mxu0 %v2644_v5  ;;  %9589 = vmatpush3.bf16.msra.mxu1 %v2694_v21  ;;  %v2676_v9 = vpop.permute.xlu1 %2675 }
 0x45a   : > { %9590 = vmatprep.subr.bf16.mxu1 %v2714_v16 }
 0x45b   : > { %v2710_v11 = vpop.permute.xlu0 %2709 }
 0x45c   : > { %2965 = vmatmul.mubr.bf16.gmra.mxu1 %v10025_v54  ;;  %9565 = vmatpush3.bf16.msra.mxu0 %v2610_v15 }
 0x45d   : > { %9566 = vmatprep.subr.bf16.mxu0 %v2642_v10  ;;  %9591 = vmatpush3.bf16.msra.mxu1 %v2692_v36  ;;  %v2708_v48 = vpop.permute.xlu1 %2707 }
 0x45e   : > { %9592 = vmatprep.subr.bf16.mxu1 %v2712_v40  ;;  %2972 = vmatprep.mubr.bf16.mxu1 %v10029_v50 }
 0x45f   : > { %v2608_v53 = vpop.permute.xlu0 %2607 }
 0x460   : > { %9567 = vmatpush3.bf16.msra.mxu0 %v2608_v53 }
 0x461   : > { %9593 = vmatpush3.bf16.msra.mxu1 %v2690_v0  ;;  %v2738_v26 = vpop.permute.xlu1 %2737  ;;  %9825 = vmatprep.subr.bf16.mxu0 %v14914_v29 }
 0x462   : > { %9594 = vmatprep.subr.bf16.mxu1 %v2710_v11 }
 0x463   : > { %v2700_v61 = vpop.permute.xlu0 %2699  ;;  %3014 = vmatmul.mubr.bf16.vlgmr.msra.gmra.mxu0 %v10026_v3 }
 0x464   : > { %2973 = vmatmul.mubr.bf16.gmra.mxu1 %v10031_v6  ;;  %9826 = vmatpush3.bf16.msra.mxu0 %v2742_v57 }
 0x465   : > { %9595 = vmatpush3.bf16.msra.mxu1 %v2676_v9  ;;  %9827 = vmatprep.subr.bf16.mxu0 %v14914_v29  ;;  %v2672_v13 = vpop.permute.xlu1 %2671 }
 0x466   : > { %9596 = vmatprep.subr.bf16.mxu1 %v2708_v48  ;;  %3021 = vmatprep.mubr.bf16.mxu0 %v10032_v28 }
 0x467   : > { %v2740_v33 = vpop.permute.xlu0 %2739  ;;  %3070 = vmatprep.mubr.bf16.mxu1 %v10040_v17 }
 0x468   : > { %9828 = vmatpush3.bf16.msra.mxu0 %v2740_v33 }
 0x469   : > { %9829 = vmatprep.subr.bf16.mxu0 %v14914_v29  ;;  %v2698_v56 = vpop.permute.xlu1 %2697 }
 0x46b   : > { %v2674_v52 = vpop.permute.xlu0 %2673  ;;  %3022 = vmatmul.mubr.bf16.gmra.mxu0 %v10034_v63 }
 0x46c   : > { %9597 = vmatpush3.bf16.msra.mxu1 %v2674_v52  ;;  %9830 = vmatpush3.bf16.msra.mxu0 %v2738_v26 }
 0x46d   : > { %9598 = vmatprep.subr.bf16.mxu1 %v2700_v61  ;;  %9831 = vmatprep.subr.bf16.mxu0 %v14914_v29  ;;  %v2734_v30 = vpop.permute.xlu1 %2733 }
 0x46e   : > { %3029 = vmatprep.mubr.bf16.mxu0 %v10035_v35 }
 0x46f   : > { %v2736_v14 = vpop.permute.xlu0 %2735 }
 0x470   : > { %9599 = vmatpush3.bf16.msra.mxu1 %v2672_v13  ;;  %9832 = vmatpush3.bf16.msra.mxu0 %v2736_v14 }
 0x471   : > { %9600 = vmatprep.subr.bf16.mxu1 %v2698_v56  ;;  %9833 = vmatprep.subr.bf16.mxu0 %v14914_v29 }
 0x473   : > { %v2670_v4 = vpop.permute.xlu0 %2669  ;;  %3030 = vmatmul.mubr.bf16.gmra.mxu0 %v10037_v20 }
 0x474   : > { %9601 = vmatpush3.bf16.msra.mxu1 %v2670_v4  ;;  %9834 = vmatpush3.bf16.msra.mxu0 %v2734_v30 }
 0x475   : > { %9835 = vmatprep.subr.bf16.mxu0 %v14914_v29  ;;  %9837 = vmatprep.mubr.msk.bf16.mxu0 %vm10223_vm14, %v14914_v29 }
 0x477   : > { %v2732_v22 = vpop.permute.xlu0 %2731  ;;  %3071 = vmatmul.mubr.bf16.vlgmr.msra.gmra.mxu1 %v10038_v62 }
 0x478   : > { %9836 = vmatpush3.bf16.msra.mxu0 %v2732_v22  ;;  %3078 = vmatprep.mubr.bf16.mxu1 %v10042_v55 }
 0x479   : > { %3509 = vmatprep.subr.bf16.mxu0 %v15099_v59 }
 0x47a   : > { %v11187_v27 = vpop.permute.xlu1 %2801 }
 0x47b   : > { %9838 = vmatmul.mubr.msk.bf16.vlgmr.msra.gmra.mxu0 %vm2914_vm3, %v10041_v37 }
 0x47c   : > { %9841 = vmatprep.mubr.msk.bf16.mxu0 %vm10223_vm14, %v14914_v29 }
 0x47e   : > { %v2782_v21 = vpop.permute.xlu1 %2781 }
 0x47f   : > { %3079 = vmatmul.mubr.bf16.gmra.mxu1 %v10044_v24 }
 0x480   : > { %3086 = vmatprep.mubr.bf16.mxu1 %v10046_v44 }
 0x482   : > { %v2792_v16 = vpop.permute.xlu1 %2791 }
 0x483   : > { %9842 = vmatmul.mubr.msk.bf16.gmra.mxu0 %vm2914_vm3, %v10045_v49 }
 0x484   : > { %9845 = vmatprep.mubr.msk.bf16.mxu0 %vm10223_vm14, %v14914_v29  ;;  %v11189_v51 = vpop.permute.xlu0 %2806 }
 0x486   : > { %v11191_v40 = vpop.permute.xlu1 %3198 }
 0x487   : > { %3087 = vmatmul.mubr.bf16.gmra.mxu1 %v10048_v46 }
 0x488   : > { %v2787_v5 = vpop.permute.xlu0 %2786 }
 0x48a   : > { %v11195_v50 = vpop.permute.xlu1 %3240 }
 0x48b   : > { %9846 = vmatmul.mubr.msk.bf16.gmra.mxu0 %vm2914_vm3, %v10049_v23 }
 0x48c   : > { %v2797_v15 = vpop.permute.xlu0 %2796 }
 0x48e   : > { %v3179_v17 = vpop.permute.xlu1 %3178 }
 0x490   : > { %v11193_v0 = vpop.permute.xlu0 %3203 }
 0x492   : > { %v11199_v24 = vpop.permute.xlu1 %3188 }
 0x494   : > { %v11197_v6 = vpop.permute.xlu0 %3245 }
 0x498   : > { %v3184_v4 = vpop.permute.xlu0 %3183 }
 0x514   : > { %v9534_v31 = vpop.f32.mrf.mxu1 }
 0x516   : > { %v9535_v42 = vpop.f32.mrf.mxu1 }
 0x517   : > { %v9536_v48 = vadd.f32 %v9535_v42, %v9534_v31 }
 0x518   : > { %v9537_v19 = vpop.f32.mrf.mxu1 }
 0x519   : > { %v2959_v13 = vadd.f32 %v9536_v48, %v2782_v21 }
 0x51a   : > { %v9538_v58 = vpop.f32.mrf.mxu1 }
 0x51b   : > { %v9539_v33 = vadd.f32 %v9538_v58, %v9537_v19 }
 0x51c   : > { %v9540_v47 = vpop.f32.mrf.mxu1 }
 0x51d   : > { %v2962_v62 = vadd.f32 %v9539_v33, %v2787_v5 }
 0x51e   : > { %v9541_v60 = vpop.f32.mrf.mxu1 }
 0x51f   : > { %v9542_v44 = vadd.f32 %v9541_v60, %v9540_v47 }
 0x520   : > { %v9543_v34 = vpop.f32.mrf.mxu1 }
 0x521   : > { %v2967_v5 = vadd.f32 %v9542_v44, %v2792_v16 }
 0x522   : > { %v9544_v1 = vpop.f32.mrf.mxu1 }
 0x523   : > { %v9568_v38 = vpop.f32.mrf.mxu0 }
 0x524   : > { %v9546_v2 = vpop.f32.mrf.mxu1 }
 0x525   : > { %v9569_v41 = vpop.f32.mrf.mxu0 }
 0x526   : > { %v9547_v45 = vpop.f32.mrf.mxu1  ;;  %v9570_v26 = vadd.f32 %v9569_v41, %v9568_v38  ;;  %v9545_v38 = vadd.f32 %v9544_v1, %v9543_v34 }
 0x527   : > { %v9571_v43 = vpop.f32.mrf.mxu0 }
 0x528   : > { %v9549_v54 = vpop.f32.mrf.mxu1  ;;  %v3016_v52 = vadd.f32 %v9570_v26, %v2959_v13  ;;  %v9548_v13 = vadd.f32 %v9547_v45, %v9546_v2 }
 0x529   : > { %v9572_v10 = vpop.f32.mrf.mxu0 }
 0x52a   : > { %v9550_v53 = vpop.f32.mrf.mxu1  ;;  %v9573_v56 = vadd.f32 %v9572_v10, %v9571_v43  ;;  %v11201_v10 = vpop.permute.xlu0 %3193 }
 0x52b   : > { %v9574_v32 = vpop.f32.mrf.mxu0 }
 0x52c   : > { %v3019_v49 = vadd.f32 %v9573_v56, %v2962_v62 }
 0x52d   : > { %v9575_v36 = vpop.f32.mrf.mxu0 }
 0x52e   : > { %v9576_v19 = vadd.f32 %v9575_v36, %v9574_v32  ;;  %v2970_v36 = vadd.f32 %v9545_v38, %v2797_v15  ;;  %v3226_v45 = vpop.permute.xlu0 %3225 }
 0x52f   : > { %v9577_v57 = vpop.f32.mrf.mxu0 }
 0x531   : > { %v9578_v9 = vpop.f32.mrf.mxu0 }
 0x532   : > { %v9579_v56 = vadd.f32 %v9578_v9, %v9577_v57 }
 0x533   : > { %v9580_v11 = vpop.f32.mrf.mxu0 }
 0x534   : > { %v3027_v57 = vadd.f32 %v9579_v56, %v2970_v36 }
 0x535   : > { %v9581_v3 = vpop.f32.mrf.mxu0 }
 0x537   : > { %v9583_v28 = vpop.f32.mrf.mxu0  ;;  %v9602_v61 = vpop.f32.mrf.mxu1 }
 0x539   : > { %v9584_v63 = vpop.f32.mrf.mxu0  ;;  %v9603_v35 = vpop.f32.mrf.mxu1 }
 0x53a   : > { %v9604_v14 = vadd.f32 %v9603_v35, %v9602_v61  ;;  %v3221_v35 = vpop.permute.xlu1 %3220  ;;  %v9585_v9 = vadd.f32 %v9584_v63, %v9583_v28 }
 0x53b   : > { %v9605_v20 = vpop.f32.mrf.mxu1  ;;  %v3129_v30 = vpop.f32.mrf.mxu0 }
 0x53c   : > { %v3073_v55 = vadd.f32 %v9604_v14, %v3016_v52  ;;  %v3024_v52 = vadd.f32 %v9576_v19, %v2967_v5 }
 0x53d   : > { %v9606_v22 = vpop.f32.mrf.mxu1  ;;  %v9839_v37 = vpop.f32.mrf.mxu0 }
 0x53e   : > { %v3130_v46 = vadd.f32 %v3129_v30, %v3073_v55  ;;  %v9607_v23 = vadd.f32 %v9606_v22, %v9605_v20  ;;  %v9582_v20 = vadd.f32 %v9581_v3, %v9580_v11  ;;  %v9551_v55 = vadd.f32 %v9550_v53, %v9549_v54 }
 0x53f   : > { %v9608_v31 = vpop.f32.mrf.mxu1  ;;  %v3132_v42 = vpop.f32.mrf.mxu0 }
 0x540   : > { %vm3152_vm15 = vcmp.ge.f32.partialorder %v3130_v46, 0.0  ;;  %v3158_v58 = vmul.f32 0.2, %v3130_v46  ;;  %v3076_v21 = vadd.f32 %v9607_v23, %v3019_v49 }
 0x541   : > { %v9609_v41 = vpop.f32.mrf.mxu1  ;;  %v9840_v43 = vpop.f32.mrf.mxu0 }
 0x542   : > { %v3164_v48 = vsel %vm3152_vm15, %v3130_v46, %v3158_v58  ;;  %v3133_v26 = vadd.f32 %v3132_v42, %v3076_v21  ;;  %v9610_v61 = vadd.f32 %v9609_v41, %v9608_v31  ;;  %v2978_v31 = vadd.f32 %v9551_v55, %v11189_v51 }
 0x543   : > { %v3206_v47 = vmul.f32 %v3179_v17, %v3164_v48  ;;  %v9611_v60 = vpop.f32.mrf.mxu1  ;;  %v3137_v33 = vpop.f32.mrf.mxu0  ;;  %v2975_v17 = vadd.f32 %v9548_v13, %v11187_v27 }
 0x544   : > { %vm3153_vm12 = vcmp.ge.f32.partialorder %v3133_v26, 0.0  ;;  %v3159_v32 = vmul.f32 0.2, %v3133_v26  ;;  %v3081_v62 = vadd.f32 %v9610_v61, %v3024_v52  ;;  %v3035_v42 = vadd.f32 %v9585_v9, %v2978_v31 }
 0x545   : > { %v9612_v14 = vpop.f32.mrf.mxu1  ;;  %v9843_v34 = vpop.f32.mrf.mxu0  ;;  %v3248_v1 = vadd.f32 %v3221_v35, %v3206_v47  ;;  %v3032_v46 = vadd.f32 %v9582_v20, %v2975_v17 }
 0x546   : > { %v3165_v30 = vsel %vm3153_vm12, %v3133_v26, %v3159_v32  ;;  %v9613_v16 = vadd.f32 %v9612_v14, %v9611_v60  ;;  %v3138_v23 = vadd.f32 %v3137_v33, %v3081_v62  ;;  %v3231_v32 = vpop.permute.xlu1 %3230 }
 0x547   : > { %v3207_v22 = vmul.f32 %v3184_v4, %v3165_v30  ;;  %v9614_v37 = vpop.f32.mrf.mxu1  ;;  %v3140_v2 = vpop.f32.mrf.mxu0  ;;  %3260 = vrot.lane.b32.xlu1 %v3248_v1, %s10210_s26 }
 0x548   : > { %v3084_v11 = vadd.f32 %v9613_v16, %v3027_v57  ;;  %v3160_v27 = vmul.f32 0.2, %v3138_v23  ;;  %vm3154_vm13 = vcmp.ge.f32.partialorder %v3138_v23, 0.0  ;;  %v10142_v16 = vld [vmem:[%s15089_s12] ss:$0 sm:$0xff]  ;;  %s15123_s12 = sld [smem:[#allocation26_spill]] }
 0x549   : > { %v9615_v44 = vpop.f32.mrf.mxu1  ;;  %v9844_v15 = vpop.f32.mrf.mxu0  ;;  %v3249_v49 = vadd.f32 %v3226_v45, %v3207_v22 }
 0x54a   : > { %v9616_v3 = vadd.f32 %v9615_v44, %v9614_v37  ;;  %v3141_v21 = vadd.f32 %v3140_v2, %v3084_v11  ;;  %v3166_v48 = vsel %vm3154_vm13, %v3138_v23, %v3160_v27  ;;  %vm3651_vm13 = vcmask 130048  }
 0x54b   : > { %v9617_v54 = vpop.f32.mrf.mxu1  ;;  %3262 = vrot.lane.b32.xlu0 %v3249_v49, %s10210_s26  ;;  %v3145_v53 = vpop.f32.mrf.mxu0  ;;  %v3208_v60 = vmul.f32 %v11199_v24, %v3166_v48 }
 0x54c   : > { %v3089_v4 = vadd.f32 %v9616_v3, %v3032_v46  ;;  %v3161_v51 = vmul.f32 0.2, %v3141_v21  ;;  %vm3155_vm12 = vcmp.ge.f32.partialorder %v3141_v21, 0.0 }
 0x54d   : > { %v9618_v19 = vpop.f32.mrf.mxu1  ;;  %v9847_v58 = vpop.f32.mrf.mxu0  ;;  %v3250_v34 = vadd.f32 %v3231_v32, %v3208_v60 }
 0x54e   : > { %v3146_v28 = vadd.f32 %v3145_v53, %v3089_v4  ;;  %v9619_v63 = vadd.f32 %v9618_v19, %v9617_v54  ;;  %v3167_v35 = vsel %vm3155_vm12, %v3141_v21, %v3161_v51  ;;  %vm14909_vm12 = vcmask 736256  }
 0x54f   : > { %v3148_v38 = vpop.f32.mrf.mxu0  ;;  %v3209_v36 = vmul.f32 %v11201_v10, %v3167_v35 }
 0x550   : > { %vm3156_vm15 = vcmp.ge.f32.partialorder %v3146_v28, 0.0  ;;  %v3162_v41 = vmul.f32 0.2, %v3146_v28  ;;  %v3092_v43 = vadd.f32 %v9619_v63, %v3035_v42 }
 0x551   : > { %v9848_v5 = vpop.f32.mrf.mxu0 }
 0x552   : > { %v3168_v26 = vsel %vm3156_vm15, %v3146_v28, %v3162_v41  ;;  %v3149_v61 = vadd.f32 %v3148_v38, %v3092_v43  ;;  %vm3824_vm15 = vcmask 596992  }
 0x553   : > { %v3210_v13 = vmul.f32 %v11191_v40, %v3168_v26  ;;  %v3236_v40 = vpop.permute.xlu0 %3235 }
 0x554   : > { %vm3157_vm11 = vcmp.ge.f32.partialorder %v3149_v61, 0.0  ;;  %v3163_v47 = vmul.f32 0.2, %v3149_v61  ;;  %v3251_v24 = vadd.f32 %v3236_v40, %v3209_v36 }
 0x555   : > { %v3252_v33 = vadd.f32 %v11195_v50, %v3210_v13 }
 0x556   : > { %v3169_v52 = vsel %vm3157_vm11, %v3149_v61, %v3163_v47  ;;  %vm14925_vm11 = vcmask 31744  }
 0x557   : > { %v3211_v56 = vmul.f32 %v11193_v0, %v3169_v52  ;;  %3268 = vrot.lane.b32.xlu1 %v3252_v33, %s10210_s26 }
 0x559   : > { %v3253_v14 = vadd.f32 %v11197_v6, %v3211_v56 }
 0x55b   : > { %3270 = vrot.lane.b32.xlu0 %v3253_v14, %s10210_s26  ;;  %3264 = vrot.lane.b32.xlu1 %v3250_v34, %s10210_s26 }
 0x55f   : > { %3266 = vrot.lane.b32.xlu0 %v3251_v24, %s10210_s26  ;;  %s15102_s26 = sld [smem:[#allocation8_spill]] }
 0x5b9   : > { %v3261_v50 = vpop.permute.xlu1 %3260 }
 0x5ba   : > { %v3278_v0 = vsel %vm1865_vm1, 0.0, %v3261_v50 }
 0x5bb   : > { %v11219_v20 = vsel %vm1867_vm2, %v3278_v0, 0.0 }
 0x5bc   : > { %v11233_v55 = vmul.f32 %v10142_v16, %v11219_v20  ;;  %v3320_v37 = vmul.f32 %v11219_v20, %v10632_v18  ;;  %v3302_v53 = vmul.f32 %v11219_v20, %v10640_v25  ;;  %v3329_v24 = vmul.f32 %v11219_v20, %v10614_v7 }
 0x5bd   : > { %v3263_v1 = vpop.permute.xlu0 %3262 }
 0x5be   : > { %v3279_v10 = vsel %vm1865_vm1, 0.0, %v3263_v1 }
 0x5bf   : > { %v11223_v6 = vsel %vm1867_vm2, %v3279_v10, 0.0 }
 0x5c0   : > { %v11227_v30 = vpack.c.bf16 %v11223_v6, %v11219_v20  ;;  %v3321_v62 = vmul.f32 %v11223_v6, %v10632_v18  ;;  %v11236_v22 = vmul.f32 %v10142_v16, %v11223_v6  ;;  %v3303_v3 = vmul.f32 %v11223_v6, %v10640_v25 }
 0x5c1   : > { %v3330_v34 = vmul.f32 %v11223_v6, %v10614_v7 }
 0x5c2   : > { %3416 = vrot.lane.b32.xlu1 %v11227_v30, %s14891_s18  ;;  %v3296_v2 = vpack.c.bf16 %v11236_v22, %v11233_v55  ;;  %v3326_v45 = vpack.c.bf16 %v3321_v62, %v3320_v37  ;;  %v3308_v19 = vpack.c.bf16 %v3303_v3, %v3302_v53 }
 0x5c3   : > { %v3335_v0 = vpack.c.bf16 %v3330_v34, %v3329_v24 }
 0x5c6   : > { %3395 = vrot.lane.b32.xlu1 %v3326_v45, %s10217_s28  ;;  %v3437_v45 = vld [vmem:[%s10365_s30] sm:$0xff] }
 0x5c7   : > { %v3445_v3 = vcombine.high %v3437_v45, %v3437_v45 }
 0x5c9   : > { %v3269_v17 = vpop.permute.xlu1 %3268 }
 0x5ca   : > { %v3282_v57 = vsel %vm1865_vm1, 0.0, %v3269_v17  ;;  %v3449_v17 = vlaneseq }
 0x5cb   : > { %v11248_v49 = vsel %vm1867_vm2, %v3282_v57, 0.0  ;;  %v10224_v57 = vmov 1983009808  }
 0x5cc   : > { %v11266_v21 = vmul.f32 %v10142_v16, %v11248_v49  ;;  %v3315_v60 = vmul.f32 %v11248_v49, %v10621_v12  ;;  %v3333_v33 = vmul.f32 %v11248_v49, %v10614_v7  ;;  %v3324_v32 = vmul.f32 %v11248_v49, %v10632_v18 }
 0x5cd   : > { %v3271_v9 = vpop.permute.xlu0 %3270  ;;  %v3265_v44 = vpop.permute.xlu1 %3264  ;;  %v3342_v10 = vmul.f32 %v11248_v49, %v10616_v8 }
 0x5ce   : > { %v3283_v15 = vsel %vm1865_vm1, 0.0, %v3271_v9  ;;  %v3280_v23 = vsel %vm1865_vm1, 0.0, %v3265_v44  ;;  %v3447_v9 = vunpack.c.l.s4 %v10224_v57 }
 0x5cf   : > { %v11251_v46 = vsel %vm1867_vm2, %v3283_v15, 0.0  ;;  %v3286_v4 = vsel %vm1867_vm2, %v3280_v23, 0.0  ;;  %v3312_v23 = vmul.f32 %v11223_v6, %v10621_v12 }
 0x5d0   : > { %v3301_v11 = vpack.c.bf16 %v11251_v46, %v11248_v49  ;;  %v11269_v28 = vmul.f32 %v10142_v16, %v11251_v46  ;;  %v3304_v63 = vmul.f32 %v3286_v4, %v10640_v25  ;;  %v11277_v5 = vmul.f32 %v10142_v16, %v3286_v4 }
 0x5d1   : > { %v3267_v31 = vpop.permute.xlu0 %3266  ;;  %v3331_v51 = vmul.f32 %v3286_v4, %v10614_v7  ;;  %v3316_v13 = vmul.f32 %v11251_v46, %v10621_v12  ;;  %v3334_v47 = vmul.f32 %v11251_v46, %v10614_v7  ;;  %v3325_v56 = vmul.f32 %v11251_v46, %v10632_v18 }
 0x5d2   : > { %v3281_v54 = vsel %vm1865_vm1, 0.0, %v3267_v31  ;;  %3420 = vrot.lane.b32.xlu1 %v3301_v11, %s14891_s18  ;;  %v3298_v38 = vpack.c.bf16 %v11269_v28, %v11266_v21  ;;  %v3322_v40 = vmul.f32 %v3286_v4, %v10632_v18  ;;  %v3343_v1 = vmul.f32 %v11251_v46, %v10616_v8 }
 0x5d3   : > { %v3287_v42 = vsel %vm1867_vm2, %v3281_v54, 0.0  ;;  %v3319_v35 = vpack.c.bf16 %v3316_v13, %v3315_v60  ;;  %v3337_v52 = vpack.c.bf16 %v3334_v47, %v3333_v33  ;;  %v3328_v36 = vpack.c.bf16 %v3325_v56, %v3324_v32 }
 0x5d4   : > { %v3300_v58 = vpack.c.bf16 %v3287_v42, %v3286_v4  ;;  %v3305_v27 = vmul.f32 %v3287_v42, %v10640_v25  ;;  %v3332_v43 = vmul.f32 %v3287_v42, %v10614_v7  ;;  %v11279_v48 = vmul.f32 %v10142_v16, %v3287_v42 }
 0x5d5   : > { %v3323_v14 = vmul.f32 %v3287_v42, %v10632_v18  ;;  %v3346_v62 = vpack.c.bf16 %v3343_v1, %v3342_v10  ;;  %v3341_v16 = vmul.f32 %v3287_v42, %v10616_v8  ;;  %v3314_v18 = vmul.f32 %v3287_v42, %v10621_v12 }
 0x5d6   : > { %3362 = vrot.lane.b32.xlu1 %v3308_v19, %s14884_s1  ;;  %3418 = vrot.lane.b32.xlu0 %v3300_v58, %s14891_s18  ;;  %v3309_v41 = vpack.c.bf16 %v3305_v27, %v3304_v63  ;;  %v3297_v26 = vpack.c.bf16 %v11279_v48, %v11277_v5  ;;  %v3336_v61 = vpack.c.bf16 %v3332_v43, %v3331_v51  ;;  %v3448_v31 = vunpack.c.0.s8 %v3447_v9  ;;  %s14897_s18 = smov 18  }
 0x5d7   : > { %v3327_v50 = vpack.c.bf16 %v3323_v14, %v3322_v40  ;;  %v3340_v7 = vmul.f32 %v3286_v4, %v10616_v8  ;;  %v3313_v37 = vmul.f32 %v3286_v4, %v10621_v12  ;;  %v3307_v42 = vmul.f32 %v11251_v46, %v10640_v25 }
 0x5d8   : > { %vm3465_vm1 = vcmask 392192   ;;  %v3338_v43 = vmul.f32 %v11219_v20, %v10616_v8  ;;  %vm3549_vm2 = vcmask 125952  }
 0x5d9   : > { %v3345_v44 = vpack.c.bf16 %v3341_v16, %v3340_v7  ;;  %v3318_v15 = vpack.c.bf16 %v3314_v18, %v3313_v37 }
 0x5da   : > { %3385 = vrot.lane.b32.xlu1 %v3300_v58, %s10221_s15  ;;  %3364 = vrot.lane.b32.xlu0 %v3309_v41, %s14884_s1  ;;  %v3339_v41 = vmul.f32 %v11223_v6, %v10616_v8 }
 0x5de   : > { %3409 = vrot.lane.b32.xlu1 %v3336_v61, %s14889_s23  ;;  %3387 = vrot.lane.b32.xlu0 %v3301_v11, %s10221_s15 }
 0x5e2   : > { %3352 = vrot.lane.b32.xlu1 %v3300_v58, %s14886_s16  ;;  %3354 = vrot.lane.b32.xlu0 %v3301_v11, %s14886_s16  ;;  %v11329_v11 = vshrl.u32 %v3449_v17, 7 }
 0x5e4   : > { %v11337_v53 = vsub.s32 %v3448_v31, %v11329_v11 }
 0x5e6   : > { %3378 = vrot.lane.b32.xlu1 %v3319_v35, %s10218_s0  ;;  %3411 = vrot.lane.b32.xlu0 %v3337_v52, %s14889_s23  ;;  %15101 = vst [vmem:[#allocation48_spill] sm:$0xff] %v11337_v53  ;;  %v11342_v19 = vrot.slane %v3437_v45, %v11337_v53  ;;  %v11345_v58 = vrot.slane %v3445_v3, %v11337_v53 }
 0x5e8   : > { %v3460_v27 = vcombine.high %v11342_v19, %v11342_v19  ;;  %v3461_v46 = vcombine.high %v11345_v58, %v11345_v58 }
 0x5ea   : > { %3399 = vrot.lane.b32.xlu1 %v3328_v36, %s10217_s28  ;;  %3383 = vrot.lane.b32.xlu0 %v11227_v30, %s10221_s15  ;;  %s15100_s15 = sld [smem:[#allocation21_spill]] }
 0x5eb   : > { %3501 = vmatprep.mubr.bf16.mxu1 %v3460_v27  ;;  %9341 = vmatprep.mubr.msk.bf16.mxu0 %vm3465_vm1, %v3461_v46 }
 0x5ee   : > { %3397 = vrot.lane.b32.xlu1 %v3327_v50, %s10217_s28  ;;  %3407 = vrot.lane.b32.xlu0 %v3335_v0, %s14889_s23  ;;  %s15105_s28 = sld [smem:[#allocation5_spill]]  ;;  %s14905_s23 = smov 9  }
 0x5f0   : > { %v3438_v54 = vld [vmem:[%s15100_s15] sm:$0xf]  ;;  %s14888_s15 = sshll.u32 %s15401_s10, 2 }
 0x5f2   : > { %3432 = vrot.lane.b32.xlu1 %v3346_v62, %s15096_s2  ;;  %3350 = vrot.lane.b32.xlu0 %v11227_v30, %s14886_s16  ;;  %v3311_v30 = vmul.f32 %v11219_v20, %v10621_v12  ;;  %v3306_v12 = vmul.f32 %v11248_v49, %v10640_v25  ;;  %v3344_v25 = vpack.c.bf16 %v3339_v41, %v3338_v43  ;;  %v3726_v49 = vld [vmem:[%s15102_s26] sm:$0xf]  ;;  %s15107_s16 = sld [smem:[#allocation7_spill]] }
 0x5f4   : > { %v3317_v4 = vpack.c.bf16 %v3312_v23, %v3311_v30  ;;  %v3310_v63 = vpack.c.bf16 %v3307_v42, %v3306_v12  ;;  %v3650_v43 = vld [vmem:[%s15105_s28 + $0x8] sm:$0xff] }
 0x5f6   : > { %3430 = vrot.lane.b32.xlu1 %v3345_v44, %s15096_s2  ;;  %3376 = vrot.lane.b32.xlu0 %v3318_v15, %s10218_s0 }
 0x5fa   : > { %3441 = vperm.xlu1 %10013, %v3438_v54   ;;  %3374 = vrot.lane.b32.xlu0 %v3317_v4, %s10218_s0  ;;  %s15104_s0 = sld [smem:[#allocation11_spill]] }
 0x5fe   : > { %3366 = vrot.lane.b32.xlu0 %v3310_v63, %s14884_s1  ;;  %s1635_s1 = scalar_lea.vmem %s15103_s17, %s14888_s15  ;;  %s15109_s15 = sld [smem:[#allocation15_spill]] }
 0x5ff   : > { %s15127_s17 = sld [smem:[#allocation28_spill]] }
 0x600   : > { %v3570_v41 = vld [vmem:[%s15104_s0] sm:$0x3f]  ;;  %s15108_s0 = sld [smem:[#allocation14_spill]] }
 0x602   : > { %3428 = vrot.lane.b32.xlu0 %v3344_v25, %s15096_s2  ;;  %v3649_v25 = vld [vmem:[%s15105_s28] sm:$0xff] }
 0x606   : > { %3729 = vperm.xlu0 %10012, %v3726_v49  }
 0x634   : > { %v3417_v51 = vpop.permute.xlu1 %3416 }
 0x638   : > { %v3396_v61 = vpop.permute.xlu1 %3395 }
 0x639   : > { %9629 = vmatprep.subr.bf16.mxu1 %v3396_v61  ;;  %v3725_v61 = vld [vmem:[%s15107_s16] sm:$0xf] }
 0x644   : > { %v3421_v13 = vpop.permute.xlu1 %3420 }
 0x645   : > { %3510 = vmatpush1.bf16.msra.mxu0 %v3421_v13 }
 0x646   : > { %3511 = vmatprep.subr.bf16.mxu0 %v15099_v59 }
 0x648   : > { %v3419_v6 = vpop.permute.xlu0 %3418  ;;  %v3363_v47 = vpop.permute.xlu1 %3362 }
 0x649   : > { %3512 = vmatpush1.bf16.msra.mxu0 %v3419_v6 }
 0x64a   : > { %3513 = vmatprep.subr.bf16.mxu0 %v15099_v59 }
 0x64c   : > { %v3365_v60 = vpop.permute.xlu0 %3364  ;;  %v3386_v33 = vpop.permute.xlu1 %3385 }
 0x64d   : > { %9630 = vmatpush3.bf16.msra.mxu1 %v3365_v60  ;;  %3514 = vmatpush1.bf16.msra.mxu0 %v3417_v51 }
 0x64e   : > { %3515 = vmatprep.subr.bf16.mxu0 %v15099_v59 }
 0x650   : > { %v3388_v8 = vpop.permute.xlu0 %3387  ;;  %v3410_v20 = vpop.permute.xlu1 %3409 }
 0x651   : > { %9631 = vmatprep.subr.bf16.mxu1 %v3388_v8 }
 0x652   : > { %9632 = vmatpush3.bf16.msra.mxu1 %v3363_v47 }
 0x653   : > { %9633 = vmatprep.subr.bf16.mxu1 %v3386_v33 }
 0x654   : > { %v3355_v35 = vpop.permute.xlu0 %3354  ;;  %v3353_v52 = vpop.permute.xlu1 %3352 }
 0x656   : > { %9634 = vmatpush3.bf16.msra.mxu1 %v3355_v35 }
 0x658   : > { %v3412_v56 = vpop.permute.xlu0 %3411  ;;  %v3379_v32 = vpop.permute.xlu1 %3378 }
 0x659   : > { %3516 = vmatpush1.bf16.msra.mxu0 %v3412_v56  ;;  %v9348_v56 = vld [vmem:[%s15109_s15] ss:$0 sm:$0xff]  ;;  %s15113_s15 = sld [smem:[#allocation22_spill]] }
 0x65a   : > { %3517 = vmatprep.subr.bf16.mxu0 %v15099_v59 }
 0x65c   : > { %v3384_v36 = vpop.permute.xlu0 %3383  ;;  %v3400_v14 = vpop.permute.xlu1 %3399 }
 0x65d   : > { %9635 = vmatprep.subr.bf16.mxu1 %v3384_v36  ;;  %3518 = vmatpush1.bf16.msra.mxu0 %v3410_v20 }
 0x65e   : > { %9636 = vmatpush3.bf16.msra.mxu1 %v3353_v52  ;;  %3519 = vmatprep.subr.bf16.mxu0 %v15099_v59  ;;  %v11417_v52 = vld [vmem:[%s15108_s0] ss:$0 sm:$0xff] }
 0x65f   : > { %9637 = vmatprep.subr.bf16.mxu1 %v3379_v32 }
 0x660   : > { %v3408_v34 = vpop.permute.xlu0 %3407  ;;  %v3398_v40 = vpop.permute.xlu1 %3397 }
 0x661   : > { %3520 = vmatpush1.bf16.msra.mxu0 %v3408_v34 }
 0x662   : > { %3521 = vmatprep.subr.bf16.mxu0 %v15099_v59 }
 0x664   : > { %v3351_v24 = vpop.permute.xlu0 %3350  ;;  %v3433_v0 = vpop.permute.xlu1 %3432 }
 0x665   : > { %9638 = vmatpush3.bf16.msra.mxu1 %v3351_v24  ;;  %3522 = vmatpush1.bf16.msra.mxu0 %v3400_v14 }
 0x666   : > { %3523 = vmatprep.subr.bf16.mxu0 %v15099_v59 }
 0x668   : > { %v3377_v50 = vpop.permute.xlu0 %3376  ;;  %v3431_v10 = vpop.permute.xlu1 %3430 }
 0x669   : > { %9639 = vmatprep.subr.bf16.mxu1 %v3377_v50  ;;  %3524 = vmatpush1.bf16.msra.mxu0 %v3398_v40 }
 0x66a   : > { %9640 = vmatpush3.bf16.msra.mxu1 %v3298_v38  ;;  %3535 = vmatprep.subr.bf16.mxu0 %v15099_v59 }
 0x66c   : > { %v3375_v1 = vpop.permute.xlu0 %3374 }
 0x66d   : > { %9641 = vmatprep.subr.bf16.mxu1 %v3375_v1  ;;  %3536 = vmatpush2.bf16.msra.mxu0 %v3433_v0 }
 0x66e   : > { %9642 = vmatpush3.bf16.msra.mxu1 %v3297_v26  ;;  %3537 = vmatprep.subr.bf16.mxu0 %v15099_v59 }
 0x670   : > { %v3367_v62 = vpop.permute.xlu0 %3366 }
 0x671   : > { %9643 = vmatprep.subr.bf16.mxu1 %v3367_v62  ;;  %3538 = vmatpush2.bf16.msra.mxu0 %v3431_v10 }
 0x672   : > { %9644 = vmatpush3.bf16.msra.mxu1 %v3296_v2  ;;  %3539 = vmatprep.subr.bf16.mxu0 %v15099_v59 }
 0x673   : > { %9849 = vmatprep.subr.mxu1 %v14914_v29 }
 0x674   : > { %v3429_v21 = vpop.permute.xlu0 %3428 }
 0x675   : > { %3502 = vmatmul.mubr.bf16.vlgmr.msra.gmra.mxu1 %v11342_v19  ;;  %3540 = vmatpush2.bf16.msra.mxu0 %v3429_v21  ;;  %v3442_v26 = vpop.permute.xlu1 %3441 }
 0x676   : > { %9851 = vmatprep.mubr.msk.f32.mxu1 %vm10223_vm14, %v14914_v29 }
 0x678   : > { %3542 = vmatmul.mubr.bf16.vlgmr.msra.gmra.mxu0 %v11345_v58 }
 0x681   : > { %v3730_v47 = vpop.permute.xlu0 %3729 }
 0x735   : > { %v9645_v28 = vpop.f32.mrf.mxu1 }
 0x737   : > { %v9646_v38 = vpop.f32.mrf.mxu1 }
 0x738   : > { %v9647_v5 = vadd.f32 %v9646_v38, %v9645_v28  ;;  %v3543_v48 = vpop.f32.mrf.mxu0 }
 0x739   : > { %v9648_v55 = vpop.f32.mrf.mxu1 }
 0x73a   : > { %v3504_v22 = vadd.f32 %v9647_v5, %v3442_v26  ;;  %v3545_v2 = vpop.f32.mrf.mxu0 }
 0x73b   : > { %v9649_v16 = vpop.f32.mrf.mxu1 }
 0x73c   : > { %v3544_v18 = vadd.f32 %v3543_v48, %v3504_v22  ;;  %v3546_v7 = vpop.f32.mrf.mxu0 }
 0x73e   : > { %v3550_v37 = vsel %vm3549_vm2, %v3544_v18, -inf  ;;  %v3547_v45 = vpop.f32.mrf.mxu0 }
 0x73f   : > { %v3551_v17 = vrot.slane %v3550_v37, 4 }
 0x741   : > { %v3552_v57 = vmax.f32 %v3550_v37, %v3551_v17 }
 0x743   : > { %v3553_v9 = vrot.slane %v3552_v57, 2 }
 0x745   : > { %v3554_v44 = vmax.f32 %v3552_v57, %v3553_v9 }
 0x747   : > { %v3555_v15 = vrot.slane %v3554_v44, 1 }
 0x749   : > { %v3556_v23 = vmax.f32 %v3554_v44, %v3555_v15 }
 0x74b   : > { %v3557_v3 = vsub.f32 %v3544_v18, %v3556_v23 }
 0x74d   : > { %v3558_v31 = vmul.f32 1.442695, %v3557_v3 }
 0x74f   : > { %10125 = vpow2.f32 %v3558_v31 }
 0x75c   : > { %v10126_v30 = vpop.eup %10125 }
 0x75d   : > { %v3560_v54 = vsel %vm3549_vm2, %v10126_v30, 0.0 }
 0x75e   : > { %v3561_v4 = vrot.slane %v3560_v54, 4 }
 0x760   : > { %v3562_v42 = vadd.f32 %v3561_v4, %v3560_v54 }
 0x762   : > { %v3563_v19 = vrot.slane %v3562_v42, 2 }
 0x764   : > { %v3564_v58 = vadd.f32 %v3563_v19, %v3562_v42  ;;  %v10051_v42 = vld [vmem:[%s15113_s15] sm:$0xff]  }
 0x766   : > { %v3565_v12 = vrot.slane %v3564_v58, 1 }
 0x768   : > { %v3566_v27 = vadd.f32 %v3565_v12, %v3564_v58 }
 0x76a   : > { %10127 = vrcp.f32 %v3566_v27 }
 0x777   : > { %v10128_v46 = vpop.eup %10127 }
 0x778   : > { %v3568_v63 = vmul.f32 %v10128_v46, %v10126_v30 }
 0x77a   : > { %3569 = vst.msk [vmem:[%s1635_s1] sm:$0xf] %vm3549_vm2, %v3568_v63  ;;  %9850 = vmatpush3.msk.msra.mxu1 %vm1948_vm8, %v3568_v63  ;;  %s1639_s1 = scalar_lea.vmem %s15106_s14, %s10574_s22  ;;  %s15125_s14 = smov 110  }
 0x77b   : > { %9852 = vmatmul.mubr.msk.f32.vlgmr.msra.gmra.mxu1 %vm14925_vm11, %v3570_v41  ;;  %9854 = vmatprep.subr.mxu1 %v14914_v29 }
 0x77c   : > { %9855 = vmatpush3.msra.mxu1 %v3650_v43  ;;  %9858 = vmatprep.mubr.msk.f32.mxu1 %vm10223_vm14, %v14914_v29 }
 0x77d   : > { %9856 = vmatprep.subr.mxu1 %v14914_v29 }
 0x77e   : > { %9857 = vmatpush3.msra.mxu1 %v3649_v25 }
 0x77f   : > { %9859 = vmatmul.mubr.msk.f32.vlgmr.msra.gmra.mxu1 %vm3651_vm13, %v3544_v18  ;;  %9861 = vmatprep.subr.mxu1 %v14914_v29 }
 0x780   : > { %9863 = vmatprep.mubr.msk.f32.mxu1 %vm10223_vm14, %v14914_v29 }
 0x83b   : > { %v3644_v49 = vpop.f32.mrf.mxu1 }
 0x83c   : > { %3648 = vst.msk [vmem:[%s1639_s1] sm:$0x3f] %vm1857_vm0, %v3644_v49  ;;  %s14895_s1 = smov 16   ;;  %vm3821_vm0 = vcmask 72704  }
 0x83d   : > { %v9853_v51 = vpop.f32.mrf.mxu1 }
 0x83e   : > { %v4264_v51 = vld [vmem:[%s15120_s8 + $0x30] sm:$0xff] }
 0x83f   : > { %v3721_v13 = vpop.f32.mrf.mxu1 }
 0x840   : > { %9862 = vmatpush3.msk.msra.mxu1 %vm1948_vm8, %v3721_v13 }
 0x841   : > { %v9860_v6 = vpop.f32.mrf.mxu1  ;;  %9864 = vmatmul.mubr.msk.f32.vlgmr.msra.gmra.mxu1 %vm14925_vm11, %v3725_v61  ;;  %v4265_v61 = vld [vmem:[%s15120_s8 + $0x38] sm:$0xff] }
 0x842   : > { %9878 = vmatprep.mubr.msk.bf16.mxu1 %vm14909_vm12, %v10051_v42 }
 0x901   : > { %v3804_v60 = vpop.f32.mrf.mxu1 }
 0x902   : > { %v3805_v33 = vadd.f32 %v3804_v60, %v3730_v47 }
 0x903   : > { %v9865_v8 = vpop.f32.mrf.mxu1 }
 0x904   : > { %v3809_v20 = vrot.slane %v3805_v33, 2  ;;  %v4260_v33 = vld [vmem:[%s15120_s8 + $0x10] sm:$0xff]  ;;  %v4261_v8 = vld [vmem:[%s15120_s8 + $0x18] sm:$0xff] }
 0x906   : > { %3817 = vrot.lane.b32.xlu0 %v3809_v20, %s14905_s23  ;;  %v3811_v35 = vsel %vm1941_vm10, %v10709_v39, %v3809_v20  ;;  %v4262_v20 = vld [vmem:[%s15120_s8 + $0x20] sm:$0xff] }
 0x907   : > { %3815 = vrot.lane.b32.xlu1 %v3811_v35, %s14905_s23  ;;  %s15118_s23 = sld [smem:[#allocation24_spill]]  ;;  %v4263_v35 = vld [vmem:[%s15120_s8 + $0x28] sm:$0xff] }
 0x90a   : > { %3860 = vrot.lane.b32.xlu0 %v11417_v52, %s14895_s1  ;;  %s14903_s1 = smov 111  }
 0x90b   : > { %3866 = vrot.lane.b32.xlu1 %v9348_v56, %s14897_s18  ;;  %s15114_s18 = sld [smem:[#allocation23_spill]] }
 0x90d   : > { %v4180_v41 = vld [vmem:[%s15118_s23 + $0x30] sm:$0xff]  ;;  %v4181_v43 = vld [vmem:[%s15118_s23 + $0x38] sm:$0xff]  ;;  %v4178_v47 = vld [vmem:[%s15118_s23 + $0x20] sm:$0xff] }
 0x90e   : > { %3848 = vrot.lane.b32.xlu0 %v11417_v52, %s15110_s3  ;;  %s14899_s3 = smov 110   ;;  %v4176_v13 = vld [vmem:[%s15118_s23 + $0x10] sm:$0xff]  ;;  %v4177_v6 = vld [vmem:[%s15118_s23 + $0x18] sm:$0xff]  ;;  %v4179_v60 = vld [vmem:[%s15118_s23 + $0x28] sm:$0xff] }
 0x90f   : > { %3854 = vrot.lane.b32.xlu1 %v9348_v56, %s15111_s4  ;;  %s14901_s4 = smov 112  }
 0x911   : > { %v3939_v19 = vld [vmem:[%s15114_s18 + $0x30] sm:$0xff]  ;;  %v3940_v58 = vld [vmem:[%s15114_s18 + $0x38] sm:$0xff]  ;;  %v3937_v46 = vld [vmem:[%s15114_s18 + $0x20] sm:$0xff] }
 0x912   : > { %v3935_v12 = vld [vmem:[%s15114_s18 + $0x10] sm:$0xff]  ;;  %v3936_v27 = vld [vmem:[%s15114_s18 + $0x18] sm:$0xff]  ;;  %v3938_v63 = vld [vmem:[%s15114_s18 + $0x28] sm:$0xff] }
 0x913   : > { %3842 = vrot.lane.b32.xlu1 %v9348_v56, %s15112_s5  ;;  %v3933_v25 = vld [vmem:[%s15114_s18] sm:$0xff]  ;;  %v3934_v49 = vld [vmem:[%s15114_s18 + $0x8] sm:$0xff] }
 0x914   : > { %v4174_v56 = vld [vmem:[%s15118_s23] sm:$0xff] }
 0x978   : > { %v3818_v39 = vpop.permute.xlu0 %3817 }
 0x979   : > { %v3823_v32 = vsel %vm3821_vm0, 0.0, %v3818_v39  ;;  %v3816_v36 = vpop.permute.xlu1 %3815  ;;  %v4175_v39 = vld [vmem:[%s15118_s23 + $0x8] sm:$0xff] }
 0x97a   : > { %v3826_v14 = vsel %vm3824_vm15, %v3823_v32, 0.0  ;;  %v3822_v34 = vsel %vm3821_vm0, 0.0, %v3816_v36  ;;  %v4258_v32 = vld [vmem:[%s15120_s8] sm:$0xff]  ;;  %v4259_v36 = vld [vmem:[%s15120_s8 + $0x8] sm:$0xff] }
 0x97b   : > { %v3825_v40 = vsel %vm3824_vm15, %v3822_v34, 0.0  ;;  %v11432_v24 = vmul.f32 %v11417_v52, %v3826_v14  ;;  %v3944_v34 = vld [vmem:[%s15114_s18 + $0x58] sm:$0xff] }
 0x97c   : > { %v11434_v50 = vpop.permute.xlu0 %3860  ;;  %v11437_v0 = vmul.f32 %v11417_v52, %v3825_v40  ;;  %v3836_v55 = vpack.c.bf16 %v3826_v14, %v3825_v40 }
 0x97d   : > { %v11439_v1 = vpop.permute.xlu1 %3866  ;;  %v3863_v10 = vmul.f32 %v11434_v50, %v3825_v40  ;;  %v3864_v62 = vmul.f32 %v11434_v50, %v3826_v14 }
 0x97e   : > { %v3869_v21 = vmul.f32 %v11439_v1, %v3825_v40  ;;  %v3870_v28 = vmul.f32 %v11439_v1, %v3826_v14  ;;  %v3835_v5 = vpack.c.bf16 %v11432_v24, %v11437_v0  ;;  %v3895_v45 = vrot.slane %v3836_v55, 5 }
 0x97f   : > { %v3865_v38 = vpack.c.bf16 %v3864_v62, %v3863_v10  ;;  %v3884_v9 = vrot.slane %v3836_v55, 4  ;;  %v3873_v54 = vrot.slane %v3836_v55, 3  ;;  %v3942_v10 = vld [vmem:[%s15114_s18 + $0x48] sm:$0xff]  ;;  %v4184_v62 = vld [vmem:[%s15118_s23 + $0x50] sm:$0xff] }
 0x980   : > { %v11447_v48 = vpop.permute.xlu0 %3848  ;;  %v3871_v26 = vpack.c.bf16 %v3870_v28, %v3869_v21  ;;  %v4185_v21 = vld [vmem:[%s15118_s23 + $0x58] sm:$0xff]  ;;  %v4268_v28 = vld [vmem:[%s15120_s8 + $0x50] sm:$0xff]  ;;  %v4183_v55 = vld [vmem:[%s15118_s23 + $0x48] sm:$0xff] }
 0x981   : > { %v11449_v22 = vpop.permute.xlu1 %3854  ;;  %v3892_v2 = vrot.slane %v3865_v38, 2  ;;  %v3851_v16 = vmul.f32 %v11447_v48, %v3825_v40  ;;  %v3852_v18 = vmul.f32 %v11447_v48, %v3826_v14  ;;  %v4269_v38 = vld [vmem:[%s15120_s8 + $0x58] sm:$0xff] }
 0x982   : > { %3899 = vrot.lane.b32.xlu0 %v3871_v26, %s14899_s3  ;;  %v3857_v7 = vmul.f32 %v11449_v22, %v3825_v40  ;;  %v3858_v37 = vmul.f32 %v11449_v22, %v3826_v14  ;;  %s15115_s3 = smov 119   ;;  %v4182_v26 = vld [vmem:[%s15118_s23 + $0x40] sm:$0xff] }
 0x983   : > { %3893 = vrot.lane.b32.xlu1 %v3892_v2, %s14901_s4  ;;  %v3853_v44 = vpack.c.bf16 %v3852_v18, %v3851_v16  ;;  %s15116_s4 = smov 120   ;;  %v4266_v2 = vld [vmem:[%s15120_s8 + $0x40] sm:$0xff]  ;;  %v4267_v16 = vld [vmem:[%s15120_s8 + $0x48] sm:$0xff]  ;;  %s15121_s8 = smov 9  }
 0x984   : > { %v3859_v17 = vpack.c.bf16 %v3858_v37, %v3857_v7 }
 0x985   : > { %v11457_v57 = vpop.permute.xlu1 %3842  ;;  %v3881_v31 = vrot.slane %v3853_v44, 1 }
 0x986   : > { %3896 = vrot.lane.b32.xlu0 %v3895_v45, %s14903_s1  ;;  %v3845_v15 = vmul.f32 %v11457_v57, %v3825_v40  ;;  %v3846_v23 = vmul.f32 %v11457_v57, %v3826_v14  ;;  %v3888_v3 = vrot.slane %v3859_v17, 7  ;;  %s15117_s1 = smov 127   ;;  %v3943_v14 = vld [vmem:[%s15114_s18 + $0x50] sm:$0xff]  ;;  %v3941_v40 = vld [vmem:[%s15114_s18 + $0x40] sm:$0xff]  ;;  %s15128_s18 = sld [smem:[#allocation29_spill]] }
 0x987   : > { %3885 = vrot.lane.b32.xlu1 %v3884_v9, %s15115_s3 }
 0x988   : > { %v3847_v30 = vpack.c.bf16 %v3846_v23, %v3845_v15 }
 0x98a   : > { %3889 = vrot.lane.b32.xlu0 %v3888_v3, %s15096_s2  ;;  %v3877_v4 = vrot.slane %v3847_v30, 6 }
 0x98b   : > { %3882 = vrot.lane.b32.xlu1 %v3881_v31, %s15116_s4 }
 0x98e   : > { %3874 = vrot.lane.b32.xlu0 %v3873_v54, %s15117_s1 }
 0x98f   : > { %3878 = vrot.lane.b32.xlu1 %v3877_v4, %s15119_s6 }
 0x992   : > { %3977 = vperm.xlu0 %10012, %v3939_v19  }
 0x993   : > { %3982 = vperm.xlu1 %10013, %v3940_v58   ;;  %v10052_v58 = vld [vmem:[%s15113_s15 + $0x8] sm:$0xff]  }
 0x996   : > { %3957 = vperm.xlu0 %10012, %v3935_v12   ;;  %v10053_v12 = vld [vmem:[%s15113_s15 + $0x10] sm:$0xff]  }
 0x997   : > { %3962 = vperm.xlu1 %10013, %v3936_v27   ;;  %v10054_v27 = vld [vmem:[%s15113_s15 + $0x18] sm:$0xff]  }
 0x99a   : > { %3967 = vperm.xlu0 %10012, %v3937_v46   ;;  %v10055_v46 = vld [vmem:[%s15113_s15 + $0x20] sm:$0xff]  }
 0x99b   : > { %3972 = vperm.xlu1 %10013, %v3938_v63   ;;  %v10056_v63 = vld [vmem:[%s15113_s15 + $0x28] sm:$0xff]   ;;  %s15126_s15 = sld [smem:[#allocation27_spill]] }
 0x99e   : > { %4218 = vperm.xlu0 %10012, %v4180_v41  }
 0x99f   : > { %4223 = vperm.xlu1 %10013, %v4181_v43  }
 0x9a2   : > { %3947 = vperm.xlu0 %10012, %v3933_v25  }
 0x9a3   : > { %3952 = vperm.xlu1 %10013, %v3934_v49  }
 0x9a6   : > { %4302 = vperm.xlu0 %10012, %v4264_v51  }
 0x9a7   : > { %4307 = vperm.xlu1 %10013, %v4265_v61  }
 0x9aa   : > { %4198 = vperm.xlu0 %10012, %v4176_v13  }
 0x9ab   : > { %4203 = vperm.xlu1 %10013, %v4177_v6  }
 0x9ae   : > { %4208 = vperm.xlu0 %10012, %v4178_v47  }
 0x9af   : > { %4213 = vperm.xlu1 %10013, %v4179_v60  }
 0x9b2   : > { %4282 = vperm.xlu0 %10012, %v4260_v33  }
 0x9b3   : > { %4287 = vperm.xlu1 %10013, %v4261_v8  }
 0x9b6   : > { %4292 = vperm.xlu0 %10012, %v4262_v20  }
 0x9b7   : > { %4297 = vperm.xlu1 %10013, %v4263_v35  }
 0x9ba   : > { %4188 = vperm.xlu0 %10012, %v4174_v56  }
 0x9bb   : > { %4193 = vperm.xlu1 %10013, %v4175_v39  }
 0x9be   : > { %4272 = vperm.xlu0 %10012, %v4258_v32  }
 0x9bf   : > { %4277 = vperm.xlu1 %10013, %v4259_v36  }
 0x9c2   : > { %3997 = vperm.xlu0 %10012, %v3943_v14  }
 0x9c3   : > { %4002 = vperm.xlu1 %10013, %v3944_v34  }
 0x9c6   : > { %3987 = vperm.xlu0 %10012, %v3941_v40  }
 0x9c7   : > { %3992 = vperm.xlu1 %10013, %v3942_v10  }
 0x9ca   : > { %4238 = vperm.xlu0 %10012, %v4184_v62  }
 0x9cb   : > { %4243 = vperm.xlu1 %10013, %v4185_v21  }
 0x9ce   : > { %4322 = vperm.xlu0 %10012, %v4268_v28  }
 0x9cf   : > { %4327 = vperm.xlu1 %10013, %v4269_v38  }
 0x9d2   : > { %4228 = vperm.xlu0 %10012, %v4182_v26  }
 0x9d3   : > { %4233 = vperm.xlu1 %10013, %v4183_v55  }
 0x9d6   : > { %4312 = vperm.xlu0 %10012, %v4266_v2  }
 0x9d7   : > { %4317 = vperm.xlu1 %10013, %v4267_v16  }
 0x9f4   : > { %v3900_v18 = vpop.permute.xlu0 %3899 }
 0x9f5   : > { %9920 = vmatprep.subr.msk.bf16.mxu1 %vm1958_vm6, %v3900_v18  ;;  %v3894_v7 = vpop.permute.xlu1 %3893  ;;  %v4055_v37 = vsel %vm1958_vm6, %v3900_v18, 0 }
 0x9f6   : > { %9867 = vmatpush3.bf16.msra.mxu1 %v4055_v37 }
 0x9f8   : > { %v3897_v45 = vpop.permute.xlu0 %3896 }
 0x9f9   : > { %v3886_v17 = vpop.permute.xlu1 %3885  ;;  %v3919_v9 = vsel %vm1937_vm4, %v3894_v7, %v3897_v45 }
 0x9fa   : > { %9868 = vmatprep.subr.bf16.mxu1 %v3919_v9 }
 0x9fb   : > { %9869 = vmatpush3.bf16.msra.mxu1 %v3919_v9 }
 0x9fc   : > { %v3890_v44 = vpop.permute.xlu0 %3889 }
 0x9fd   : > { %v3914_v15 = vsel %vm14913_vm7, %v3886_v17, %v3890_v44  ;;  %v3883_v23 = vpop.permute.xlu1 %3882 }
 0x9fe   : > { %v3916_v3 = vsel %vm1941_vm10, %v3914_v15, %v3894_v7  ;;  %v3911_v30 = vsel %vm1948_vm8, %v3883_v23, %v3886_v17 }
 0x9ff   : > { %9870 = vmatprep.subr.bf16.mxu1 %v3916_v3 }
 0xa00   : > { %v3875_v31 = vpop.permute.xlu0 %3874  ;;  %9871 = vmatpush3.bf16.msra.mxu1 %v3916_v3 }
 0xa01   : > { %9872 = vmatprep.subr.bf16.mxu1 %v3911_v30  ;;  %v3879_v54 = vpop.permute.xlu1 %3878  ;;  %v3903_v19 = vsel %vm1958_vm6, %v3835_v5, %v3875_v31 }
 0xa02   : > { %v3906_v4 = vsel %vm14912_vm5, %v3875_v31, %v3879_v54 }
 0xa03   : > { %v3908_v42 = vsel %vm14911_vm9, %v3906_v4, %v3883_v23 }
 0xa04   : > { %9873 = vmatpush3.bf16.msra.mxu1 %v3911_v30 }
 0xa05   : > { %9874 = vmatprep.subr.bf16.mxu1 %v3908_v42 }
 0xa08   : > { %9875 = vmatpush3.bf16.msra.mxu1 %v3908_v42 }
 0xa09   : > { %9876 = vmatprep.subr.bf16.mxu1 %v3903_v19 }
 0xa0c   : > { %9877 = vmatpush3.bf16.msra.mxu1 %v3903_v19 }
 0xa0d   : > { %v3978_v24 = vpop.permute.xlu0 %3977 }
 0xa0e   : > { %v3983_v0 = vpop.permute.xlu1 %3982 }
 0xa0f   : > { %9879 = vmatmul.mubr.msk.bf16.vlgmr.msra.gmra.mxu1 %vm14909_vm12, %v10052_v58 }
 0xa10   : > { %9882 = vmatprep.mubr.msk.bf16.mxu1 %vm14909_vm12, %v10053_v12 }
 0xa11   : > { %v3958_v5 = vpop.permute.xlu0 %3957 }
 0xa12   : > { %v3963_v41 = vpop.permute.xlu1 %3962 }
 0xa15   : > { %v3968_v43 = vpop.permute.xlu0 %3967 }
 0xa16   : > { %v3973_v25 = vpop.permute.xlu1 %3972 }
 0xa17   : > { %9883 = vmatmul.mubr.msk.bf16.gmra.mxu1 %vm14909_vm12, %v10054_v27 }
 0xa18   : > { %9886 = vmatprep.mubr.msk.bf16.mxu1 %vm14909_vm12, %v10055_v46 }
 0xa19   : > { %v4219_v49 = vpop.permute.xlu0 %4218 }
 0xa1a   : > { %v11527_v51 = vpop.permute.xlu1 %4223 }
 0xa1d   : > { %v3948_v61 = vpop.permute.xlu0 %3947 }
 0xa1e   : > { %v3953_v13 = vpop.permute.xlu1 %3952 }
 0xa1f   : > { %9887 = vmatmul.mubr.msk.bf16.gmra.mxu1 %vm14909_vm12, %v10056_v63 }
 0xa21   : > { %v4303_v6 = vpop.permute.xlu0 %4302 }
 0xa22   : > { %v11529_v47 = vpop.permute.xlu1 %4307 }
 0xa25   : > { %v4199_v60 = vpop.permute.xlu0 %4198 }
 0xa26   : > { %v4204_v33 = vpop.permute.xlu1 %4203 }
 0xa29   : > { %v4209_v8 = vpop.permute.xlu0 %4208 }
 0xa2a   : > { %v11531_v20 = vpop.permute.xlu1 %4213 }
 0xa2d   : > { %v4283_v35 = vpop.permute.xlu0 %4282 }
 0xa2e   : > { %v4288_v56 = vpop.permute.xlu1 %4287 }
 0xa31   : > { %v11533_v39 = vpop.permute.xlu0 %4292 }
 0xa32   : > { %v11535_v32 = vpop.permute.xlu1 %4297 }
 0xa35   : > { %v11537_v36 = vpop.permute.xlu0 %4188 }
 0xa36   : > { %v11539_v14 = vpop.permute.xlu1 %4193 }
 0xa39   : > { %v11541_v34 = vpop.permute.xlu0 %4272 }
 0xa3a   : > { %v11543_v40 = vpop.permute.xlu1 %4277 }
 0xa3d   : > { %v3998_v62 = vpop.permute.xlu0 %3997 }
 0xa3e   : > { %v11545_v55 = vpop.permute.xlu1 %4002 }
 0xa41   : > { %v3988_v37 = vpop.permute.xlu0 %3987 }
 0xa42   : > { %v3993_v30 = vpop.permute.xlu1 %3992 }
 0xa45   : > { %v4239_v27 = vpop.permute.xlu0 %4238 }
 0xacf   : > { %v9880_v10 = vpop.f32.mrf.mxu1 }
 0xad0   : > { %v4100_v21 = vadd.f32 %v9880_v10, %v3958_v5 }
 0xad1   : > { %v4091_v28 = vpop.f32.mrf.mxu1 }
 0xad2   : > { %vm4140_vm2 = vcmp.ge.f32.partialorder %v4100_v21, 0.0  ;;  %v4152_v38 = vmul.f32 0.2, %v4100_v21  ;;  %v4092_v17 = vadd.f32 %v4091_v28, %v3948_v61 }
 0xad3   : > { %v9881_v26 = vpop.f32.mrf.mxu1 }
 0xad4   : > { %v4164_v2 = vsel %vm4140_vm2, %v4100_v21, %v4152_v38  ;;  %v4103_v16 = vadd.f32 %v9881_v26, %v3963_v41  ;;  %vm4138_vm2 = vcmp.ge.f32.partialorder %v4092_v17, 0.0  ;;  %v4150_v42 = vmul.f32 0.2, %v4092_v17 }
 0xad5   : > { %v4248_v18 = vmul.f32 %v4199_v60, %v4164_v2  ;;  %v4094_v7 = vpop.f32.mrf.mxu1  ;;  %v4323_v2 = vpop.permute.xlu0 %4322 }
 0xad6   : > { %vm4141_vm12 = vcmp.ge.f32.partialorder %v4103_v16, 0.0  ;;  %v4153_v45 = vmul.f32 0.2, %v4103_v16  ;;  %v4095_v19 = vadd.f32 %v4094_v7, %v3953_v13 }
 0xad7   : > { %v9884_v9 = vpop.f32.mrf.mxu1  ;;  %v4332_v44 = vadd.f32 %v4283_v35, %v4248_v18 }
 0xad8   : > { %v4165_v15 = vsel %vm4141_vm12, %v4103_v16, %v4153_v45  ;;  %v4116_v23 = vadd.f32 %v9884_v9, %v3978_v24  ;;  %v4151_v35 = vmul.f32 0.2, %v4095_v19  ;;  %vm4139_vm7 = vcmp.ge.f32.partialorder %v4095_v19, 0.0 }
 0xad9   : > { %v4249_v3 = vmul.f32 %v4204_v33, %v4165_v15  ;;  %4358 = vrot.lane.b32.xlu0 %v4332_v44, %s15121_s8  ;;  %v4107_v31 = vpop.f32.mrf.mxu1 }
 0xada   : > { %vm4144_vm9 = vcmp.ge.f32.partialorder %v4116_v23, 0.0  ;;  %v4156_v54 = vmul.f32 0.2, %v4116_v23  ;;  %v4108_v4 = vadd.f32 %v4107_v31, %v3968_v43  ;;  %v4162_v43 = vsel %vm4138_vm2, %v4092_v17, %v4150_v42  ;;  %v4229_v31 = vpop.permute.xlu0 %4228 }
 0xadb   : > { %v9885_v58 = vpop.f32.mrf.mxu1  ;;  %v4333_v12 = vadd.f32 %v4288_v56, %v4249_v3  ;;  %v4244_v56 = vpop.permute.xlu1 %4243  ;;  %v4163_v17 = vsel %vm4139_vm7, %v4095_v19, %v4151_v35 }
 0xadc   : > { %v4168_v46 = vsel %vm4144_vm9, %v4116_v23, %v4156_v54  ;;  %vm4142_vm5 = vcmp.ge.f32.partialorder %v4108_v4, 0.0  ;;  %v4154_v63 = vmul.f32 0.2, %v4108_v4  ;;  %v4119_v5 = vadd.f32 %v9885_v58, %v3983_v0 }
 0xadd   : > { %v4252_v41 = vmul.f32 %v4219_v49, %v4168_v46  ;;  %v4110_v24 = vpop.f32.mrf.mxu1  ;;  %4360 = vrot.lane.b32.xlu1 %v4333_v12, %s15121_s8  ;;  %v4247_v23 = vmul.f32 %v11539_v14, %v4163_v17 }
 0xade   : > { %v4166_v61 = vsel %vm4142_vm5, %v4108_v4, %v4154_v63  ;;  %vm4145_vm12 = vcmp.ge.f32.partialorder %v4119_v5, 0.0  ;;  %v4157_v60 = vmul.f32 0.2, %v4119_v5  ;;  %v4111_v33 = vadd.f32 %v4110_v24, %v3973_v25 }
 0xadf   : > { %v4250_v10 = vmul.f32 %v4209_v8, %v4166_v61  ;;  %v9888_v13 = vpop.f32.mrf.mxu1  ;;  %v4336_v21 = vadd.f32 %v4303_v6, %v4252_v41  ;;  %v4246_v8 = vmul.f32 %v11537_v36, %v4162_v43 }
 0xae0   : > { %v4169_v28 = vsel %vm4145_vm12, %v4119_v5, %v4157_v60  ;;  %vm4143_vm9 = vcmp.ge.f32.partialorder %v4111_v33, 0.0  ;;  %v4155_v38 = vmul.f32 0.2, %v4111_v33  ;;  %v4132_v26 = vadd.f32 %v9888_v13, %v3998_v62 }
 0xae1   : > { %v4253_v0 = vmul.f32 %v11527_v51, %v4169_v28  ;;  %4366 = vrot.lane.b32.xlu0 %v4336_v21, %s15121_s8  ;;  %v4123_v49 = vpop.f32.mrf.mxu1  ;;  %v4334_v45 = vadd.f32 %v11533_v39, %v4250_v10 }
 0xae2   : > { %v4167_v16 = vsel %vm4143_vm9, %v4111_v33, %v4155_v38  ;;  %vm4148_vm5 = vcmp.ge.f32.partialorder %v4132_v26, 0.0  ;;  %v4160_v25 = vmul.f32 0.2, %v4132_v26  ;;  %v4124_v18 = vadd.f32 %v4123_v49, %v3988_v37  ;;  %v4328_v37 = vpop.permute.xlu1 %4327 }
 0xae3   : > { %v4251_v6 = vmul.f32 %v11531_v20, %v4167_v16  ;;  %v9889_v7 = vpop.f32.mrf.mxu1  ;;  %v4337_v62 = vadd.f32 %v11529_v47, %v4253_v0  ;;  %v4330_v47 = vadd.f32 %v11541_v34, %v4246_v8 }
 0xae4   : > { %v4172_v9 = vsel %vm4148_vm5, %v4132_v26, %v4160_v25  ;;  %v4158_v51 = vmul.f32 0.2, %v4124_v18  ;;  %v4135_v44 = vadd.f32 %v9889_v7, %v11545_v55  ;;  %vm4146_vm2 = vcmp.ge.f32.partialorder %v4124_v18, 0.0 }
 0xae5   : > { %v4126_v15 = vpop.f32.mrf.mxu1  ;;  %4362 = vrot.lane.b32.xlu0 %v4334_v45, %s15121_s8  ;;  %4368 = vrot.lane.b32.xlu1 %v4337_v62, %s15121_s8  ;;  %v4256_v39 = vmul.f32 %v4239_v27, %v4172_v9  ;;  %v4335_v3 = vadd.f32 %v11535_v32, %v4251_v6  ;;  %v4313_v32 = vpop.permute.xlu0 %4312 }
 0xae6   : > { %vm4149_vm12 = vcmp.ge.f32.partialorder %v4135_v44, 0.0  ;;  %v4161_v36 = vmul.f32 0.2, %v4135_v44  ;;  %v4127_v20 = vadd.f32 %v4126_v15, %v3993_v30  ;;  %v4170_v54 = vsel %vm4146_vm2, %v4124_v18, %v4158_v51  ;;  %v4234_v14 = vpop.permute.xlu1 %4233 }
 0xae7   : > { %v4254_v42 = vmul.f32 %v4229_v31, %v4170_v54  ;;  %v4340_v58 = vadd.f32 %v4323_v2, %v4256_v39  ;;  %v4331_v30 = vadd.f32 %v11543_v40, %v4247_v23 }
 0xae8   : > { %v4173_v55 = vsel %vm4149_vm12, %v4135_v44, %v4161_v36  ;;  %v4159_v4 = vmul.f32 0.2, %v4127_v20  ;;  %vm4147_vm7 = vcmp.ge.f32.partialorder %v4127_v20, 0.0 }
 0xae9   : > { %4354 = vrot.lane.b32.xlu0 %v4330_v47, %s15121_s8  ;;  %4364 = vrot.lane.b32.xlu1 %v4335_v3, %s15121_s8  ;;  %v4257_v19 = vmul.f32 %v4244_v56, %v4173_v55  ;;  %v4338_v27 = vadd.f32 %v4313_v32, %v4254_v42 }
 0xaea   : > { %v4171_v12 = vsel %vm4147_vm7, %v4127_v20, %v4159_v4  ;;  %v4318_v63 = vpop.permute.xlu1 %4317 }
 0xaeb   : > { %v4255_v34 = vmul.f32 %v4234_v14, %v4171_v12  ;;  %v4341_v46 = vadd.f32 %v4328_v37, %v4257_v19 }
 0xaed   : > { %4374 = vrot.lane.b32.xlu0 %v4340_v58, %s15121_s8  ;;  %4356 = vrot.lane.b32.xlu1 %v4331_v30, %s15121_s8  ;;  %v4339_v5 = vadd.f32 %v4318_v63, %v4255_v34 }
 0xaf1   : > { %4370 = vrot.lane.b32.xlu0 %v4338_v27, %s15121_s8  ;;  %4376 = vrot.lane.b32.xlu1 %v4341_v46, %s15121_s8 }
 0xaf5   : > { %4372 = vrot.lane.b32.xlu1 %v4339_v5, %s15121_s8 }
 0xb4b   : > { %v4359_v41 = vpop.permute.xlu0 %4358 }
 0xb4c   : > { %v4392_v40 = vsel %vm3821_vm0, 0.0, %v4359_v41 }
 0xb4d   : > { %v4404_v24 = vsel %vm3824_vm15, %v4392_v40, 0.0 }
 0xb4e   : > { %v4440_v43 = vmul.f32 %v4404_v24, %v11457_v57  ;;  %v11579_v13 = vmul.f32 %v4404_v24, %v11434_v50  ;;  %v11582_v21 = vmul.f32 %v4404_v24, %v11439_v1  ;;  %v11591_v26 = vmul.f32 %v11417_v52, %v4404_v24 }
 0xb4f   : > { %v4361_v61 = vpop.permute.xlu1 %4360  ;;  %v4476_v8 = vmul.f32 %v4404_v24, %v11449_v22  ;;  %v4458_v27 = vmul.f32 %v4404_v24, %v11447_v48 }
 0xb50   : > { %v4393_v60 = vsel %vm3821_vm0, 0.0, %v4361_v61 }
 0xb51   : > { %v4405_v33 = vsel %vm3824_vm15, %v4393_v60, 0.0 }
 0xb52   : > { %v11575_v35 = vpack.c.bf16 %v4405_v33, %v4404_v24  ;;  %v4441_v10 = vmul.f32 %v4405_v33, %v11457_v57  ;;  %v11585_v28 = vmul.f32 %v4405_v33, %v11434_v50  ;;  %v11588_v38 = vmul.f32 %v4405_v33, %v11439_v1 }
 0xb53   : > { %v4367_v56 = vpop.permute.xlu0 %4366  ;;  %v11594_v0 = vmul.f32 %v11417_v52, %v4405_v33  ;;  %v4477_v2 = vmul.f32 %v4405_v33, %v11449_v22  ;;  %v4459_v14 = vmul.f32 %v4405_v33, %v11447_v48 }
 0xb54   : > { %4536 = vrot.lane.b32.xlu1 %v11575_v35, %s15117_s1  ;;  %v4451_v49 = vpack.c.bf16 %v4441_v10, %v4440_v43  ;;  %v4505_v16 = vpack.c.bf16 %v11585_v28, %v11579_v13  ;;  %v4523_v25 = vpack.c.bf16 %v11588_v38, %v11582_v21  ;;  %v4396_v45 = vsel %vm3821_vm0, 0.0, %v4367_v56  ;;  %v4734_v21 = vld [vmem:[%s15126_s15 + $0x10] sm:$0xff]  ;;  %v4737_v38 = vld [vmem:[%s15126_s15 + $0x28] sm:$0xff] }
 0xb55   : > { %v4487_v17 = vpack.c.bf16 %v4477_v2, %v4476_v8  ;;  %v11614_v51 = vsel %vm3824_vm15, %v4396_v45, 0.0  ;;  %v4469_v5 = vpack.c.bf16 %v4459_v14, %v4458_v27 }
 0xb56   : > { %4560 = vrot.lane.b32.xlu0 %v4451_v49, %s15119_s6  ;;  %v11629_v23 = vmul.f32 %v11614_v51, %v11439_v1  ;;  %v4444_v30 = vmul.f32 %v11614_v51, %v11457_v57  ;;  %v11675_v33 = vmul.f32 %v11614_v51, %v11449_v22  ;;  %v4462_v18 = vmul.f32 %v11614_v51, %v11447_v48 }
 0xb57   : > { %v4363_v6 = vpop.permute.xlu0 %4362  ;;  %v4369_v7 = vpop.permute.xlu1 %4368 }
 0xb58   : > { %v4397_v62 = vsel %vm3821_vm0, 0.0, %v4369_v7  ;;  %v4394_v55 = vsel %vm3821_vm0, 0.0, %v4363_v6 }
 0xb59   : > { %v11610_v9 = vsel %vm3824_vm15, %v4397_v62, 0.0  ;;  %v11654_v32 = vsel %vm3824_vm15, %v4394_v55, 0.0 }
 0xb5a   : > { %4626 = vrot.lane.b32.xlu0 %v4487_v17, %s15096_s2  ;;  %v11618_v37 = vpack.c.bf16 %v11610_v9, %v11614_v51  ;;  %v11622_v36 = vmul.f32 %v11610_v9, %v11439_v1  ;;  %v4445_v31 = vmul.f32 %v11610_v9, %v11457_v57  ;;  %v11667_v40 = vmul.f32 %v11610_v9, %v11449_v22 }
 0xb5b   : > { %v4355_v44 = vpop.permute.xlu0 %4354  ;;  %v4365_v15 = vpop.permute.xlu1 %4364  ;;  %v4442_v60 = vmul.f32 %v11654_v32, %v11457_v57  ;;  %v4460_v24 = vmul.f32 %v11654_v32, %v11447_v48 }
 0xb5c   : > { %v4390_v20 = vsel %vm3821_vm0, 0.0, %v4355_v44  ;;  %v4525_v54 = vpack.c.bf16 %v11622_v36, %v11629_v23  ;;  %v4395_v19 = vsel %vm3821_vm0, 0.0, %v4365_v15  ;;  %v4453_v34 = vpack.c.bf16 %v4445_v31, %v4444_v30 }
 0xb5d   : > { %v11638_v4 = vsel %vm3824_vm15, %v4390_v20, 0.0  ;;  %v11660_v46 = vsel %vm3824_vm15, %v4395_v19, 0.0  ;;  %v4489_v44 = vpack.c.bf16 %v11667_v40, %v11675_v33  ;;  %v4736_v33 = vld [vmem:[%s15126_s15 + $0x20] sm:$0xff] }
 0xb5e   : > { %4540 = vrot.lane.b32.xlu0 %v11618_v37, %s15117_s1  ;;  %v11680_v43 = vpack.c.bf16 %v11660_v46, %v11654_v32  ;;  %v4438_v10 = vmul.f32 %v11638_v4, %v11457_v57  ;;  %v4443_v56 = vmul.f32 %v11660_v46, %v11457_v57  ;;  %v4461_v49 = vmul.f32 %v11660_v46, %v11447_v48 }
 0xb5f   : > { %v4357_v39 = vpop.permute.xlu1 %4356  ;;  %v4375_v47 = vpop.permute.xlu0 %4374  ;;  %v4474_v15 = vmul.f32 %v11638_v4, %v11449_v22  ;;  %v4456_v20 = vmul.f32 %v11638_v4, %v11447_v48 }
 0xb60   : > { %v4391_v3 = vsel %vm3821_vm0, 0.0, %v4357_v39  ;;  %v4400_v2 = vsel %vm3821_vm0, 0.0, %v4375_v47  ;;  %v4463_v39 = vmul.f32 %v11610_v9, %v11447_v48  ;;  %v11708_v47 = vmul.f32 %v11417_v52, %v11614_v51 }
 0xb61   : > { %v11641_v42 = vsel %vm3824_vm15, %v4391_v3, 0.0  ;;  %v11711_v3 = vsel %vm3824_vm15, %v4400_v2, 0.0  ;;  %v4452_v55 = vpack.c.bf16 %v4443_v56, %v4442_v60  ;;  %v4470_v19 = vpack.c.bf16 %v4461_v49, %v4460_v24 }
 0xb62   : > { %4606 = vrot.lane.b32.xlu0 %v11618_v37, %s15115_s3  ;;  %v11648_v58 = vpack.c.bf16 %v11641_v42, %v11638_v4  ;;  %v4439_v41 = vmul.f32 %v11641_v42, %v11457_v57  ;;  %v4475_v6 = vmul.f32 %v11641_v42, %v11449_v22  ;;  %v4457_v7 = vmul.f32 %v11641_v42, %v11447_v48 }
 0xb63   : > { %v4377_v12 = vpop.permute.xlu1 %4376  ;;  %v4371_v63 = vpop.permute.xlu0 %4370  ;;  %v11744_v60 = vmul.f32 %v11638_v4, %v11439_v1  ;;  %v11748_v24 = vmul.f32 %v11641_v42, %v11439_v1 }
 0xb64   : > { %4534 = vrot.lane.b32.xlu1 %v11648_v58, %s15117_s1  ;;  %v4398_v8 = vsel %vm3821_vm0, 0.0, %v4371_v63  ;;  %v4401_v45 = vsel %vm3821_vm0, 0.0, %v4377_v12  ;;  %v4450_v17 = vpack.c.bf16 %v4439_v41, %v4438_v10  ;;  %v11725_v12 = vmul.f32 %v11654_v32, %v11439_v1 }
 0xb65   : > { %v11714_v31 = vsel %vm3824_vm15, %v4398_v8, 0.0  ;;  %v11718_v30 = vsel %vm3824_vm15, %v4401_v45, 0.0  ;;  %v4486_v27 = vpack.c.bf16 %v4475_v6, %v4474_v15  ;;  %v4468_v63 = vpack.c.bf16 %v4457_v7, %v4456_v20 }
 0xb66   : > { %4564 = vrot.lane.b32.xlu0 %v4453_v34, %s15119_s6  ;;  %v11729_v34 = vmul.f32 %v11660_v46, %v11439_v1  ;;  %v11738_v41 = vmul.f32 %v11660_v46, %v11449_v22  ;;  %v11752_v10 = vmul.f32 %v11417_v52, %v11711_v3  ;;  %v11759_v49 = vmul.f32 %v11417_v52, %v11718_v30 }
 0xb67   : > { %v4373_v61 = vpop.permute.xlu1 %4372  ;;  %v11763_v2 = vmul.f32 %v11417_v52, %v11714_v31  ;;  %v4522_v6 = vpack.c.bf16 %v11748_v24, %v11744_v60  ;;  %v11773_v7 = vmul.f32 %v11417_v52, %v11610_v9  ;;  %v11777_v45 = vmul.f32 %v11417_v52, %v11654_v32  ;;  %v5175_v24 = vld [vmem:[%s15128_s18 + $0x28] sm:$0xff] }
 0xb68   : > { %4584 = vrot.lane.b32.xlu1 %v4469_v5, %s15116_s4  ;;  %v4399_v62 = vsel %vm3821_vm0, 0.0, %v4373_v61  ;;  %v11734_v5 = vmul.f32 %v11654_v32, %v11449_v22  ;;  %v4524_v61 = vpack.c.bf16 %v11729_v34, %v11725_v12  ;;  %v11790_v20 = vmul.f32 %v11417_v52, %v11638_v4  ;;  %v4735_v12 = vld [vmem:[%s15126_s15 + $0x18] sm:$0xff]  ;;  %v5128_v34 = vld [vmem:[%s15127_s17] sm:$0xff] }
 0xb69   : > { %v11721_v14 = vsel %vm3824_vm15, %v4399_v62, 0.0  ;;  %v11781_v62 = vmul.f32 %v11417_v52, %v11660_v46  ;;  %v4437_v29 = vpack.c.bf16 %v11718_v30, %v11711_v3  ;;  %v4446_v28 = vmul.f32 %v11714_v31, %v11457_v57 }
 0xb6a   : > { %4604 = vrot.lane.b32.xlu0 %v11680_v43, %s15115_s3  ;;  %v4488_v56 = vpack.c.bf16 %v11738_v41, %v11734_v5  ;;  %v11767_v8 = vmul.f32 %v11417_v52, %v11721_v14  ;;  %v4447_v13 = vmul.f32 %v11721_v14, %v11457_v57  ;;  %v4500_v23 = vmul.f32 %v11714_v31, %v11434_v50  ;;  %v5133_v41 = vld [vmem:[%s15127_s17 + $0x28] sm:$0xff] }
 0xb6c   : > { %4558 = vrot.lane.b32.xlu1 %v4450_v17, %s15119_s6  ;;  %v4431_v17 = vpack.c.bf16 %v11759_v49, %v11752_v10 }
 0xb6e   : > { %4562 = vrot.lane.b32.xlu0 %v4452_v55, %s15119_s6  ;;  %v11794_v55 = vmul.f32 %v11417_v52, %v11641_v42  ;;  %v4471_v52 = vpack.c.bf16 %v4463_v39, %v4462_v18  ;;  %v4497_v18 = vmul.f32 %v11660_v46, %v11434_v50  ;;  %v4436_v39 = vpack.c.bf16 %v11721_v14, %v11714_v31 }
 0xb6f   : > { %v4467_v46 = vmul.f32 %v11718_v30, %v11447_v48 }
 0xb70   : > { %4624 = vrot.lane.b32.xlu1 %v4486_v27, %s15096_s2  ;;  %v4426_v15 = vpack.c.bf16 %v11794_v55, %v11790_v20 }
 0xb72   : > { %4586 = vrot.lane.b32.xlu0 %v4470_v19, %s15116_s4  ;;  %v4499_v19 = vmul.f32 %v11610_v9, %v11434_v50  ;;  %v4496_v9 = vmul.f32 %v11654_v32, %v11434_v50 }
 0xb74   : > { %4582 = vrot.lane.b32.xlu1 %v4468_v63, %s15116_s4  ;;  %v4498_v63 = vmul.f32 %v11614_v51, %v11434_v50  ;;  %v4506_v51 = vpack.c.bf16 %v4497_v18, %v4496_v9  ;;  %v4449_v18 = vmul.f32 %v11718_v30, %v11457_v57  ;;  %v4448_v9 = vmul.f32 %v11711_v3, %v11457_v57 }
 0xb76   : > { %4544 = vrot.lane.b32.xlu0 %v4437_v29, %s15117_s1  ;;  %v4507_v27 = vpack.c.bf16 %v4499_v19, %v4498_v63  ;;  %v4466_v19 = vmul.f32 %v11711_v3, %v11447_v48  ;;  %v10059_v63 = vld [vmem:[%s15123_s12 + $0x4] ss:$28 sps:$4 sm:$0xff]  }
 0xb77   : > { %4914 = vmatprep.mubr.bf16.mxu0 %v10059_v63  ;;  %v4502_v63 = vmul.f32 %v11711_v3, %v11434_v50 }
 0xb78   : > { %4588 = vrot.lane.b32.xlu1 %v4471_v52, %s15116_s4  ;;  %v4465_v52 = vmul.f32 %v11721_v14, %v11447_v48  ;;  %v4473_v32 = vpack.c.bf16 %v4467_v46, %v4466_v19  ;;  %v4492_v46 = vmul.f32 %v11638_v4, %v11434_v50  ;;  %v10065_v19 = vld [vmem:[%s15123_s12 + $0xc] ss:$28 sps:$4 sm:$0xff]   ;;  %v4503_v4 = vmul.f32 %v11718_v30, %v11434_v50 }
 0xb79   : > { %4971 = vmatprep.mubr.bf16.mxu1 %v10065_v19  ;;  %v5171_v19 = vld [vmem:[%s15128_s18 + $0x8] sm:$0xff] }
 0xb7a   : > { %4610 = vrot.lane.b32.xlu0 %v4437_v29, %s15115_s3 }
 0xb7c   : > { %4538 = vrot.lane.b32.xlu1 %v11680_v43, %s15117_s1 }
 0xb7e   : > { %4676 = vrot.lane.b32.xlu0 %v4437_v29, %s15122_s9  ;;  %v4464_v29 = vmul.f32 %v11714_v31, %v11447_v48 }
 0xb80   : > { %4654 = vrot.lane.b32.xlu1 %v4507_v27, %s15124_s13  ;;  %v4472_v27 = vpack.c.bf16 %v4465_v52, %v4464_v29  ;;  %v4455_v52 = vpack.c.bf16 %v4449_v18, %v4448_v9  ;;  %v4519_v18 = vmul.f32 %v11721_v14, %v11439_v1  ;;  %v4482_v9 = vmul.f32 %v11714_v31, %v11449_v22 }
 0xb82   : > { %4674 = vrot.lane.b32.xlu0 %v4436_v39, %s15122_s9 }
 0xb84   : > { %4652 = vrot.lane.b32.xlu1 %v4506_v51, %s15124_s13  ;;  %v4521_v51 = vmul.f32 %v11718_v30, %v11439_v1 }
 0xb86   : > { %4590 = vrot.lane.b32.xlu0 %v4472_v27, %s15116_s4  ;;  %v4485_v27 = vmul.f32 %v11718_v30, %v11449_v22  ;;  %v4501_v30 = vmul.f32 %v11721_v14, %v11434_v50 }
 0xb88   : > { %4592 = vrot.lane.b32.xlu1 %v4473_v32, %s15116_s4  ;;  %v4484_v32 = vmul.f32 %v11711_v3, %v11449_v22 }
 0xb8a   : > { %4602 = vrot.lane.b32.xlu0 %v11575_v35, %s15115_s3 }
 0xb8c   : > { %4542 = vrot.lane.b32.xlu1 %v4436_v39, %s15117_s1 }
 0xb8e   : > { %4672 = vrot.lane.b32.xlu0 %v11618_v37, %s15122_s9  ;;  %v4520_v37 = vmul.f32 %v11711_v3, %v11439_v1  ;;  %v4508_v3 = vpack.c.bf16 %v4501_v30, %v4500_v23 }
 0xb90   : > { %4608 = vrot.lane.b32.xlu1 %v4436_v39, %s15115_s3  ;;  %v4493_v39 = vmul.f32 %v11641_v42, %v11434_v50  ;;  %v4527_v29 = vpack.c.bf16 %v4521_v51, %v4520_v37  ;;  %v4491_v42 = vpack.c.bf16 %v4485_v27, %v4484_v32  ;;  %v5172_v37 = vld [vmem:[%s15128_s18 + $0x10] sm:$0xff] }
 0xb92   : > { %4600 = vrot.lane.b32.xlu0 %v11648_v58, %s15115_s3 }
 0xb94   : > { %4568 = vrot.lane.b32.xlu1 %v4455_v52, %s15119_s6  ;;  %v5129_v52 = vld [vmem:[%s15127_s17 + $0x8] sm:$0xff] }
 0xb96   : > { %4670 = vrot.lane.b32.xlu0 %v11680_v43, %s15122_s9  ;;  %v4504_v43 = vpack.c.bf16 %v4493_v39, %v4492_v46 }
 0xb98   : > { %4650 = vrot.lane.b32.xlu1 %v4505_v16, %s15124_s13  ;;  %v4454_v16 = vpack.c.bf16 %v4447_v13, %v4446_v28 }
 0xb9a   : > { %4700 = vrot.lane.b32.xlu0 %v4527_v29, %s15125_s14  ;;  %v5131_v29 = vld [vmem:[%s15127_s17 + $0x18] sm:$0xff] }
 0xb9c   : > { %4648 = vrot.lane.b32.xlu1 %v4504_v43, %s15124_s13 }
 0xb9e   : > { %4634 = vrot.lane.b32.xlu0 %v4491_v42, %s15096_s2  ;;  %v5173_v42 = vld [vmem:[%s15128_s18 + $0x18] sm:$0xff] }
 0xba0   : > { %4668 = vrot.lane.b32.xlu1 %v11575_v35, %s15122_s9  ;;  %v4509_v35 = vpack.c.bf16 %v4503_v4, %v4502_v63 }
 0xba2   : > { %4666 = vrot.lane.b32.xlu0 %v11648_v58, %s15122_s9  ;;  %v4518_v58 = vmul.f32 %v11714_v31, %v11439_v1  ;;  %v4733_v31 = vld [vmem:[%s15126_s15 + $0x8] sm:$0xff] }
 0xba4   : > { %4566 = vrot.lane.b32.xlu1 %v4454_v16, %s15119_s6  ;;  %v4526_v36 = vpack.c.bf16 %v4519_v18, %v4518_v58  ;;  %v15129_v18 = vpack.c.bf16 %v11767_v8, %v11763_v2 }
 0xba6   : > { %4696 = vrot.lane.b32.xlu0 %v4525_v54, %s15125_s14  ;;  %v4483_v54 = vmul.f32 %v11721_v14, %v11449_v22  ;;  %v5174_v14 = vld [vmem:[%s15128_s18 + $0x20] sm:$0xff] }
 0xba8   : > { %4658 = vrot.lane.b32.xlu1 %v4509_v35, %s15124_s13  ;;  %v4490_v40 = vpack.c.bf16 %v4483_v54, %v4482_v9 }
 0xbaa   : > { %4630 = vrot.lane.b32.xlu0 %v4489_v44, %s15096_s2  ;;  %v4732_v44 = vld [vmem:[%s15126_s15] sm:$0xff] }
 0xbac   : > { %4698 = vrot.lane.b32.xlu1 %v4526_v36, %s15125_s14  ;;  %v15130_v36 = vpack.c.bf16 %v11773_v7, %v11708_v47 }
 0xbae   : > { %4656 = vrot.lane.b32.xlu0 %v4508_v3, %s15124_s13 }
 0xbb0   : > { %4632 = vrot.lane.b32.xlu1 %v4490_v40, %s15096_s2 }
 0xbb2   : > { %4692 = vrot.lane.b32.xlu0 %v4523_v25, %s15125_s14  ;;  %v5132_v25 = vld [vmem:[%s15127_s17 + $0x20] sm:$0xff] }
 0xbb4   : > { %4694 = vrot.lane.b32.xlu1 %v4524_v61, %s15125_s14  ;;  %v5130_v61 = vld [vmem:[%s15127_s17 + $0x10] sm:$0xff] }
 0xbb6   : > { %4760 = vperm.xlu0 %10012, %v4736_v33   ;;  %v15131_v33 = vpack.c.bf16 %v11781_v62, %v11777_v45  ;;  %v10060_v45 = vld [vmem:[%s15123_s12 + $0x3c] ss:$28 sps:$4 sm:$0xff]  }
 0xbb8   : > { %4628 = vrot.lane.b32.xlu1 %v4488_v56, %s15096_s2  ;;  %v5170_v56 = vld [vmem:[%s15128_s18] sm:$0xff] }
 0xbba   : > { %4740 = vperm.xlu0 %10012, %v4732_v44   ;;  %v15132_v44 = vpack.c.bf16 %v11594_v0, %v11591_v26 }
 0xbbc   : > { %4690 = vrot.lane.b32.xlu1 %v4522_v6, %s15125_s14 }
 0xbbe   : > { %4750 = vperm.xlu0 %10012, %v4734_v21  }
 0xbc0   : > { %4765 = vperm.xlu1 %10013, %v4737_v38   ;;  %v10057_v38 = vld [vmem:[%s15123_s12] ss:$28 sps:$4 sm:$0xff]  }
 0xbc2   : > { %5156 = vperm.xlu0 %10012, %v5132_v25  }
 0xbc4   : > { %4745 = vperm.xlu1 %10013, %v4733_v31   ;;  %v10062_v31 = vld [vmem:[%s15123_s12 + $0x38] ss:$28 sps:$4 sm:$0xff]  }
 0xbc6   : > { %5198 = vperm.xlu0 %10012, %v5174_v14   ;;  %v4537_v51 = vpop.permute.xlu1 %4536 }
 0xbc8   : > { %v4561_v5 = vpop.permute.xlu0 %4560  ;;  %4755 = vperm.xlu1 %10013, %v4735_v12  }
 0xbca   : > { %5136 = vperm.xlu0 %10012, %v5128_v34   ;;  %v10063_v34 = vld [vmem:[%s15123_s12 + $0x8] ss:$28 sps:$4 sm:$0xff]  }
 0xbcc   : > { %v4627_v60 = vpop.permute.xlu0 %4626  ;;  %5161 = vperm.xlu1 %10013, %v5133_v41  }
 0xbcd   : > { %9704 = vmatprep.subr.bf16.mxu1 %v4627_v60  ;;  %v10069_v60 = vld [vmem:[%s15123_s12 + $0x44] ss:$28 sps:$4 sm:$0xff]  }
 0xbce   : > { %5146 = vperm.xlu0 %10012, %v5130_v61   ;;  %v15133_v61 = vmov 0.0  }
 0xbd0   : > { %v4541_v6 = vpop.permute.xlu0 %4540  ;;  %5203 = vperm.xlu1 %10013, %v5175_v24  }
 0xbd2   : > { %5178 = vperm.xlu0 %10012, %v5170_v56   ;;  %v10077_v56 = vld [vmem:[%s15123_s12 + $0x14] ss:$28 sps:$4 sm:$0xff]  }
 0xbd4   : > { %v4607_v39 = vpop.permute.xlu0 %4606  ;;  %5141 = vperm.xlu1 %10013, %v5129_v52  }
 0xbd6   : > { %5188 = vperm.xlu0 %10012, %v5172_v37   ;;  %v4535_v46 = vpop.permute.xlu1 %4534  ;;  %v10072_v37 = vld [vmem:[%s15123_s12 + $0x7c] ss:$28 sps:$4 sm:$0xff]  }
 0xbd8   : > { %v4565_v27 = vpop.permute.xlu0 %4564  ;;  %5151 = vperm.xlu1 %10013, %v5131_v29  }
 0xbd9   : > { %9670 = vmatprep.subr.bf16.mxu0 %v4565_v27  ;;  %v10074_v27 = vld [vmem:[%s15123_s12 + $0x78] ss:$28 sps:$4 sm:$0xff]  }
 0xbda   : > { %9671 = vmatpush3.bf16.msra.mxu0 %v4537_v51  ;;  %v4585_v43 = vpop.permute.xlu1 %4584  ;;  %v10071_v51 = vld [vmem:[%s15123_s12 + $0x40] ss:$28 sps:$4 sm:$0xff]  }
 0xbdc   : > { %v4605_v32 = vpop.permute.xlu0 %4604  ;;  %5183 = vperm.xlu1 %10013, %v5171_v19  }
 0xbde   : > { %v4559_v13 = vpop.permute.xlu1 %4558 }
 0xbe0   : > { %v4563_v28 = vpop.permute.xlu0 %4562  ;;  %5193 = vperm.xlu1 %10013, %v5173_v42   ;;  %v10079_v42 = vld [vmem:[%s15123_s12 + $0x4c] ss:$28 sps:$4 sm:$0xff]  }
 0xbe1   : > { %9672 = vmatprep.subr.bf16.mxu0 %v4563_v28  ;;  %v10078_v28 = vld [vmem:[%s15123_s12 + $0x18] ss:$28 sps:$4 sm:$0xff]  }
 0xbe2   : > { %9673 = vmatpush3.bf16.msra.mxu0 %v4535_v46  ;;  %v4625_v16 = vpop.permute.xlu1 %4624 }
 0xbe3   : > { %9674 = vmatprep.subr.bf16.mxu0 %v4561_v5  ;;  %v10068_v5 = vld [vmem:[%s15123_s12 + $0x70] ss:$28 sps:$4 sm:$0xff]  }
 0xbe4   : > { %v4587_v4 = vpop.permute.xlu0 %4586 }
 0xbe6   : > { %9675 = vmatpush3.bf16.msra.mxu0 %v4431_v17  ;;  %v4583_v63 = vpop.permute.xlu1 %4582 }
 0xbe7   : > { %9676 = vmatprep.subr.bf16.mxu0 %v4559_v13 }
 0xbe8   : > { %v4545_v35 = vpop.permute.xlu0 %4544 }
 0xbea   : > { %9677 = vmatpush3.bf16.msra.mxu0 %v15129_v18  ;;  %v4589_v58 = vpop.permute.xlu1 %4588  ;;  %v10086_v18 = vld [vmem:[%s15123_s12 + $0x88] ss:$28 sps:$4 sm:$0xff]  }
 0xbeb   : > { %9678 = vmatprep.subr.bf16.mxu0 %v4545_v35  ;;  %v10085_v35 = vld [vmem:[%s15123_s12 + $0x80] ss:$28 sps:$4 sm:$0xff]  }
 0xbec   : > { %v4611_v30 = vpop.permute.xlu0 %4610 }
 0xbee   : > { %9679 = vmatpush3.bf16.msra.mxu0 %v15130_v36  ;;  %v4539_v23 = vpop.permute.xlu1 %4538 }
 0xbf0   : > { %v4677_v54 = vpop.permute.xlu0 %4676 }
 0xbf2   : > { %v4655_v3 = vpop.permute.xlu1 %4654 }
 0xbf4   : > { %v4675_v9 = vpop.permute.xlu0 %4674 }
 0xbf6   : > { %v4653_v10 = vpop.permute.xlu1 %4652 }
 0xbf8   : > { %v4591_v49 = vpop.permute.xlu0 %4590 }
 0xbfa   : > { %v4593_v17 = vpop.permute.xlu1 %4592 }
 0xbfb   : > { %9705 = vmatpush3.bf16.msra.mxu1 %v4593_v17 }
 0xbfc   : > { %v4603_v40 = vpop.permute.xlu0 %4602  ;;  %9706 = vmatprep.subr.bf16.mxu1 %v4625_v16  ;;  %v10081_v16 = vld [vmem:[%s15123_s12 + $0x48] ss:$28 sps:$4 sm:$0xff]  }
 0xbfe   : > { %v4543_v2 = vpop.permute.xlu1 %4542 }
 0xbff   : > { %9680 = vmatprep.subr.bf16.mxu0 %v4543_v2  ;;  %9707 = vmatpush3.bf16.msra.mxu1 %v4591_v49 }
 0xc00   : > { %v4673_v8 = vpop.permute.xlu0 %4672  ;;  %9681 = vmatpush3.bf16.msra.mxu0 %v15131_v33  ;;  %9708 = vmatprep.subr.bf16.mxu1 %v4611_v30 }
 0xc01   : > { %9682 = vmatprep.subr.bf16.mxu0 %v4541_v6 }
 0xc02   : > { %v4609_v47 = vpop.permute.xlu1 %4608 }
 0xc03   : > { %9709 = vmatpush3.bf16.msra.mxu1 %v4589_v58 }
 0xc04   : > { %v4601_v7 = vpop.permute.xlu0 %4600  ;;  %9683 = vmatpush3.bf16.msra.mxu0 %v15132_v44  ;;  %9710 = vmatprep.subr.bf16.mxu1 %v4609_v47 }
 0xc05   : > { %9684 = vmatprep.subr.bf16.mxu0 %v4539_v23 }
 0xc06   : > { %v4569_v21 = vpop.permute.xlu1 %4568 }
 0xc07   : > { %9711 = vmatpush3.bf16.msra.mxu1 %v4587_v4  ;;  %v10083_v4 = vld [vmem:[%s15123_s12 + $0x84] ss:$28 sps:$4 sm:$0xff]  }
 0xc08   : > { %v4671_v25 = vpop.permute.xlu0 %4670  ;;  %9685 = vmatpush3.bf16.msra.mxu0 %v4426_v15  ;;  %9712 = vmatprep.subr.bf16.mxu1 %v4607_v39  ;;  %v10066_v15 = vld [vmem:[%s15123_s12 + $0x74] ss:$28 sps:$4 sm:$0xff]  }
 0xc09   : > { %9738 = vmatprep.subr.bf16.mxu0 %v4677_v54 }
 0xc0a   : > { %v4651_v62 = vpop.permute.xlu1 %4650 }
 0xc0b   : > { %4915 = vmatmul.mubr.bf16.vlgmr.msra.gmra.mxu0 %v10057_v38  ;;  %9713 = vmatpush3.bf16.msra.mxu1 %v4585_v43 }
 0xc0c   : > { %v4701_v26 = vpop.permute.xlu0 %4700  ;;  %9714 = vmatprep.subr.bf16.mxu1 %v4605_v32  ;;  %9739 = vmatpush3.bf16.msra.mxu0 %v4655_v3  ;;  %v10075_v32 = vld [vmem:[%s15123_s12 + $0x10] ss:$28 sps:$4 sm:$0xff]  }
 0xc0d   : > { %9740 = vmatprep.subr.bf16.mxu0 %v4675_v9  ;;  %4922 = vmatprep.mubr.bf16.mxu0 %v10060_v45 }
 0xc0e   : > { %v4649_v0 = vpop.permute.xlu1 %4648 }
 0xc0f   : > { %9715 = vmatpush3.bf16.msra.mxu1 %v4583_v63  ;;  %v10082_v63 = vld [vmem:[%s15123_s12 + $0x50] ss:$28 sps:$4 sm:$0xff]  }
 0xc10   : > { %v4635_v14 = vpop.permute.xlu0 %4634  ;;  %9716 = vmatprep.subr.bf16.mxu1 %v4603_v40  ;;  %9741 = vmatpush3.bf16.msra.mxu0 %v4653_v10 }
 0xc11   : > { %9742 = vmatprep.subr.bf16.mxu0 %v4673_v8 }
 0xc12   : > { %v4669_v20 = vpop.permute.xlu1 %4668 }
 0xc13   : > { %4923 = vmatmul.mubr.bf16.gmra.mxu0 %v10062_v31  ;;  %9717 = vmatpush3.bf16.msra.mxu1 %v4569_v21 }
 0xc14   : > { %v4667_v55 = vpop.permute.xlu0 %4666  ;;  %9718 = vmatprep.subr.bf16.mxu1 %v4601_v7  ;;  %9743 = vmatpush3.bf16.msra.mxu0 %v4651_v62 }
 0xc15   : > { %9744 = vmatprep.subr.bf16.mxu0 %v4671_v25  ;;  %4930 = vmatprep.mubr.bf16.mxu0 %v10066_v15 }
 0xc16   : > { %v4567_v12 = vpop.permute.xlu1 %4566 }
 0xc17   : > { %9719 = vmatpush3.bf16.msra.mxu1 %v4567_v12 }
 0xc18   : > { %v4697_v41 = vpop.permute.xlu0 %4696  ;;  %9745 = vmatpush3.bf16.msra.mxu0 %v4649_v0  ;;  %9890 = vmatprep.subr.bf16.mxu1 %v15133_v61 }
 0xc19   : > { %9746 = vmatprep.subr.bf16.mxu0 %v4669_v20 }
 0xc1a   : > { %4972 = vmatmul.mubr.bf16.vlgmr.msra.gmra.mxu1 %v10063_v34  ;;  %v4659_v24 = vpop.permute.xlu1 %4658 }
 0xc1b   : > { %4931 = vmatmul.mubr.bf16.gmra.mxu0 %v10068_v5  ;;  %9891 = vmatpush3.bf16.msra.mxu1 %v4701_v26 }
 0xc1c   : > { %9747 = vmatpush3.bf16.msra.mxu0 %v4635_v14  ;;  %9892 = vmatprep.subr.bf16.mxu1 %v15133_v61  ;;  %v4631_v6 = vpop.permute.xlu0 %4630 }
 0xc1d   : > { %9748 = vmatprep.subr.bf16.mxu0 %v4667_v55  ;;  %4979 = vmatprep.mubr.bf16.mxu1 %v10069_v60 }
 0xc1e   : > { %v4699_v52 = vpop.permute.xlu1 %4698  ;;  %5028 = vmatprep.mubr.bf16.mxu0 %v10077_v56 }
 0xc1f   : > { %9893 = vmatpush3.bf16.msra.mxu1 %v4699_v52 }
 0xc20   : > { %9894 = vmatprep.subr.bf16.mxu1 %v15133_v61  ;;  %v4657_v29 = vpop.permute.xlu0 %4656 }
 0xc22   : > { %4980 = vmatmul.mubr.bf16.gmra.mxu1 %v10071_v51  ;;  %v4633_v39 = vpop.permute.xlu1 %4632 }
 0xc23   : > { %9749 = vmatpush3.bf16.msra.mxu0 %v4633_v39  ;;  %9895 = vmatpush3.bf16.msra.mxu1 %v4697_v41 }
 0xc24   : > { %9750 = vmatprep.subr.bf16.mxu0 %v4659_v24  ;;  %9896 = vmatprep.subr.bf16.mxu1 %v15133_v61  ;;  %v4693_v19 = vpop.permute.xlu0 %4692 }
 0xc25   : > { %4987 = vmatprep.mubr.bf16.mxu1 %v10072_v37 }
 0xc26   : > { %v4695_v46 = vpop.permute.xlu1 %4694 }
 0xc27   : > { %9751 = vmatpush3.bf16.msra.mxu0 %v4631_v6  ;;  %9897 = vmatpush3.bf16.msra.mxu1 %v4695_v46 }
 0xc28   : > { %9752 = vmatprep.subr.bf16.mxu0 %v4657_v29  ;;  %9898 = vmatprep.subr.bf16.mxu1 %v15133_v61 }
 0xc2a   : > { %4988 = vmatmul.mubr.bf16.gmra.mxu1 %v10074_v27  ;;  %v4629_v43 = vpop.permute.xlu1 %4628 }
 0xc2b   : > { %9753 = vmatpush3.bf16.msra.mxu0 %v4629_v43  ;;  %9899 = vmatpush3.bf16.msra.mxu1 %v4693_v19 }
 0xc2c   : > { %9900 = vmatprep.subr.bf16.mxu1 %v15133_v61  ;;  %9902 = vmatprep.mubr.msk.bf16.mxu1 %vm10223_vm14, %v15133_v61 }
 0xc2e   : > { %5029 = vmatmul.mubr.bf16.vlgmr.msra.gmra.mxu0 %v10075_v32  ;;  %v4691_v13 = vpop.permute.xlu1 %4690 }
 0xc2f   : > { %9901 = vmatpush3.bf16.msra.mxu1 %v4691_v13  ;;  %5036 = vmatprep.mubr.bf16.mxu0 %v10079_v42 }
 0xc30   : > { %5466 = vmatprep.subr.bf16.mxu1 %v15099_v59 }
 0xc31   : > { %v11996_v23 = vpop.permute.xlu0 %4760 }
 0xc32   : > { %9903 = vmatmul.mubr.msk.bf16.vlgmr.msra.gmra.mxu1 %vm2914_vm3, %v10078_v28 }
 0xc33   : > { %9906 = vmatprep.mubr.msk.bf16.mxu1 %vm10223_vm14, %v15133_v61 }
 0xc35   : > { %v4741_v49 = vpop.permute.xlu0 %4740 }
 0xc36   : > { %5037 = vmatmul.mubr.bf16.gmra.mxu0 %v10081_v16 }
 0xc37   : > { %5044 = vmatprep.mubr.bf16.mxu0 %v10083_v4 }
 0xc39   : > { %v4751_v47 = vpop.permute.xlu0 %4750 }
 0xc3a   : > { %9907 = vmatmul.mubr.msk.bf16.gmra.mxu1 %vm2914_vm3, %v10082_v63 }
 0xc3b   : > { %9910 = vmatprep.mubr.msk.bf16.mxu1 %vm10223_vm14, %v15133_v61  ;;  %v11998_v9 = vpop.permute.xlu1 %4765 }
 0xc3d   : > { %v12000_v45 = vpop.permute.xlu0 %5156 }
 0xc3e   : > { %5045 = vmatmul.mubr.bf16.gmra.mxu0 %v10085_v35 }
 0xc3f   : > { %v4746_v2 = vpop.permute.xlu1 %4745 }
 0xc41   : > { %v12004_v20 = vpop.permute.xlu0 %5198 }
 0xc42   : > { %9911 = vmatmul.mubr.msk.bf16.gmra.mxu1 %vm2914_vm3, %v10086_v18 }
 0xc43   : > { %v4756_v38 = vpop.permute.xlu1 %4755 }
 0xc45   : > { %v5137_v6 = vpop.permute.xlu0 %5136 }
 0xc47   : > { %v12002_v31 = vpop.permute.xlu1 %5161 }
 0xc49   : > { %v12008_v4 = vpop.permute.xlu0 %5146 }
 0xc4b   : > { %v12006_v41 = vpop.permute.xlu1 %5203 }
 0xc4f   : > { %v5142_v32 = vpop.permute.xlu1 %5141 }
 0xccb   : > { %v9686_v58 = vpop.f32.mrf.mxu0 }
 0xccd   : > { %v9687_v30 = vpop.f32.mrf.mxu0 }
 0xcce   : > { %v9688_v12 = vadd.f32 %v9687_v30, %v9686_v58 }
 0xccf   : > { %v9689_v36 = vpop.f32.mrf.mxu0 }
 0xcd0   : > { %v4917_v52 = vadd.f32 %v9688_v12, %v4741_v49  ;;  %v12010_v12 = vpop.permute.xlu1 %5151 }
 0xcd1   : > { %v9690_v54 = vpop.f32.mrf.mxu0 }
 0xcd2   : > { %v9691_v51 = vadd.f32 %v9690_v54, %v9689_v36 }
 0xcd3   : > { %v9692_v3 = vpop.f32.mrf.mxu0 }
 0xcd4   : > { %v4920_v42 = vadd.f32 %v9691_v51, %v4746_v2 }
 0xcd5   : > { %v9693_v10 = vpop.f32.mrf.mxu0 }
 0xcd6   : > { %v9694_v63 = vadd.f32 %v9693_v10, %v9692_v3 }
 0xcd7   : > { %v9695_v17 = vpop.f32.mrf.mxu0 }
 0xcd8   : > { %v4925_v2 = vadd.f32 %v9694_v63, %v4751_v47 }
 0xcd9   : > { %v9696_v8 = vpop.f32.mrf.mxu0 }
 0xcda   : > { %v9720_v40 = vpop.f32.mrf.mxu1 }
 0xcdb   : > { %v9698_v44 = vpop.f32.mrf.mxu0 }
 0xcdc   : > { %v9721_v33 = vpop.f32.mrf.mxu1 }
 0xcdd   : > { %v9699_v62 = vpop.f32.mrf.mxu0  ;;  %v9722_v60 = vadd.f32 %v9721_v33, %v9720_v40  ;;  %v9697_v33 = vadd.f32 %v9696_v8, %v9695_v17 }
 0xcde   : > { %v9723_v7 = vpop.f32.mrf.mxu1  ;;  %v9700_v51 = vadd.f32 %v9699_v62, %v9698_v44  ;;  %v5184_v62 = vpop.permute.xlu1 %5183 }
 0xcdf   : > { %v9701_v14 = vpop.f32.mrf.mxu0  ;;  %v4974_v29 = vadd.f32 %v9722_v60, %v4917_v52 }
 0xce0   : > { %v9724_v21 = vpop.f32.mrf.mxu1 }
 0xce1   : > { %v9702_v34 = vpop.f32.mrf.mxu0  ;;  %v9725_v46 = vadd.f32 %v9724_v21, %v9723_v7 }
 0xce2   : > { %v9726_v25 = vpop.f32.mrf.mxu1 }
 0xce3   : > { %v4977_v35 = vadd.f32 %v9725_v46, %v4920_v42 }
 0xce4   : > { %v9727_v26 = vpop.f32.mrf.mxu1 }
 0xce5   : > { %v9728_v54 = vadd.f32 %v9727_v26, %v9726_v25  ;;  %v4928_v26 = vadd.f32 %v9697_v33, %v4756_v38 }
 0xce6   : > { %v9729_v0 = vpop.f32.mrf.mxu1 }
 0xce7   : > { %v4982_v46 = vadd.f32 %v9728_v54, %v4925_v2 }
 0xce8   : > { %v9730_v15 = vpop.f32.mrf.mxu1 }
 0xcea   : > { %v9732_v55 = vpop.f32.mrf.mxu1 }
 0xcec   : > { %v9733_v5 = vpop.f32.mrf.mxu1 }
 0xcee   : > { %v9735_v24 = vpop.f32.mrf.mxu1  ;;  %v9754_v56 = vpop.f32.mrf.mxu0 }
 0xcf0   : > { %v9736_v37 = vpop.f32.mrf.mxu1  ;;  %v9755_v39 = vpop.f32.mrf.mxu0 }
 0xcf1   : > { %v9756_v27 = vadd.f32 %v9755_v39, %v9754_v56 }
 0xcf2   : > { %v9757_v19 = vpop.f32.mrf.mxu0  ;;  %v5087_v43 = vpop.f32.mrf.mxu1 }
 0xcf3   : > { %v5031_v13 = vadd.f32 %v9756_v27, %v4974_v29  ;;  %v5179_v29 = vpop.permute.xlu0 %5178  ;;  %v9731_v27 = vadd.f32 %v9730_v15, %v9729_v0  ;;  %v9737_v15 = vadd.f32 %v9736_v37, %v9735_v24 }
 0xcf4   : > { %v9758_v28 = vpop.f32.mrf.mxu0  ;;  %v9904_v16 = vpop.f32.mrf.mxu1 }
 0xcf5   : > { %v5088_v18 = vadd.f32 %v5087_v43, %v5031_v13  ;;  %v9759_v58 = vadd.f32 %v9758_v28, %v9757_v19  ;;  %v9734_v43 = vadd.f32 %v9733_v5, %v9732_v55  ;;  %v9703_v28 = vadd.f32 %v9702_v34, %v9701_v14 }
 0xcf6   : > { %v9760_v30 = vpop.f32.mrf.mxu0  ;;  %v5090_v36 = vpop.f32.mrf.mxu1  ;;  %v4985_v0 = vadd.f32 %v9731_v27, %v4928_v26 }
 0xcf7   : > { %vm5110_vm9 = vcmp.ge.f32.partialorder %v5088_v18, 0.0  ;;  %v5116_v49 = vmul.f32 0.2, %v5088_v18  ;;  %v5034_v40 = vadd.f32 %v9759_v58, %v4977_v35  ;;  %v5189_v26 = vpop.permute.xlu0 %5188 }
 0xcf8   : > { %v9761_v7 = vpop.f32.mrf.mxu0  ;;  %v9905_v21 = vpop.f32.mrf.mxu1 }
 0xcf9   : > { %v5122_v60 = vsel %vm5110_vm9, %v5088_v18, %v5116_v49  ;;  %v5091_v56 = vadd.f32 %v5090_v36, %v5034_v40  ;;  %v9762_v52 = vadd.f32 %v9761_v7, %v9760_v30  ;;  %v4936_v36 = vadd.f32 %v9703_v28, %v11998_v9  ;;  %v10143_v28 = vld [vmem:[%s15108_s0] ss:$0 sm:$0xff] }
 0xcfa   : > { %v5164_v3 = vmul.f32 %v5137_v6, %v5122_v60  ;;  %v9763_v10 = vpop.f32.mrf.mxu0  ;;  %v5095_v39 = vpop.f32.mrf.mxu1  ;;  %v4933_v6 = vadd.f32 %v9700_v51, %v11996_v23 }
 0xcfb   : > { %vm5111_vm5 = vcmp.ge.f32.partialorder %v5091_v56, 0.0  ;;  %v5117_v25 = vmul.f32 0.2, %v5091_v56  ;;  %v5039_v13 = vadd.f32 %v9762_v52, %v4982_v46  ;;  %v4993_v54 = vadd.f32 %v9737_v15, %v4936_v36 }
 0xcfc   : > { %v9764_v19 = vpop.f32.mrf.mxu0  ;;  %v9908_v17 = vpop.f32.mrf.mxu1  ;;  %v5206_v8 = vadd.f32 %v5179_v29, %v5164_v3  ;;  %v4990_v58 = vadd.f32 %v9734_v43, %v4933_v6 }
 0xcfd   : > { %v5123_v42 = vsel %vm5111_vm5, %v5091_v56, %v5117_v25  ;;  %v9765_v47 = vadd.f32 %v9764_v19, %v9763_v10  ;;  %v5096_v30 = vadd.f32 %v5095_v39, %v5039_v13  ;;  %vm5803_vm5 = vcmask 138240  }
 0xcfe   : > { %v5165_v16 = vmul.f32 %v5142_v32, %v5123_v42  ;;  %v9766_v63 = vpop.f32.mrf.mxu0  ;;  %5218 = vrot.lane.b32.xlu0 %v5206_v8, %s15121_s8  ;;  %v5098_v44 = vpop.f32.mrf.mxu1 }
 0xcff   : > { %v5042_v55 = vadd.f32 %v9765_v47, %v4985_v0  ;;  %v5118_v23 = vmul.f32 0.2, %v5096_v30  ;;  %vm5112_vm2 = vcmp.ge.f32.partialorder %v5096_v30, 0.0 }
 0xd00   : > { %v9767_v35 = vpop.f32.mrf.mxu0  ;;  %v9909_v38 = vpop.f32.mrf.mxu1  ;;  %v5207_v18 = vadd.f32 %v5184_v62, %v5165_v16 }
 0xd01   : > { %v9768_v5 = vadd.f32 %v9767_v35, %v9766_v63  ;;  %v5099_v33 = vadd.f32 %v5098_v44, %v5042_v55  ;;  %v5124_v56 = vsel %vm5112_vm2, %v5096_v30, %v5118_v23  ;;  %vm5920_vm2 = vcmask 277504  }
 0xd02   : > { %v9769_v14 = vpop.f32.mrf.mxu0  ;;  %v5103_v34 = vpop.f32.mrf.mxu1  ;;  %5220 = vrot.lane.b32.xlu1 %v5207_v18, %s15121_s8  ;;  %v5166_v39 = vmul.f32 %v12008_v4, %v5124_v56 }
 0xd03   : > { %v5047_v32 = vadd.f32 %v9768_v5, %v4990_v58  ;;  %v5119_v9 = vmul.f32 0.2, %v5099_v33  ;;  %vm5113_vm7 = vcmp.ge.f32.partialorder %v5099_v33, 0.0 }
 0xd04   : > { %v9770_v49 = vpop.f32.mrf.mxu0  ;;  %v9912_v40 = vpop.f32.mrf.mxu1  ;;  %v5208_v17 = vadd.f32 %v5189_v26, %v5166_v39 }
 0xd05   : > { %v5104_v24 = vadd.f32 %v5103_v34, %v5047_v32  ;;  %v9771_v37 = vadd.f32 %v9770_v49, %v9769_v14  ;;  %v5125_v46 = vsel %vm5113_vm7, %v5099_v33, %v5119_v9  ;;  %vm5884_vm7 = vcmask 146432  }
 0xd06   : > { %v5106_v7 = vpop.f32.mrf.mxu1  ;;  %v5167_v19 = vmul.f32 %v12010_v12, %v5125_v46 }
 0xd07   : > { %vm5114_vm12 = vcmp.ge.f32.partialorder %v5104_v24, 0.0  ;;  %v5120_v21 = vmul.f32 0.2, %v5104_v24  ;;  %v5050_v2 = vadd.f32 %v9771_v37, %v4993_v54 }
 0xd08   : > { %v9913_v60 = vpop.f32.mrf.mxu1 }
 0xd09   : > { %v5126_v52 = vsel %vm5114_vm12, %v5104_v24, %v5120_v21  ;;  %v5107_v51 = vadd.f32 %v5106_v7, %v5050_v2  ;;  %vm5902_vm12 = vcmask 261120  }
 0xd0a   : > { %v5168_v3 = vmul.f32 %v12000_v45, %v5126_v52  ;;  %v5194_v45 = vpop.permute.xlu1 %5193 }
 0xd0b   : > { %vm5115_vm9 = vcmp.ge.f32.partialorder %v5107_v51, 0.0  ;;  %v5121_v10 = vmul.f32 0.2, %v5107_v51  ;;  %v5209_v4 = vadd.f32 %v5194_v45, %v5167_v19 }
 0xd0c   : > { %v5210_v29 = vadd.f32 %v12004_v20, %v5168_v3 }
 0xd0d   : > { %v5127_v27 = vsel %vm5115_vm9, %v5107_v51, %v5121_v10  ;;  %vm5849_vm9 = vcmask 15360  }
 0xd0e   : > { %v5169_v25 = vmul.f32 %v12002_v31, %v5127_v27  ;;  %5226 = vrot.lane.b32.xlu0 %v5210_v29, %s15121_s8 }
 0xd10   : > { %v5211_v8 = vadd.f32 %v12006_v41, %v5169_v25 }
 0xd12   : > { %5222 = vrot.lane.b32.xlu0 %v5208_v17, %s15121_s8  ;;  %5228 = vrot.lane.b32.xlu1 %v5211_v8, %s15121_s8 }
 0xd16   : > { %5224 = vrot.lane.b32.xlu1 %v5209_v4, %s15121_s8  ;;  %s15134_s8 = sld [smem:[#allocation30_spill]] }
 0xd70   : > { %v5219_v20 = vpop.permute.xlu0 %5218 }
 0xd71   : > { %v5236_v31 = vsel %vm3821_vm0, 0.0, %v5219_v20 }
 0xd72   : > { %v12028_v42 = vsel %vm3824_vm15, %v5236_v31, 0.0 }
 0xd73   : > { %v12042_v16 = vmul.f32 %v10143_v28, %v12028_v42  ;;  %v5278_v44 = vmul.f32 %v12028_v42, %v11449_v22  ;;  %v5260_v32 = vmul.f32 %v12028_v42, %v11457_v57  ;;  %v5287_v20 = vmul.f32 %v12028_v42, %v11434_v50 }
 0xd74   : > { %v5221_v43 = vpop.permute.xlu1 %5220 }
 0xd75   : > { %v5237_v12 = vsel %vm3821_vm0, 0.0, %v5221_v43 }
 0xd76   : > { %v12032_v13 = vsel %vm3824_vm15, %v5237_v12, 0.0 }
 0xd77   : > { %v12036_v41 = vpack.c.bf16 %v12032_v13, %v12028_v42  ;;  %v5279_v47 = vmul.f32 %v12032_v13, %v11449_v22  ;;  %v12045_v63 = vmul.f32 %v10143_v28, %v12032_v13  ;;  %v5261_v36 = vmul.f32 %v12032_v13, %v11457_v57 }
 0xd78   : > { %v5288_v45 = vmul.f32 %v12032_v13, %v11434_v50 }
 0xd79   : > { %5374 = vrot.lane.b32.xlu0 %v12036_v41, %s15122_s9  ;;  %v5254_v62 = vpack.c.bf16 %v12045_v63, %v12042_v16  ;;  %v5284_v6 = vpack.c.bf16 %v5279_v47, %v5278_v44  ;;  %v5266_v40 = vpack.c.bf16 %v5261_v36, %v5260_v32 }
 0xd7a   : > { %v5293_v43 = vpack.c.bf16 %v5288_v45, %v5287_v20 }
 0xd7d   : > { %5353 = vrot.lane.b32.xlu0 %v5284_v6, %s15096_s2 }
 0xd80   : > { %v5227_v0 = vpop.permute.xlu0 %5226 }
 0xd81   : > { %v5240_v15 = vsel %vm3821_vm0, 0.0, %v5227_v0  ;;  %v5395_v0 = vld [vmem:[%s15134_s8] sm:$0xff]  ;;  %s15138_s8 = sld [smem:[#allocation6_spill]] }
 0xd82   : > { %v12057_v58 = vsel %vm3824_vm15, %v5240_v15, 0.0  ;;  %v5403_v15 = vcombine.high %v5395_v0, %v5395_v0 }
 0xd83   : > { %v12075_v24 = vmul.f32 %v10143_v28, %v12057_v58  ;;  %v5273_v29 = vmul.f32 %v12057_v58, %v11447_v48  ;;  %v5291_v46 = vmul.f32 %v12057_v58, %v11434_v50  ;;  %v5282_v19 = vmul.f32 %v12057_v58, %v11449_v22 }
 0xd84   : > { %v5223_v35 = vpop.permute.xlu0 %5222  ;;  %v5229_v38 = vpop.permute.xlu1 %5228  ;;  %v5300_v47 = vmul.f32 %v12057_v58, %v11439_v1  ;;  %v12144_v36 = vrot.slane %v5403_v15, %v11337_v53 }
 0xd85   : > { %v5241_v18 = vsel %vm3821_vm0, 0.0, %v5229_v38  ;;  %v5238_v55 = vsel %vm3821_vm0, 0.0, %v5223_v35  ;;  %v12137_v35 = vrot.slane %v5395_v0, %v11337_v53 }
 0xd86   : > { %v12060_v30 = vsel %vm3824_vm15, %v5241_v18, 0.0  ;;  %v5244_v54 = vsel %vm3824_vm15, %v5238_v55, 0.0  ;;  %v5270_v55 = vmul.f32 %v12032_v13, %v11447_v48 }
 0xd87   : > { %v5259_v5 = vpack.c.bf16 %v12060_v30, %v12057_v58  ;;  %v12078_v37 = vmul.f32 %v10143_v28, %v12060_v30  ;;  %v5262_v7 = vmul.f32 %v5244_v54, %v11457_v57  ;;  %v12086_v56 = vmul.f32 %v10143_v28, %v5244_v54 }
 0xd88   : > { %v5225_v14 = vpop.permute.xlu1 %5224  ;;  %v5289_v52 = vmul.f32 %v5244_v54, %v11434_v50  ;;  %v5274_v10 = vmul.f32 %v12060_v30, %v11447_v48  ;;  %v5292_v39 = vmul.f32 %v12060_v30, %v11434_v50  ;;  %v5283_v26 = vmul.f32 %v12060_v30, %v11449_v22 }
 0xd89   : > { %v5239_v34 = vsel %vm3821_vm0, 0.0, %v5225_v14  ;;  %5378 = vrot.lane.b32.xlu0 %v5259_v5, %s15122_s9  ;;  %v5256_v21 = vpack.c.bf16 %v12078_v37, %v12075_v24  ;;  %v5280_v4 = vmul.f32 %v5244_v54, %v11449_v22  ;;  %v5301_v12 = vmul.f32 %v12060_v30, %v11439_v1 }
 0xd8a   : > { %v5245_v49 = vsel %vm3824_vm15, %v5239_v34, 0.0  ;;  %v5277_v27 = vpack.c.bf16 %v5274_v10, %v5273_v29  ;;  %v5295_v25 = vpack.c.bf16 %v5292_v39, %v5291_v46  ;;  %v5286_v17 = vpack.c.bf16 %v5283_v26, %v5282_v19 }
 0xd8b   : > { %v5258_v23 = vpack.c.bf16 %v5245_v49, %v5244_v54  ;;  %v5263_v33 = vmul.f32 %v5245_v49, %v11457_v57  ;;  %v5290_v60 = vmul.f32 %v5245_v49, %v11434_v50  ;;  %v12088_v9 = vmul.f32 %v10143_v28, %v5245_v49 }
 0xd8c   : > { %v5281_v8 = vmul.f32 %v5245_v49, %v11449_v22  ;;  %v5304_v28 = vpack.c.bf16 %v5301_v12, %v5300_v47  ;;  %v5299_v44 = vmul.f32 %v5245_v49, %v11439_v1  ;;  %v5272_v22 = vmul.f32 %v5245_v49, %v11447_v48 }
 0xd8d   : > { %5320 = vrot.lane.b32.xlu0 %v5266_v40, %s15119_s6  ;;  %5376 = vrot.lane.b32.xlu1 %v5258_v23, %s15122_s9  ;;  %v5267_v2 = vpack.c.bf16 %v5263_v33, %v5262_v7  ;;  %v5255_v51 = vpack.c.bf16 %v12088_v9, %v12086_v56  ;;  %v5294_v3 = vpack.c.bf16 %v5290_v60, %v5289_v52  ;;  %vm5506_vm0 = vcmask 519168  }
 0xd8e   : > { %v5285_v31 = vpack.c.bf16 %v5281_v8, %v5280_v4  ;;  %v5298_v50 = vmul.f32 %v5244_v54, %v11439_v1  ;;  %v5271_v6 = vmul.f32 %v5244_v54, %v11447_v48  ;;  %v5419_v34 = vcombine.high %v12144_v36, %v12144_v36 }
 0xd8f   : > { %v5265_v54 = vmul.f32 %v12060_v30, %v11457_v57  ;;  %v5264_v49 = vmul.f32 %v12057_v58, %v11457_v57  ;;  %v5697_v30 = vld [vmem:[%s15102_s26] sm:$0xf]  ;;  %vm15143_vm15 = vcmask 521216  }
 0xd90   : > { %v5303_v38 = vpack.c.bf16 %v5299_v44, %v5298_v50  ;;  %v5276_v18 = vpack.c.bf16 %v5272_v22, %v5271_v6  ;;  %9385 = vmatprep.mubr.msk.bf16.mxu1 %vm3465_vm1, %v5419_v34 }
 0xd91   : > { %5343 = vrot.lane.b32.xlu0 %v5258_v23, %s15115_s3  ;;  %5322 = vrot.lane.b32.xlu1 %v5267_v2, %s15119_s6  ;;  %v5268_v40 = vpack.c.bf16 %v5265_v54, %v5264_v49 }
 0xd95   : > { %5367 = vrot.lane.b32.xlu0 %v5294_v3, %s15124_s13  ;;  %5345 = vrot.lane.b32.xlu1 %v5259_v5, %s15115_s3 }
 0xd99   : > { %5310 = vrot.lane.b32.xlu0 %v5258_v23, %s15117_s1  ;;  %5312 = vrot.lane.b32.xlu1 %v5259_v5, %s15117_s1  ;;  %v5418_v5 = vcombine.high %v12137_v35, %v12137_v35  ;;  %v5296_v23 = vmul.f32 %v12028_v42, %v11439_v1 }
 0xd9b   : > { %5458 = vmatprep.mubr.bf16.mxu0 %v5418_v5 }
 0xd9d   : > { %5336 = vrot.lane.b32.xlu0 %v5277_v27, %s15116_s4  ;;  %5369 = vrot.lane.b32.xlu1 %v5295_v25, %s15124_s13 }
 0xda1   : > { %5357 = vrot.lane.b32.xlu0 %v5286_v17, %s15096_s2  ;;  %5341 = vrot.lane.b32.xlu1 %v12036_v41, %s15115_s3  ;;  %s15135_s3 = sld [smem:[#allocation31_spill]] }
 0xda5   : > { %5355 = vrot.lane.b32.xlu0 %v5285_v31, %s15096_s2  ;;  %5365 = vrot.lane.b32.xlu1 %v5293_v43, %s15124_s13  ;;  %s15136_s2 = sld [smem:[#allocation44_spill]] }
 0xda7   : > { %v5396_v14 = vld [vmem:[%s15135_s3] sm:$0xf]  ;;  %s15139_s3 = sshll.u32 %s15401_s10, 2 }
 0xda9   : > { %5390 = vrot.lane.b32.xlu0 %v5304_v28, %s15125_s14  ;;  %5308 = vrot.lane.b32.xlu1 %v12036_v41, %s15117_s1  ;;  %v5269_v41 = vmul.f32 %v12028_v42, %v11447_v48  ;;  %v5297_v48 = vmul.f32 %v12032_v13, %v11439_v1 }
 0xdab   : > { %v5275_v32 = vpack.c.bf16 %v5270_v55, %v5269_v41  ;;  %v5302_v33 = vpack.c.bf16 %v5297_v48, %v5296_v23  ;;  %s1627_s0 = scalar_lea.vmem %s15136_s2, %s15139_s3  ;;  %v5620_v48 = vld [vmem:[%s15138_s8 + $0x78] sm:$0xff]  ;;  %v5619_v23 = vld [vmem:[%s15138_s8 + $0x70] sm:$0xff]  ;;  %s15141_s2 = sld [smem:[#allocation45_spill]] }
 0xdac   : > { %s10231_s3 = smov 34  }
 0xdad   : > { %5388 = vrot.lane.b32.xlu0 %v5303_v38, %s15125_s14  ;;  %5334 = vrot.lane.b32.xlu1 %v5276_v18, %s15116_s4 }
 0xdb1   : > { %5399 = vperm.xlu0 %10012, %v5396_v14   ;;  %5332 = vrot.lane.b32.xlu1 %v5275_v32, %s15116_s4  ;;  %s15137_s4 = sld [smem:[#allocation10_spill]] }
 0xdb5   : > { %5324 = vrot.lane.b32.xlu1 %v5268_v40, %s15119_s6 }
 0xdb7   : > { %v5527_v40 = vld [vmem:[%s15137_s4] sm:$0x3f]  ;;  %s15142_s4 = sld [smem:[#allocation12_spill]] }
 0xdb9   : > { %5386 = vrot.lane.b32.xlu1 %v5302_v33, %s15125_s14  ;;  %v5618_v33 = vld [vmem:[%s15138_s8 + $0x68] sm:$0xff] }
 0xdbd   : > { %5700 = vperm.xlu1 %10013, %v5697_v30   ;;  %v5617_v30 = vld [vmem:[%s15138_s8 + $0x60] sm:$0xff] }
 0xdeb   : > { %v5375_v7 = vpop.permute.xlu0 %5374 }
 0xdef   : > { %v5354_v2 = vpop.permute.xlu0 %5353 }
 0xdf0   : > { %9781 = vmatprep.subr.bf16.mxu0 %v5354_v2  ;;  %v5615_v2 = vld [vmem:[%s15138_s8 + $0x50] sm:$0xff] }
 0xdfb   : > { %v5379_v60 = vpop.permute.xlu0 %5378 }
 0xdfc   : > { %5467 = vmatpush1.bf16.msra.mxu1 %v5379_v60  ;;  %v5614_v60 = vld [vmem:[%s15138_s8 + $0x48] sm:$0xff] }
 0xdfd   : > { %5468 = vmatprep.subr.bf16.mxu1 %v15099_v59 }
 0xdff   : > { %v5321_v57 = vpop.permute.xlu0 %5320  ;;  %v5377_v58 = vpop.permute.xlu1 %5376 }
 0xe00   : > { %5469 = vmatpush1.bf16.msra.mxu1 %v5377_v58  ;;  %v5612_v58 = vld [vmem:[%s15138_s8 + $0x38] sm:$0xff] }
 0xe01   : > { %5470 = vmatprep.subr.bf16.mxu1 %v15099_v59 }
 0xe03   : > { %v5344_v13 = vpop.permute.xlu0 %5343  ;;  %v5323_v52 = vpop.permute.xlu1 %5322 }
 0xe04   : > { %9782 = vmatpush3.bf16.msra.mxu0 %v5323_v52  ;;  %5471 = vmatpush1.bf16.msra.mxu1 %v5375_v7  ;;  %v5616_v7 = vld [vmem:[%s15138_s8 + $0x58] sm:$0xff]  ;;  %v5610_v52 = vld [vmem:[%s15138_s8 + $0x28] sm:$0xff] }
 0xe05   : > { %5472 = vmatprep.subr.bf16.mxu1 %v15099_v59 }
 0xe07   : > { %v5368_v1 = vpop.permute.xlu0 %5367  ;;  %v5346_v42 = vpop.permute.xlu1 %5345 }
 0xe08   : > { %9783 = vmatprep.subr.bf16.mxu0 %v5346_v42  ;;  %v5608_v42 = vld [vmem:[%s15138_s8 + $0x18] sm:$0xff] }
 0xe09   : > { %9784 = vmatpush3.bf16.msra.mxu0 %v5321_v57  ;;  %v5613_v57 = vld [vmem:[%s15138_s8 + $0x40] sm:$0xff] }
 0xe0a   : > { %9785 = vmatprep.subr.bf16.mxu0 %v5344_v13  ;;  %v5611_v13 = vld [vmem:[%s15138_s8 + $0x30] sm:$0xff] }
 0xe0b   : > { %v5311_v3 = vpop.permute.xlu0 %5310  ;;  %v5313_v10 = vpop.permute.xlu1 %5312 }
 0xe0d   : > { %9786 = vmatpush3.bf16.msra.mxu0 %v5313_v10  ;;  %v5606_v10 = vld [vmem:[%s15138_s8 + $0x8] sm:$0xff] }
 0xe0f   : > { %v5337_v39 = vpop.permute.xlu0 %5336  ;;  %v5370_v29 = vpop.permute.xlu1 %5369 }
 0xe10   : > { %5473 = vmatpush1.bf16.msra.mxu1 %v5370_v29 }
 0xe11   : > { %5474 = vmatprep.subr.bf16.mxu1 %v15099_v59 }
 0xe13   : > { %v5342_v46 = vpop.permute.xlu1 %5341  ;;  %v5358_v27 = vpop.permute.xlu0 %5357 }
 0xe14   : > { %9787 = vmatprep.subr.bf16.mxu0 %v5342_v46  ;;  %5475 = vmatpush1.bf16.msra.mxu1 %v5368_v1  ;;  %v5609_v1 = vld [vmem:[%s15138_s8 + $0x20] sm:$0xff]  ;;  %v5819_v46 = vsub.s32 0, %v11329_v11 }
 0xe15   : > { %9788 = vmatpush3.bf16.msra.mxu0 %v5311_v3  ;;  %5476 = vmatprep.subr.bf16.mxu1 %v15099_v59  ;;  %v5607_v3 = vld [vmem:[%s15138_s8 + $0x10] sm:$0xff] }
 0xe16   : > { %9789 = vmatprep.subr.bf16.mxu0 %v5337_v39  ;;  %v5605_v39 = vld [vmem:[%s15138_s8] sm:$0xff]  ;;  %s1631_s8 = scalar_lea.vmem %s15141_s2, %s10574_s22  ;;  %s15146_s2 = smov 18  }
 0xe17   : > { %v5366_v25 = vpop.permute.xlu1 %5365  ;;  %v5356_v26 = vpop.permute.xlu0 %5355 }
 0xe18   : > { %5477 = vmatpush1.bf16.msra.mxu1 %v5366_v25 }
 0xe19   : > { %5478 = vmatprep.subr.bf16.mxu1 %v15099_v59 }
 0xe1b   : > { %v5309_v19 = vpop.permute.xlu1 %5308  ;;  %v5391_v8 = vpop.permute.xlu0 %5390 }
 0xe1c   : > { %9790 = vmatpush3.bf16.msra.mxu0 %v5309_v19  ;;  %5479 = vmatpush1.bf16.msra.mxu1 %v5358_v27  ;;  %v5823_v27 = vsub.s32 1, %v11329_v11  ;;  %v5791_v11 = vld [vmem:[%s15142_s4] sm:$0x3]  ;;  %s15147_s4 = smov 16  }
 0xe1d   : > { %5480 = vmatprep.subr.bf16.mxu1 %v15099_v59 }
 0xe1f   : > { %v5335_v17 = vpop.permute.xlu1 %5334  ;;  %v5389_v4 = vpop.permute.xlu0 %5388 }
 0xe20   : > { %9791 = vmatprep.subr.bf16.mxu0 %v5335_v17  ;;  %5481 = vmatpush1.bf16.msra.mxu1 %v5356_v26 }
 0xe21   : > { %9792 = vmatpush3.bf16.msra.mxu0 %v5256_v21  ;;  %5492 = vmatprep.subr.bf16.mxu1 %v15099_v59 }
 0xe23   : > { %v5333_v45 = vpop.permute.xlu1 %5332 }
 0xe24   : > { %9793 = vmatprep.subr.bf16.mxu0 %v5333_v45  ;;  %5493 = vmatpush2.bf16.msra.mxu1 %v5391_v8 }
 0xe25   : > { %9794 = vmatpush3.bf16.msra.mxu0 %v5255_v51  ;;  %5494 = vmatprep.subr.bf16.mxu1 %v15099_v59 }
 0xe27   : > { %v5325_v20 = vpop.permute.xlu1 %5324 }
 0xe28   : > { %9795 = vmatprep.subr.bf16.mxu0 %v5325_v20  ;;  %5495 = vmatpush2.bf16.msra.mxu1 %v5389_v4  ;;  %v5696_v4 = vld [vmem:[%s15107_s16] sm:$0xf]  ;;  %v12234_v20 = vrot.slane %v5791_v11, %v5819_v46 }
 0xe29   : > { %9796 = vmatpush3.bf16.msra.mxu0 %v5254_v62  ;;  %5496 = vmatprep.subr.bf16.mxu1 %v15099_v59 }
 0xe2a   : > { %9914 = vmatprep.subr.mxu0 %v15133_v61  ;;  %15144 = vst [vmem:[#allocation49_spill] sm:$0xff] %v12234_v20 }
 0xe2b   : > { %v5387_v24 = vpop.permute.xlu1 %5386 }
 0xe2c   : > { %5459 = vmatmul.mubr.bf16.vlgmr.msra.gmra.mxu0 %v12137_v35  ;;  %5497 = vmatpush2.bf16.msra.mxu1 %v5387_v24  ;;  %v5400_v63 = vpop.permute.xlu0 %5399  ;;  %v12236_v24 = vrot.slane %v5791_v11, %v5823_v27 }
 0xe2d   : > { %9916 = vmatprep.mubr.msk.f32.mxu0 %vm10223_vm14, %v15133_v61  ;;  %vm5621_vm14 = vcmask 523264  }
 0xe2e   : > { %15145 = vst [vmem:[#allocation50_spill] sm:$0xff] %v12236_v24 }
 0xe2f   : > { %5499 = vmatmul.mubr.bf16.vlgmr.msra.gmra.mxu1 %v12144_v36 }
 0xe30   : > { %6255 = vmatprep.mubr.bf16.mxu1 %v15099_v59 }
 0xeec   : > { %v9797_v37 = vpop.f32.mrf.mxu0 }
 0xeee   : > { %v9798_v21 = vpop.f32.mrf.mxu0 }
 0xeef   : > { %v9799_v56 = vadd.f32 %v9798_v21, %v9797_v37  ;;  %v5500_v16 = vpop.f32.mrf.mxu1  ;;  %v5701_v37 = vpop.permute.xlu1 %5700 }
 0xef0   : > { %v9800_v62 = vpop.f32.mrf.mxu0 }
 0xef1   : > { %v5461_v9 = vadd.f32 %v9799_v56, %v5400_v63  ;;  %v5502_v51 = vpop.f32.mrf.mxu1 }
 0xef2   : > { %v9801_v31 = vpop.f32.mrf.mxu0  ;;  %v10144_v51 = vld [vmem:[%s10536_s11] sm:$0x3f] }
 0xef3   : > { %v12191_v43 = vadd.f32 %v5500_v16, %v5461_v9  ;;  %v5503_v12 = vpop.f32.mrf.mxu1 }
 0xef5   : > { %v5507_v47 = vsel %vm5506_vm0, %v12191_v43, -inf  ;;  %v5504_v28 = vpop.f32.mrf.mxu1 }
 0xef6   : > { %v5508_v44 = vrot.slane %v5507_v47, 4 }
 0xef8   : > { %v5509_v22 = vmax.f32 %v5507_v47, %v5508_v44 }
 0xefa   : > { %v5510_v50 = vrot.slane %v5509_v22, 2 }
 0xefc   : > { %v5511_v6 = vmax.f32 %v5509_v22, %v5510_v50 }
 0xefe   : > { %v5512_v0 = vrot.slane %v5511_v6, 1 }
 0xf00   : > { %v5513_v15 = vmax.f32 %v5511_v6, %v5512_v0 }
 0xf02   : > { %v5514_v35 = vsub.f32 %v12191_v43, %v5513_v15 }
 0xf04   : > { %v5515_v38 = vmul.f32 1.442695, %v5514_v35 }
 0xf06   : > { %10129 = vpow2.f32 %v5515_v38 }
 0xf13   : > { %v10130_v18 = vpop.eup %10129 }
 0xf14   : > { %v5517_v55 = vsel %vm5506_vm0, %v10130_v18, 0.0 }
 0xf15   : > { %v5518_v5 = vrot.slane %v5517_v55, 4 }
 0xf17   : > { %v5519_v36 = vadd.f32 %v5518_v5, %v5517_v55 }
 0xf19   : > { %v5520_v41 = vrot.slane %v5519_v36, 2 }
 0xf1b   : > { %v5521_v14 = vadd.f32 %v5520_v41, %v5519_v36 }
 0xf1d   : > { %v5522_v34 = vrot.slane %v5521_v14, 1 }
 0xf1f   : > { %v5523_v32 = vadd.f32 %v5522_v34, %v5521_v14 }
 0xf21   : > { %10131 = vrcp.f32 %v5523_v32 }
 0xf2e   : > { %v10132_v54 = vpop.eup %10131 }
 0xf2f   : > { %v5525_v49 = vmul.f32 %v10132_v54, %v10130_v18 }
 0xf31   : > { %5526 = vst.msk [vmem:[%s1627_s0] sm:$0xf] %vm5506_vm0, %v5525_v49  ;;  %9915 = vmatpush3.msk.msra.mxu0 %vm1948_vm8, %v5525_v49  ;;  %s15140_s0 = sld [smem:[#allocation13_spill]]  ;;  %vm6030_vm0 = vcmask 777216  }
 0xf32   : > { %9917 = vmatmul.mubr.msk.f32.vlgmr.msra.gmra.mxu0 %vm14925_vm11, %v5527_v40  ;;  %5641 = vmatprep.subr.mxu0 %v5620_v48 }
 0xf33   : > { %5642 = vmatpush1.msra.mxu0 %v5619_v23  ;;  %5689 = vmatprep.mubr.f32.mxu0 %v15133_v61 }
 0xf34   : > { %5643 = vmatprep.subr.mxu0 %v5618_v33 }
 0xf35   : > { %5644 = vmatpush1.msra.mxu0 %v5617_v30 }
 0xf36   : > { %5645 = vmatprep.subr.mxu0 %v5616_v7 }
 0xf37   : > { %5646 = vmatpush1.msra.mxu0 %v5615_v2  ;;  %v5792_v29 = vld [vmem:[%s15140_s0] sm:$0x3]  ;;  %s10232_s0 = smov 32  }
 0xf38   : > { %5647 = vmatprep.subr.mxu0 %v5614_v60  ;;  %v5840_v25 = vrot.slane %v5792_v29, %v5819_v46  ;;  %v5844_v26 = vrot.slane %v5792_v29, %v5823_v27 }
 0xf39   : > { %5648 = vmatpush1.msra.mxu0 %v5613_v57 }
 0xf3a   : > { %5649 = vmatprep.subr.mxu0 %v5612_v58  ;;  %5916 = vrot.lane.b32.xlu0 %v5840_v25, %s10231_s3 }
 0xf3b   : > { %5650 = vmatpush1.msra.mxu0 %v5611_v13  ;;  %5918 = vrot.lane.b32.xlu1 %v5844_v26, %s10231_s3  ;;  %s15022_s3 = smov 96  }
 0xf3c   : > { %5651 = vmatprep.subr.mxu0 %v5610_v52 }
 0xf3d   : > { %5652 = vmatpush1.msra.mxu0 %v5609_v1 }
 0xf3e   : > { %5653 = vmatprep.subr.mxu0 %v5608_v42  ;;  %5898 = vrot.lane.b32.xlu0 %v12234_v20, %s10232_s0 }
 0xf3f   : > { %5654 = vmatpush1.msra.mxu0 %v5607_v3  ;;  %5900 = vrot.lane.b32.xlu1 %v12236_v24, %s10232_s0  ;;  %s15161_s0 = sld [smem:[#allocation33_spill]] }
 0xf40   : > { %5655 = vmatprep.subr.mxu0 %v5606_v10 }
 0xf41   : > { %5656 = vmatpush1.msra.mxu0 %v5605_v39 }
 0xf42   : > { %9388 = vmatmul.mubr.msk.f32.vlgmr.msra.gmra.mxu0 %vm5621_vm14, %v12191_v43  ;;  %v10145_v43 = vld [vmem:[%s10536_s11 + $0x8] sm:$0x3f]  ;;  %s15030_s11 = smov 95   ;;  %vm5988_vm14 = vcmask 908288  }
 0xf43   : > { %5776 = vmatprep.mubr.f32.mxu0 %v15133_v61 }
 0xfac   : > { %v12256_v47 = vpop.permute.xlu0 %5916 }
 0xfad   : > { %v12258_v28 = vpop.permute.xlu1 %5918 }
 0xfae   : > { %15148 = vst [vmem:[#allocation51_spill] sm:$0xff] %v12258_v28  ;;  %v12286_v14 = vsel %vm5920_vm2, %v12256_v47, %v12258_v28  ;;  %vm5976_vm2 = vcmask 916480  }
 0xfaf   : > { %15151 = vst [vmem:[#allocation54_spill] sm:$0xff] %v12286_v14 }
 0xfb0   : > { %v12260_v44 = vpop.permute.xlu0 %5898 }
 0xfb1   : > { %15149 = vst [vmem:[#allocation52_spill] sm:$0xff] %v12260_v44  ;;  %v12262_v22 = vpop.permute.xlu1 %5900 }
 0xfb2   : > { %15150 = vst [vmem:[#allocation53_spill] sm:$0xff] %v12262_v22 }
 0xff2   : > { %v5600_v19 = vpop.f32.mrf.mxu0 }
 0xff3   : > { %5604 = vst.msk [vmem:[%s1631_s8] sm:$0x3f] %vm15143_vm15, %v5600_v19  ;;  %s15007_s8 = smov 17   ;;  %vm6003_vm15 = vcmask 900096  }
 0xff4   : > { %v9918_v17 = vpop.f32.mrf.mxu0 }
0x1002   : > { %v5691_v8 = vpop.f32.mrf.mxu0 }
0x1004   : > { %v5693_v45 = vpop.f32.mrf.mxu0 }
0x1005   : > { %9389 = vmatprep.subr.msk.mxu0 %vm1948_vm8, %v5693_v45 }
0x1006   : > { %9390 = vmatpush1.msk.msra.mxu0 %vm1948_vm8, %v5691_v8 }
0x1007   : > { %9391 = vmatmul.mubr.msk.f32.vlgmr.msra.gmra.mxu0 %vm14925_vm11, %v5696_v4 }
0x10c7   : > { %v5778_v21 = vpop.f32.mrf.mxu0 }
0x10c8   : > { %v5779_v56 = vadd.f32 %v5778_v21, %v5701_v37 }
0x10c9   : > { %v5780_v16 = vpop.f32.mrf.mxu0 }
0x10ca   : > { %v5785_v63 = vrot.slane %v5779_v56, 2  ;;  %v5781_v62 = vadd.f32 %v5780_v16, %v5701_v37 }
0x10cc   : > { %v5786_v9 = vrot.slane %v5781_v62, 2  ;;  %5799 = vrot.lane.b32.xlu0 %v5785_v63, %s15007_s8  ;;  %v5789_v31 = vsel %vm1941_vm10, %v10144_v51, %v5785_v63  ;;  %v12360_v62 = vsel %vm5902_vm12, %v12260_v44, %v12262_v22  ;;  %vm15164_vm12 = vcmask 1040384  }
0x10cd   : > { %15154 = vst [vmem:[#allocation57_spill] sm:$0xff] %v12360_v62 }
0x10ce   : > { %5801 = vrot.lane.b32.xlu1 %v5786_v9, %s15007_s8  ;;  %v5790_v12 = vsel %vm1941_vm10, %v10145_v43, %v5786_v9 }
0x10d0   : > { %5795 = vrot.lane.b32.xlu0 %v5789_v31, %s15007_s8 }
0x10d2   : > { %5797 = vrot.lane.b32.xlu1 %v5790_v12, %s15007_s8 }
0x10d4   : > { %5880 = vrot.lane.b32.xlu0 %v5840_v25, %s15146_s2 }
0x10d6   : > { %5882 = vrot.lane.b32.xlu1 %v5844_v26, %s15146_s2  ;;  %s15162_s2 = sld [smem:[#allocation34_spill]] }
0x10d8   : > { %5863 = vrot.lane.b32.xlu0 %v12234_v20, %s15147_s4 }
0x10da   : > { %5865 = vrot.lane.b32.xlu1 %v12236_v24, %s15147_s4  ;;  %s15163_s4 = sld [smem:[#allocation35_spill]] }
0x10dc   : > { %5845 = vrot.lane.b32.xlu0 %v5840_v25, %s15112_s5 }
0x10de   : > { %5847 = vrot.lane.b32.xlu1 %v5844_v26, %s15112_s5  ;;  %s14923_s5 = smov 94  }
0x113e   : > { %v5800_v50 = vpop.permute.xlu0 %5799 }
0x113f   : > { %v12265_v0 = vsel %vm5803_vm5, 0.0, %v5800_v50 }
0x1140   : > { %v5802_v6 = vpop.permute.xlu1 %5801  ;;  %v5928_v55 = vmul.f32 %v12256_v47, %v12265_v0  ;;  %v5910_v58 = vmul.f32 %v12260_v44, %v12265_v0  ;;  %v12336_v19 = vmul.f32 %v12234_v20, %v12265_v0 }
0x1141   : > { %v12279_v36 = vsel %vm5803_vm5, %v5800_v50, %v5802_v6  ;;  %v12299_v48 = vsel %vm5803_vm5, %v5802_v6, 0.0 }
0x1142   : > { %v5796_v15 = vpop.permute.xlu0 %5795  ;;  %v5929_v40 = vmul.f32 %v12286_v14, %v12279_v36  ;;  %v5930_v57 = vmul.f32 %v12258_v28, %v12299_v48  ;;  %v12348_v45 = vmul.f32 %v12236_v24, %v12279_v36  ;;  %v5912_v12 = vmul.f32 %v12262_v22, %v12299_v48 }
0x1143   : > { %v12268_v35 = vsel %vm5803_vm5, 0.0, %v5796_v15  ;;  %v5911_v6 = vmul.f32 %v12360_v62, %v12279_v36 }
0x1144   : > { %v5798_v38 = vpop.permute.xlu1 %5797  ;;  %v5925_v18 = vmul.f32 %v12256_v47, %v12268_v35  ;;  %v12276_v5 = vpack.c.bf16 %v12265_v0, %v12268_v35  ;;  %v5907_v33 = vmul.f32 %v12260_v44, %v12268_v35  ;;  %v12328_v29 = vmul.f32 %v12234_v20, %v12268_v35 }
0x1145   : > { %v12282_v41 = vsel %vm5803_vm5, %v5796_v15, %v5798_v38  ;;  %v12292_v49 = vsel %vm5803_vm5, %v5798_v38, 0.0 }
0x1146   : > { %v5931_v34 = vpack.c.bf16 %v5928_v55, %v5925_v18  ;;  %v5979_v32 = vrot.slane %v12276_v5, 4  ;;  %v5926_v54 = vmul.f32 %v12286_v14, %v12282_v41  ;;  %v12301_v23 = vpop.permute.xlu0 %5880  ;;  %v6021_v30 = vrot.slane %v12276_v5, 5 }
0x1147   : > { %15152 = vst [vmem:[#allocation55_spill] sm:$0xff] %v12301_v23  ;;  %v5927_v2 = vmul.f32 %v12258_v28, %v12292_v49  ;;  %v5834_v60 = vpack.c.bf16 %v12279_v36, %v12282_v41  ;;  %v5835_v1 = vpack.c.bf16 %v12299_v48, %v12292_v49  ;;  %v5913_v42 = vpack.c.bf16 %v5910_v58, %v5907_v33 }
0x1148   : > { %6036 = vrot.lane.b32.xlu0 %v5931_v34, %s14923_s5  ;;  %5982 = vrot.lane.b32.xlu1 %v5979_v32, %s15122_s9  ;;  %v5932_v7 = vpack.c.bf16 %v5929_v40, %v5926_v54  ;;  %v5889_v10 = vmul.f32 %v12301_v23, %v12268_v35  ;;  %v5892_v39 = vmul.f32 %v12301_v23, %v12265_v0  ;;  %v12338_v17 = vpop.permute.xlu1 %5882 }
0x1149   : > { %v5933_v13 = vpack.c.bf16 %v5930_v57, %v5927_v2  ;;  %v6022_v52 = vrot.slane %v5834_v60, 5  ;;  %v6023_v46 = vrot.slane %v5835_v1, 5  ;;  %v6009_v27 = vrot.slane %v5913_v42, 2 }
0x114a   : > { %v12318_v3 = vpop.permute.xlu0 %5863  ;;  %v12344_v8 = vmul.f32 %v12236_v24, %v12282_v41  ;;  %v5831_v4 = vpack.c.bf16 %v12336_v19, %v12328_v29  ;;  %v5981_v11 = vrot.slane %v5835_v1, 4  ;;  %v5980_v37 = vrot.slane %v5834_v60, 4 }
0x114b   : > { %15153 = vst [vmem:[#allocation56_spill] sm:$0xff] %v12318_v3  ;;  %v5871_v25 = vmul.f32 %v12318_v3, %v12268_v35  ;;  %v5874_v26 = vmul.f32 %v12318_v3, %v12265_v0  ;;  %v5895_v21 = vpack.c.bf16 %v5892_v39, %v5889_v10  ;;  %v5909_v63 = vmul.f32 %v12262_v22, %v12292_v49 }
0x114c   : > { %6024 = vrot.lane.b32.xlu0 %v6021_v30, %s15030_s11  ;;  %6038 = vrot.lane.b32.xlu1 %v5932_v7, %s14923_s5  ;;  %v5832_v16 = vpack.c.bf16 %v12348_v45, %v12344_v8  ;;  %v12362_v9 = vpop.permute.xlu1 %5865  ;;  %v5908_v43 = vmul.f32 %v12360_v62, %v12282_v41  ;;  %v12370_v50 = vsel %vm5884_vm7, %v12301_v23, %v12338_v17  ;;  %v5938_v15 = vrot.slane %v5834_v60, 3  ;;  %vm15165_vm7 = vmmov %vm15164_vm12 }
0x114d   : > { %v5877_v56 = vpack.c.bf16 %v5874_v26, %v5871_v25  ;;  %15155 = vst [vmem:[#allocation58_spill] sm:$0xff] %v12362_v9  ;;  %v5994_v51 = vrot.slane %v5895_v21, 7  ;;  %15156 = vst [vmem:[#allocation59_spill] sm:$0xff] %v12370_v50  ;;  %v5915_v38 = vpack.c.bf16 %v5912_v12, %v5909_v63  ;;  %v5891_v18 = vmul.f32 %v12338_v17, %v12292_v49  ;;  %v6100_v12 = vld [vmem:[%s15161_s0 + $0x18] sm:$0xff] }
0x114e   : > { %v5894_v55 = vmul.f32 %v12338_v17, %v12299_v48  ;;  %v5939_v34 = vrot.slane %v5835_v1, 3  ;;  %v5914_v32 = vpack.c.bf16 %v5911_v6, %v5908_v43  ;;  %v5890_v54 = vmul.f32 %v12370_v50, %v12282_v41  ;;  %v12397_v58 = vpop.permute.xlu0 %5845  ;;  %v6099_v6 = vld [vmem:[%s15161_s0 + $0x10] sm:$0xff] }
0x114f   : > { %v5967_v31 = vrot.slane %v5877_v56, 1  ;;  %v5893_v40 = vmul.f32 %v12370_v50, %v12279_v36  ;;  %v12387_v33 = vsel %vm3651_vm13, %v12318_v3, %v12362_v9  ;;  %v6011_v7 = vrot.slane %v5915_v38, 2  ;;  %15159 = vst [vmem:[#allocation62_spill] sm:$0xff] %v12397_v58  ;;  %v6097_v38 = vld [vmem:[%s15161_s0] sm:$0xff] }
0x1150   : > { %6040 = vrot.lane.b32.xlu0 %v5933_v13, %s14923_s5  ;;  %6026 = vrot.lane.b32.xlu1 %v6022_v52, %s15030_s11  ;;  %15157 = vst [vmem:[#allocation60_spill] sm:$0xff] %v12387_v33  ;;  %v12389_v30 = vpop.permute.xlu1 %5847  ;;  %v5897_v2 = vpack.c.bf16 %v5894_v55, %v5891_v18  ;;  %v5873_v60 = vmul.f32 %v12362_v9, %v12292_v49  ;;  %v6010_v13 = vrot.slane %v5914_v32, 2  ;;  %v6391_v18 = vld [vmem:[%s15162_s2 + $0x18] sm:$0xff]  ;;  %v6389_v32 = vld [vmem:[%s15162_s2 + $0x8] sm:$0xff]  ;;  %vm6042_vm13 = vcmask 769024   ;;  %s15166_s5 = sld [smem:[#allocation32_spill]] }
0x1151   : > { %15158 = vst [vmem:[#allocation61_spill] sm:$0xff] %v12389_v30  ;;  %v5876_v57 = vmul.f32 %v12362_v9, %v12299_v48  ;;  %v5896_v52 = vpack.c.bf16 %v5893_v40, %v5890_v54  ;;  %v5872_v1 = vmul.f32 %v12387_v33, %v12282_v41  ;;  %v5875_v42 = vmul.f32 %v12387_v33, %v12279_v36  ;;  %v6487_v55 = vld [vmem:[%s15163_s4 + $0x18] sm:$0xff]  ;;  %v6388_v54 = vld [vmem:[%s15162_s2] sm:$0xff]  ;;  %v6485_v40 = vld [vmem:[%s15163_s4 + $0x8] sm:$0xff] }
0x1152   : > { %v12405_v10 = vsel %vm5849_vm9, %v12397_v58, %v12389_v30  ;;  %v5996_v39 = vrot.slane %v5897_v2, 7  ;;  %v5859_v25 = vmul.f32 %v12389_v30, %v12299_v48  ;;  %v5854_v56 = vmul.f32 %v12397_v58, %v12268_v35  ;;  %v6104_v2 = vld [vmem:[%s15161_s0 + $0x38] sm:$0xff] }
0x1153   : > { %15160 = vst [vmem:[#allocation63_spill] sm:$0xff] %v12405_v10  ;;  %v5995_v26 = vrot.slane %v5896_v52, 7  ;;  %v5858_v21 = vmul.f32 %v12405_v10, %v12279_v36  ;;  %v5937_v35 = vrot.slane %v12276_v5, 3  ;;  %v6390_v5 = vld [vmem:[%s15162_s2 + $0x10] sm:$0xff]  ;;  %v6395_v52 = vld [vmem:[%s15162_s2 + $0x38] sm:$0xff]  ;;  %vm5961_vm9 = vcmask 1031168  }
0x1154   : > { %6028 = vrot.lane.b32.xlu0 %v6023_v46, %s15030_s11  ;;  %6012 = vrot.lane.b32.xlu1 %v6009_v27, %s15022_s3  ;;  %v5879_v46 = vpack.c.bf16 %v5876_v57, %v5873_v60  ;;  %v5856_v27 = vmul.f32 %v12389_v30, %v12292_v49  ;;  %v5857_v49 = vmul.f32 %v12397_v58, %v12265_v0  ;;  %v6103_v60 = vld [vmem:[%s15161_s0 + $0x30] sm:$0xff]  ;;  %v6102_v57 = vld [vmem:[%s15161_s0 + $0x28] sm:$0xff] }
0x1156   : > { %v5969_v48 = vrot.slane %v5879_v46, 1  ;;  %v5860_v43 = vpack.c.bf16 %v5857_v49, %v5854_v56  ;;  %v6393_v46 = vld [vmem:[%s15162_s2 + $0x28] sm:$0xff]  ;;  %v6105_v56 = vld [vmem:[%s15161_s0 + $0x40] sm:$0xff]  ;;  %v6399_v49 = vld [vmem:[%s15162_s2 + $0x58] sm:$0xff] }
0x1157   : > { %v10090_v8 = vld [vmem:[%s15166_s5 + $0x10] sm:$0xff]   ;;  %v10091_v29 = vld [vmem:[%s15166_s5 + $0x18] sm:$0xff]   ;;  %v10092_v19 = vld [vmem:[%s15166_s5 + $0x20] sm:$0xff]  }
0x1158   : > { %5986 = vrot.lane.b32.xlu0 %v5981_v11, %s15122_s9  ;;  %5984 = vrot.lane.b32.xlu1 %v5980_v37, %s15122_s9  ;;  %v5878_v11 = vpack.c.bf16 %v5875_v42, %v5872_v1  ;;  %v5855_v37 = vmul.f32 %v12405_v10, %v12282_v41  ;;  %v5952_v0 = vrot.slane %v5860_v43, 6  ;;  %v6394_v1 = vld [vmem:[%s15162_s2 + $0x30] sm:$0xff]  ;;  %v6491_v42 = vld [vmem:[%s15163_s4 + $0x38] sm:$0xff] }
0x1159   : > { %v6492_v43 = vld [vmem:[%s15163_s4 + $0x40] sm:$0xff]  ;;  %v10093_v45 = vld [vmem:[%s15166_s5 + $0x28] sm:$0xff]  }
0x115a   : > { %v5968_v63 = vrot.slane %v5878_v11, 1  ;;  %v6489_v11 = vld [vmem:[%s15163_s4 + $0x28] sm:$0xff] }
0x115c   : > { %5997 = vrot.lane.b32.xlu0 %v5994_v51, %s15125_s14  ;;  %5970 = vrot.lane.b32.xlu1 %v5967_v31, %s15124_s13  ;;  %v5862_v51 = vpack.c.bf16 %v5859_v25, %v5856_v27  ;;  %v5861_v31 = vpack.c.bf16 %v5858_v21, %v5855_v37  ;;  %v6392_v27 = vld [vmem:[%s15162_s2 + $0x20] sm:$0xff]  ;;  %v6108_v25 = vld [vmem:[%s15161_s0 + $0x58] sm:$0xff] }
0x115d   : > { %v6488_v37 = vld [vmem:[%s15163_s4 + $0x20] sm:$0xff]  ;;  %v6106_v21 = vld [vmem:[%s15161_s0 + $0x48] sm:$0xff] }
0x115e   : > { %v5954_v36 = vrot.slane %v5862_v51, 6  ;;  %v5953_v41 = vrot.slane %v5861_v31, 6  ;;  %v6494_v51 = vld [vmem:[%s15163_s4 + $0x50] sm:$0xff]  ;;  %v6397_v31 = vld [vmem:[%s15162_s2 + $0x48] sm:$0xff] }
0x1160   : > { %5942 = vrot.lane.b32.xlu0 %v5938_v15, %s15117_s1  ;;  %5944 = vrot.lane.b32.xlu1 %v5939_v34, %s15117_s1  ;;  %v6098_v15 = vld [vmem:[%s15161_s0 + $0x8] sm:$0xff]  ;;  %v6486_v34 = vld [vmem:[%s15163_s4 + $0x10] sm:$0xff] }
0x1164   : > { %6016 = vrot.lane.b32.xlu0 %v6011_v7, %s15022_s3  ;;  %6014 = vrot.lane.b32.xlu1 %v6010_v13, %s15022_s3  ;;  %v6484_v7 = vld [vmem:[%s15163_s4] sm:$0xff] }
0x1165   : > { %v6101_v13 = vld [vmem:[%s15161_s0 + $0x20] sm:$0xff] }
0x1168   : > { %6001 = vrot.lane.b32.xlu0 %v5996_v39, %s15125_s14  ;;  %5999 = vrot.lane.b32.xlu1 %v5995_v26, %s15125_s14  ;;  %v6490_v39 = vld [vmem:[%s15163_s4 + $0x30] sm:$0xff] }
0x1169   : > { %v6107_v26 = vld [vmem:[%s15161_s0 + $0x50] sm:$0xff]  ;;  %s15317_s0 = sld [smem:[#allocation37_spill]] }
0x116c   : > { %5974 = vrot.lane.b32.xlu0 %v5969_v48, %s15124_s13  ;;  %5972 = vrot.lane.b32.xlu1 %v5968_v63, %s15124_s13  ;;  %v6398_v48 = vld [vmem:[%s15162_s2 + $0x50] sm:$0xff]  ;;  %v6495_v63 = vld [vmem:[%s15163_s4 + $0x58] sm:$0xff] }
0x1170   : > { %5959 = vrot.lane.b32.xlu1 %v5954_v36, %s15119_s6  ;;  %5957 = vrot.lane.b32.xlu0 %v5953_v41, %s15119_s6  ;;  %v6396_v36 = vld [vmem:[%s15162_s2 + $0x40] sm:$0xff]  ;;  %v6493_v41 = vld [vmem:[%s15163_s4 + $0x48] sm:$0xff]  ;;  %s15324_s2 = sld [smem:[#allocation38_spill]] }
0x1171   : > { %s15325_s4 = sld [smem:[#allocation39_spill]] }
0x1174   : > { %5955 = vrot.lane.b32.xlu1 %v5952_v0, %s15119_s6  ;;  %5940 = vrot.lane.b32.xlu0 %v5937_v35, %s15117_s1 }
0x1178   : > { %6126 = vperm.xlu1 %10013, %v6100_v12   ;;  %6121 = vperm.xlu0 %10012, %v6099_v6  }
0x117c   : > { %6116 = vperm.xlu1 %10013, %v6098_v15   ;;  %6111 = vperm.xlu0 %10012, %v6097_v38  }
0x1180   : > { %6417 = vperm.xlu1 %10013, %v6391_v18   ;;  %6412 = vperm.xlu0 %10012, %v6390_v5  }
0x1184   : > { %6513 = vperm.xlu1 %10013, %v6487_v55   ;;  %6508 = vperm.xlu0 %10012, %v6486_v34  }
0x1188   : > { %6407 = vperm.xlu1 %10013, %v6389_v32   ;;  %6402 = vperm.xlu0 %10012, %v6388_v54  }
0x118c   : > { %6503 = vperm.xlu1 %10013, %v6485_v40   ;;  %6498 = vperm.xlu0 %10012, %v6484_v7  }
0x1190   : > { %6146 = vperm.xlu1 %10013, %v6104_v2   ;;  %6141 = vperm.xlu0 %10012, %v6103_v60  }
0x1194   : > { %6136 = vperm.xlu1 %10013, %v6102_v57   ;;  %6131 = vperm.xlu0 %10012, %v6101_v13  }
0x1198   : > { %6437 = vperm.xlu1 %10013, %v6395_v52   ;;  %6432 = vperm.xlu0 %10012, %v6394_v1  }
0x119c   : > { %6533 = vperm.xlu1 %10013, %v6491_v42   ;;  %6528 = vperm.xlu0 %10012, %v6490_v39  }
0x11a0   : > { %6427 = vperm.xlu1 %10013, %v6393_v46   ;;  %6422 = vperm.xlu0 %10012, %v6392_v27  }
0x11a4   : > { %6166 = vperm.xlu1 %10013, %v6108_v25   ;;  %6161 = vperm.xlu0 %10012, %v6107_v26  }
0x11a8   : > { %6523 = vperm.xlu1 %10013, %v6489_v11   ;;  %6518 = vperm.xlu0 %10012, %v6488_v37  }
0x11ac   : > { %6156 = vperm.xlu1 %10013, %v6106_v21   ;;  %6151 = vperm.xlu0 %10012, %v6105_v56  }
0x11b0   : > { %6457 = vperm.xlu1 %10013, %v6399_v49   ;;  %6452 = vperm.xlu0 %10012, %v6398_v48  }
0x11b4   : > { %6553 = vperm.xlu1 %10013, %v6495_v63   ;;  %6548 = vperm.xlu0 %10012, %v6494_v51  }
0x11b8   : > { %6447 = vperm.xlu1 %10013, %v6397_v31   ;;  %6442 = vperm.xlu0 %10012, %v6396_v36  }
0x11ba   : > { %v5983_v0 = vpop.permute.xlu1 %5982  ;;  %v6037_v35 = vpop.permute.xlu0 %6036 }
0x11bc   : > { %6543 = vperm.xlu1 %10013, %v6493_v41   ;;  %6538 = vperm.xlu0 %10012, %v6492_v43  }
0x11be   : > { %v6039_v12 = vpop.permute.xlu1 %6038  ;;  %v6025_v6 = vpop.permute.xlu0 %6024 }
0x11bf   : > { %v6043_v15 = vsel %vm6042_vm13, %v6037_v35, %v6039_v12 }
0x11c0   : > { %v6218_v55 = vsel %vm1958_vm6, %v6043_v15, 0 }
0x11c2   : > { %v6027_v38 = vpop.permute.xlu1 %6026  ;;  %v6041_v18 = vpop.permute.xlu0 %6040 }
0x11c3   : > { %v6044_v5 = vsel %vm6042_vm13, %v6039_v12, %v6041_v18  ;;  %v6031_v1 = vsel %vm6030_vm0, %v6025_v6, %v6027_v38 }
0x11c4   : > { %9398 = vmatprep.subr.msk.bf16.mxu1 %vm1958_vm6, %v6044_v5 }
0x11c5   : > { %6228 = vmatpush1.bf16.msra.mxu1 %v6218_v55 }
0x11c6   : > { %v6013_v34 = vpop.permute.xlu1 %6012  ;;  %v6029_v32 = vpop.permute.xlu0 %6028 }
0x11c7   : > { %v6032_v42 = vsel %vm6030_vm0, %v6027_v38, %v6029_v32 }
0x11ca   : > { %v5985_v54 = vpop.permute.xlu1 %5984  ;;  %v5987_v40 = vpop.permute.xlu0 %5986 }
0x11cb   : > { %v5989_v37 = vsel %vm5988_vm14, %v5983_v0, %v5985_v54  ;;  %v5990_v21 = vsel %vm5988_vm14, %v5985_v54, %v5987_v40 }
0x11ce   : > { %v5971_v7 = vpop.permute.xlu1 %5970  ;;  %v5998_v2 = vpop.permute.xlu0 %5997 }
0x11d2   : > { %v5945_v60 = vpop.permute.xlu1 %5944  ;;  %v5943_v57 = vpop.permute.xlu0 %5942 }
0x11d6   : > { %v6015_v13 = vpop.permute.xlu1 %6014  ;;  %v6017_v52 = vpop.permute.xlu0 %6016 }
0x11d7   : > { %v6019_v39 = vsel %vm2914_vm3, %v6013_v34, %v6015_v13  ;;  %v6020_v46 = vsel %vm2914_vm3, %v6015_v13, %v6017_v52  ;;  %v10088_v52 = vld [vmem:[%s15166_s5] sm:$0xff]  }
0x11d8   : > { %v6083_v27 = vsel %vm1937_vm4, %v6020_v46, %v6032_v42  ;;  %v6080_v25 = vsel %vm1937_vm4, %v6019_v39, %v6031_v1  ;;  %vm5946_vm4 = vcmask 1039360  }
0x11d9   : > { %6229 = vmatprep.subr.bf16.mxu1 %v6083_v27  ;;  %v5948_v38 = vsel %vm5946_vm4, %v5943_v57, %v5945_v60 }
0x11da   : > { %v6000_v26 = vpop.permute.xlu1 %5999  ;;  %6230 = vmatpush1.bf16.msra.mxu1 %v6080_v25  ;;  %v6002_v11 = vpop.permute.xlu0 %6001  ;;  %v6051_v60 = vsel %vm1958_vm6, %v5832_v16, %v5948_v38 }
0x11db   : > { %v6004_v56 = vsel %vm6003_vm15, %v5998_v2, %v6000_v26  ;;  %v6005_v49 = vsel %vm6003_vm15, %v6000_v26, %v6002_v11 }
0x11dc   : > { %v6072_v48 = vsel %vm15164_vm12, %v5990_v21, %v6005_v49  ;;  %v6070_v63 = vsel %vm15165_vm7, %v5989_v37, %v6004_v56  ;;  %vm15168_vm12 = vcmask 1046528  }
0x11dd   : > { %v6077_v51 = vsel %vm1941_vm10, %v6072_v48, %v6020_v46  ;;  %v6074_v31 = vsel %vm1941_vm10, %v6070_v63, %v6019_v39  ;;  %vm15167_vm10 = vcmask 1041408   ;;  %vm15170_vm11 = vmmov %vm15168_vm12 }
0x11de   : > { %v5973_v36 = vpop.permute.xlu1 %5972  ;;  %6231 = vmatprep.subr.bf16.mxu1 %v6077_v51  ;;  %v5975_v41 = vpop.permute.xlu0 %5974  ;;  %vm15169_vm7 = vmmov %vm15167_vm10 }
0x11df   : > { %v5977_v43 = vsel %vm5976_vm2, %v5971_v7, %v5973_v36  ;;  %v5978_v0 = vsel %vm5976_vm2, %v5973_v36, %v5975_v41  ;;  %6232 = vmatpush1.bf16.msra.mxu1 %v6074_v31 }
0x11e0   : > { %v6067_v35 = vsel %vm1948_vm8, %v5978_v0, %v5990_v21  ;;  %v6064_v15 = vsel %vm1948_vm8, %v5977_v43, %v5989_v37 }
0x11e1   : > { %6233 = vmatprep.subr.bf16.mxu1 %v6067_v35 }
0x11e2   : > { %v5960_v12 = vpop.permute.xlu1 %5959  ;;  %v5958_v6 = vpop.permute.xlu0 %5957 }
0x11e3   : > { %v5963_v18 = vsel %vm5961_vm9, %v5958_v6, %v5960_v12  ;;  %6234 = vmatpush1.bf16.msra.mxu1 %v6064_v15 }
0x11e4   : > { %v6056_v5 = vsel %vm15167_vm10, %v5948_v38, %v5963_v18  ;;  %vm15171_vm10 = vcmask 736256  }
0x11e5   : > { %v6061_v55 = vsel %vm15168_vm12, %v6056_v5, %v5978_v0  ;;  %vm15173_vm12 = vmmov %vm15171_vm10 }
0x11e6   : > { %v5956_v34 = vpop.permute.xlu1 %5955  ;;  %6235 = vmatprep.subr.bf16.mxu1 %v6061_v55  ;;  %v5941_v32 = vpop.permute.xlu0 %5940 }
0x11e7   : > { %v5962_v54 = vsel %vm5961_vm9, %v5956_v34, %v5958_v6  ;;  %v5947_v40 = vsel %vm5946_vm4, %v5941_v32, %v5943_v57  ;;  %v10089_v57 = vld [vmem:[%s15166_s5 + $0x8] sm:$0xff]  }
0x11e8   : > { %v6054_v7 = vsel %vm15169_vm7, %v5947_v40, %v5962_v54  ;;  %v6047_v13 = vsel %vm1958_vm6, %v5831_v4, %v5947_v40  ;;  %vm15174_vm7 = vmmov %vm15171_vm10 }
0x11e9   : > { %v6058_v2 = vsel %vm15170_vm11, %v6054_v7, %v5977_v43  ;;  %vm15172_vm11 = vmmov %vm15171_vm10 }
0x11ea   : > { %6236 = vmatpush1.bf16.msra.mxu1 %v6058_v2  ;;  %vm15175_vm6 = vmmov %vm15174_vm7 }
0x11eb   : > { %6237 = vmatprep.subr.bf16.mxu1 %v6051_v60 }
0x11ee   : > { %6238 = vmatpush1.bf16.msra.mxu1 %v6047_v13 }
0x11f1   : > { %9399 = vmatmul.mubr.msk.bf16.vlgmr.msra.gmra.mxu1 %vm15171_vm10, %v10088_v52  ;;  %vm15176_vm10 = vmmov %vm15175_vm6 }
0x11f2   : > { %6265 = vmatprep.mubr.bf16.mxu1 %v15099_v59 }
0x11f3   : > { %v6122_v4 = vpop.permute.xlu0 %6121  ;;  %v12521_v16 = vpop.permute.xlu1 %6126 }
0x11f7   : > { %v6112_v1 = vpop.permute.xlu0 %6111  ;;  %v6117_v42 = vpop.permute.xlu1 %6116 }
0x11f9   : > { %9400 = vmatmul.mubr.msk.bf16.gmra.mxu1 %vm15172_vm11, %v10089_v57 }
0x11fa   : > { %6275 = vmatprep.mubr.bf16.mxu1 %v15099_v59 }
0x11fb   : > { %v12523_v39 = vpop.permute.xlu0 %6412  ;;  %v12525_v46 = vpop.permute.xlu1 %6417 }
0x11ff   : > { %v12527_v27 = vpop.permute.xlu0 %6508  ;;  %v12529_v25 = vpop.permute.xlu1 %6513 }
0x1201   : > { %9401 = vmatmul.mubr.msk.bf16.gmra.mxu1 %vm15173_vm12, %v10090_v8 }
0x1202   : > { %6285 = vmatprep.mubr.bf16.mxu1 %v15099_v59 }
0x1203   : > { %v6403_v26 = vpop.permute.xlu0 %6402  ;;  %v6408_v11 = vpop.permute.xlu1 %6407 }
0x1207   : > { %v6499_v37 = vpop.permute.xlu0 %6498  ;;  %v6504_v21 = vpop.permute.xlu1 %6503 }
0x1209   : > { %9402 = vmatmul.mubr.msk.bf16.gmra.mxu1 %vm15174_vm7, %v10091_v29 }
0x120a   : > { %6295 = vmatprep.mubr.bf16.mxu1 %v15099_v59 }
0x120b   : > { %v12531_v56 = vpop.permute.xlu0 %6141  ;;  %v12533_v49 = vpop.permute.xlu1 %6146 }
0x120f   : > { %v12535_v48 = vpop.permute.xlu0 %6131  ;;  %v12537_v63 = vpop.permute.xlu1 %6136 }
0x1211   : > { %9403 = vmatmul.mubr.msk.bf16.gmra.mxu1 %vm15175_vm6, %v10092_v19 }
0x1212   : > { %6305 = vmatprep.mubr.bf16.mxu1 %v15099_v59 }
0x1213   : > { %v12539_v51 = vpop.permute.xlu0 %6432  ;;  %v12541_v31 = vpop.permute.xlu1 %6437 }
0x1217   : > { %v12543_v36 = vpop.permute.xlu0 %6528  ;;  %v12545_v41 = vpop.permute.xlu1 %6533 }
0x1219   : > { %9404 = vmatmul.mubr.msk.bf16.gmra.mxu1 %vm15176_vm10, %v10093_v45 }
0x121b   : > { %v12547_v43 = vpop.permute.xlu0 %6422  ;;  %v12549_v35 = vpop.permute.xlu1 %6427 }
0x121f   : > { %v12551_v15 = vpop.permute.xlu0 %6161  ;;  %v12553_v7 = vpop.permute.xlu1 %6166 }
0x1223   : > { %v12555_v29 = vpop.permute.xlu0 %6518 }
0x12b1   : > { %v6257_v0 = vpop.f32.mrf.mxu1 }
0x12b2   : > { %v6258_v12 = vadd.f32 %v6257_v0, %v6112_v1 }
0x12b3   : > { %v6259_v6 = vpop.f32.mrf.mxu1 }
0x12b4   : > { %vm6316_vm11 = vcmp.ge.f32.partialorder %v6258_v12, 0.0  ;;  %v6340_v38 = vmul.f32 0.2, %v6258_v12  ;;  %v6260_v18 = vadd.f32 %v6259_v6, %v6112_v1 }
0x12b5   : > { %v6261_v5 = vpop.f32.mrf.mxu1 }
0x12b6   : > { %v6364_v55 = vsel %vm6316_vm11, %v6258_v12, %v6340_v38  ;;  %vm6317_vm12 = vcmp.ge.f32.partialorder %v6260_v18, 0.0  ;;  %v6341_v34 = vmul.f32 0.2, %v6260_v18  ;;  %v6262_v32 = vadd.f32 %v6261_v5, %v6117_v42 }
0x12b7   : > { %v6460_v54 = vmul.f32 %v6403_v26, %v6364_v55  ;;  %v6263_v40 = vpop.f32.mrf.mxu1 }
0x12b8   : > { %v6365_v2 = vsel %vm6317_vm12, %v6260_v18, %v6341_v34  ;;  %vm6318_vm7 = vcmp.ge.f32.partialorder %v6262_v32, 0.0  ;;  %v6342_v60 = vmul.f32 0.2, %v6262_v32  ;;  %v6264_v13 = vadd.f32 %v6263_v40, %v6117_v42  ;;  %v12559_v34 = vpop.permute.xlu1 %6523 }
0x12b9   : > { %v6461_v52 = vmul.f32 %v6403_v26, %v6365_v2  ;;  %v6267_v57 = vpop.f32.mrf.mxu1  ;;  %v6556_v8 = vadd.f32 %v6499_v37, %v6460_v54 }
0x12ba   : > { %v6366_v19 = vsel %vm6318_vm7, %v6262_v32, %v6342_v60  ;;  %vm6319_vm6 = vcmp.ge.f32.partialorder %v6264_v13, 0.0  ;;  %v6343_v45 = vmul.f32 0.2, %v6264_v13  ;;  %v6268_v1 = vadd.f32 %v6267_v57, %v6122_v4 }
0x12bb   : > { %v6462_v0 = vmul.f32 %v6408_v11, %v6366_v19  ;;  %v6269_v12 = vpop.f32.mrf.mxu1  ;;  %6604 = vrot.lane.b32.xlu0 %v6556_v8, %s15007_s8  ;;  %v6557_v6 = vadd.f32 %v6499_v37, %v6461_v52 }
0x12bc   : > { %v6367_v38 = vsel %vm6319_vm6, %v6264_v13, %v6343_v45  ;;  %vm6320_vm10 = vcmp.ge.f32.partialorder %v6268_v1, 0.0  ;;  %v6344_v18 = vmul.f32 0.2, %v6268_v1  ;;  %v6270_v5 = vadd.f32 %v6269_v12, %v6122_v4  ;;  %v12564_v13 = vpop.permute.xlu0 %6151 }
0x12bd   : > { %v6463_v55 = vmul.f32 %v6408_v11, %v6367_v38  ;;  %v6271_v42 = vpop.f32.mrf.mxu1  ;;  %6606 = vrot.lane.b32.xlu1 %v6557_v6, %s15007_s8  ;;  %v6558_v26 = vadd.f32 %v6504_v21, %v6462_v0 }
0x12be   : > { %v6368_v32 = vsel %vm6320_vm10, %v6268_v1, %v6344_v18  ;;  %vm6321_vm11 = vcmp.ge.f32.partialorder %v6270_v5, 0.0  ;;  %v6345_v54 = vmul.f32 0.2, %v6270_v5  ;;  %v6272_v40 = vadd.f32 %v6271_v42, %v12521_v16 }
0x12bf   : > { %v6464_v2 = vmul.f32 %v12523_v39, %v6368_v32  ;;  %v6273_v60 = vpop.f32.mrf.mxu1  ;;  %6608 = vrot.lane.b32.xlu0 %v6558_v26, %s15007_s8  ;;  %v6559_v37 = vadd.f32 %v6504_v21, %v6463_v55 }
0x12c0   : > { %v6369_v4 = vsel %vm6321_vm11, %v6270_v5, %v6345_v54  ;;  %vm6322_vm12 = vcmp.ge.f32.partialorder %v6272_v40, 0.0  ;;  %v6346_v11 = vmul.f32 0.2, %v6272_v40  ;;  %v6274_v52 = vadd.f32 %v6273_v60, %v12521_v16  ;;  %v12574_v16 = vpop.permute.xlu1 %6156  ;;  %v12580_v26 = vpop.permute.xlu0 %6452 }
0x12c1   : > { %v6465_v57 = vmul.f32 %v12523_v39, %v6369_v4  ;;  %v6277_v8 = vpop.f32.mrf.mxu1  ;;  %6610 = vrot.lane.b32.xlu1 %v6559_v37, %s15007_s8  ;;  %v6560_v19 = vadd.f32 %v12527_v27, %v6464_v2 }
0x12c2   : > { %v6370_v45 = vsel %vm6322_vm12, %v6272_v40, %v6346_v11  ;;  %vm6323_vm7 = vcmp.ge.f32.partialorder %v6274_v52, 0.0  ;;  %v6347_v1 = vmul.f32 0.2, %v6274_v52  ;;  %v6278_v0 = vadd.f32 %v6277_v8, %v12535_v48 }
0x12c3   : > { %v6466_v21 = vmul.f32 %v12525_v46, %v6370_v45  ;;  %v6279_v12 = vpop.f32.mrf.mxu1  ;;  %6612 = vrot.lane.b32.xlu0 %v6560_v19, %s15007_s8  ;;  %v6561_v6 = vadd.f32 %v12527_v27, %v6465_v57 }
0x12c4   : > { %v6371_v39 = vsel %vm6323_vm7, %v6274_v52, %v6347_v1  ;;  %vm6324_vm6 = vcmp.ge.f32.partialorder %v6278_v0, 0.0  ;;  %v6348_v38 = vmul.f32 0.2, %v6278_v0  ;;  %v6280_v18 = vadd.f32 %v6279_v12, %v12535_v48  ;;  %v12590_v57 = vpop.permute.xlu1 %6457 }
0x12c5   : > { %v6467_v5 = vmul.f32 %v12525_v46, %v6371_v39  ;;  %v6281_v55 = vpop.f32.mrf.mxu1  ;;  %6614 = vrot.lane.b32.xlu1 %v6561_v6, %s15007_s8  ;;  %v6562_v42 = vadd.f32 %v12529_v25, %v6466_v21 }
0x12c6   : > { %v6372_v32 = vsel %vm6324_vm6, %v6278_v0, %v6348_v38  ;;  %vm6325_vm10 = vcmp.ge.f32.partialorder %v6280_v18, 0.0  ;;  %v6349_v54 = vmul.f32 0.2, %v6280_v18  ;;  %v6282_v27 = vadd.f32 %v6281_v55, %v12537_v63 }
0x12c7   : > { %v6468_v40 = vmul.f32 %v12547_v43, %v6372_v32  ;;  %v6283_v2 = vpop.f32.mrf.mxu1  ;;  %6616 = vrot.lane.b32.xlu0 %v6562_v42, %s15007_s8  ;;  %v6563_v48 = vadd.f32 %v12529_v25, %v6467_v5 }
0x12c8   : > { %v6373_v46 = vsel %vm6325_vm10, %v6280_v18, %v6349_v54  ;;  %vm6326_vm11 = vcmp.ge.f32.partialorder %v6282_v27, 0.0  ;;  %v6350_v60 = vmul.f32 0.2, %v6282_v27  ;;  %v6284_v37 = vadd.f32 %v6283_v2, %v12537_v63 }
0x12c9   : > { %v6469_v4 = vmul.f32 %v12547_v43, %v6373_v46  ;;  %v6287_v11 = vpop.f32.mrf.mxu1  ;;  %6618 = vrot.lane.b32.xlu1 %v6563_v48, %s15007_s8  ;;  %v6564_v52 = vadd.f32 %v12555_v29, %v6468_v40  ;;  %v12596_v43 = vpop.permute.xlu0 %6548 }
0x12ca   : > { %v6374_v8 = vsel %vm6326_vm11, %v6282_v27, %v6350_v60  ;;  %vm6327_vm12 = vcmp.ge.f32.partialorder %v6284_v37, 0.0  ;;  %v6351_v19 = vmul.f32 0.2, %v6284_v37  ;;  %v6288_v45 = vadd.f32 %v6287_v11, %v12531_v56 }
0x12cb   : > { %v6470_v25 = vmul.f32 %v12549_v35, %v6374_v8  ;;  %v6289_v1 = vpop.f32.mrf.mxu1  ;;  %6620 = vrot.lane.b32.xlu0 %v6564_v52, %s15007_s8  ;;  %v6565_v63 = vadd.f32 %v12555_v29, %v6469_v4 }
0x12cc   : > { %v6375_v0 = vsel %vm6327_vm12, %v6284_v37, %v6351_v19  ;;  %vm6328_vm7 = vcmp.ge.f32.partialorder %v6288_v45, 0.0  ;;  %v6352_v21 = vmul.f32 0.2, %v6288_v45  ;;  %v6290_v12 = vadd.f32 %v6289_v1, %v12531_v56  ;;  %v12606_v56 = vpop.permute.xlu1 %6553 }
0x12cd   : > { %v6471_v6 = vmul.f32 %v12549_v35, %v6375_v0  ;;  %v6291_v39 = vpop.f32.mrf.mxu1  ;;  %6622 = vrot.lane.b32.xlu1 %v6565_v63, %s15007_s8  ;;  %v6566_v38 = vadd.f32 %v12559_v34, %v6470_v25  ;;  %v6443_v46 = vpop.permute.xlu0 %6442 }
0x12ce   : > { %v6376_v18 = vsel %vm6328_vm7, %v6288_v45, %v6352_v21  ;;  %vm6329_vm6 = vcmp.ge.f32.partialorder %v6290_v12, 0.0  ;;  %v6353_v5 = vmul.f32 0.2, %v6290_v12  ;;  %v6292_v55 = vadd.f32 %v6291_v39, %v12533_v49 }
0x12cf   : > { %v6472_v29 = vmul.f32 %v12539_v51, %v6376_v18  ;;  %v6293_v42 = vpop.f32.mrf.mxu1  ;;  %6624 = vrot.lane.b32.xlu0 %v6566_v38, %s15007_s8  ;;  %v6567_v32 = vadd.f32 %v12559_v34, %v6471_v6 }
0x12d0   : > { %v6377_v35 = vsel %vm6329_vm6, %v6290_v12, %v6353_v5  ;;  %vm6330_vm10 = vcmp.ge.f32.partialorder %v6292_v55, 0.0  ;;  %v6354_v54 = vmul.f32 0.2, %v6292_v55  ;;  %v6294_v27 = vadd.f32 %v6293_v42, %v12533_v49  ;;  %v6448_v1 = vpop.permute.xlu1 %6447 }
0x12d1   : > { %v6473_v40 = vmul.f32 %v12539_v51, %v6377_v35  ;;  %v6297_v2 = vpop.f32.mrf.mxu1  ;;  %6626 = vrot.lane.b32.xlu1 %v6567_v32, %s15007_s8  ;;  %v6568_v48 = vadd.f32 %v12543_v36, %v6472_v29 }
0x12d2   : > { %v6378_v60 = vsel %vm6330_vm10, %v6292_v55, %v6354_v54  ;;  %vm6331_vm11 = vcmp.ge.f32.partialorder %v6294_v27, 0.0  ;;  %v6355_v37 = vmul.f32 0.2, %v6294_v27  ;;  %v6298_v34 = vadd.f32 %v6297_v2, %v12564_v13 }
0x12d3   : > { %v6474_v4 = vmul.f32 %v12541_v31, %v6378_v60  ;;  %v6299_v11 = vpop.f32.mrf.mxu1  ;;  %6628 = vrot.lane.b32.xlu0 %v6568_v48, %s15007_s8  ;;  %v6569_v49 = vadd.f32 %v12543_v36, %v6473_v40 }
0x12d4   : > { %v6379_v52 = vsel %vm6331_vm11, %v6294_v27, %v6355_v37  ;;  %vm6332_vm12 = vcmp.ge.f32.partialorder %v6298_v34, 0.0  ;;  %v6356_v51 = vmul.f32 0.2, %v6298_v34  ;;  %v6300_v8 = vadd.f32 %v6299_v11, %v12564_v13  ;;  %v6539_v13 = vpop.permute.xlu0 %6538  ;;  %v6544_v27 = vpop.permute.xlu1 %6543 }
0x12d5   : > { %v6475_v19 = vmul.f32 %v12541_v31, %v6379_v52  ;;  %v6301_v45 = vpop.f32.mrf.mxu1  ;;  %6630 = vrot.lane.b32.xlu1 %v6569_v49, %s15007_s8  ;;  %v6570_v25 = vadd.f32 %v12545_v41, %v6474_v4 }
0x12d6   : > { %v6380_v63 = vsel %vm6332_vm12, %v6298_v34, %v6356_v51  ;;  %vm6333_vm7 = vcmp.ge.f32.partialorder %v6300_v8, 0.0  ;;  %v6357_v0 = vmul.f32 0.2, %v6300_v8  ;;  %v6302_v21 = vadd.f32 %v6301_v45, %v12574_v16 }
0x12d7   : > { %v6476_v12 = vmul.f32 %v6443_v46, %v6380_v63  ;;  %v6303_v36 = vpop.f32.mrf.mxu1  ;;  %6632 = vrot.lane.b32.xlu0 %v6570_v25, %s15007_s8  ;;  %v6571_v6 = vadd.f32 %v12545_v41, %v6475_v19 }
0x12d8   : > { %v6381_v39 = vsel %vm6333_vm7, %v6300_v8, %v6357_v0  ;;  %vm6334_vm6 = vcmp.ge.f32.partialorder %v6302_v21, 0.0  ;;  %v6358_v31 = vmul.f32 0.2, %v6302_v21  ;;  %v6304_v38 = vadd.f32 %v6303_v36, %v12574_v16 }
0x12d9   : > { %v6477_v18 = vmul.f32 %v6443_v46, %v6381_v39  ;;  %v6307_v5 = vpop.f32.mrf.mxu1  ;;  %6634 = vrot.lane.b32.xlu1 %v6571_v6, %s15007_s8  ;;  %v6572_v55 = vadd.f32 %v6539_v13, %v6476_v12 }
0x12da   : > { %v6382_v29 = vsel %vm6334_vm6, %v6302_v21, %v6358_v31  ;;  %vm6335_vm10 = vcmp.ge.f32.partialorder %v6304_v38, 0.0  ;;  %v6359_v42 = vmul.f32 0.2, %v6304_v38  ;;  %v6308_v32 = vadd.f32 %v6307_v5, %v12551_v15 }
0x12db   : > { %v6478_v35 = vmul.f32 %v6448_v1, %v6382_v29  ;;  %v6309_v54 = vpop.f32.mrf.mxu1  ;;  %6636 = vrot.lane.b32.xlu0 %v6572_v55, %s15007_s8  ;;  %v6573_v41 = vadd.f32 %v6539_v13, %v6477_v18 }
0x12dc   : > { %v6383_v40 = vsel %vm6335_vm10, %v6304_v38, %v6359_v42  ;;  %vm6336_vm11 = vcmp.ge.f32.partialorder %v6308_v32, 0.0  ;;  %v6360_v2 = vmul.f32 0.2, %v6308_v32  ;;  %v6310_v16 = vadd.f32 %v6309_v54, %v12551_v15 }
0x12dd   : > { %v6479_v48 = vmul.f32 %v6448_v1, %v6383_v40  ;;  %v6311_v46 = vpop.f32.mrf.mxu1  ;;  %6638 = vrot.lane.b32.xlu1 %v6573_v41, %s15007_s8  ;;  %v6574_v60 = vadd.f32 %v6544_v27, %v6478_v35 }
0x12de   : > { %v6384_v37 = vsel %vm6336_vm11, %v6308_v32, %v6360_v2  ;;  %vm6337_vm12 = vcmp.ge.f32.partialorder %v6310_v16, 0.0  ;;  %v6361_v34 = vmul.f32 0.2, %v6310_v16  ;;  %v6312_v4 = vadd.f32 %v6311_v46, %v12553_v7 }
0x12df   : > { %v6480_v11 = vmul.f32 %v12580_v26, %v6384_v37  ;;  %v6313_v49 = vpop.f32.mrf.mxu1  ;;  %6640 = vrot.lane.b32.xlu0 %v6574_v60, %s15007_s8  ;;  %v6575_v52 = vadd.f32 %v6544_v27, %v6479_v48 }
0x12e0   : > { %v6385_v51 = vsel %vm6337_vm12, %v6310_v16, %v6361_v34  ;;  %vm6338_vm7 = vcmp.ge.f32.partialorder %v6312_v4, 0.0  ;;  %v6362_v8 = vmul.f32 0.2, %v6312_v4  ;;  %v6314_v15 = vadd.f32 %v6313_v49, %v12553_v7 }
0x12e1   : > { %v6481_v19 = vmul.f32 %v12580_v26, %v6385_v51  ;;  %6642 = vrot.lane.b32.xlu1 %v6575_v52, %s15007_s8  ;;  %v6576_v45 = vadd.f32 %v12596_v43, %v6480_v11 }
0x12e2   : > { %v6386_v25 = vsel %vm6338_vm7, %v6312_v4, %v6362_v8  ;;  %vm6339_vm6 = vcmp.ge.f32.partialorder %v6314_v15, 0.0  ;;  %v6363_v1 = vmul.f32 0.2, %v6314_v15 }
0x12e3   : > { %v6482_v63 = vmul.f32 %v12590_v57, %v6386_v25  ;;  %6644 = vrot.lane.b32.xlu0 %v6576_v45, %s15007_s8  ;;  %v6577_v0 = vadd.f32 %v12596_v43, %v6481_v19 }
0x12e4   : > { %v6387_v21 = vsel %vm6339_vm6, %v6314_v15, %v6363_v1 }
0x12e5   : > { %v6483_v12 = vmul.f32 %v12590_v57, %v6387_v21  ;;  %6646 = vrot.lane.b32.xlu1 %v6577_v0, %s15007_s8  ;;  %v6578_v7 = vadd.f32 %v12606_v56, %v6482_v63 }
0x12e7   : > { %6648 = vrot.lane.b32.xlu0 %v6578_v7, %s15007_s8  ;;  %v6579_v26 = vadd.f32 %v12606_v56, %v6483_v12 }
0x12e9   : > { %6650 = vrot.lane.b32.xlu1 %v6579_v26, %s15007_s8  ;;  %s15256_s8 = sld [smem:[#allocation36_spill]] }
0x132d   : > { %v6605_v36 = vpop.permute.xlu0 %6604 }
0x132e   : > { %v12646_v39 = vsel %vm5803_vm5, 0.0, %v6605_v36 }
0x132f   : > { %v6607_v6 = vpop.permute.xlu1 %6606  ;;  %15177 = vst [vmem:[#allocation64_spill] sm:$0xff] %v12646_v39  ;;  %v6778_v32 = vmul.f32 %v12646_v39, %v12397_v58  ;;  %v6832_v41 = vmul.f32 %v12646_v39, %v12318_v3  ;;  %v6940_v2 = vmul.f32 %v12646_v39, %v12260_v44  ;;  %v6886_v60 = vmul.f32 %v12646_v39, %v12301_v23 }
0x1330   : > { %v12656_v38 = vsel %vm5803_vm5, %v6607_v6, 0.0  ;;  %v12673_v29 = vsel %vm5803_vm5, %v6605_v36, %v6607_v6 }
0x1331   : > { %v6609_v13 = vpop.permute.xlu0 %6608  ;;  %15180 = vst [vmem:[#allocation67_spill] sm:$0xff] %v12656_v38  ;;  %15184 = vst [vmem:[#allocation71_spill] sm:$0xff] %v12673_v29  ;;  %v6779_v11 = vmul.f32 %v12673_v29, %v12405_v10  ;;  %v6780_v51 = vmul.f32 %v12656_v38, %v12389_v30  ;;  %v6834_v45 = vmul.f32 %v12656_v38, %v12362_v9 }
0x1332   : > { %v12649_v43 = vsel %vm5803_vm5, 0.0, %v6609_v13  ;;  %v6833_v0 = vmul.f32 %v12673_v29, %v12387_v33  ;;  %v6941_v7 = vmul.f32 %v12673_v29, %v12360_v62 }
0x1333   : > { %15178 = vst [vmem:[#allocation65_spill] sm:$0xff] %v12649_v43  ;;  %v6611_v57 = vpop.permute.xlu1 %6610  ;;  %v12653_v31 = vpack.c.bf16 %v12649_v43, %v12646_v39  ;;  %v6781_v55 = vmul.f32 %v12649_v43, %v12397_v58  ;;  %v6835_v35 = vmul.f32 %v12649_v43, %v12318_v3  ;;  %v6943_v27 = vmul.f32 %v12649_v43, %v12260_v44 }
0x1334   : > { %v12659_v56 = vsel %vm5803_vm5, %v6609_v13, %v6611_v57  ;;  %v12662_v18 = vsel %vm5803_vm5, %v6611_v57, 0.0  ;;  %v6889_v16 = vmul.f32 %v12649_v43, %v12301_v23  ;;  %v6942_v13 = vmul.f32 %v12656_v38, %v12262_v22 }
0x1335   : > { %15179 = vst [vmem:[#allocation66_spill] sm:$0xff] %v12653_v31  ;;  %15181 = vst [vmem:[#allocation68_spill] sm:$0xff] %v12659_v56  ;;  %7066 = vrot.lane.b32.xlu1 %v12653_v31, %s15117_s1  ;;  %v12668_v5 = vpack.c.bf16 %v12662_v18, %v12656_v38  ;;  %v12679_v42 = vpack.c.bf16 %v12659_v56, %v12673_v29  ;;  %v6814_v54 = vpack.c.bf16 %v6781_v55, %v6778_v32  ;;  %v6613_v34 = vpop.permute.xlu0 %6612 }
0x1336   : > { %15182 = vst [vmem:[#allocation69_spill] sm:$0xff] %v12662_v18  ;;  %v6868_v40 = vpack.c.bf16 %v6835_v35, %v6832_v41  ;;  %v6976_v46 = vpack.c.bf16 %v6943_v27, %v6940_v2  ;;  %v6782_v37 = vmul.f32 %v12659_v56, %v12405_v10  ;;  %v6922_v4 = vpack.c.bf16 %v6889_v16, %v6886_v60 }
0x1337   : > { %15183 = vst [vmem:[#allocation70_spill] sm:$0xff] %v12668_v5  ;;  %7070 = vrot.lane.b32.xlu0 %v12668_v5, %s15117_s1  ;;  %15185 = vst [vmem:[#allocation72_spill] sm:$0xff] %v12679_v42  ;;  %v6615_v48 = vpop.permute.xlu1 %6614  ;;  %v6783_v49 = vmul.f32 %v12662_v18, %v12389_v30  ;;  %v6837_v8 = vmul.f32 %v12662_v18, %v12362_v9  ;;  %v6836_v25 = vmul.f32 %v12659_v56, %v12387_v33 }
0x1338   : > { %v6815_v52 = vpack.c.bf16 %v6782_v37, %v6779_v11  ;;  %v6944_v21 = vmul.f32 %v12659_v56, %v12360_v62  ;;  %v6945_v26 = vmul.f32 %v12662_v18, %v12262_v22  ;;  %v6891_v57 = vmul.f32 %v12662_v18, %v12338_v17 }
0x1339   : > { %7068 = vrot.lane.b32.xlu1 %v12679_v42, %s15117_s1  ;;  %v6816_v19 = vpack.c.bf16 %v6783_v49, %v6780_v51  ;;  %v6617_v1 = vpop.permute.xlu0 %6616  ;;  %v6870_v63 = vpack.c.bf16 %v6837_v8, %v6834_v45  ;;  %v6869_v12 = vpack.c.bf16 %v6836_v25, %v6833_v0  ;;  %v6888_v35 = vmul.f32 %v12656_v38, %v12338_v17 }
0x133a   : > { %v6977_v6 = vpack.c.bf16 %v6944_v21, %v6941_v7  ;;  %v6978_v32 = vpack.c.bf16 %v6945_v26, %v6942_v13  ;;  %v6887_v27 = vmul.f32 %v12673_v29, %v12370_v50  ;;  %v12763_v11 = vsel %vm5803_vm5, %v6613_v34, %v6615_v48 }
0x133b   : > { %7144 = vrot.lane.b32.xlu0 %v6814_v54, %s15119_s6  ;;  %v6619_v15 = vpop.permute.xlu1 %6618  ;;  %v6890_v54 = vmul.f32 %v12659_v56, %v12370_v50  ;;  %v6924_v41 = vpack.c.bf16 %v6891_v57, %v6888_v35  ;;  %15189 = vst [vmem:[#allocation76_spill] sm:$0xff] %v12763_v11 }
0x133c   : > { %v12766_v49 = vsel %vm5803_vm5, %v6619_v15, 0.0 }
0x133d   : > { %7222 = vrot.lane.b32.xlu1 %v6868_v40, %s15124_s13  ;;  %v12733_v55 = vpop.permute.xlu0 %6620  ;;  %v12744_v40 = vsel %vm5803_vm5, 0.0, %v6617_v1  ;;  %v6923_v16 = vpack.c.bf16 %v6890_v54, %v6887_v27  ;;  %15190 = vst [vmem:[#allocation77_spill] sm:$0xff] %v12766_v49  ;;  %v6789_v27 = vmul.f32 %v12766_v49, %v12389_v30  ;;  %v6897_v38 = vmul.f32 %v12766_v49, %v12338_v17 }
0x133e   : > { %15186 = vst [vmem:[#allocation73_spill] sm:$0xff] %v12744_v40  ;;  %v6787_v8 = vmul.f32 %v12744_v40, %v12397_v58  ;;  %v6841_v25 = vmul.f32 %v12744_v40, %v12318_v3  ;;  %v6895_v7 = vmul.f32 %v12744_v40, %v12301_v23 }
0x133f   : > { %7438 = vrot.lane.b32.xlu0 %v6976_v46, %s15022_s3  ;;  %v12726_v36 = vpop.permute.xlu1 %6622  ;;  %v12750_v46 = vsel %vm5803_vm5, 0.0, %v6613_v34 }
0x1340   : > { %15187 = vst [vmem:[#allocation74_spill] sm:$0xff] %v12750_v46  ;;  %v12755_v37 = vpack.c.bf16 %v12744_v40, %v12750_v46  ;;  %v6784_v45 = vmul.f32 %v12750_v46, %v12397_v58  ;;  %v6892_v13 = vmul.f32 %v12750_v46, %v12301_v23 }
0x1341   : > { %7360 = vrot.lane.b32.xlu1 %v6922_v4, %s15125_s14  ;;  %v6625_v60 = vpop.permute.xlu0 %6624  ;;  %v12758_v4 = vsel %vm5803_vm5, %v6617_v1, %v6619_v15  ;;  %v6838_v1 = vmul.f32 %v12750_v46, %v12318_v3 }
0x1342   : > { %15188 = vst [vmem:[#allocation75_spill] sm:$0xff] %v12755_v37  ;;  %v12774_v51 = vpack.c.bf16 %v12758_v4, %v12763_v11  ;;  %v6925_v57 = vpack.c.bf16 %v6895_v7, %v6892_v13  ;;  %v6788_v35 = vmul.f32 %v12758_v4, %v12405_v10  ;;  %v12855_v13 = vsel %vm5803_vm5, 0.0, %v12733_v55 }
0x1343   : > { %7146 = vrot.lane.b32.xlu0 %v6815_v52, %s15119_s6  ;;  %v12746_v2 = vpop.permute.xlu1 %6626  ;;  %v6871_v21 = vpack.c.bf16 %v6841_v25, %v6838_v1  ;;  %v12842_v1 = vsel %vm5803_vm5, %v12733_v55, %v12726_v36  ;;  %v6950_v55 = vmul.f32 %v12758_v4, %v12360_v62  ;;  %v12890_v59 = vmul.f32 %v12855_v13, %v12234_v20 }
0x1344   : > { %15191 = vst [vmem:[#allocation78_spill] sm:$0xff] %v12774_v51  ;;  %v12879_v53 = vmul.f32 %v12842_v1, %v12236_v24 }
0x1345   : > { %7148 = vrot.lane.b32.xlu1 %v6816_v19, %s15119_s6  ;;  %v12779_v19 = vsel %vm5803_vm5, %v6615_v48, 0.0  ;;  %v12781_v34 = vpop.permute.xlu0 %6628  ;;  %v6817_v48 = vpack.c.bf16 %v6787_v8, %v6784_v45  ;;  %15196 = vst [vmem:[#allocation83_spill] sm:$0xff] %v12890_v59 }
0x1346   : > { %15192 = vst [vmem:[#allocation79_spill] sm:$0xff] %v12779_v19  ;;  %v12787_v15 = vpack.c.bf16 %v12766_v49, %v12779_v19  ;;  %v12829_v8 = vsel %vm5803_vm5, 0.0, %v12781_v34  ;;  %v6840_v7 = vmul.f32 %v12779_v19, %v12362_v9  ;;  %15194 = vst [vmem:[#allocation81_spill] sm:$0xff] %v12879_v53  ;;  %v6894_v18 = vmul.f32 %v12779_v19, %v12338_v17 }
0x1347   : > { %7226 = vrot.lane.b32.xlu0 %v6870_v63, %s15124_s13  ;;  %v12768_v52 = vpop.permute.xlu1 %6630  ;;  %v6949_v63 = vmul.f32 %v12744_v40, %v12260_v44 }
0x1348   : > { %15193 = vst [vmem:[#allocation80_spill] sm:$0xff] %v12787_v15  ;;  %v6927_v5 = vpack.c.bf16 %v6897_v38, %v6894_v18 }
0x1349   : > { %7224 = vrot.lane.b32.xlu1 %v6869_v12, %s15124_s13  ;;  %v6946_v12 = vmul.f32 %v12750_v46, %v12260_v44  ;;  %v12806_v26 = vpop.permute.xlu0 %6632 }
0x134a   : > { %v12833_v45 = vsel %vm5803_vm5, 0.0, %v12806_v26 }
0x134b   : > { %7440 = vrot.lane.b32.xlu0 %v6977_v6, %s15022_s3  ;;  %v12799_v0 = vpop.permute.xlu1 %6634  ;;  %v6979_v6 = vpack.c.bf16 %v6949_v63, %v6946_v12  ;;  %v12846_v63 = vsel %vm5803_vm5, %v6625_v60, %v12746_v2 }
0x134d   : > { %7442 = vrot.lane.b32.xlu1 %v6978_v32, %s15022_s3  ;;  %v12817_v54 = vpop.permute.xlu0 %6636 }
0x134f   : > { %7364 = vrot.lane.b32.xlu0 %v6924_v41, %s15125_s14  ;;  %v12812_v32 = vpop.permute.xlu1 %6638  ;;  %v6785_v41 = vmul.f32 %v12763_v11, %v12405_v10 }
0x1350   : > { %v12970_v43 = vsel %vm5803_vm5, %v12812_v32, 0.0 }
0x1351   : > { %7362 = vrot.lane.b32.xlu1 %v6923_v16, %s15125_s14  ;;  %v6786_v16 = vmul.f32 %v12779_v19, %v12389_v30  ;;  %v6818_v25 = vpack.c.bf16 %v6788_v35, %v6785_v41  ;;  %v12862_v35 = vmul.f32 %v12829_v8, %v12234_v20  ;;  %v12866_v41 = vmul.f32 %v12833_v45, %v12234_v20 }
0x1353   : > { %7072 = vrot.lane.b32.xlu0 %v12755_v37, %s15117_s1  ;;  %v6819_v12 = vpack.c.bf16 %v6789_v27, %v6786_v16  ;;  %v6641_v27 = vpop.permute.xlu0 %6640 }
0x1355   : > { %7288 = vrot.lane.b32.xlu1 %v12755_v37, %s15122_s9 }
0x1357   : > { %7074 = vrot.lane.b32.xlu0 %v12774_v51, %s15117_s1 }
0x1359   : > { %7076 = vrot.lane.b32.xlu1 %v12787_v15, %s15117_s1 }
0x135b   : > { %7150 = vrot.lane.b32.xlu0 %v6817_v48, %s15119_s6  ;;  %v6843_v48 = vmul.f32 %v12766_v49, %v12362_v9 }
0x135d   : > { %7228 = vrot.lane.b32.xlu1 %v6871_v21, %s15124_s13  ;;  %v6643_v21 = vpop.permute.xlu1 %6642  ;;  %v6873_v16 = vpack.c.bf16 %v6843_v48, %v6840_v7  ;;  %v6951_v7 = vmul.f32 %v12766_v49, %v12262_v22  ;;  %v6893_v49 = vmul.f32 %v12763_v11, %v12370_v50 }
0x135e   : > { %v12950_v31 = vsel %vm5803_vm5, %v6641_v27, %v6643_v21  ;;  %v12973_v29 = vsel %vm5803_vm5, %v6643_v21, 0.0 }
0x135f   : > { %7444 = vrot.lane.b32.xlu0 %v6979_v6, %s15022_s3  ;;  %v6842_v6 = vmul.f32 %v12758_v4, %v12387_v33  ;;  %v12989_v21 = vmul.f32 %v12950_v31, %v12286_v14  ;;  %v13021_v56 = vmul.f32 %v12973_v29, %v12258_v28 }
0x1361   : > { %7366 = vrot.lane.b32.xlu1 %v6925_v57, %s15125_s14  ;;  %v12858_v57 = vsel %vm5803_vm5, 0.0, %v6625_v60  ;;  %v6947_v60 = vmul.f32 %v12763_v11, %v12360_v62  ;;  %v6647_v37 = vpop.permute.xlu1 %6646  ;;  %15200 = vst [vmem:[#allocation87_spill] sm:$0xff] %v12989_v21  ;;  %15204 = vst [vmem:[#allocation91_spill] sm:$0xff] %v13021_v56  ;;  %v13088_v56 = vmul.f32 %v12855_v13, %v12256_v47 }
0x1362   : > { %v12894_v61 = vmul.f32 %v12858_v57, %v12234_v20  ;;  %v6955_v18 = vmul.f32 %v12858_v57, %v12260_v44  ;;  %v6847_v39 = vmul.f32 %v12858_v57, %v12318_v3 }
0x1363   : > { %7292 = vrot.lane.b32.xlu0 %v12787_v15, %s15122_s9  ;;  %v12909_v15 = vsel %vm5803_vm5, %v12726_v36, 0.0  ;;  %v12924_v36 = vpack.c.bf16 %v12858_v57, %v12855_v13  ;;  %15209 = vst [vmem:[#allocation96_spill] sm:$0xff] %v13088_v56  ;;  %v13149_v56 = vmul.f32 %v12970_v43, %v12262_v22 }
0x1364   : > { %15197 = vst [vmem:[#allocation84_spill] sm:$0xff] %v12894_v61  ;;  %v13017_v61 = vmul.f32 %v12970_v43, %v12258_v28 }
0x1365   : > { %7290 = vrot.lane.b32.xlu1 %v12774_v51, %s15122_s9  ;;  %v6793_v51 = vmul.f32 %v12858_v57, %v12397_v58  ;;  %15198 = vst [vmem:[#allocation85_spill] sm:$0xff] %v12924_v36  ;;  %15217 = vst [vmem:[#allocation104_spill] sm:$0xff] %v13149_v56 }
0x1366   : > { %15203 = vst [vmem:[#allocation90_spill] sm:$0xff] %v13017_v61 }
0x1367   : > { %7152 = vrot.lane.b32.xlu0 %v6818_v25, %s15119_s6  ;;  %v6839_v25 = vmul.f32 %v12763_v11, %v12387_v33 }
0x1369   : > { %7154 = vrot.lane.b32.xlu1 %v6819_v12, %s15119_s6  ;;  %v12883_v12 = vmul.f32 %v12846_v63, %v12236_v24  ;;  %v6872_v48 = vpack.c.bf16 %v6842_v6, %v6839_v25  ;;  %v6980_v6 = vpack.c.bf16 %v6950_v55, %v6947_v60  ;;  %v6896_v25 = vmul.f32 %v12758_v4, %v12370_v50  ;;  %v6645_v55 = vpop.permute.xlu0 %6644 }
0x136a   : > { %v12980_v46 = vsel %vm5803_vm5, %v6645_v55, %v6647_v37  ;;  %v13024_v40 = vsel %vm5803_vm5, 0.0, %v6645_v55 }
0x136b   : > { %15195 = vst [vmem:[#allocation82_spill] sm:$0xff] %v12883_v12  ;;  %7232 = vrot.lane.b32.xlu0 %v6873_v16, %s15124_s13  ;;  %v6948_v16 = vmul.f32 %v12779_v19, %v12262_v22  ;;  %v12928_v19 = vpack.c.bf16 %v12846_v63, %v12842_v1  ;;  %v6926_v38 = vpack.c.bf16 %v6896_v25, %v6893_v49  ;;  %v12960_v49 = vsel %vm5803_vm5, 0.0, %v12817_v54 }
0x136c   : > { %v12963_v25 = vsel %vm5803_vm5, 0.0, %v6641_v27  ;;  %v6901_v27 = vmul.f32 %v12858_v57, %v12301_v23  ;;  %v13084_v12 = vmul.f32 %v12846_v63, %v12286_v14 }
0x136d   : > { %7230 = vrot.lane.b32.xlu1 %v6872_v48, %s15124_s13  ;;  %v12915_v48 = vsel %vm5803_vm5, %v12746_v2, 0.0  ;;  %v6981_v60 = vpack.c.bf16 %v6951_v7, %v6948_v16  ;;  %v6790_v2 = vmul.f32 %v12855_v13, %v12397_v58  ;;  %v12935_v7 = vsel %vm5803_vm5, %v12781_v34, %v12768_v52 }
0x136e   : > { %v12947_v16 = vsel %vm5803_vm5, %v12817_v54, %v12812_v32  ;;  %v6952_v34 = vmul.f32 %v12855_v13, %v12260_v44  ;;  %v6898_v54 = vmul.f32 %v12855_v13, %v12301_v23 }
0x136f   : > { %7446 = vrot.lane.b32.xlu0 %v6980_v6, %s15022_s3  ;;  %v12939_v6 = vsel %vm5803_vm5, %v12768_v52, 0.0  ;;  %v12956_v52 = vmul.f32 %v12855_v13, %v12318_v3  ;;  %v6820_v42 = vpack.c.bf16 %v6793_v51, %v6790_v2  ;;  %v12985_v32 = vmul.f32 %v12947_v16, %v12286_v14 }
0x1370   : > { %v6982_v51 = vpack.c.bf16 %v6955_v18, %v6952_v34  ;;  %v12994_v2 = vsel %vm5803_vm5, %v12806_v26, %v12799_v0  ;;  %v13005_v18 = vmul.f32 %v12963_v25, %v12256_v47  ;;  %v13009_v34 = vsel %vm5803_vm5, %v12799_v0, 0.0 }
0x1371   : > { %7448 = vrot.lane.b32.xlu1 %v6981_v60, %s15022_s3  ;;  %v6651_v60 = vpop.permute.xlu1 %6650  ;;  %15199 = vst [vmem:[#allocation86_spill] sm:$0xff] %v12985_v32  ;;  %v13027_v0 = vsel %vm5803_vm5, %v6647_v37, 0.0  ;;  %v13033_v26 = vmul.f32 %v12980_v46, %v12370_v50  ;;  %v13045_v37 = vmul.f32 %v12935_v7, %v12286_v14  ;;  %v13049_v11 = vmul.f32 %v12994_v2, %v12286_v14 }
0x1372   : > { %15202 = vst [vmem:[#allocation89_spill] sm:$0xff] %v13005_v18  ;;  %v13056_v18 = vmul.f32 %v12829_v8, %v12256_v47  ;;  %v13060_v32 = vmul.f32 %v12833_v45, %v12256_v47  ;;  %v13064_v61 = vmul.f32 %v12939_v6, %v12258_v28  ;;  %v13074_v21 = vmul.f32 %v13009_v34, %v12258_v28 }
0x1373   : > { %7370 = vrot.lane.b32.xlu0 %v6927_v5, %s15125_s14  ;;  %v6649_v5 = vpop.permute.xlu0 %6648  ;;  %15205 = vst [vmem:[#allocation92_spill] sm:$0xff] %v13045_v37  ;;  %v13095_v37 = vsel %vm5803_vm5, %v6651_v60, 0.0  ;;  %v13106_v13 = vmul.f32 %v12915_v48, %v12258_v28 }
0x1374   : > { %v12997_v59 = vsel %vm5803_vm5, %v6649_v5, %v6651_v60  ;;  %15206 = vst [vmem:[#allocation93_spill] sm:$0xff] %v13056_v18  ;;  %15207 = vst [vmem:[#allocation94_spill] sm:$0xff] %v13064_v61  ;;  %v13102_v18 = vmul.f32 %v12909_v15, %v12258_v28  ;;  %v6874_v61 = vpack.c.bf16 %v6847_v39, %v12956_v52 }
0x1375   : > { %7368 = vrot.lane.b32.xlu1 %v6926_v38, %s15125_s14  ;;  %v13001_v38 = vmul.f32 %v12960_v49, %v12256_v47  ;;  %v13041_v55 = vmul.f32 %v12997_v59, %v12370_v50  ;;  %15208 = vst [vmem:[#allocation95_spill] sm:$0xff] %v13074_v21  ;;  %v13118_v53 = vmul.f32 %v12997_v59, %v12286_v14 }
0x1376   : > { %15210 = vst [vmem:[#allocation97_spill] sm:$0xff] %v13102_v18  ;;  %v13140_v39 = vmul.f32 %v13095_v37, %v12258_v28  ;;  %v6928_v52 = vpack.c.bf16 %v6901_v27, %v6898_v54  ;;  %v13162_v54 = vmul.f32 %v12947_v16, %v12360_v62  ;;  %v13166_v27 = vmul.f32 %v12950_v31, %v12360_v62 }
0x1377   : > { %15201 = vst [vmem:[#allocation88_spill] sm:$0xff] %v13001_v38  ;;  %7078 = vrot.lane.b32.xlu0 %v12924_v36, %s15117_s1  ;;  %v13052_v38 = vsel %vm5803_vm5, 0.0, %v6649_v5  ;;  %v13092_v5 = vmul.f32 %v12858_v57, %v12256_v47  ;;  %15212 = vst [vmem:[#allocation99_spill] sm:$0xff] %v13118_v53  ;;  %v13126_v57 = vmul.f32 %v13024_v40, %v12260_v44 }
0x1378   : > { %v13130_v60 = vmul.f32 %v13052_v38, %v12260_v44  ;;  %15216 = vst [vmem:[#allocation103_spill] sm:$0xff] %v13140_v39  ;;  %15219 = vst [vmem:[#allocation106_spill] sm:$0xff] %v13162_v54  ;;  %v13186_v21 = vmul.f32 %v12980_v46, %v12360_v62  ;;  %v13190_v56 = vmul.f32 %v12997_v59, %v12360_v62 }
0x1379   : > { %7294 = vrot.lane.b32.xlu1 %v12924_v36, %s15122_s9  ;;  %v13078_v36 = vmul.f32 %v12842_v1, %v12286_v14  ;;  %15213 = vst [vmem:[#allocation100_spill] sm:$0xff] %v13126_v57  ;;  %15220 = vst [vmem:[#allocation107_spill] sm:$0xff] %v13166_v27  ;;  %v13200_v57 = vmul.f32 %v12963_v25, %v12260_v44  ;;  %v6792_v39 = vmul.f32 %v12909_v15, %v12389_v30 }
0x137a   : > { %15214 = vst [vmem:[#allocation101_spill] sm:$0xff] %v13130_v60  ;;  %v6794_v54 = vmul.f32 %v12846_v63, %v12405_v10  ;;  %v6791_v27 = vmul.f32 %v12842_v1, %v12405_v10  ;;  %v6849_v60 = vmul.f32 %v12915_v48, %v12362_v9  ;;  %v6846_v18 = vmul.f32 %v12909_v15, %v12362_v9 }
0x137b   : > { %7080 = vrot.lane.b32.xlu0 %v12928_v19, %s15117_s1  ;;  %15224 = vst [vmem:[#allocation111_spill] sm:$0xff] %v13200_v57 }
0x137c   : > { %v6821_v53 = vpack.c.bf16 %v6794_v54, %v6791_v27  ;;  %v6953_v54 = vmul.f32 %v12842_v1, %v12360_v62  ;;  %v6957_v27 = vmul.f32 %v12915_v48, %v12262_v22 }
0x137d   : > { %7156 = vrot.lane.b32.xlu1 %v6820_v42, %s15119_s6  ;;  %v13114_v42 = vmul.f32 %v12980_v46, %v12286_v14  ;;  %v13136_v14 = vmul.f32 %v13027_v0, %v12258_v28  ;;  %v13196_v28 = vmul.f32 %v12960_v49, %v12260_v44 }
0x137f   : > { %15211 = vst [vmem:[#allocation98_spill] sm:$0xff] %v13114_v42  ;;  %7450 = vrot.lane.b32.xlu0 %v6982_v51, %s15022_s3  ;;  %15215 = vst [vmem:[#allocation102_spill] sm:$0xff] %v13136_v14  ;;  %v13153_v42 = vmul.f32 %v12973_v29, %v12262_v22  ;;  %v13172_v51 = vmul.f32 %v13027_v0, %v12262_v22  ;;  %v6795_v14 = vmul.f32 %v12915_v48, %v12389_v30 }
0x1380   : > { %15223 = vst [vmem:[#allocation110_spill] sm:$0xff] %v13196_v28 }
0x1381   : > { %7234 = vrot.lane.b32.xlu1 %v6874_v61, %s15124_s13  ;;  %15218 = vst [vmem:[#allocation105_spill] sm:$0xff] %v13153_v42  ;;  %v13158_v61 = vpack.c.bf16 %v12915_v48, %v12909_v15  ;;  %15221 = vst [vmem:[#allocation108_spill] sm:$0xff] %v13172_v51  ;;  %v6848_v42 = vmul.f32 %v12846_v63, %v12387_v33  ;;  %v6876_v51 = vpack.c.bf16 %v6849_v60, %v6846_v18 }
0x1382   : > { %v6902_v18 = vmul.f32 %v12846_v63, %v12370_v50 }
0x1383   : > { %7372 = vrot.lane.b32.xlu0 %v6928_v52, %s15125_s14  ;;  %v13176_v52 = vmul.f32 %v13095_v37, %v12262_v22 }
0x1385   : > { %15222 = vst [vmem:[#allocation109_spill] sm:$0xff] %v13176_v52  ;;  %7082 = vrot.lane.b32.xlu1 %v13158_v61, %s15117_s1  ;;  %v6822_v52 = vpack.c.bf16 %v6795_v14, %v6792_v39  ;;  %v6845_v14 = vmul.f32 %v12842_v1, %v12387_v33  ;;  %v6956_v39 = vmul.f32 %v12846_v63, %v12360_v62 }
0x1386   : > { %v13250_v63 = vpack.c.bf16 %v12833_v45, %v12829_v8 }
0x1387   : > { %7298 = vrot.lane.b32.xlu0 %v13158_v61, %s15122_s9  ;;  %v6875_v28 = vpack.c.bf16 %v6848_v42, %v6845_v14  ;;  %v6899_v42 = vmul.f32 %v12842_v1, %v12370_v50  ;;  %v6799_v1 = vmul.f32 %v12833_v45, %v12397_v58 }
0x1389   : > { %7296 = vrot.lane.b32.xlu1 %v12928_v19, %s15122_s9  ;;  %v6929_v14 = vpack.c.bf16 %v6902_v18, %v6899_v42  ;;  %v6961_v18 = vmul.f32 %v12833_v45, %v12260_v44  ;;  %v6958_v42 = vmul.f32 %v12829_v8, %v12260_v44  ;;  %v6855_v44 = vmul.f32 %v13009_v34, %v12362_v9 }
0x138b   : > { %7160 = vrot.lane.b32.xlu0 %v6822_v52, %s15119_s6  ;;  %v6983_v52 = vpack.c.bf16 %v6956_v39, %v6953_v54 }
0x138d   : > { %7158 = vrot.lane.b32.xlu1 %v6821_v53, %s15119_s6  ;;  %v6954_v53 = vmul.f32 %v12909_v15, %v12262_v22 }
0x138f   : > { %7238 = vrot.lane.b32.xlu0 %v6876_v51, %s15124_s13  ;;  %v6984_v60 = vpack.c.bf16 %v6957_v27, %v6954_v53  ;;  %v6903_v51 = vmul.f32 %v12915_v48, %v12338_v17  ;;  %v6796_v48 = vmul.f32 %v12829_v8, %v12397_v58  ;;  %v6850_v27 = vmul.f32 %v12829_v8, %v12318_v3 }
0x1390   : > { %v13268_v53 = vpack.c.bf16 %v12994_v2, %v12935_v7 }
0x1391   : > { %7236 = vrot.lane.b32.xlu1 %v6875_v28, %s15124_s13  ;;  %v6900_v28 = vmul.f32 %v12909_v15, %v12338_v17  ;;  %v6853_v15 = vmul.f32 %v12833_v45, %v12318_v3  ;;  %v6823_v54 = vpack.c.bf16 %v6799_v1, %v6796_v48  ;;  %v6801_v1 = vmul.f32 %v13009_v34, %v12389_v30 }
0x1393   : > { %7452 = vrot.lane.b32.xlu0 %v6983_v52, %s15022_s3  ;;  %v6930_v39 = vpack.c.bf16 %v6903_v51, %v6900_v28  ;;  %v6877_v52 = vpack.c.bf16 %v6853_v15, %v6850_v27  ;;  %v6985_v51 = vpack.c.bf16 %v6961_v18, %v6958_v42  ;;  %v6851_v18 = vmul.f32 %v12935_v7, %v12387_v33 }
0x1394   : > { %v6800_v42 = vmul.f32 %v12994_v2, %v12405_v10 }
0x1395   : > { %7454 = vrot.lane.b32.xlu1 %v6984_v60, %s15022_s3  ;;  %v13276_v60 = vpack.c.bf16 %v13009_v34, %v12939_v6 }
0x1397   : > { %7374 = vrot.lane.b32.xlu0 %v6929_v14, %s15125_s14  ;;  %v6907_v14 = vmul.f32 %v12833_v45, %v12301_v23 }
0x1399   : > { %7376 = vrot.lane.b32.xlu1 %v6930_v39, %s15125_s14  ;;  %v6904_v39 = vmul.f32 %v12829_v8, %v12301_v23  ;;  %v6854_v8 = vmul.f32 %v12994_v2, %v12387_v33 }
0x139b   : > { %7084 = vrot.lane.b32.xlu0 %v13250_v63, %s15117_s1  ;;  %v6931_v15 = vpack.c.bf16 %v6907_v14, %v6904_v39  ;;  %v6878_v14 = vpack.c.bf16 %v6854_v8, %v6851_v18  ;;  %v6797_v39 = vmul.f32 %v12935_v7, %v12405_v10  ;;  %v6852_v18 = vmul.f32 %v12939_v6, %v12362_v9 }
0x139d   : > { %7300 = vrot.lane.b32.xlu1 %v13250_v63, %s15122_s9 }
0x139f   : > { %7162 = vrot.lane.b32.xlu0 %v6823_v54, %s15119_s6  ;;  %v6798_v54 = vmul.f32 %v12939_v6, %v12389_v30 }
0x13a1   : > { %7240 = vrot.lane.b32.xlu1 %v6877_v52, %s15124_s13  ;;  %v6825_v27 = vpack.c.bf16 %v6801_v1, %v6798_v54  ;;  %v6963_v1 = vmul.f32 %v13009_v34, %v12262_v22  ;;  %v6824_v54 = vpack.c.bf16 %v6800_v42, %v6797_v39  ;;  %v6879_v39 = vpack.c.bf16 %v6855_v44, %v6852_v18 }
0x13a2   : > { %v6908_v44 = vmul.f32 %v12994_v2, %v12370_v50  ;;  %v6859_v18 = vmul.f32 %v12963_v25, %v12318_v3 }
0x13a3   : > { %7086 = vrot.lane.b32.xlu0 %v13268_v53, %s15117_s1 }
0x13a5   : > { %7088 = vrot.lane.b32.xlu1 %v13276_v60, %s15117_s1 }
0x13a7   : > { %v13284_v28 = vpop.permute.xlu1 %7066  ;;  %7456 = vrot.lane.b32.xlu0 %v6985_v51, %s15022_s3 }
0x13a9   : > { %7302 = vrot.lane.b32.xlu1 %v13268_v53, %s15122_s9  ;;  %v13293_v48 = vpop.permute.xlu0 %7070 }
0x13ab   : > { %v13297_v45 = vpop.permute.xlu1 %7068  ;;  %7378 = vrot.lane.b32.xlu0 %v6931_v15, %s15125_s14 }
0x13ad   : > { %7166 = vrot.lane.b32.xlu1 %v6825_v27, %s15119_s6  ;;  %v13303_v52 = vpop.permute.xlu0 %7144  ;;  %v6960_v27 = vmul.f32 %v12939_v6, %v12262_v22  ;;  %v6906_v22 = vmul.f32 %v12939_v6, %v12338_v17 }
0x13af   : > { %v13309_v51 = vpop.permute.xlu1 %7222  ;;  %7304 = vrot.lane.b32.xlu0 %v13276_v60, %s15122_s9  ;;  %v6987_v8 = vpack.c.bf16 %v6963_v1, %v6960_v27 }
0x13b0   : > { %15225 = vst [vmem:[#allocation112_spill] sm:$0xff] %v13309_v51 }
0x13b1   : > { %7242 = vrot.lane.b32.xlu1 %v6878_v14, %s15124_s13  ;;  %v13318_v15 = vpop.permute.xlu0 %7438  ;;  %v6909_v14 = vmul.f32 %v13009_v34, %v12338_v17 }
0x13b2   : > { %15226 = vst [vmem:[#allocation113_spill] sm:$0xff] %v13318_v15 }
0x13b3   : > { %v13324_v51 = vpop.permute.xlu1 %7360  ;;  %7164 = vrot.lane.b32.xlu0 %v6824_v54, %s15119_s6  ;;  %v6933_v1 = vpack.c.bf16 %v6909_v14, %v6906_v22  ;;  %v6959_v54 = vmul.f32 %v12935_v7, %v12360_v62  ;;  %v6905_v22 = vmul.f32 %v12935_v7, %v12370_v50 }
0x13b4   : > { %15227 = vst [vmem:[#allocation114_spill] sm:$0xff] %v13324_v51  ;;  %v6962_v51 = vmul.f32 %v12994_v2, %v12360_v62 }
0x13b5   : > { %7460 = vrot.lane.b32.xlu1 %v6987_v8, %s15022_s3  ;;  %v13332_v42 = vpop.permute.xlu0 %7146  ;;  %v6772_v8 = vpack.c.bf16 %v12963_v25, %v12960_v49 }
0x13b6   : > { %v6986_v27 = vpack.c.bf16 %v6962_v51, %v6959_v54  ;;  %v6932_v51 = vpack.c.bf16 %v6908_v44, %v6905_v22  ;;  %v6805_v44 = vmul.f32 %v12963_v25, %v12397_v58 }
0x13b7   : > { %v13338_v15 = vpop.permute.xlu1 %7148  ;;  %7244 = vrot.lane.b32.xlu0 %v6879_v39, %s15124_s13  ;;  %v6856_v39 = vmul.f32 %v12960_v49, %v12318_v3 }
0x13b9   : > { %7382 = vrot.lane.b32.xlu1 %v6933_v1, %s15125_s14  ;;  %v13344_v34 = vpop.permute.xlu0 %7226  ;;  %v6880_v54 = vpack.c.bf16 %v6859_v18, %v6856_v39  ;;  %v6802_v18 = vmul.f32 %v12960_v49, %v12397_v58 }
0x13ba   : > { %15228 = vst [vmem:[#allocation115_spill] sm:$0xff] %v13344_v34 }
0x13bb   : > { %v13348_v6 = vpop.permute.xlu1 %7224  ;;  %7458 = vrot.lane.b32.xlu0 %v6986_v27, %s15022_s3  ;;  %v6826_v39 = vpack.c.bf16 %v6805_v44, %v6802_v18  ;;  %s15264_s3 = smov 94  }
0x13bc   : > { %15229 = vst [vmem:[#allocation116_spill] sm:$0xff] %v13348_v6  ;;  %v6774_v6 = vpack.c.bf16 %v12973_v29, %v12970_v43 }
0x13bd   : > { %7306 = vrot.lane.b32.xlu1 %v6772_v8, %s15122_s9  ;;  %v13358_v14 = vpop.permute.xlu0 %7440 }
0x13be   : > { %15230 = vst [vmem:[#allocation117_spill] sm:$0xff] %v13358_v14  ;;  %v6910_v14 = vmul.f32 %v12960_v49, %v12301_v23 }
0x13bf   : > { %v13362_v1 = vpop.permute.xlu1 %7442  ;;  %7380 = vrot.lane.b32.xlu0 %v6932_v51, %s15125_s14 }
0x13c0   : > { %15231 = vst [vmem:[#allocation118_spill] sm:$0xff] %v13362_v1  ;;  %v7103_v1 = vsel %vm5946_vm4, %v13297_v45, %v13293_v48  ;;  %v7102_v48 = vsel %vm5946_vm4, %v13284_v28, %v13297_v45  ;;  %v6741_v28 = vmul.f32 %v12947_v16, %v12236_v24  ;;  %v6806_v45 = vmul.f32 %v12950_v31, %v12405_v10 }
0x13c1   : > { %7246 = vrot.lane.b32.xlu1 %v6880_v54, %s15124_s13  ;;  %v13366_v27 = vpop.permute.xlu0 %7364 }
0x13c2   : > { %15232 = vst [vmem:[#allocation119_spill] sm:$0xff] %v13366_v27  ;;  %v6913_v27 = vmul.f32 %v12963_v25, %v12301_v23 }
0x13c3   : > { %v13368_v62 = vpop.permute.xlu1 %7362  ;;  %7090 = vrot.lane.b32.xlu0 %v6772_v8, %s15117_s1 }
0x13c4   : > { %15233 = vst [vmem:[#allocation120_spill] sm:$0xff] %v13368_v62  ;;  %v6773_v62 = vpack.c.bf16 %v12950_v31, %v12947_v16  ;;  %v6934_v18 = vpack.c.bf16 %v6913_v27, %v6910_v14  ;;  %v6746_v14 = vmul.f32 %v13052_v38, %v12234_v20 }
0x13c5   : > { %7094 = vrot.lane.b32.xlu1 %v6774_v6, %s15117_s1  ;;  %v7073_v22 = vpop.permute.xlu0 %7072 }
0x13c7   : > { %v13378_v51 = vpop.permute.xlu1 %7288  ;;  %7522 = vrot.lane.b32.xlu0 %v6772_v8, %s15030_s11 }
0x13c8   : > { %15234 = vst [vmem:[#allocation121_spill] sm:$0xff] %v13378_v51 }
0x13c9   : > { %7168 = vrot.lane.b32.xlu1 %v6826_v39, %s15119_s6  ;;  %v7075_v54 = vpop.permute.xlu0 %7074  ;;  %v6747_v39 = vmul.f32 %v12997_v59, %v12236_v24 }
0x13ca   : > { %v7104_v44 = vsel %vm5946_vm4, %v7073_v22, %v7075_v54  ;;  %v6860_v22 = vmul.f32 %v12950_v31, %v12387_v33 }
0x13cb   : > { %v7077_v34 = vpop.permute.xlu1 %7076  ;;  %7092 = vrot.lane.b32.xlu0 %v6773_v62, %s15117_s1 }
0x13cc   : > { %v7105_v51 = vsel %vm5946_vm4, %v7075_v54, %v7077_v34  ;;  %v6745_v34 = vmul.f32 %v12980_v46, %v12236_v24  ;;  %v6743_v54 = vmul.f32 %v12950_v31, %v12236_v24 }
0x13cd   : > { %7308 = vrot.lane.b32.xlu1 %v6773_v62, %s15122_s9  ;;  %7810 = vmatprep.subr.bf16.mxu0 %v7105_v51  ;;  %v13391_v8 = vpop.permute.xlu0 %7150 }
0x13ce   : > { %7811 = vmatpush1.bf16.msra.mxu0 %v7104_v44  ;;  %v6759_v51 = vpack.c.bf16 %v6747_v39, %v6745_v34  ;;  %v6744_v44 = vmul.f32 %v13024_v40, %v12234_v20  ;;  %v6742_v34 = vmul.f32 %v12963_v25, %v12234_v20  ;;  %v6858_v25 = vmul.f32 %v12970_v43, %v12362_v9 }
0x13cf   : > { %v13399_v57 = vpop.permute.xlu1 %7228  ;;  %7384 = vrot.lane.b32.xlu0 %v6934_v18, %s15125_s14  ;;  %7812 = vmatprep.subr.bf16.mxu0 %v7103_v1  ;;  %v6857_v1 = vmul.f32 %v12947_v16, %v12387_v33 }
0x13d0   : > { %15235 = vst [vmem:[#allocation122_spill] sm:$0xff] %v13399_v57  ;;  %v6758_v39 = vpack.c.bf16 %v6746_v14, %v6744_v44  ;;  %v6740_v14 = vmul.f32 %v12960_v49, %v12234_v20  ;;  %v6915_v44 = vmul.f32 %v12973_v29, %v12338_v17 }
0x13d1   : > { %7526 = vrot.lane.b32.xlu1 %v6774_v6, %s15030_s11  ;;  %v13409_v27 = vpop.permute.xlu0 %7444  ;;  %v6881_v57 = vpack.c.bf16 %v6860_v22, %v6857_v1  ;;  %v6861_v22 = vmul.f32 %v12973_v29, %v12362_v9 }
0x13d2   : > { %15236 = vst [vmem:[#allocation123_spill] sm:$0xff] %v13409_v27  ;;  %7813 = vmatpush1.bf16.msra.mxu0 %v7102_v48  ;;  %v6757_v27 = vpack.c.bf16 %v6743_v54, %v6741_v28  ;;  %v6737_v54 = vmul.f32 %v12935_v7, %v12236_v24 }
0x13d3   : > { %v13420_v18 = vpop.permute.xlu1 %7366  ;;  %7310 = vrot.lane.b32.xlu0 %v6774_v6, %s15122_s9  ;;  %7814 = vmatprep.subr.bf16.mxu0 %v6759_v51  ;;  %v6803_v6 = vmul.f32 %v12947_v16, %v12405_v10  ;;  %v6739_v51 = vmul.f32 %v12994_v2, %v12236_v24  ;;  %v6756_v2 = vpack.c.bf16 %v6742_v34, %v6740_v14 }
0x13d4   : > { %15237 = vst [vmem:[#allocation124_spill] sm:$0xff] %v13420_v18  ;;  %v6882_v49 = vpack.c.bf16 %v6861_v22, %v6858_v25  ;;  %v6914_v22 = vmul.f32 %v12950_v31, %v12370_v50  ;;  %v6775_v14 = vpack.c.bf16 %v13052_v38, %v13024_v40  ;;  %v6911_v31 = vmul.f32 %v12947_v16, %v12370_v50  ;;  %v15247_v16 = vld [vmem:[#allocation68_spill] sm:$0xff] }
0x13d5   : > { %7248 = vrot.lane.b32.xlu1 %v6881_v57, %s15124_s13  ;;  %v13430_v48 = vpop.permute.xlu0 %7292  ;;  %v6827_v1 = vpack.c.bf16 %v6806_v45, %v6803_v6  ;;  %v6804_v45 = vmul.f32 %v12970_v43, %v12389_v30 }
0x13d6   : > { %15238 = vst [vmem:[#allocation125_spill] sm:$0xff] %v13430_v48  ;;  %7815 = vmatpush1.bf16.msra.mxu0 %v6758_v39  ;;  %v6755_v39 = vpack.c.bf16 %v6739_v51, %v6737_v54  ;;  %v15240_v51 = vpack.c.bf16 %v12866_v41, %v12862_v35  ;;  %v15245_v54 = vld [vmem:[#allocation76_spill] sm:$0xff]  ;;  %v6865_v35 = vmul.f32 %v13052_v38, %v12318_v3  ;;  %v15246_v41 = vld [vmem:[#allocation73_spill] sm:$0xff] }
0x13d7   : > { %v13442_v57 = vpop.permute.xlu1 %7290  ;;  %7524 = vrot.lane.b32.xlu0 %v6773_v62, %s15030_s11  ;;  %7816 = vmatprep.subr.bf16.mxu0 %v6757_v27  ;;  %v6807_v62 = vmul.f32 %v12973_v29, %v12389_v30  ;;  %v6731_v29 = vmul.f32 %v12758_v4, %v12236_v24 }
0x13d8   : > { %15239 = vst [vmem:[#allocation126_spill] sm:$0xff] %v13442_v57  ;;  %v6912_v57 = vmul.f32 %v12970_v43, %v12338_v17  ;;  %v15242_v43 = vld [vmem:[#allocation82_spill] sm:$0xff] }
0x13d9   : > { %7170 = vrot.lane.b32.xlu1 %v6827_v1, %s15119_s6  ;;  %v13450_v28 = vpop.permute.xlu0 %7152  ;;  %v6828_v6 = vpack.c.bf16 %v6807_v62, %v6804_v45  ;;  %v6727_v45 = vmul.f32 %v15247_v16, %v12236_v24 }
0x13da   : > { %7817 = vmatpush1.bf16.msra.mxu0 %v6756_v2  ;;  %v6936_v7 = vpack.c.bf16 %v6915_v44, %v6912_v57  ;;  %v15243_v57 = vld [vmem:[#allocation81_spill] sm:$0xff]  ;;  %v6729_v44 = vmul.f32 %v15245_v54, %v12236_v24  ;;  %v6730_v2 = vmul.f32 %v15246_v41, %v12234_v20 }
0x13db   : > { %v13456_v27 = vpop.permute.xlu1 %7154  ;;  %7250 = vrot.lane.b32.xlu0 %v6882_v49, %s15124_s13  ;;  %7818 = vmatprep.subr.bf16.mxu0 %v6755_v39  ;;  %v15244_v1 = vpack.c.bf16 %v15242_v43, %v15243_v57  ;;  %v6935_v39 = vpack.c.bf16 %v6914_v22, %v6911_v31  ;;  %v15251_v57 = vld [vmem:[#allocation74_spill] sm:$0xff] }
0x13dc   : > { %v6751_v62 = vpack.c.bf16 %v6731_v29, %v6729_v44  ;;  %v15252_v29 = vld [vmem:[#allocation71_spill] sm:$0xff] }
0x13dd   : > { %7388 = vrot.lane.b32.xlu1 %v6936_v7, %s15125_s14  ;;  %v13462_v34 = vpop.permute.xlu0 %7232  ;;  %v6862_v7 = vmul.f32 %v13024_v40, %v12318_v3  ;;  %v6725_v31 = vmul.f32 %v15252_v29, %v12236_v24  ;;  %v15253_v3 = vld [vmem:[#allocation65_spill] sm:$0xff]  ;;  %v6863_v24 = vmul.f32 %v12980_v46, %v12387_v33 }
0x13de   : > { %7819 = vmatpush1.bf16.msra.mxu0 %v15240_v51  ;;  %v15249_v51 = vld [vmem:[#allocation83_spill] sm:$0xff]  ;;  %v6726_v48 = vmul.f32 %v15253_v3, %v12234_v20 }
0x13df   : > { %v13473_v25 = vpop.permute.xlu1 %7230  ;;  %7172 = vrot.lane.b32.xlu0 %v6828_v6, %s15119_s6  ;;  %7820 = vmatprep.subr.bf16.mxu0 %v15244_v1  ;;  %v15248_v6 = vld [vmem:[#allocation84_spill] sm:$0xff]  ;;  %v6728_v1 = vmul.f32 %v15251_v57, %v12234_v20  ;;  %v6883_v22 = vpack.c.bf16 %v6865_v35, %v6862_v7  ;;  %v6777_v35 = vpack.c.bf16 %v13095_v37, %v13027_v0 }
0x13e0   : > { %15241 = vst [vmem:[#allocation127_spill] sm:$0xff] %v13473_v25  ;;  %v15250_v43 = vpack.c.bf16 %v15248_v6, %v15249_v51  ;;  %v6749_v51 = vpack.c.bf16 %v6727_v45, %v6725_v31  ;;  %v6808_v7 = vmul.f32 %v13024_v40, %v12397_v58 }
0x13e1   : > { %7312 = vrot.lane.b32.xlu1 %v6775_v14, %s15122_s9  ;;  %v13488_v49 = vpop.permute.xlu0 %7446  ;;  %v6750_v44 = vpack.c.bf16 %v6730_v2, %v6728_v1  ;;  %v6811_v2 = vmul.f32 %v13052_v38, %v12397_v58 }
0x13e2   : > { %7821 = vmatpush1.bf16.msra.mxu0 %v15250_v43  ;;  %v15254_v43 = vld [vmem:[#allocation64_spill] sm:$0xff] }
0x13e3   : > { %v13499_v50 = vpop.permute.xlu1 %7448  ;;  %7386 = vrot.lane.b32.xlu0 %v6935_v39, %s15125_s14  ;;  %7822 = vmatprep.subr.bf16.mxu0 %v6751_v62  ;;  %v6724_v18 = vmul.f32 %v15254_v43, %v12234_v20  ;;  %v6829_v1 = vpack.c.bf16 %v6811_v2, %v6808_v7  ;;  %v10096_v2 = vld [vmem:[%s15256_s8 + $0x4] ss:$28 sps:$4 sm:$0xff]   ;;  %v6866_v7 = vmul.f32 %v12997_v59, %v12387_v33 }
0x13e4   : > { %7842 = vmatprep.mubr.bf16.mxu0 %v10096_v2  ;;  %v15261_v33 = vld [vmem:[#allocation72_spill] sm:$0xff] }
0x13e5   : > { %7252 = vrot.lane.b32.xlu1 %v6883_v22, %s15124_s13  ;;  %v13507_v6 = vpop.permute.xlu0 %7370  ;;  %v6748_v39 = vpack.c.bf16 %v6726_v48, %v6724_v18  ;;  %v6776_v18 = vpack.c.bf16 %v12997_v59, %v12980_v46  ;;  %v6919_v48 = vmul.f32 %v13052_v38, %v12301_v23 }
0x13e6   : > { %7823 = vmatpush1.bf16.msra.mxu0 %v6750_v44  ;;  %v6916_v44 = vmul.f32 %v13024_v40, %v12301_v23  ;;  %v6864_v23 = vmul.f32 %v13027_v0, %v12362_v9 }
0x13e7   : > { %v13511_v25 = vpop.permute.xlu1 %7368  ;;  %7096 = vrot.lane.b32.xlu0 %v6775_v14, %s15117_s1  ;;  %7824 = vmatprep.subr.bf16.mxu0 %v6749_v51 }
0x13e8   : > { %15255 = vst [vmem:[#allocation82_spill] sm:$0xff] %v13511_v25  ;;  %v6937_v51 = vpack.c.bf16 %v6919_v48, %v6916_v44  ;;  %v6884_v48 = vpack.c.bf16 %v6866_v7, %v6863_v24  ;;  %v15262_v7 = vld [vmem:[#allocation66_spill] sm:$0xff]  ;;  %v15275_v25 = vld [vmem:[#allocation91_spill] sm:$0xff] }
0x13e9   : > { %7100 = vrot.lane.b32.xlu1 %v6777_v35, %s15117_s1  ;;  %v13519_v62 = vpop.permute.xlu0 %7078 }
0x13ea   : > { %7825 = vmatpush1.bf16.msra.mxu0 %v6748_v39 }
0x13eb   : > { %v13523_v45 = vpop.permute.xlu1 %7294  ;;  %7528 = vrot.lane.b32.xlu0 %v6775_v14, %s15030_s11 }
0x13ec   : > { %15257 = vst [vmem:[#allocation81_spill] sm:$0xff] %v13523_v45 }
0x13ed   : > { %7174 = vrot.lane.b32.xlu1 %v6829_v1, %s15119_s6  ;;  %v13527_v22 = vpop.permute.xlu0 %7080 }
0x13ef   : > { %v13533_v31 = vpop.permute.xlu1 %7156  ;;  %7098 = vrot.lane.b32.xlu0 %v6776_v18, %s15117_s1 }
0x13f1   : > { %7314 = vrot.lane.b32.xlu1 %v6776_v18, %s15122_s9  ;;  %v13539_v14 = vpop.permute.xlu0 %7450 }
0x13f3   : > { %v13542_v39 = vpop.permute.xlu1 %7234  ;;  %7390 = vrot.lane.b32.xlu0 %v6937_v51, %s15125_s14  ;;  %v6867_v51 = vmul.f32 %v13095_v37, %v12362_v9  ;;  %v7027_v9 = vmul.f32 %v13052_v38, %v12256_v47  ;;  %v6812_v38 = vmul.f32 %v12997_v59, %v12405_v10  ;;  %v6813_v59 = vmul.f32 %v13095_v37, %v12389_v30 }
0x13f5   : > { %7532 = vrot.lane.b32.xlu1 %v6777_v35, %s15030_s11  ;;  %v13548_v1 = vpop.permute.xlu0 %7372 }
0x13f6   : > { %15258 = vst [vmem:[#allocation76_spill] sm:$0xff] %v13548_v1 }
0x13f7   : > { %v13552_v20 = vpop.permute.xlu1 %7082  ;;  %7316 = vrot.lane.b32.xlu0 %v6777_v35, %s15122_s9  ;;  %v6885_v35 = vpack.c.bf16 %v6867_v51, %v6864_v23  ;;  %v7024_v51 = vmul.f32 %v13024_v40, %v12256_v47 }
0x13f9   : > { %7254 = vrot.lane.b32.xlu1 %v6884_v48, %s15124_s13  ;;  %v13556_v44 = vpop.permute.xlu0 %7298 }
0x13fa   : > { %15259 = vst [vmem:[#allocation73_spill] sm:$0xff] %v13556_v44 }
0x13fb   : > { %v13560_v2 = vpop.permute.xlu1 %7296  ;;  %7530 = vrot.lane.b32.xlu0 %v6776_v18, %s15030_s11  ;;  %v15263_v18 = vld [vmem:[#allocation70_spill] sm:$0xff] }
0x13fc   : > { %15260 = vst [vmem:[#allocation68_spill] sm:$0xff] %v13560_v2  ;;  %v7045_v2 = vpack.c.bf16 %v7027_v9, %v7024_v51  ;;  %v6809_v9 = vmul.f32 %v12980_v46, %v12405_v10  ;;  %v6810_v46 = vmul.f32 %v13027_v0, %v12389_v30  ;;  %v15269_v51 = vld [vmem:[#allocation87_spill] sm:$0xff]  ;;  %v15270_v10 = vld [vmem:[#allocation86_spill] sm:$0xff] }
0x13fd   : > { %7284 = vrot.lane.b32.xlu1 %v15261_v33, %s15122_s9  ;;  %v7161_v58 = vpop.permute.xlu0 %7160 }
0x13ff   : > { %v13567_v24 = vpop.permute.xlu1 %7158  ;;  %7256 = vrot.lane.b32.xlu0 %v6885_v35, %s15124_s13 }
0x1401   : > { %7282 = vrot.lane.b32.xlu1 %v15262_v7, %s15122_s9  ;;  %v13572_v48 = vpop.permute.xlu0 %7238 }
0x1403   : > { %v13574_v45 = vpop.permute.xlu1 %7236  ;;  %7286 = vrot.lane.b32.xlu0 %v15263_v18, %s15122_s9 }
0x1405   : > { %7520 = vrot.lane.b32.xlu1 %v13276_v60, %s15030_s11  ;;  %v13582_v23 = vpop.permute.xlu0 %7452  ;;  %v6830_v60 = vpack.c.bf16 %v6812_v38, %v6809_v9  ;;  %v6831_v38 = vpack.c.bf16 %v6813_v59, %v6810_v46  ;;  %v6921_v59 = vmul.f32 %v13095_v37, %v12338_v17  ;;  %v15278_v46 = vld [vmem:[#allocation80_spill] sm:$0xff]  ;;  %v15280_v37 = vpack.c.bf16 %v13041_v55, %v13033_v26  ;;  %v15284_v55 = vld [vmem:[#allocation93_spill] sm:$0xff] }
0x1406   : > { %v7185_v26 = vsel %vm5961_vm9, %v13567_v24, %v7161_v58  ;;  %v7184_v58 = vsel %vm5961_vm9, %v13533_v31, %v13567_v24  ;;  %v7182_v31 = vsel %vm5961_vm9, %v13391_v8, %v13450_v28  ;;  %v15289_v24 = vpack.c.bf16 %v13084_v12, %v13078_v36 }
0x1407   : > { %v13586_v35 = vpop.permute.xlu1 %7454  ;;  %7518 = vrot.lane.b32.xlu0 %v13268_v53, %s15030_s11 }
0x1409   : > { %7606 = vrot.lane.b32.xlu1 %v7045_v2, %s15264_s3  ;;  %v13591_v44 = vpop.permute.xlu0 %7374 }
0x140a   : > { %15265 = vst [vmem:[#allocation84_spill] sm:$0xff] %v13591_v44  ;;  %v15273_v44 = vld [vmem:[#allocation88_spill] sm:$0xff] }
0x140b   : > { %v13593_v1 = vpop.permute.xlu1 %7376  ;;  %7516 = vrot.lane.b32.xlu0 %v13250_v63, %s15030_s11 }
0x140c   : > { %15266 = vst [vmem:[#allocation83_spill] sm:$0xff] %v13593_v1 }
0x140d   : > { %7514 = vrot.lane.b32.xlu1 %v13158_v61, %s15030_s11  ;;  %v13601_v40 = vpop.permute.xlu0 %7084  ;;  %v15268_v61 = vld [vmem:[#allocation85_spill] sm:$0xff] }
0x140f   : > { %v13605_v53 = vpop.permute.xlu1 %7300  ;;  %7512 = vrot.lane.b32.xlu0 %v12928_v19, %s15030_s11 }
0x1410   : > { %15267 = vst [vmem:[#allocation74_spill] sm:$0xff] %v13605_v53  ;;  %v15271_v53 = vpack.c.bf16 %v15269_v51, %v15270_v10  ;;  %v15276_v10 = vld [vmem:[#allocation90_spill] sm:$0xff] }
0x1411   : > { %7176 = vrot.lane.b32.xlu1 %v6830_v60, %s15119_s6  ;;  %v7163_v63 = vpop.permute.xlu0 %7162  ;;  %v15272_v60 = vld [vmem:[#allocation89_spill] sm:$0xff] }
0x1412   : > { %v15274_v1 = vpack.c.bf16 %v15272_v60, %v15273_v44 }
0x1413   : > { %v13612_v2 = vpop.permute.xlu1 %7240  ;;  %7510 = vrot.lane.b32.xlu0 %v15268_v61, %s15030_s11 }
0x1415   : > { %7602 = vrot.lane.b32.xlu1 %v15271_v53, %s15264_s3  ;;  %v13622_v19 = vpop.permute.xlu0 %7086  ;;  %v15277_v53 = vpack.c.bf16 %v15275_v25, %v15276_v10 }
0x1417   : > { %v13624_v9 = vpop.permute.xlu1 %7088  ;;  %7178 = vrot.lane.b32.xlu0 %v6831_v38, %s15119_s6  ;;  %v15279_v38 = vld [vmem:[#allocation78_spill] sm:$0xff] }
0x1419   : > { %7600 = vrot.lane.b32.xlu1 %v15274_v1, %s15264_s3  ;;  %v13631_v61 = vpop.permute.xlu0 %7456  ;;  %v6918_v1 = vmul.f32 %v13027_v0, %v12338_v17 }
0x141b   : > { %v13633_v30 = vpop.permute.xlu1 %7302  ;;  %7604 = vrot.lane.b32.xlu0 %v15277_v53, %s15264_s3  ;;  %v6939_v60 = vpack.c.bf16 %v6921_v59, %v6918_v1  ;;  %v15281_v53 = vld [vmem:[#allocation92_spill] sm:$0xff] }
0x141c   : > { %v15282_v0 = vpack.c.bf16 %v13049_v11, %v15281_v53  ;;  %v15285_v11 = vpack.c.bf16 %v13060_v32, %v15284_v55  ;;  %v15287_v53 = vld [vmem:[#allocation94_spill] sm:$0xff]  ;;  %v7183_v32 = vsel %vm5961_vm9, %v13450_v28, %v13456_v27  ;;  %v7181_v27 = vsel %vm5961_vm9, %v13332_v42, %v13338_v15  ;;  %v15290_v15 = vld [vmem:[#allocation96_spill] sm:$0xff]  ;;  %v15292_v28 = vld [vmem:[#allocation97_spill] sm:$0xff] }
0x141d   : > { %7508 = vrot.lane.b32.xlu1 %v15278_v46, %s15030_s11  ;;  %v13643_v51 = vpop.permute.xlu0 %7378  ;;  %v15291_v12 = vpack.c.bf16 %v13092_v5, %v15290_v15  ;;  %v15304_v15 = vld [vmem:[#allocation103_spill] sm:$0xff] }
0x141f   : > { %v7167_v44 = vpop.permute.xlu1 %7166  ;;  %7506 = vrot.lane.b32.xlu0 %v15279_v38, %s15030_s11 }
0x1421   : > { %7394 = vrot.lane.b32.xlu1 %v6939_v60, %s15125_s14  ;;  %v13650_v25 = vpop.permute.xlu0 %7304  ;;  %v15283_v60 = vld [vmem:[#allocation75_spill] sm:$0xff] }
0x1423   : > { %v13652_v10 = vpop.permute.xlu1 %7242  ;;  %7392 = vrot.lane.b32.xlu0 %v15280_v37, %s15125_s14 }
0x1425   : > { %7596 = vrot.lane.b32.xlu1 %v15282_v0, %s15264_s3  ;;  %v7165_v46 = vpop.permute.xlu0 %7164 }
0x1426   : > { %v7187_v38 = vsel %vm5961_vm9, %v7165_v46, %v7167_v44  ;;  %v7186_v59 = vsel %vm5961_vm9, %v7163_v63, %v7165_v46  ;;  %v15286_v63 = vld [vmem:[#allocation95_spill] sm:$0xff] }
0x1427   : > { %v13664_v1 = vpop.permute.xlu1 %7460  ;;  %7504 = vrot.lane.b32.xlu0 %v15283_v60, %s15030_s11  ;;  %7826 = vmatprep.subr.bf16.mxu0 %v7187_v38  ;;  %v15288_v0 = vpack.c.bf16 %v15286_v63, %v15287_v53 }
0x1428   : > { %7827 = vmatpush2.bf16.msra.mxu0 %v7186_v59  ;;  %v10105_v59 = vld [vmem:[%s15256_s8 + $0xc] ss:$28 sps:$4 sm:$0xff]  }
0x1429   : > { %7594 = vrot.lane.b32.xlu1 %v15285_v11, %s15264_s3  ;;  %7828 = vmatprep.subr.bf16.mxu0 %v7185_v26  ;;  %v13674_v37 = vpop.permute.xlu0 %7244  ;;  %v15293_v26 = vpack.c.bf16 %v13106_v13, %v15292_v28 }
0x142a   : > { %7905 = vmatprep.mubr.bf16.mxu1 %v10105_v59 }
0x142b   : > { %v13676_v44 = vpop.permute.xlu1 %7382  ;;  %7598 = vrot.lane.b32.xlu0 %v15288_v0, %s15264_s3  ;;  %v15299_v0 = vld [vmem:[#allocation101_spill] sm:$0xff] }
0x142c   : > { %7829 = vmatpush2.bf16.msra.mxu0 %v7184_v58  ;;  %v15300_v58 = vld [vmem:[#allocation100_spill] sm:$0xff] }
0x142d   : > { %7502 = vrot.lane.b32.xlu1 %v15263_v18, %s15030_s11  ;;  %7830 = vmatprep.subr.bf16.mxu0 %v7183_v32  ;;  %v13690_v46 = vpop.permute.xlu0 %7458  ;;  %v15301_v13 = vpack.c.bf16 %v15299_v0, %v15300_v58 }
0x142f   : > { %v13692_v38 = vpop.permute.xlu1 %7306  ;;  %7500 = vrot.lane.b32.xlu0 %v15261_v33, %s15030_s11  ;;  %v7180_v33 = vsel %vm5961_vm9, %v13303_v52, %v13332_v42  ;;  %v15295_v52 = vld [vmem:[#allocation99_spill] sm:$0xff]  ;;  %v15296_v42 = vld [vmem:[#allocation98_spill] sm:$0xff] }
0x1430   : > { %7831 = vmatpush2.bf16.msra.mxu0 %v7182_v31  ;;  %v15297_v11 = vpack.c.bf16 %v15295_v52, %v15296_v42 }
0x1431   : > { %7590 = vrot.lane.b32.xlu1 %v15289_v24, %s15264_s3  ;;  %7832 = vmatprep.subr.bf16.mxu0 %v7181_v27  ;;  %v13706_v18 = vpop.permute.xlu0 %7380  ;;  %v7000_v27 = vmul.f32 %v15251_v57, %v12256_v47  ;;  %v15302_v24 = vld [vmem:[#allocation51_spill] sm:$0xff] }
0x1433   : > { %v13709_v60 = vpop.permute.xlu1 %7246  ;;  %7498 = vrot.lane.b32.xlu0 %v15262_v7, %s15030_s11  ;;  %v15294_v7 = vld [vmem:[#allocation54_spill] sm:$0xff]  ;;  %s15298_s11 = smov 96  }
0x1434   : > { %7833 = vmatpush2.bf16.msra.mxu0 %v7180_v33  ;;  %v7004_v55 = vmul.f32 %v12758_v4, %v15294_v7  ;;  %v7001_v5 = vmul.f32 %v15245_v54, %v15294_v7  ;;  %v7003_v4 = vmul.f32 %v15246_v41, %v12256_v47  ;;  %v15303_v54 = vld [vmem:[#allocation77_spill] sm:$0xff]  ;;  %v15307_v41 = vld [vmem:[#allocation79_spill] sm:$0xff] }
0x1435   : > { %7588 = vrot.lane.b32.xlu1 %v15291_v12, %s15264_s3  ;;  %v13720_v36 = vpop.permute.xlu0 %7090  ;;  %v7005_v59 = vmul.f32 %v15303_v54, %v15302_v24  ;;  %v15305_v12 = vld [vmem:[#allocation102_spill] sm:$0xff]  ;;  %v6998_v54 = vmul.f32 %v15247_v16, %v15294_v7  ;;  %v6997_v16 = vmul.f32 %v15253_v3, %v12256_v47 }
0x1436   : > { %v7034_v32 = vpack.c.bf16 %v7004_v55, %v7001_v5  ;;  %v15306_v28 = vpack.c.bf16 %v15304_v15, %v15305_v12  ;;  %v7002_v55 = vmul.f32 %v15307_v41, %v15302_v24  ;;  %v15309_v5 = vld [vmem:[#allocation104_spill] sm:$0xff] }
0x1437   : > { %v13722_v8 = vpop.permute.xlu1 %7094  ;;  %7592 = vrot.lane.b32.xlu0 %v15293_v26, %s15264_s3  ;;  %v7033_v26 = vpack.c.bf16 %v7003_v4, %v7000_v27  ;;  %v15312_v4 = vld [vmem:[#allocation106_spill] sm:$0xff]  ;;  %v15315_v15 = vld [vmem:[#allocation108_spill] sm:$0xff] }
0x1438   : > { %v7035_v42 = vpack.c.bf16 %v7005_v59, %v7002_v55  ;;  %v15314_v59 = vld [vmem:[#allocation109_spill] sm:$0xff]  ;;  %v15318_v55 = vpack.c.bf16 %v13190_v56, %v13186_v21  ;;  %v15320_v56 = vld [vmem:[#allocation111_spill] sm:$0xff]  ;;  %v15321_v21 = vld [vmem:[#allocation110_spill] sm:$0xff] }
0x1439   : > { %7608 = vrot.lane.b32.xlu1 %v15297_v11, %s15264_s3  ;;  %v13734_v63 = vpop.permute.xlu0 %7522  ;;  %v15308_v11 = vld [vmem:[#allocation105_spill] sm:$0xff]  ;;  %v15316_v12 = vpack.c.bf16 %v15314_v59, %v15315_v15  ;;  %v7663_v15 = vld [vmem:[%s15317_s0 + $0x18] sm:$0xff] }
0x143a   : > { %v15310_v0 = vpack.c.bf16 %v15308_v11, %v15309_v5  ;;  %v15319_v5 = vld [vmem:[#allocation69_spill] sm:$0xff] }
0x143b   : > { %v13738_v53 = vpop.permute.xlu1 %7168  ;;  %7468 = vrot.lane.b32.xlu0 %v15301_v13, %s15298_s11 }
0x143d   : > { %7584 = vrot.lane.b32.xlu1 %v7034_v32, %s15264_s3  ;;  %v13747_v31 = vpop.permute.xlu0 %7092  ;;  %v15311_v32 = vld [vmem:[#allocation107_spill] sm:$0xff] }
0x143e   : > { %v15313_v27 = vpack.c.bf16 %v15311_v32, %v15312_v4  ;;  %v15322_v4 = vpack.c.bf16 %v15320_v56, %v15321_v21  ;;  %v7664_v21 = vld [vmem:[%s15317_s0 + $0x20] sm:$0xff] }
0x143f   : > { %v13753_v33 = vpop.permute.xlu1 %7308  ;;  %7610 = vrot.lane.b32.xlu0 %v15306_v28, %s15264_s3 }
0x1441   : > { %7582 = vrot.lane.b32.xlu1 %v7033_v26, %s15264_s3  ;;  %v13762_v52 = vpop.permute.xlu0 %7384  ;;  %v6995_v26 = vmul.f32 %v15252_v29, %v15294_v7  ;;  %v6994_v29 = vmul.f32 %v15254_v43, %v12256_v47 }
0x1443   : > { %v13764_v57 = vpop.permute.xlu1 %7526  ;;  %7586 = vrot.lane.b32.xlu0 %v7035_v42, %s15264_s3  ;;  %v7031_v42 = vpack.c.bf16 %v6998_v54, %v6995_v26  ;;  %v7030_v3 = vpack.c.bf16 %v6997_v16, %v6994_v29  ;;  %v7662_v26 = vld [vmem:[%s15317_s0 + $0x10] sm:$0xff]  ;;  %v7660_v29 = vld [vmem:[%s15317_s0] sm:$0xff] }
0x1445   : > { %7466 = vrot.lane.b32.xlu1 %v15310_v0, %s15298_s11  ;;  %v13771_v58 = vpop.permute.xlu0 %7310  ;;  %v6999_v0 = vmul.f32 %v15319_v5, %v15302_v24 }
0x1447   : > { %v13773_v13 = vpop.permute.xlu1 %7248  ;;  %7464 = vrot.lane.b32.xlu0 %v15313_v27, %s15298_s11  ;;  %v15323_v27 = vld [vmem:[#allocation67_spill] sm:$0xff] }
0x1448   : > { %v6996_v54 = vmul.f32 %v15323_v27, %v15302_v24 }
0x1449   : > { %7472 = vrot.lane.b32.xlu1 %v15316_v12, %s15298_s11  ;;  %v13785_v28 = vpop.permute.xlu0 %7524 }
0x144a   : > { %v7032_v43 = vpack.c.bf16 %v6999_v0, %v6996_v54  ;;  %v7665_v0 = vld [vmem:[%s15317_s0 + $0x28] sm:$0xff]  ;;  %v8100_v54 = vld [vmem:[%s15324_s2 + $0x10] sm:$0xff] }
0x144b   : > { %v13789_v41 = vpop.permute.xlu1 %7170  ;;  %7470 = vrot.lane.b32.xlu0 %v15318_v55, %s15298_s11 }
0x144d   : > { %7578 = vrot.lane.b32.xlu1 %v7031_v42, %s15264_s3  ;;  %v13798_v11 = vpop.permute.xlu0 %7250  ;;  %v7661_v42 = vld [vmem:[%s15317_s0 + $0x8] sm:$0xff]  ;;  %s15351_s0 = smov 17  }
0x144f   : > { %v13804_v32 = vpop.permute.xlu1 %7388  ;;  %7462 = vrot.lane.b32.xlu0 %v15322_v4, %s15298_s11 }
0x1451   : > { %7576 = vrot.lane.b32.xlu1 %v7030_v3, %s15264_s3  ;;  %v13813_v59 = vpop.permute.xlu0 %7172  ;;  %v8101_v3 = vld [vmem:[%s15324_s2 + $0x18] sm:$0xff] }
0x1453   : > { %v13816_v12 = vpop.permute.xlu1 %7312  ;;  %7580 = vrot.lane.b32.xlu0 %v7032_v43, %s15264_s3 }
0x1455   : > { %7683 = vperm.xlu1 %10013, %v7663_v15   ;;  %v13820_v55 = vpop.permute.xlu0 %7386 }
0x1457   : > { %v13823_v16 = vpop.permute.xlu1 %7252  ;;  %7678 = vperm.xlu0 %10012, %v7662_v26  }
0x1459   : > { %7673 = vperm.xlu1 %10013, %v7661_v42   ;;  %v7097_v5 = vpop.permute.xlu0 %7096  ;;  %v8149_v42 = vld [vmem:[%s15325_s4 + $0x18] sm:$0xff] }
0x145b   : > { %v7101_v56 = vpop.permute.xlu1 %7100  ;;  %7668 = vperm.xlu0 %10012, %v7660_v29  }
0x145d   : > { %7693 = vperm.xlu1 %10013, %v7665_v0   ;;  %v13828_v4 = vpop.permute.xlu0 %7528  ;;  %v7111_v0 = vsel %vm5946_vm4, %v13747_v31, %v13722_v8  ;;  %v7109_v8 = vsel %vm5946_vm4, %v13622_v19, %v13624_v9  ;;  %v8146_v9 = vld [vmem:[%s15325_s4] sm:$0xff] }
0x145f   : > { %v13831_v27 = vpop.permute.xlu1 %7174  ;;  %7688 = vperm.xlu0 %10012, %v7664_v21   ;;  %v8148_v21 = vld [vmem:[%s15325_s4 + $0x10] sm:$0xff] }
0x1461   : > { %8121 = vperm.xlu1 %10013, %v8101_v3   ;;  %v7099_v43 = vpop.permute.xlu0 %7098 }
0x1462   : > { %v7113_v15 = vsel %vm5946_vm4, %v7099_v43, %v7101_v56  ;;  %v7112_v26 = vsel %vm5946_vm4, %v7097_v5, %v7099_v43  ;;  %v8099_v56 = vld [vmem:[%s15324_s2 + $0x8] sm:$0xff]  ;;  %v8098_v43 = vld [vmem:[%s15324_s2] sm:$0xff] }
0x1463   : > { %v13837_v29 = vpop.permute.xlu1 %7314  ;;  %8116 = vperm.xlu0 %10012, %v8100_v54   ;;  %7834 = vmatprep.subr.bf16.mxu0 %v7113_v15  ;;  %v7110_v54 = vsel %vm5946_vm4, %v13720_v36, %v13747_v31  ;;  %v7108_v36 = vsel %vm5946_vm4, %v13601_v40, %v13622_v19  ;;  %v7107_v31 = vsel %vm5946_vm4, %v13527_v22, %v13552_v20  ;;  %v10094_v19 = vld [vmem:[%s15256_s8] ss:$28 sps:$4 sm:$0xff]  }
0x1464   : > { %7835 = vmatpush2.bf16.msra.mxu0 %v7112_v26  ;;  %v8147_v26 = vld [vmem:[%s15325_s4 + $0x8] sm:$0xff]  ;;  %v7106_v40 = vsel %vm5946_vm4, %v13519_v62, %v13527_v22  ;;  %v7481_v20 = vsel %vm2914_vm3, %v13690_v46, %v13664_v1  ;;  %v7480_v62 = vsel %vm2914_vm3, %v13631_v61, %v13690_v46  ;;  %v10097_v22 = vld [vmem:[%s15256_s8 + $0x3c] ss:$28 sps:$4 sm:$0xff]  }
0x1465   : > { %8169 = vperm.xlu1 %10013, %v8149_v42   ;;  %7836 = vmatprep.subr.bf16.mxu0 %v7111_v0  ;;  %v13843_v3 = vpop.permute.xlu0 %7390 }
0x1467   : > { %v13846_v5 = vpop.permute.xlu1 %7532  ;;  %8164 = vperm.xlu0 %10012, %v8148_v21   ;;  %v8103_v21 = vld [vmem:[%s15324_s2 + $0x28] sm:$0xff] }
0x1468   : > { %7837 = vmatpush2.bf16.msra.mxu0 %v7110_v54  ;;  %v8102_v54 = vld [vmem:[%s15324_s2 + $0x20] sm:$0xff]  ;;  %s15353_s2 = smov 95  }
0x1469   : > { %8111 = vperm.xlu1 %10013, %v8099_v56   ;;  %7838 = vmatprep.subr.bf16.mxu0 %v7109_v8  ;;  %v13855_v15 = vpop.permute.xlu0 %7316 }
0x146b   : > { %v7255_v42 = vpop.permute.xlu1 %7254  ;;  %8106 = vperm.xlu0 %10012, %v8098_v43  }
0x146c   : > { %7839 = vmatpush2.bf16.msra.mxu0 %v7108_v36  ;;  %v7268_v1 = vsel %vm5976_vm2, %v13823_v16, %v7255_v42  ;;  %v7478_v16 = vsel %vm2914_vm3, %v13539_v14, %v13582_v23 }
0x146d   : > { %8159 = vperm.xlu1 %10013, %v8147_v26   ;;  %7840 = vmatprep.subr.bf16.mxu0 %v7107_v31  ;;  %v13865_v0 = vpop.permute.xlu0 %7530  ;;  %v8151_v26 = vld [vmem:[%s15325_s4 + $0x28] sm:$0xff]  ;;  %v8150_v31 = vld [vmem:[%s15325_s4 + $0x20] sm:$0xff] }
0x146f   : > { %v13868_v56 = vpop.permute.xlu1 %7284  ;;  %8154 = vperm.xlu0 %10012, %v8146_v9   ;;  %v7267_v9 = vsel %vm5976_vm2, %v13773_v13, %v13798_v11  ;;  %v7266_v11 = vsel %vm5976_vm2, %v13709_v60, %v13773_v13  ;;  %v15327_v13 = vld [vmem:[#allocation118_spill] sm:$0xff] }
0x1470   : > { %7841 = vmatpush2.bf16.msra.mxu0 %v7106_v40  ;;  %v10100_v40 = vld [vmem:[%s15256_s8 + $0x74] ss:$28 sps:$4 sm:$0xff]  }
0x1471   : > { %8131 = vperm.xlu1 %10013, %v8103_v21   ;;  %7936 = vmatprep.subr.bf16.mxu0 %v7481_v20  ;;  %v7257_v8 = vpop.permute.xlu0 %7256  ;;  %v7479_v21 = vsel %vm2914_vm3, %v13582_v23, %v13586_v35  ;;  %v7477_v35 = vsel %vm2914_vm3, %v13488_v49, %v13499_v50  ;;  %v15326_v23 = vld [vmem:[#allocation123_spill] sm:$0xff]  ;;  %v7264_v50 = vsel %vm5976_vm2, %v13612_v2, %v13652_v10 }
0x1472   : > { %v7269_v43 = vsel %vm5976_vm2, %v7255_v42, %v7257_v8  ;;  %v10099_v42 = vld [vmem:[%s15256_s8 + $0x38] ss:$28 sps:$4 sm:$0xff]   ;;  %v7476_v60 = vsel %vm2914_vm3, %v15326_v23, %v13488_v49  ;;  %v7263_v8 = vsel %vm5976_vm2, %v13574_v45, %v13572_v48 }
0x1473   : > { %v13880_v36 = vpop.permute.xlu1 %7282  ;;  %8126 = vperm.xlu0 %10012, %v8102_v54   ;;  %7843 = vmatmul.mubr.bf16.vlgmr.msra.gmra.mxu0 %v10094_v19  ;;  %v7265_v19 = vsel %vm5976_vm2, %v13652_v10, %v13674_v37  ;;  %v15328_v37 = vld [vmem:[#allocation117_spill] sm:$0xff]  ;;  %v15330_v48 = vld [vmem:[#allocation127_spill] sm:$0xff] }
0x1474   : > { %7873 = vmatprep.subr.bf16.mxu1 %v7269_v43  ;;  %7937 = vmatpush1.bf16.msra.mxu0 %v7480_v62  ;;  %v7475_v54 = vsel %vm2914_vm3, %v15328_v37, %v15327_v13  ;;  %v10102_v10 = vld [vmem:[%s15256_s8 + $0x70] ss:$28 sps:$4 sm:$0xff]   ;;  %v7262_v62 = vsel %vm5976_vm2, %v13542_v39, %v13574_v45  ;;  %v15333_v45 = vld [vmem:[#allocation116_spill] sm:$0xff]  ;;  %v7189_v13 = vsel %vm5961_vm9, %v13789_v41, %v13813_v59 }
0x1475   : > { %7874 = vmatpush1.bf16.msra.mxu1 %v7268_v1  ;;  %8179 = vperm.xlu1 %10013, %v8151_v26   ;;  %v13895_v61 = vpop.permute.xlu0 %7286  ;;  %v15329_v26 = vld [vmem:[#allocation113_spill] sm:$0xff]  ;;  %v7261_v1 = vsel %vm5976_vm2, %v15330_v48, %v13462_v34  ;;  %v15334_v34 = vld [vmem:[#allocation112_spill] sm:$0xff] }
0x1476   : > { %7875 = vmatprep.subr.bf16.mxu1 %v7267_v9  ;;  %7938 = vmatprep.subr.bf16.mxu0 %v7479_v21  ;;  %v7474_v2 = vsel %vm2914_vm3, %v15329_v26, %v15328_v37  ;;  %v15331_v21 = vld [vmem:[#allocation122_spill] sm:$0xff]  ;;  %v15336_v59 = vld [vmem:[#allocation124_spill] sm:$0xff] }
0x1477   : > { %v13897_v46 = vpop.permute.xlu1 %7520  ;;  %8174 = vperm.xlu0 %10012, %v8150_v31   ;;  %7852 = vmatprep.mubr.bf16.mxu0 %v10097_v22  ;;  %v10114_v22 = vld [vmem:[%s15256_s8 + $0x14] ss:$28 sps:$4 sm:$0xff]  }
0x1478   : > { %7939 = vmatpush1.bf16.msra.mxu0 %v7478_v16  ;;  %v7260_v16 = vsel %vm5976_vm2, %v15331_v21, %v15330_v48  ;;  %v15335_v26 = vld [vmem:[#allocation82_spill] sm:$0xff]  ;;  %v15338_v48 = vld [vmem:[#allocation120_spill] sm:$0xff] }
0x1479   : > { %7876 = vmatpush1.bf16.msra.mxu1 %v7266_v11  ;;  %7940 = vmatprep.subr.bf16.mxu0 %v7477_v35  ;;  %v13913_v20 = vpop.permute.xlu0 %7518  ;;  %v15339_v21 = vld [vmem:[#allocation114_spill] sm:$0xff] }
0x147a   : > { %7877 = vmatprep.subr.bf16.mxu1 %v7265_v19 }
0x147b   : > { %v13915_v14 = vpop.permute.xlu1 %7606  ;;  %7853 = vmatmul.mubr.bf16.gmra.mxu0 %v10099_v42  ;;  %v15332_v42 = vld [vmem:[#allocation115_spill] sm:$0xff] }
0x147c   : > { %7941 = vmatpush1.bf16.msra.mxu0 %v7476_v60  ;;  %7862 = vmatprep.mubr.bf16.mxu0 %v10100_v40  ;;  %v7259_v39 = vsel %vm5976_vm2, %v15333_v45, %v15332_v42  ;;  %v7258_v40 = vsel %vm5976_vm2, %v15334_v34, %v15333_v45  ;;  %v7405_v42 = vsel %vm6003_vm15, %v13820_v55, %v13804_v32 }
0x147d   : > { %7878 = vmatpush1.bf16.msra.mxu1 %v7264_v50  ;;  %7942 = vmatprep.subr.bf16.mxu0 %v7475_v54  ;;  %v13929_v43 = vpop.permute.xlu0 %7516  ;;  %v7329_v45 = vsel %vm5988_vm14, %v13837_v29, %v13855_v15  ;;  %v7404_v34 = vsel %vm6003_vm15, %v13762_v52, %v13820_v55  ;;  %v7403_v32 = vsel %vm6003_vm15, %v13706_v18, %v13676_v44  ;;  %v15340_v44 = vld [vmem:[#allocation83_spill] sm:$0xff]  ;;  %v15341_v55 = vld [vmem:[#allocation84_spill] sm:$0xff] }
0x147e   : > { %7879 = vmatprep.subr.bf16.mxu1 %v7263_v8  ;;  %v7188_v8 = vsel %vm5961_vm9, %v13738_v53, %v13789_v41  ;;  %v7327_v15 = vsel %vm5988_vm14, %v13753_v33, %v13771_v58  ;;  %v7402_v52 = vsel %vm6003_vm15, %v13643_v51, %v13706_v18  ;;  %v7325_v58 = vsel %vm5988_vm14, %v13633_v30, %v13650_v25  ;;  %v15342_v51 = vld [vmem:[#allocation76_spill] sm:$0xff]  ;;  %v15343_v18 = vld [vmem:[#allocation74_spill] sm:$0xff]  ;;  %v15344_v25 = vld [vmem:[#allocation73_spill] sm:$0xff] }
0x147f   : > { %v13931_v49 = vpop.permute.xlu1 %7514 }
0x1480   : > { %7943 = vmatpush1.bf16.msra.mxu0 %v7474_v2  ;;  %v7399_v2 = vsel %vm6003_vm15, %v15335_v26, %v13507_v6 }
0x1481   : > { %7880 = vmatpush1.bf16.msra.mxu1 %v7262_v62  ;;  %v13944_v31 = vpop.permute.xlu0 %7512  ;;  %v7398_v62 = vsel %vm6003_vm15, %v15336_v59, %v15335_v26  ;;  %v15345_v26 = vld [vmem:[#allocation68_spill] sm:$0xff] }
0x1482   : > { %7881 = vmatprep.subr.bf16.mxu1 %v7261_v1 }
0x1483   : > { %v7177_v9 = vpop.permute.xlu1 %7176  ;;  %7863 = vmatmul.mubr.bf16.gmra.mxu0 %v10102_v10 }
0x1484   : > { %7968 = vmatprep.mubr.bf16.mxu0 %v10114_v22  ;;  %v7190_v50 = vsel %vm5961_vm9, %v13831_v27, %v7177_v9  ;;  %v15337_v22 = vld [vmem:[#allocation119_spill] sm:$0xff] }
0x1485   : > { %7882 = vmatpush1.bf16.msra.mxu1 %v7260_v16  ;;  %v13952_v11 = vpop.permute.xlu0 %7510  ;;  %v7397_v1 = vsel %vm6003_vm15, %v15338_v48, %v15337_v22  ;;  %v7396_v16 = vsel %vm6003_vm15, %v15339_v21, %v15338_v48  ;;  %v15347_v48 = vld [vmem:[#allocation125_spill] sm:$0xff] }
0x1486   : > { %7883 = vmatprep.subr.bf16.mxu1 %v7259_v39 }
0x1487   : > { %v13954_v35 = vpop.permute.xlu1 %7602 }
0x1489   : > { %7884 = vmatpush1.bf16.msra.mxu1 %v7258_v40  ;;  %v7179_v19 = vpop.permute.xlu0 %7178  ;;  %v7328_v40 = vsel %vm5988_vm14, %v13816_v12, %v13837_v29  ;;  %v7326_v12 = vsel %vm5988_vm14, %v13692_v38, %v13753_v33  ;;  %v7401_v29 = vsel %vm6003_vm15, %v15341_v55, %v15340_v44  ;;  %v7400_v38 = vsel %vm6003_vm15, %v15342_v51, %v15341_v55  ;;  %v10109_v44 = vld [vmem:[%s15256_s8 + $0x7c] ss:$28 sps:$4 sm:$0xff]  }
0x148a   : > { %v7191_v23 = vsel %vm5961_vm9, %v7177_v9, %v7179_v19  ;;  %v7324_v33 = vsel %vm5988_vm14, %v15343_v18, %v13633_v30  ;;  %v15346_v30 = vld [vmem:[#allocation81_spill] sm:$0xff] }
0x148b   : > { %v13960_v60 = vpop.permute.xlu1 %7600  ;;  %7885 = vmatprep.subr.bf16.mxu1 %v7191_v23  ;;  %v7322_v22 = vsel %vm5988_vm14, %v15346_v30, %v15345_v26  ;;  %v10112_v18 = vld [vmem:[%s15256_s8 + $0x10] ss:$28 sps:$4 sm:$0xff]   ;;  %v10120_v30 = vld [vmem:[%s15256_s8 + $0x84] ss:$28 sps:$4 sm:$0xff]  }
0x148d   : > { %7886 = vmatpush1.bf16.msra.mxu1 %v7190_v50  ;;  %v13967_v37 = vpop.permute.xlu0 %7604 }
0x148e   : > { %7887 = vmatprep.subr.bf16.mxu1 %v7189_v13 }
0x148f   : > { %v13969_v54 = vpop.permute.xlu1 %7508 }
0x1491   : > { %7888 = vmatpush1.bf16.msra.mxu1 %v7188_v8  ;;  %v13977_v27 = vpop.permute.xlu0 %7506  ;;  %v7545_v8 = vsel %vm6030_vm0, %v13865_v0, %v13846_v5  ;;  %v7543_v5 = vsel %vm6030_vm0, %v13785_v28, %v13764_v57  ;;  %v7541_v57 = vsel %vm6030_vm0, %v13913_v20, %v13897_v46  ;;  %v7539_v46 = vsel %vm6030_vm0, %v13944_v31, %v13931_v49 }
0x1492   : > { %7889 = vmatprep.subr.bf16.mxu1 %v7399_v2  ;;  %v7323_v2 = vsel %vm5988_vm14, %v15345_v26, %v15344_v25  ;;  %v7621_v49 = vsel %vm6042_vm13, %v13954_v35, %v13967_v37  ;;  %v15350_v26 = vmov 0  }
0x1493   : > { %v7395_v10 = vpop.permute.xlu1 %7394 }
0x1495   : > { %7890 = vmatpush2.bf16.msra.mxu1 %v7398_v62  ;;  %v7393_v9 = vpop.permute.xlu0 %7392  ;;  %v7544_v62 = vsel %vm6030_vm0, %v13828_v4, %v13865_v0  ;;  %v7542_v4 = vsel %vm6030_vm0, %v13734_v63, %v13785_v28  ;;  %v15349_v0 = vld [vmem:[#allocation121_spill] sm:$0xff]  ;;  %v7540_v63 = vsel %vm6030_vm0, %v13929_v43, %v13913_v20  ;;  %v7538_v20 = vsel %vm6030_vm0, %v13952_v11, %v13944_v31 }
0x1496   : > { %7891 = vmatprep.subr.bf16.mxu1 %v7397_v1  ;;  %v7407_v53 = vsel %vm6003_vm15, %v7393_v9, %v7395_v10  ;;  %v7406_v6 = vsel %vm6003_vm15, %v13843_v3, %v7393_v9  ;;  %v15348_v1 = vld [vmem:[#allocation126_spill] sm:$0xff] }
0x1497   : > { %v13988_v41 = vpop.permute.xlu1 %7596  ;;  %7944 = vmatprep.subr.bf16.mxu0 %v7407_v53  ;;  %v7321_v9 = vsel %vm5988_vm14, %v15348_v1, %v15347_v48  ;;  %v7320_v21 = vsel %vm5988_vm14, %v15349_v0, %v15348_v1  ;;  %v10123_v48 = vld [vmem:[%s15256_s8 + $0x88] ss:$28 sps:$4 sm:$0xff]  }
0x1498   : > { %7945 = vmatpush1.bf16.msra.mxu0 %v7406_v6 }
0x1499   : > { %7892 = vmatpush2.bf16.msra.mxu1 %v7396_v16  ;;  %7946 = vmatprep.subr.bf16.mxu0 %v7405_v42  ;;  %v13999_v39 = vpop.permute.xlu0 %7504  ;;  %v7319_v16 = vsel %vm5988_vm14, %v13868_v56, %v13895_v61 }
0x149a   : > { %7893 = vmatprep.subr.bf16.mxu1 %v7329_v45  ;;  %v7318_v45 = vsel %vm5988_vm14, %v13880_v36, %v13868_v56  ;;  %v7537_v36 = vsel %vm6030_vm0, %v13977_v27, %v13969_v54  ;;  %v7536_v11 = vsel %vm6030_vm0, %v13999_v39, %v13977_v27 }
0x149b   : > { %v14001_v3 = vpop.permute.xlu1 %7594 }
0x149c   : > { %7947 = vmatpush1.bf16.msra.mxu0 %v7404_v34  ;;  %v10103_v34 = vld [vmem:[%s15256_s8 + $0x8] ss:$28 sps:$4 sm:$0xff]  }
0x149d   : > { %7894 = vmatpush2.bf16.msra.mxu1 %v7328_v40  ;;  %7948 = vmatprep.subr.bf16.mxu0 %v7403_v32  ;;  %v14015_v19 = vpop.permute.xlu0 %7598  ;;  %v10106_v32 = vld [vmem:[%s15256_s8 + $0x44] ss:$28 sps:$4 sm:$0xff]  }
0x149e   : > { %7895 = vmatprep.subr.bf16.mxu1 %v7327_v15  ;;  %v7619_v37 = vsel %vm6042_vm13, %v13988_v41, %v14015_v19 }
0x149f   : > { %v14017_v23 = vpop.permute.xlu1 %7502 }
0x14a0   : > { %7949 = vmatpush1.bf16.msra.mxu0 %v7402_v52  ;;  %v10108_v52 = vld [vmem:[%s15256_s8 + $0x40] ss:$28 sps:$4 sm:$0xff]  }
0x14a1   : > { %7896 = vmatpush2.bf16.msra.mxu1 %v7326_v12  ;;  %7950 = vmatprep.subr.bf16.mxu0 %v7401_v29  ;;  %v14031_v50 = vpop.permute.xlu0 %7500 }
0x14a2   : > { %7897 = vmatprep.subr.bf16.mxu1 %v7325_v58  ;;  %v7535_v54 = vsel %vm6030_vm0, %v14031_v50, %v14017_v23  ;;  %v10111_v58 = vld [vmem:[%s15256_s8 + $0x78] ss:$28 sps:$4 sm:$0xff]  }
0x14a3   : > { %v14033_v13 = vpop.permute.xlu1 %7590 }
0x14a4   : > { %7951 = vmatpush1.bf16.msra.mxu0 %v7400_v38 }
0x14a5   : > { %7898 = vmatpush2.bf16.msra.mxu1 %v7324_v33  ;;  %7952 = vmatprep.subr.bf16.mxu0 %v7545_v8  ;;  %v7499_v10 = vpop.permute.xlu0 %7498 }
0x14a6   : > { %7899 = vmatprep.subr.bf16.mxu1 %v7323_v2  ;;  %v7534_v27 = vsel %vm6030_vm0, %v7499_v10, %v14031_v50 }
0x14a7   : > { %v14047_v59 = vpop.permute.xlu1 %7588 }
0x14a8   : > { %7953 = vmatpush2.bf16.msra.mxu0 %v7544_v62  ;;  %v10118_v62 = vld [vmem:[%s15256_s8 + $0x48] ss:$28 sps:$4 sm:$0xff]  }
0x14a9   : > { %7900 = vmatpush2.bf16.msra.mxu1 %v7322_v22  ;;  %7954 = vmatprep.subr.bf16.mxu0 %v7543_v5  ;;  %v7593_v53 = vpop.permute.xlu0 %7592  ;;  %v10119_v22 = vld [vmem:[%s15256_s8 + $0x50] ss:$28 sps:$4 sm:$0xff]   ;;  %v10122_v5 = vld [vmem:[%s15256_s8 + $0x80] ss:$28 sps:$4 sm:$0xff]  }
0x14aa   : > { %7901 = vmatprep.subr.bf16.mxu1 %v7321_v9 }
0x14ab   : > { %v7609_v6 = vpop.permute.xlu1 %7608 }
0x14ac   : > { %7955 = vmatpush2.bf16.msra.mxu0 %v7542_v4  ;;  %v7622_v56 = vsel %vm6042_vm13, %v13915_v14, %v7609_v6  ;;  %v7620_v14 = vsel %vm6042_vm13, %v13960_v60, %v13954_v35  ;;  %v7618_v35 = vsel %vm6042_vm13, %v14001_v3, %v13988_v41  ;;  %v7617_v60 = vsel %vm6042_vm13, %v14033_v13, %v7593_v53 }
0x14ad   : > { %7902 = vmatpush2.bf16.msra.mxu1 %v7320_v21  ;;  %7956 = vmatprep.subr.bf16.mxu0 %v7541_v57  ;;  %v7469_v42 = vpop.permute.xlu0 %7468  ;;  %v7616_v41 = vsel %vm6042_vm13, %v14047_v59, %v14033_v13  ;;  %v10116_v13 = vld [vmem:[%s15256_s8 + $0x4c] ss:$28 sps:$4 sm:$0xff]   ;;  %v10115_v59 = vld [vmem:[%s15256_s8 + $0x18] ss:$28 sps:$4 sm:$0xff]  }
0x14ae   : > { %7903 = vmatprep.subr.bf16.mxu1 %v7319_v16 }
0x14af   : > { %v7585_v28 = vpop.permute.xlu1 %7584 }
0x14b0   : > { %7957 = vmatpush2.bf16.msra.mxu0 %v7540_v63 }
0x14b1   : > { %7904 = vmatpush2.bf16.msra.mxu1 %v7318_v45  ;;  %7958 = vmatprep.subr.bf16.mxu0 %v7539_v46  ;;  %v7611_v61 = vpop.permute.xlu0 %7610 }
0x14b2   : > { %v7623_v40 = vsel %vm6042_vm13, %v7609_v6, %v7611_v61 }
0x14b3   : > { %v7583_v43 = vpop.permute.xlu1 %7582  ;;  %8003 = vmatprep.subr.bf16.mxu1 %v7623_v40 }
0x14b4   : > { %7906 = vmatmul.mubr.bf16.vlgmr.msra.gmra.mxu1 %v10103_v34  ;;  %7959 = vmatpush2.bf16.msra.mxu0 %v7538_v20  ;;  %v7614_v33 = vsel %vm6042_vm13, %v7583_v43, %v7585_v28 }
0x14b5   : > { %8004 = vmatpush1.bf16.msra.mxu1 %v7622_v56  ;;  %7960 = vmatprep.subr.bf16.mxu0 %v7537_v36  ;;  %v7587_v31 = vpop.permute.xlu0 %7586 }
0x14b6   : > { %8005 = vmatprep.subr.bf16.mxu1 %v7621_v49  ;;  %7915 = vmatprep.mubr.bf16.mxu1 %v10106_v32  ;;  %v7615_v50 = vsel %vm6042_vm13, %v7585_v28, %v7587_v31 }
0x14b7   : > { %v7467_v15 = vpop.permute.xlu1 %7466 }
0x14b8   : > { %7961 = vmatpush2.bf16.msra.mxu0 %v7536_v11 }
0x14b9   : > { %8006 = vmatpush1.bf16.msra.mxu1 %v7620_v14  ;;  %7962 = vmatprep.subr.bf16.mxu0 %v7535_v54  ;;  %v7465_v12 = vpop.permute.xlu0 %7464 }
0x14ba   : > { %8007 = vmatprep.subr.bf16.mxu1 %v7619_v37  ;;  %v7483_v3 = vsel %vm2914_vm3, %v7465_v12, %v7467_v15 }
0x14bb   : > { %v7473_v39 = vpop.permute.xlu1 %7472 }
0x14bc   : > { %7916 = vmatmul.mubr.bf16.gmra.mxu1 %v10108_v52  ;;  %7963 = vmatpush2.bf16.msra.mxu0 %v7534_v27 }
0x14bd   : > { %8008 = vmatpush1.bf16.msra.mxu1 %v7618_v35  ;;  %v7471_v23 = vpop.permute.xlu0 %7470  ;;  %7925 = vmatprep.mubr.bf16.mxu1 %v10109_v44 }
0x14be   : > { %8009 = vmatprep.subr.bf16.mxu1 %v7617_v60  ;;  %v7485_v19 = vsel %vm2914_vm3, %v7471_v23, %v7473_v39  ;;  %v7484_v55 = vsel %vm2914_vm3, %v7469_v42, %v7471_v23 }
0x14bf   : > { %v7579_v29 = vpop.permute.xlu1 %7578  ;;  %7964 = vmatprep.subr.bf16.mxu0 %v7485_v19 }
0x14c0   : > { %7965 = vmatpush2.bf16.msra.mxu0 %v7484_v55 }
0x14c1   : > { %8010 = vmatpush1.bf16.msra.mxu1 %v7616_v41  ;;  %7966 = vmatprep.subr.bf16.mxu0 %v7483_v3  ;;  %v7463_v51 = vpop.permute.xlu0 %7462 }
0x14c2   : > { %8011 = vmatprep.subr.bf16.mxu1 %v7615_v50  ;;  %v7482_v38 = vsel %vm2914_vm3, %v7463_v51, %v7465_v12 }
0x14c3   : > { %v7577_v8 = vpop.permute.xlu1 %7576 }
0x14c4   : > { %7926 = vmatmul.mubr.bf16.gmra.mxu1 %v10111_v58  ;;  %7967 = vmatpush2.bf16.msra.mxu0 %v7482_v38  ;;  %v7612_v10 = vsel %vm6042_vm13, %v7577_v8, %v7579_v29 }
0x14c5   : > { %8012 = vmatpush1.bf16.msra.mxu1 %v7614_v33  ;;  %v7581_v25 = vpop.permute.xlu0 %7580  ;;  %8031 = vmatprep.mubr.bf16.mxu1 %v15350_v26 }
0x14c6   : > { %v7613_v2 = vsel %vm6042_vm13, %v7579_v29, %v7581_v25 }
0x14c7   : > { %7969 = vmatmul.mubr.bf16.vlgmr.msra.gmra.mxu0 %v10112_v18  ;;  %8013 = vmatprep.subr.bf16.mxu1 %v7613_v2 }
0x14c8   : > { %7978 = vmatprep.mubr.bf16.mxu0 %v10116_v13 }
0x14c9   : > { %8014 = vmatpush1.bf16.msra.mxu1 %v7612_v10 }
0x14cc   : > { %9426 = vmatmul.mubr.msk.bf16.vlgmr.msra.gmra.mxu1 %vm2914_vm3, %v10115_v59 }
0x14cd   : > { %8041 = vmatprep.mubr.bf16.mxu1 %v15350_v26 }
0x14cf   : > { %7979 = vmatmul.mubr.bf16.gmra.mxu0 %v10118_v62 }
0x14d0   : > { %7988 = vmatprep.mubr.bf16.mxu0 %v10120_v30  ;;  %v7684_v16 = vpop.permute.xlu1 %7683 }
0x14d2   : > { %v7679_v21 = vpop.permute.xlu0 %7678 }
0x14d4   : > { %9427 = vmatmul.mubr.msk.bf16.gmra.mxu1 %vm2914_vm3, %v10119_v22  ;;  %v7674_v34 = vpop.permute.xlu1 %7673 }
0x14d5   : > { %8051 = vmatprep.mubr.bf16.mxu1 %v15350_v26 }
0x14d6   : > { %v7669_v63 = vpop.permute.xlu0 %7668 }
0x14d7   : > { %7989 = vmatmul.mubr.bf16.gmra.mxu0 %v10122_v5 }
0x14d8   : > { %v7694_v36 = vpop.permute.xlu1 %7693 }
0x14da   : > { %v7689_v32 = vpop.permute.xlu0 %7688 }
0x14dc   : > { %9428 = vmatmul.mubr.msk.bf16.gmra.mxu1 %vm2914_vm3, %v10123_v48  ;;  %v14149_v54 = vpop.permute.xlu1 %8121 }
0x14de   : > { %v14143_v31 = vpop.permute.xlu0 %8116 }
0x14e0   : > { %v14159_v55 = vpop.permute.xlu1 %8169 }
0x14e2   : > { %v14153_v12 = vpop.permute.xlu0 %8164 }
0x14e6   : > { %v8107_v18 = vpop.permute.xlu0 %8106 }
0x1533   : > { %v7844_v1 = vpop.f32.mrf.mxu0 }
0x1534   : > { %v7845_v44 = vadd.f32 %v7844_v1, %v7669_v63 }
0x1535   : > { %v7846_v9 = vpop.f32.mrf.mxu0 }
0x1536   : > { %v7847_v35 = vadd.f32 %v7846_v9, %v7669_v63 }
0x1537   : > { %v7848_v53 = vpop.f32.mrf.mxu0 }
0x1538   : > { %v7849_v29 = vadd.f32 %v7848_v53, %v7674_v34 }
0x1539   : > { %v7850_v6 = vpop.f32.mrf.mxu0 }
0x153a   : > { %v7851_v50 = vadd.f32 %v7850_v6, %v7674_v34 }
0x153b   : > { %v7854_v4 = vpop.f32.mrf.mxu0 }
0x153c   : > { %v7855_v51 = vadd.f32 %v7854_v4, %v7679_v21 }
0x153d   : > { %v7856_v0 = vpop.f32.mrf.mxu0 }
0x153e   : > { %v7857_v33 = vadd.f32 %v7856_v0, %v7679_v21  ;;  %v8112_v21 = vpop.permute.xlu1 %8111 }
0x153f   : > { %v7858_v57 = vpop.f32.mrf.mxu0 }
0x1540   : > { %v7859_v2 = vadd.f32 %v7858_v57, %v7684_v16 }
0x1541   : > { %v7860_v28 = vpop.f32.mrf.mxu0 }
0x1542   : > { %v7861_v10 = vadd.f32 %v7860_v28, %v7684_v16 }
0x1543   : > { %v7864_v61 = vpop.f32.mrf.mxu0 }
0x1544   : > { %v7865_v59 = vadd.f32 %v7864_v61, %v7689_v32 }
0x1545   : > { %v7866_v43 = vpop.f32.mrf.mxu0 }
0x1546   : > { %v7867_v9 = vadd.f32 %v7866_v43, %v7689_v32 }
0x1547   : > { %v7868_v11 = vpop.f32.mrf.mxu0 }
0x1548   : > { %v14161_v53 = vadd.f32 %v7868_v11, %v7694_v36 }
0x1549   : > { %v7870_v52 = vpop.f32.mrf.mxu0 }
0x154a   : > { %v14163_v28 = vadd.f32 %v7870_v52, %v7694_v36 }
0x1574   : > { %v7907_v42 = vpop.f32.mrf.mxu1 }
0x1575   : > { %v7908_v60 = vadd.f32 %v7907_v42, %v7845_v44 }
0x1576   : > { %v7909_v45 = vpop.f32.mrf.mxu1 }
0x1577   : > { %v7910_v41 = vadd.f32 %v7909_v45, %v7847_v35 }
0x1578   : > { %v7911_v46 = vpop.f32.mrf.mxu1 }
0x1579   : > { %v7912_v13 = vadd.f32 %v7911_v46, %v7849_v29 }
0x157a   : > { %v7913_v40 = vpop.f32.mrf.mxu1 }
0x157b   : > { %v7914_v62 = vadd.f32 %v7913_v40, %v7851_v50  ;;  %v8155_v40 = vpop.permute.xlu0 %8154 }
0x157c   : > { %v7917_v20 = vpop.f32.mrf.mxu1 }
0x157d   : > { %v7918_v6 = vadd.f32 %v7917_v20, %v7855_v51 }
0x157e   : > { %v7919_v56 = vpop.f32.mrf.mxu1 }
0x157f   : > { %v7920_v45 = vadd.f32 %v7919_v56, %v7857_v33 }
0x1580   : > { %v7921_v49 = vpop.f32.mrf.mxu1 }
0x1581   : > { %v7922_v11 = vadd.f32 %v7921_v49, %v7859_v2 }
0x1582   : > { %v14145_v15 = vpop.f32.mrf.mxu1 }
0x1583   : > { %v7924_v56 = vadd.f32 %v14145_v15, %v7861_v10 }
0x1584   : > { %v14147_v14 = vpop.f32.mrf.mxu1 }
0x1586   : > { %v14151_v37 = vpop.f32.mrf.mxu1 }
0x1587   : > { %v7970_v27 = vpop.f32.mrf.mxu0 }
0x1588   : > { %v14155_v39 = vpop.f32.mrf.mxu1  ;;  %v7971_v3 = vadd.f32 %v7970_v27, %v7908_v60 }
0x1589   : > { %v7972_v23 = vpop.f32.mrf.mxu0 }
0x158a   : > { %v14157_v19 = vpop.f32.mrf.mxu1  ;;  %v7973_v8 = vadd.f32 %v7972_v23, %v7910_v41 }
0x158b   : > { %v7974_v58 = vpop.f32.mrf.mxu0 }
0x158c   : > { %v8033_v38 = vpop.f32.mrf.mxu1  ;;  %v7975_v22 = vadd.f32 %v7974_v58, %v7912_v13 }
0x158d   : > { %v8034_v25 = vadd.f32 %v8033_v38, %v7971_v3  ;;  %v7976_v26 = vpop.f32.mrf.mxu0  ;;  %v8160_v38 = vpop.permute.xlu1 %8159 }
0x158e   : > { %v8035_v30 = vpop.f32.mrf.mxu1  ;;  %v7977_v4 = vadd.f32 %v7976_v26, %v7914_v62 }
0x158f   : > { %vm8062_vm10 = vcmp.ge.f32.partialorder %v8034_v25, 0.0  ;;  %v8074_v5 = vmul.f32 0.2, %v8034_v25  ;;  %v8036_v48 = vadd.f32 %v8035_v30, %v7973_v8  ;;  %v7980_v1 = vpop.f32.mrf.mxu0  ;;  %v7928_v8 = vadd.f32 %v14147_v14, %v7865_v59 }
0x1590   : > { %v8037_v0 = vpop.f32.mrf.mxu1  ;;  %v7981_v34 = vadd.f32 %v7980_v1, %v7918_v6 }
0x1591   : > { %v8086_v42 = vsel %vm8062_vm10, %v8034_v25, %v8074_v5  ;;  %vm8063_vm11 = vcmp.ge.f32.partialorder %v8036_v48, 0.0  ;;  %v8075_v63 = vmul.f32 0.2, %v8036_v48  ;;  %v8038_v57 = vadd.f32 %v8037_v0, %v7975_v22  ;;  %v7982_v16 = vpop.f32.mrf.mxu0 }
0x1592   : > { %v8134_v46 = vmul.f32 %v8107_v18, %v8086_v42  ;;  %v8039_v61 = vpop.f32.mrf.mxu1  ;;  %v7983_v35 = vadd.f32 %v7982_v16, %v7920_v45  ;;  %v7930_v5 = vadd.f32 %v14151_v37, %v7867_v9  ;;  %v7932_v42 = vadd.f32 %v14155_v39, %v14161_v53  ;;  %v8127_v9 = vpop.permute.xlu0 %8126 }
0x1593   : > { %v8087_v44 = vsel %vm8063_vm11, %v8036_v48, %v8075_v63  ;;  %vm8064_vm12 = vcmp.ge.f32.partialorder %v8038_v57, 0.0  ;;  %v8076_v32 = vmul.f32 0.2, %v8038_v57  ;;  %v8040_v43 = vadd.f32 %v8039_v61, %v7977_v4  ;;  %v7984_v20 = vpop.f32.mrf.mxu0 }
0x1594   : > { %v8135_v27 = vmul.f32 %v8107_v18, %v8087_v44  ;;  %v8043_v60 = vpop.f32.mrf.mxu1  ;;  %v8182_v23 = vadd.f32 %v8155_v40, %v8134_v46  ;;  %v7985_v58 = vadd.f32 %v7984_v20, %v7922_v11 }
0x1595   : > { %v8088_v29 = vsel %vm8064_vm12, %v8038_v57, %v8076_v32  ;;  %vm8065_vm7 = vcmp.ge.f32.partialorder %v8040_v43, 0.0  ;;  %v8077_v41 = vmul.f32 0.2, %v8040_v43  ;;  %v8044_v36 = vadd.f32 %v8043_v60, %v7981_v34  ;;  %v7986_v52 = vpop.f32.mrf.mxu0 }
0x1596   : > { %v8136_v3 = vmul.f32 %v8112_v21, %v8088_v29  ;;  %v8045_v50 = vpop.f32.mrf.mxu1  ;;  %8206 = vrot.lane.b32.xlu0 %v8182_v23, %s15351_s0  ;;  %v8183_v51 = vadd.f32 %v8155_v40, %v8135_v27  ;;  %v7987_v26 = vadd.f32 %v7986_v52, %v7924_v56  ;;  %v7934_v40 = vadd.f32 %v14157_v19, %v14163_v28  ;;  %v8132_v28 = vpop.permute.xlu1 %8131 }
0x1597   : > { %v8089_v33 = vsel %vm8065_vm7, %v8040_v43, %v8077_v41  ;;  %vm8066_vm6 = vcmp.ge.f32.partialorder %v8044_v36, 0.0  ;;  %v8078_v49 = vmul.f32 0.2, %v8044_v36  ;;  %v8046_v18 = vadd.f32 %v8045_v50, %v7983_v35  ;;  %v7990_v13 = vpop.f32.mrf.mxu0  ;;  %v8175_v52 = vpop.permute.xlu0 %8174 }
0x1598   : > { %v8137_v25 = vmul.f32 %v8112_v21, %v8089_v33  ;;  %v8047_v2 = vpop.f32.mrf.mxu1  ;;  %8208 = vrot.lane.b32.xlu1 %v8183_v51, %s15351_s0  ;;  %v8184_v15 = vadd.f32 %v8160_v38, %v8136_v3  ;;  %v7991_v1 = vadd.f32 %v7990_v13, %v7928_v8 }
0x1599   : > { %v8090_v10 = vsel %vm8066_vm6, %v8044_v36, %v8078_v49  ;;  %vm8067_vm10 = vcmp.ge.f32.partialorder %v8046_v18, 0.0  ;;  %v8079_v62 = vmul.f32 0.2, %v8046_v18  ;;  %v8048_v30 = vadd.f32 %v8047_v2, %v7985_v58  ;;  %v7992_v22 = vpop.f32.mrf.mxu0 }
0x159a   : > { %v8138_v48 = vmul.f32 %v14143_v31, %v8090_v10  ;;  %v8049_v6 = vpop.f32.mrf.mxu1  ;;  %8210 = vrot.lane.b32.xlu0 %v8184_v15, %s15351_s0  ;;  %v8185_v14 = vadd.f32 %v8160_v38, %v8137_v25  ;;  %v7993_v57 = vadd.f32 %v7992_v22, %v7930_v5  ;;  %v15352_v22 = vld [vmem:[#allocation62_spill] sm:$0xff] }
0x159b   : > { %v8091_v59 = vsel %vm8067_vm10, %v8046_v18, %v8079_v62  ;;  %vm8068_vm11 = vcmp.ge.f32.partialorder %v8048_v30, 0.0  ;;  %v8080_v4 = vmul.f32 0.2, %v8048_v30  ;;  %v8050_v0 = vadd.f32 %v8049_v6, %v7987_v26  ;;  %v7994_v21 = vpop.f32.mrf.mxu0  ;;  %v8180_v18 = vpop.permute.xlu1 %8179 }
0x159c   : > { %v8139_v63 = vmul.f32 %v14143_v31, %v8091_v59  ;;  %v8053_v16 = vpop.f32.mrf.mxu1  ;;  %8212 = vrot.lane.b32.xlu1 %v8185_v14, %s15351_s0  ;;  %v8186_v37 = vadd.f32 %v14153_v12, %v8138_v48  ;;  %v7995_v39 = vadd.f32 %v7994_v21, %v7932_v42 }
0x159d   : > { %v8092_v45 = vsel %vm8068_vm11, %v8048_v30, %v8080_v4  ;;  %vm8069_vm12 = vcmp.ge.f32.partialorder %v8050_v0, 0.0  ;;  %v8081_v46 = vmul.f32 0.2, %v8050_v0  ;;  %v8054_v34 = vadd.f32 %v8053_v16, %v7991_v1  ;;  %v7996_v61 = vpop.f32.mrf.mxu0  ;;  %v15355_v16 = vld [vmem:[#allocation55_spill] sm:$0xff] }
0x159e   : > { %v8140_v44 = vmul.f32 %v14149_v54, %v8092_v45  ;;  %v8055_v53 = vpop.f32.mrf.mxu1  ;;  %8214 = vrot.lane.b32.xlu0 %v8186_v37, %s15351_s0  ;;  %v8187_v31 = vadd.f32 %v14153_v12, %v8139_v63  ;;  %v7997_v27 = vadd.f32 %v7996_v61, %v7934_v40  ;;  %v15354_v63 = vld [vmem:[#allocation52_spill] sm:$0xff] }
0x159f   : > { %v8093_v32 = vsel %vm8069_vm12, %v8050_v0, %v8081_v46  ;;  %vm8070_vm7 = vcmp.ge.f32.partialorder %v8054_v34, 0.0  ;;  %v8082_v43 = vmul.f32 0.2, %v8054_v34  ;;  %v8056_v20 = vadd.f32 %v8055_v53, %v7993_v57 }
0x15a0   : > { %v8141_v11 = vmul.f32 %v14149_v54, %v8093_v32  ;;  %v8057_v35 = vpop.f32.mrf.mxu1  ;;  %8216 = vrot.lane.b32.xlu1 %v8187_v31, %s15351_s0  ;;  %v8188_v19 = vadd.f32 %v14159_v55, %v8140_v44  ;;  %v15356_v44 = vld [vmem:[#allocation56_spill] sm:$0xff]  ;;  %v15357_v31 = vld [vmem:[#allocation58_spill] sm:$0xff] }
0x15a1   : > { %v8094_v60 = vsel %vm8070_vm7, %v8054_v34, %v8082_v43  ;;  %vm8071_vm6 = vcmp.ge.f32.partialorder %v8056_v20, 0.0  ;;  %v8083_v23 = vmul.f32 0.2, %v8056_v20  ;;  %v8058_v29 = vadd.f32 %v8057_v35, %v7995_v39 }
0x15a2   : > { %v8142_v41 = vmul.f32 %v8127_v9, %v8094_v60  ;;  %v8059_v36 = vpop.f32.mrf.mxu1  ;;  %8218 = vrot.lane.b32.xlu0 %v8188_v19, %s15351_s0  ;;  %v8189_v12 = vadd.f32 %v14159_v55, %v8141_v11  ;;  %v15358_v11 = vld [vmem:[#allocation63_spill] sm:$0xff]  ;;  %v15359_v19 = vld [vmem:[#allocation61_spill] sm:$0xff] }
0x15a3   : > { %v8095_v56 = vsel %vm8071_vm6, %v8056_v20, %v8083_v23  ;;  %vm8072_vm10 = vcmp.ge.f32.partialorder %v8058_v29, 0.0  ;;  %v8084_v54 = vmul.f32 0.2, %v8058_v29  ;;  %v8060_v3 = vadd.f32 %v8059_v36, %v7997_v27  ;;  %v15360_v36 = vld [vmem:[#allocation60_spill] sm:$0xff] }
0x15a4   : > { %v8143_v58 = vmul.f32 %v8127_v9, %v8095_v56  ;;  %8220 = vrot.lane.b32.xlu1 %v8189_v12, %s15351_s0  ;;  %v8190_v50 = vadd.f32 %v8175_v52, %v8142_v41 }
0x15a5   : > { %v8096_v51 = vsel %vm8072_vm10, %v8058_v29, %v8084_v54  ;;  %vm8073_vm11 = vcmp.ge.f32.partialorder %v8060_v3, 0.0  ;;  %v8085_v38 = vmul.f32 0.2, %v8060_v3 }
0x15a6   : > { %v8144_v33 = vmul.f32 %v8132_v28, %v8096_v51  ;;  %8222 = vrot.lane.b32.xlu0 %v8190_v50, %s15351_s0  ;;  %v8191_v49 = vadd.f32 %v8175_v52, %v8143_v58  ;;  %v15361_v50 = vld [vmem:[#allocation59_spill] sm:$0xff] }
0x15a7   : > { %v8097_v13 = vsel %vm8073_vm11, %v8060_v3, %v8085_v38 }
0x15a8   : > { %v8145_v8 = vmul.f32 %v8132_v28, %v8097_v13  ;;  %8224 = vrot.lane.b32.xlu1 %v8191_v49, %s15351_s0  ;;  %v8192_v55 = vadd.f32 %v8180_v18, %v8144_v33 }
0x15aa   : > { %8226 = vrot.lane.b32.xlu0 %v8192_v55, %s15351_s0  ;;  %v8193_v25 = vadd.f32 %v8180_v18, %v8145_v8 }
0x15ac   : > { %8228 = vrot.lane.b32.xlu1 %v8193_v25, %s15351_s0 }
0x1608   : > { %v8207_v26 = vpop.permute.xlu0 %8206 }
0x1609   : > { %v14193_v10 = vsel %vm5803_vm5, 0.0, %v8207_v26 }
0x160a   : > { %v8209_v2 = vpop.permute.xlu1 %8208  ;;  %v8293_v1 = vmul.f32 %v14193_v10, %v15352_v22  ;;  %v8374_v45 = vmul.f32 %v14193_v10, %v15354_v63  ;;  %v8347_v46 = vmul.f32 %v14193_v10, %v15355_v16  ;;  %v14252_v20 = vmul.f32 %v14193_v10, %v15356_v44 }
0x160b   : > { %v14215_v4 = vsel %vm5803_vm5, %v8207_v26, %v8209_v2  ;;  %v14218_v0 = vsel %vm5803_vm5, %v8209_v2, 0.0 }
0x160c   : > { %v8211_v15 = vpop.permute.xlu0 %8210  ;;  %v14244_v32 = vmul.f32 %v14218_v0, %v15357_v31  ;;  %v8294_v27 = vmul.f32 %v14215_v4, %v15358_v11  ;;  %v8295_v28 = vmul.f32 %v14218_v0, %v15359_v19  ;;  %v8349_v29 = vmul.f32 %v14218_v0, %v12338_v17 }
0x160d   : > { %v14196_v62 = vsel %vm5803_vm5, 0.0, %v8211_v15  ;;  %v14268_v12 = vmul.f32 %v14215_v4, %v15360_v36  ;;  %v8348_v51 = vmul.f32 %v14215_v4, %v15361_v50 }
0x160e   : > { %v8284_v30 = vpack.c.bf16 %v14196_v62, %v14193_v10  ;;  %v8296_v5 = vmul.f32 %v14196_v62, %v15352_v22  ;;  %v8213_v48 = vpop.permute.xlu1 %8212  ;;  %v8377_v57 = vmul.f32 %v14196_v62, %v15354_v63  ;;  %v8350_v37 = vmul.f32 %v14196_v62, %v15355_v16 }
0x160f   : > { %v14207_v14 = vsel %vm5803_vm5, %v8211_v15, %v8213_v48  ;;  %v14210_v59 = vsel %vm5803_vm5, %v8213_v48, 0.0  ;;  %v14240_v39 = vmul.f32 %v14196_v62, %v15356_v44  ;;  %v15362_v15 = vld [vmem:[#allocation57_spill] sm:$0xff] }
0x1610   : > { %8653 = vrot.lane.b32.xlu1 %v8284_v30, %s15353_s2  ;;  %8437 = vrot.lane.b32.xlu0 %v8284_v30, %s15117_s1  ;;  %v8311_v6 = vpack.c.bf16 %v8296_v5, %v8293_v1  ;;  %v8286_v21 = vpack.c.bf16 %v14210_v59, %v14218_v0  ;;  %v8285_v42 = vpack.c.bf16 %v14207_v14, %v14215_v4  ;;  %v8215_v34 = vpop.permute.xlu0 %8214 }
0x1611   : > { %v8392_v61 = vpack.c.bf16 %v8377_v57, %v8374_v45  ;;  %v8365_v40 = vpack.c.bf16 %v8350_v37, %v8347_v46  ;;  %v14248_v43 = vmul.f32 %v14210_v59, %v15357_v31  ;;  %v8297_v35 = vmul.f32 %v14207_v14, %v15358_v11 }
0x1612   : > { %v8217_v9 = vpop.permute.xlu1 %8216  ;;  %v8298_v60 = vmul.f32 %v14210_v59, %v15359_v19  ;;  %v14272_v52 = vmul.f32 %v14207_v14, %v15360_v36  ;;  %v8352_v58 = vmul.f32 %v14210_v59, %v12338_v17  ;;  %v8351_v38 = vmul.f32 %v14207_v14, %v15361_v50 }
0x1613   : > { %v14275_v56 = vsel %vm5803_vm5, %v8215_v34, %v8217_v9  ;;  %v14293_v49 = vsel %vm5803_vm5, 0.0, %v8215_v34  ;;  %v14296_v18 = vsel %vm5803_vm5, %v8217_v9, 0.0  ;;  %v8312_v13 = vpack.c.bf16 %v8297_v35, %v8294_v27 }
0x1614   : > { %8476 = vrot.lane.b32.xlu1 %v8311_v6, %s15119_s6  ;;  %8545 = vrot.lane.b32.xlu0 %v8284_v30, %s15122_s9  ;;  %v8219_v23 = vpop.permute.xlu0 %8218  ;;  %v8313_v8 = vpack.c.bf16 %v8298_v60, %v8295_v28  ;;  %v14306_v26 = vmul.f32 %v14275_v56, %v15294_v7  ;;  %v8378_v30 = vmul.f32 %v14207_v14, %v15362_v15 }
0x1615   : > { %v14299_v55 = vsel %vm5803_vm5, 0.0, %v8219_v23  ;;  %v8367_v1 = vpack.c.bf16 %v8352_v58, %v8349_v29  ;;  %v8366_v6 = vpack.c.bf16 %v8351_v38, %v8348_v51  ;;  %v14324_v37 = vmul.f32 %v14293_v49, %v12256_v47 }
0x1616   : > { %v8221_v53 = vpop.permute.xlu1 %8220  ;;  %v14328_v9 = vmul.f32 %v14299_v55, %v12256_v47  ;;  %v14332_v45 = vmul.f32 %v14296_v18, %v15302_v24  ;;  %v8375_v34 = vmul.f32 %v14215_v4, %v15362_v15  ;;  %v14356_v29 = vmul.f32 %v14207_v14, %v15294_v7 }
0x1617   : > { %v14278_v54 = vsel %vm5803_vm5, %v8219_v23, %v8221_v53  ;;  %v14302_v25 = vsel %vm5803_vm5, %v8221_v53, 0.0  ;;  %v14352_v23 = vmul.f32 %v14215_v4, %v15294_v7  ;;  %v14362_v58 = vmul.f32 %v14193_v10, %v12256_v47 }
0x1618   : > { %8441 = vrot.lane.b32.xlu1 %v8286_v21, %s15117_s1  ;;  %8439 = vrot.lane.b32.xlu0 %v8285_v42, %s15117_s1  ;;  %v14310_v2 = vmul.f32 %v14278_v54, %v15294_v7  ;;  %v8223_v5 = vpop.permute.xlu0 %8222  ;;  %v14336_v46 = vmul.f32 %v14302_v25, %v15302_v24  ;;  %v8393_v27 = vpack.c.bf16 %v8378_v30, %v8375_v34 }
0x1619   : > { %15364 = vst [vmem:[#allocation71_spill] sm:$0xff] %v14362_v58  ;;  %v8287_v38 = vpack.c.bf16 %v14299_v55, %v14293_v49  ;;  %v14388_v34 = vmul.f32 %v14196_v62, %v12256_v47 }
0x161a   : > { %v14316_v48 = vpop.permute.xlu1 %8224 }
0x161b   : > { %v14366_v51 = vsel %vm5803_vm5, %v8223_v5, %v14316_v48  ;;  %15366 = vst [vmem:[#allocation65_spill] sm:$0xff] %v14388_v34 }
0x161c   : > { %8655 = vrot.lane.b32.xlu1 %v8285_v42, %s15353_s2  ;;  %8657 = vrot.lane.b32.xlu0 %v8286_v21, %s15353_s2  ;;  %v8227_v28 = vpop.permute.xlu0 %8226 }
0x161e   : > { %v14348_v60 = vpop.permute.xlu1 %8228 }
0x1620   : > { %8623 = vrot.lane.b32.xlu1 %v8392_v61, %s15298_s11  ;;  %8584 = vrot.lane.b32.xlu0 %v8365_v40, %s15125_s14 }
0x1624   : > { %8549 = vrot.lane.b32.xlu1 %v8286_v21, %s15122_s9  ;;  %8547 = vrot.lane.b32.xlu0 %v8285_v42, %s15122_s9  ;;  %v15363_v21 = vld [vmem:[#allocation53_spill] sm:$0xff] }
0x1625   : > { %v8379_v42 = vmul.f32 %v14210_v59, %v15363_v21  ;;  %v8376_v61 = vmul.f32 %v14218_v0, %v15363_v21 }
0x1627   : > { %v8394_v35 = vpack.c.bf16 %v8379_v42, %v8376_v61  ;;  %v14384_v42 = vsel %vm5803_vm5, %v8227_v28, %v14348_v60  ;;  %v8299_v61 = vmul.f32 %v14293_v49, %v15352_v22 }
0x1628   : > { %8478 = vrot.lane.b32.xlu1 %v8312_v13, %s15119_s6  ;;  %8480 = vrot.lane.b32.xlu0 %v8313_v8, %s15119_s6  ;;  %v15365_v8 = vld [vmem:[#allocation49_spill] sm:$0xff]  ;;  %v15369_v13 = vld [vmem:[#allocation50_spill] sm:$0xff] }
0x1629   : > { %v14374_v30 = vmul.f32 %v14193_v10, %v15365_v8  ;;  %v8302_v10 = vmul.f32 %v14299_v55, %v15352_v22  ;;  %v14410_v53 = vmul.f32 %v14366_v51, %v15369_v13  ;;  %v14432_v3 = vmul.f32 %v14278_v54, %v15369_v13 }
0x162a   : > { %v14440_v33 = vmul.f32 %v14299_v55, %v15365_v8  ;;  %v14452_v58 = vmul.f32 %v14207_v14, %v15369_v13  ;;  %v8289_v14 = vpack.c.bf16 %v14302_v25, %v14296_v18 }
0x162c   : > { %8588 = vrot.lane.b32.xlu1 %v8367_v1, %s15125_s14  ;;  %8586 = vrot.lane.b32.xlu0 %v8366_v6, %s15125_s14  ;;  %v14377_v1 = vsel %vm5803_vm5, 0.0, %v8223_v5  ;;  %v14380_v6 = vsel %vm5803_vm5, 0.0, %v8227_v28  ;;  %v14396_v5 = vmul.f32 %v14218_v0, %v15302_v24  ;;  %v14428_v28 = vmul.f32 %v14275_v56, %v15369_v13 }
0x162d   : > { %v14420_v40 = vmul.f32 %v14377_v1, %v15365_v8  ;;  %v14424_v57 = vmul.f32 %v14380_v6, %v15365_v8  ;;  %v14436_v0 = vmul.f32 %v14293_v49, %v15365_v8 }
0x162e   : > { %15367 = vst [vmem:[#allocation64_spill] sm:$0xff] %v14396_v5  ;;  %v14462_v5 = vmul.f32 %v14196_v62, %v15365_v8  ;;  %v8380_v62 = vmul.f32 %v14293_v49, %v15354_v63 }
0x162f   : > { %15370 = vst [vmem:[#allocation66_spill] sm:$0xff] %v14420_v40  ;;  %v8314_v40 = vpack.c.bf16 %v8302_v10, %v8299_v61  ;;  %v8356_v61 = vmul.f32 %v14299_v55, %v15355_v16 }
0x1630   : > { %8625 = vrot.lane.b32.xlu1 %v8393_v27, %s15298_s11  ;;  %8627 = vrot.lane.b32.xlu0 %v8394_v35, %s15298_s11  ;;  %v14400_v27 = vmul.f32 %v14210_v59, %v15302_v24  ;;  %v8288_v35 = vpack.c.bf16 %v14278_v54, %v14275_v56  ;;  %v14416_v59 = vmul.f32 %v14384_v42, %v15369_v13 }
0x1632   : > { %15368 = vst [vmem:[#allocation72_spill] sm:$0xff] %v14400_v27  ;;  %v14448_v27 = vmul.f32 %v14215_v4, %v15369_v13  ;;  %v8303_v13 = vmul.f32 %v14278_v54, %v15358_v11 }
0x1634   : > { %8659 = vrot.lane.b32.xlu0 %v8287_v38, %s15353_s2  ;;  %8443 = vrot.lane.b32.xlu1 %v8287_v38, %s15117_s1 }
0x1638   : > { %8551 = vrot.lane.b32.xlu0 %v8287_v38, %s15122_s9  ;;  %8445 = vrot.lane.b32.xlu1 %v8288_v35, %s15117_s1  ;;  %v8383_v38 = vmul.f32 %v14299_v55, %v15354_v63 }
0x163a   : > { %v8395_v8 = vpack.c.bf16 %v8383_v38, %v8380_v62  ;;  %v8304_v38 = vmul.f32 %v14302_v25, %v15359_v19  ;;  %v8300_v62 = vmul.f32 %v14275_v56, %v15358_v11 }
0x163c   : > { %8482 = vrot.lane.b32.xlu0 %v8314_v40, %s15119_s6  ;;  %8663 = vrot.lane.b32.xlu1 %v8289_v14, %s15353_s2  ;;  %v8353_v40 = vmul.f32 %v14293_v49, %v15355_v16 }
0x163e   : > { %v8368_v10 = vpack.c.bf16 %v8356_v61, %v8353_v40  ;;  %v8385_v61 = vmul.f32 %v14302_v25, %v15363_v21  ;;  %v8384_v40 = vmul.f32 %v14278_v54, %v15362_v15 }
0x1640   : > { %8447 = vrot.lane.b32.xlu0 %v8289_v14, %s15117_s1  ;;  %8629 = vrot.lane.b32.xlu1 %v8395_v8, %s15298_s11  ;;  %v8315_v8 = vpack.c.bf16 %v8303_v13, %v8300_v62  ;;  %v8358_v13 = vmul.f32 %v14302_v25, %v12338_v17  ;;  %v8354_v62 = vmul.f32 %v14275_v56, %v15361_v50 }
0x1644   : > { %8661 = vrot.lane.b32.xlu0 %v8288_v35, %s15353_s2  ;;  %8555 = vrot.lane.b32.xlu1 %v8289_v14, %s15122_s9  ;;  %v8301_v14 = vmul.f32 %v14296_v18, %v15359_v19 }
0x1646   : > { %v8316_v4 = vpack.c.bf16 %v8304_v38, %v8301_v14  ;;  %v8357_v38 = vmul.f32 %v14278_v54, %v15361_v50 }
0x1648   : > { %8553 = vrot.lane.b32.xlu0 %v8288_v35, %s15122_s9  ;;  %8590 = vrot.lane.b32.xlu1 %v8368_v10, %s15125_s14  ;;  %v8382_v35 = vmul.f32 %v14296_v18, %v15363_v21  ;;  %v8381_v10 = vmul.f32 %v14275_v56, %v15362_v15 }
0x164a   : > { %v8397_v41 = vpack.c.bf16 %v8385_v61, %v8382_v35  ;;  %v8396_v34 = vpack.c.bf16 %v8384_v40, %v8381_v10  ;;  %v8330_v61 = vmul.f32 %v14278_v54, %v15360_v36  ;;  %v8331_v40 = vmul.f32 %v14302_v25, %v15357_v31 }
0x164b   : > { %v8290_v54 = vpack.c.bf16 %v14380_v6, %v14377_v1  ;;  %v14532_v25 = vsel %vm5803_vm5, %v14348_v60, 0.0  ;;  %v8329_v60 = vmul.f32 %v14299_v55, %v15356_v44  ;;  %v15372_v55 = vpack.c.bf16 %v14272_v52, %v14268_v12 }
0x164c   : > { %8484 = vrot.lane.b32.xlu0 %v8315_v8, %s15119_s6  ;;  %8486 = vrot.lane.b32.xlu1 %v8316_v4, %s15119_s6  ;;  %v8355_v4 = vmul.f32 %v14296_v18, %v12338_v17  ;;  %v8369_v8 = vpack.c.bf16 %v8357_v38, %v8354_v62  ;;  %v8291_v38 = vpack.c.bf16 %v14384_v42, %v14366_v51 }
0x164d   : > { %v8413_v12 = vmul.f32 %v14377_v1, %v12256_v47 }
0x164e   : > { %v8370_v14 = vpack.c.bf16 %v8358_v13, %v8355_v4  ;;  %v8386_v4 = vmul.f32 %v14377_v1, %v15354_v63 }
0x1650   : > { %8633 = vrot.lane.b32.xlu0 %v8397_v41, %s15298_s11  ;;  %8631 = vrot.lane.b32.xlu1 %v8396_v34, %s15298_s11  ;;  %v8327_v41 = vmul.f32 %v14275_v56, %v15360_v36  ;;  %v8328_v34 = vmul.f32 %v14296_v18, %v15357_v31  ;;  %v15371_v56 = vpack.c.bf16 %v14248_v43, %v14244_v32  ;;  %v14541_v18 = vsel %vm5803_vm5, %v14316_v48, 0.0 }
0x1651   : > { %v8292_v13 = vpack.c.bf16 %v14532_v25, %v14541_v18  ;;  %v8326_v32 = vmul.f32 %v14293_v49, %v15356_v44  ;;  %v8389_v48 = vmul.f32 %v14380_v6, %v15354_v63  ;;  %v8362_v49 = vmul.f32 %v14380_v6, %v15355_v16 }
0x1652   : > { %v8342_v35 = vpack.c.bf16 %v8330_v61, %v8327_v41  ;;  %v8343_v10 = vpack.c.bf16 %v8331_v40, %v8328_v34  ;;  %v8359_v63 = vmul.f32 %v14377_v1, %v15355_v16  ;;  %v8416_v61 = vmul.f32 %v14380_v6, %v12256_v47 }
0x1653   : > { %v8341_v43 = vpack.c.bf16 %v8329_v60, %v8326_v32  ;;  %v8398_v62 = vpack.c.bf16 %v8389_v48, %v8386_v4  ;;  %v8390_v40 = vmul.f32 %v14384_v42, %v15362_v15  ;;  %v8387_v16 = vmul.f32 %v14366_v51, %v15362_v15 }
0x1654   : > { %8594 = vrot.lane.b32.xlu0 %v8370_v14, %s15125_s14  ;;  %8592 = vrot.lane.b32.xlu1 %v8369_v8, %s15125_s14  ;;  %v15373_v14 = vpack.c.bf16 %v14240_v39, %v14252_v20  ;;  %v8371_v8 = vpack.c.bf16 %v8362_v49, %v8359_v63  ;;  %v8425_v52 = vpack.c.bf16 %v8416_v61, %v8413_v12 }
0x1655   : > { %v8335_v39 = vmul.f32 %v14380_v6, %v15356_v44  ;;  %v8332_v20 = vmul.f32 %v14377_v1, %v15356_v44  ;;  %v8399_v41 = vpack.c.bf16 %v8390_v40, %v8387_v16  ;;  %v8391_v47 = vmul.f32 %v14532_v25, %v15363_v21 }
0x1656   : > { %v15374_v15 = vpack.c.bf16 %v14310_v2, %v14306_v26  ;;  %v15376_v26 = vpack.c.bf16 %v14336_v46, %v14332_v45  ;;  %v8360_v2 = vmul.f32 %v14366_v51, %v15361_v50  ;;  %v8308_v49 = vmul.f32 %v14380_v6, %v15352_v22 }
0x1657   : > { %v8344_v34 = vpack.c.bf16 %v8335_v39, %v8332_v20 }
0x1658   : > { %8523 = vrot.lane.b32.xlu0 %v8342_v35, %s15124_s13  ;;  %8525 = vrot.lane.b32.xlu1 %v8343_v10, %s15124_s13  ;;  %v8388_v35 = vmul.f32 %v14541_v18, %v15363_v21  ;;  %v15375_v21 = vpack.c.bf16 %v14328_v9, %v14324_v37  ;;  %v8337_v37 = vmul.f32 %v14532_v25, %v15357_v31 }
0x1659   : > { %v8336_v9 = vmul.f32 %v14384_v42, %v15360_v36 }
0x165a   : > { %v8400_v10 = vpack.c.bf16 %v8391_v47, %v8388_v35 }
0x165c   : > { %8665 = vrot.lane.b32.xlu1 %v8290_v54, %s15353_s2  ;;  %8449 = vrot.lane.b32.xlu0 %v8290_v54, %s15117_s1 }
0x1660   : > { %8519 = vrot.lane.b32.xlu1 %v15371_v56, %s15124_s13  ;;  %8557 = vrot.lane.b32.xlu0 %v8290_v54, %s15122_s9  ;;  %v8363_v56 = vmul.f32 %v14384_v42, %v15361_v50  ;;  %v8334_v50 = vmul.f32 %v14541_v18, %v15357_v31  ;;  %v8414_v31 = vmul.f32 %v14366_v51, %v15294_v7 }
0x1662   : > { %v8346_v4 = vpack.c.bf16 %v8337_v37, %v8334_v50 }
0x1664   : > { %8453 = vrot.lane.b32.xlu1 %v8292_v13, %s15117_s1  ;;  %8451 = vrot.lane.b32.xlu0 %v8291_v38, %s15117_s1  ;;  %s15397_s1 = sld [smem:[#allocation43_spill]] }
0x1668   : > { %8667 = vrot.lane.b32.xlu1 %v8291_v38, %s15353_s2  ;;  %8521 = vrot.lane.b32.xlu0 %v8341_v43, %s15124_s13  ;;  %v8372_v43 = vpack.c.bf16 %v8363_v56, %v8360_v2 }
0x166c   : > { %8635 = vrot.lane.b32.xlu1 %v8398_v62, %s15298_s11  ;;  %8517 = vrot.lane.b32.xlu0 %v15372_v55, %s15124_s13  ;;  %v8417_v55 = vmul.f32 %v14384_v42, %v15294_v7  ;;  %v8415_v7 = vmul.f32 %v14541_v18, %v15302_v24 }
0x166e   : > { %v8426_v12 = vpack.c.bf16 %v8417_v55, %v8414_v31 }
0x1670   : > { %8561 = vrot.lane.b32.xlu1 %v8292_v13, %s15122_s9  ;;  %8515 = vrot.lane.b32.xlu0 %v15373_v14, %s15124_s13 }
0x1674   : > { %8596 = vrot.lane.b32.xlu1 %v8371_v8, %s15125_s14  ;;  %8669 = vrot.lane.b32.xlu0 %v8292_v13, %s15353_s2  ;;  %v8364_v13 = vmul.f32 %v14532_v25, %v12338_v17 }
0x1678   : > { %8704 = vrot.lane.b32.xlu1 %v8425_v52, %s15264_s3  ;;  %8559 = vrot.lane.b32.xlu0 %v8291_v38, %s15122_s9  ;;  %v8361_v38 = vmul.f32 %v14541_v18, %v12338_v17  ;;  %v8333_v17 = vmul.f32 %v14366_v51, %v15360_v36  ;;  %s15377_s9 = sld [smem:[#allocation40_spill]]  ;;  %v8305_v36 = vmul.f32 %v14377_v1, %v15352_v22  ;;  %v15378_v1 = vld [vmem:[#allocation48_spill] sm:$0xff] }
0x1679   : > { %v8418_v52 = vmul.f32 %v14532_v25, %v15302_v24  ;;  %v15379_v24 = vpack.c.bf16 %v14356_v29, %v14352_v23 }
0x167a   : > { %v8373_v48 = vpack.c.bf16 %v8364_v13, %v8361_v38  ;;  %v8345_v62 = vpack.c.bf16 %v8336_v9, %v8333_v17  ;;  %v8317_v6 = vpack.c.bf16 %v8308_v49, %v8305_v36  ;;  %v15384_v38 = vld [vmem:[#allocation72_spill] sm:$0xff] }
0x167b   : > { %v8427_v35 = vpack.c.bf16 %v8418_v52, %v8415_v7 }
0x167c   : > { %8637 = vrot.lane.b32.xlu1 %v8399_v41, %s15298_s11  ;;  %8527 = vrot.lane.b32.xlu0 %v8344_v34, %s15124_s13  ;;  %v8310_v41 = vmul.f32 %v14532_v25, %v15359_v19  ;;  %v8307_v25 = vmul.f32 %v14541_v18, %v15359_v19  ;;  %v15382_v18 = vld [vmem:[#allocation71_spill] sm:$0xff] }
0x167e   : > { %v8722_v16 = vld [vmem:[%s15377_s9] sm:$0xff] }
0x167f   : > { %v8730_v22 = vcombine.high %v8722_v16, %v8722_v16  ;;  %v14658_v20 = vrot.slane %v8722_v16, %v15378_v1 }
0x1680   : > { %8700 = vrot.lane.b32.xlu1 %v15374_v15, %s15264_s3  ;;  %8639 = vrot.lane.b32.xlu0 %v8400_v10, %s15298_s11  ;;  %v8309_v10 = vmul.f32 %v14384_v42, %v15358_v11 }
0x1681   : > { %v8745_v15 = vcombine.high %v14658_v20, %v14658_v20 }
0x1682   : > { %v8654_v44 = vpop.permute.xlu1 %8653  ;;  %v8438_v54 = vpop.permute.xlu0 %8437 }
0x1683   : > { %8785 = vmatprep.mubr.bf16.mxu1 %v8745_v15 }
0x1684   : > { %8698 = vrot.lane.b32.xlu1 %v15375_v21, %s15264_s3  ;;  %8702 = vrot.lane.b32.xlu0 %v15376_v26, %s15264_s3  ;;  %v8319_v21 = vpack.c.bf16 %v8310_v41, %v8307_v25 }
0x1686   : > { %v14616_v60 = vpop.permute.xlu1 %8476  ;;  %v8546_v32 = vpop.permute.xlu0 %8545 }
0x1688   : > { %8598 = vrot.lane.b32.xlu1 %v8372_v43, %s15125_s14  ;;  %8600 = vrot.lane.b32.xlu0 %v8373_v48, %s15125_s14  ;;  %v15385_v43 = vld [vmem:[#allocation64_spill] sm:$0xff]  ;;  %s15395_s14 = sld [smem:[#allocation42_spill]] }
0x1689   : > { %v15386_v48 = vpack.c.bf16 %v15384_v38, %v15385_v43 }
0x168a   : > { %v8442_v45 = vpop.permute.xlu1 %8441  ;;  %v8440_v46 = vpop.permute.xlu0 %8439 }
0x168b   : > { %v14633_v14 = vsel %vm5946_vm4, %v8438_v54, %v8440_v46  ;;  %v14636_v63 = vsel %vm5946_vm4, %v8440_v46, %v8442_v45  ;;  %v8306_v54 = vmul.f32 %v14366_v51, %v15358_v11  ;;  %v15381_v51 = vld [vmem:[#allocation65_spill] sm:$0xff] }
0x168c   : > { %8531 = vrot.lane.b32.xlu1 %v8346_v4, %s15124_s13  ;;  %8529 = vrot.lane.b32.xlu0 %v8345_v62, %s15124_s13  ;;  %s15380_s13 = sld [smem:[#allocation41_spill]]  ;;  %v15383_v2 = vpack.c.bf16 %v15381_v51, %v15382_v18 }
0x168d   : > { %v8318_v26 = vpack.c.bf16 %v8309_v10, %v8306_v54 }
0x168e   : > { %v8656_v8 = vpop.permute.xlu1 %8655  ;;  %v8658_v61 = vpop.permute.xlu0 %8657  ;;  %s1618_s11 = scalar_lea.vmem %s15395_s14, %s10574_s22 }
0x168f   : > { %v14647_v40 = vsel %vm6030_vm0, %v8654_v44, %v8656_v8  ;;  %v14650_v39 = vsel %vm6030_vm0, %v8656_v8, %v8658_v61  ;;  %v14667_v44 = vrot.slane %v8730_v22, %v15378_v1 }
0x1690   : > { %8706 = vrot.lane.b32.xlu1 %v8426_v12, %s15264_s3  ;;  %8488 = vrot.lane.b32.xlu0 %v8317_v6, %s15119_s6 }
0x1691   : > { %v8746_v42 = vcombine.high %v14667_v44, %v14667_v44 }
0x1692   : > { %v8624_v34 = vpop.permute.xlu1 %8623  ;;  %v8585_v47 = vpop.permute.xlu0 %8584 }
0x1693   : > { %9429 = vmatprep.mubr.msk.bf16.mxu0 %vm3465_vm1, %v8746_v42 }
0x1694   : > { %8694 = vrot.lane.b32.xlu1 %v15379_v24, %s15264_s3  ;;  %8708 = vrot.lane.b32.xlu0 %v8427_v35, %s15264_s3 }
0x1696   : > { %v8550_v56 = vpop.permute.xlu1 %8549  ;;  %v8548_v13 = vpop.permute.xlu0 %8547 }
0x1697   : > { %v14682_v23 = vsel %vm5988_vm14, %v8546_v32, %v8548_v13  ;;  %v14685_v29 = vsel %vm5988_vm14, %v8548_v13, %v8550_v56  ;;  %v8723_v32 = vld [vmem:[%s15380_s13] sm:$0xf] }
0x1698   : > { %8492 = vrot.lane.b32.xlu1 %v8319_v21, %s15119_s6  ;;  %8490 = vrot.lane.b32.xlu0 %v8318_v26, %s15119_s6  ;;  %s15396_s6 = sld [smem:[#allocation9_spill]] }
0x169a   : > { %v8479_v11 = vpop.permute.xlu1 %8478  ;;  %v8481_v19 = vpop.permute.xlu0 %8480 }
0x169b   : > { %v8495_v35 = vsel %vm5961_vm9, %v8479_v11, %v8481_v19  ;;  %v8494_v24 = vsel %vm5961_vm9, %v14616_v60, %v8479_v11 }
0x169c   : > { %8692 = vrot.lane.b32.xlu1 %v15383_v2, %s15264_s3  ;;  %8696 = vrot.lane.b32.xlu0 %v15386_v48, %s15264_s3  ;;  %s15399_s3 = sshll.u32 %s15401_s10, 4 }
0x169d   : > { %s1623_s0 = scalar_lea.vmem %s15397_s1, %s15399_s3 }
0x169e   : > { %v8589_v37 = vpop.permute.xlu1 %8588  ;;  %v8587_v9 = vpop.permute.xlu0 %8586 }
0x169f   : > { %v14699_v50 = vsel %vm6003_vm15, %v8585_v47, %v8587_v9  ;;  %v14702_v17 = vsel %vm6003_vm15, %v8587_v9, %v8589_v37 }
0x16a0   : > { %8726 = vperm.xlu0 %10012, %v8723_v32  }
0x16a2   : > { %v8626_v45 = vpop.permute.xlu1 %8625  ;;  %v8628_v46 = vpop.permute.xlu0 %8627 }
0x16a3   : > { %v14705_v4 = vsel %vm2914_vm3, %v8624_v34, %v8626_v45  ;;  %v14708_v62 = vsel %vm2914_vm3, %v8626_v45, %v8628_v46  ;;  %v15387_v45 = vpack.c.bf16 %v14416_v59, %v14410_v53  ;;  %v15391_v53 = vpack.c.bf16 %v14440_v33, %v14436_v0 }
0x16a6   : > { %v8444_v55 = vpop.permute.xlu1 %8443  ;;  %v14710_v49 = vpop.permute.xlu0 %8659 }
0x16aa   : > { %v8446_v31 = vpop.permute.xlu1 %8445  ;;  %v14712_v36 = vpop.permute.xlu0 %8551 }
0x16ab   : > { %v8457_v48 = vsel %vm5946_vm4, %v8444_v55, %v8446_v31 }
0x16ae   : > { %v8664_v8 = vpop.permute.xlu1 %8663  ;;  %v8483_v61 = vpop.permute.xlu0 %8482 }
0x16b2   : > { %v14714_v12 = vpop.permute.xlu1 %8629  ;;  %v8448_v6 = vpop.permute.xlu0 %8447 }
0x16b3   : > { %v8458_v11 = vsel %vm5946_vm4, %v8446_v31, %v8448_v6  ;;  %v15390_v31 = vpack.c.bf16 %v14432_v3, %v14428_v28 }
0x16b6   : > { %v14716_v52 = vpop.permute.xlu1 %8555  ;;  %v8662_v16 = vpop.permute.xlu0 %8661 }
0x16b7   : > { %v8674_v59 = vsel %vm6030_vm0, %v8662_v16, %v8664_v8  ;;  %v8673_v28 = vsel %vm6030_vm0, %v14710_v49, %v8662_v16 }
0x16ba   : > { %v14718_v7 = vpop.permute.xlu1 %8590  ;;  %v14720_v22 = vpop.permute.xlu0 %8553 }
0x16bb   : > { %v8565_v16 = vsel %vm5988_vm14, %v14712_v36, %v14720_v22 }
0x16be   : > { %v8487_v1 = vpop.permute.xlu1 %8486  ;;  %v8485_v41 = vpop.permute.xlu0 %8484 }
0x16bf   : > { %v8496_v34 = vsel %vm5961_vm9, %v8483_v61, %v8485_v41  ;;  %v8497_v47 = vsel %vm5961_vm9, %v8485_v41, %v8487_v1  ;;  %v15388_v61 = vld [vmem:[#allocation66_spill] sm:$0xff]  ;;  %v15392_v41 = vpack.c.bf16 %v14452_v58, %v14448_v27 }
0x16c0   : > { %8753 = vmatprep.subr.bf16.mxu1 %v8497_v47  ;;  %v15389_v6 = vpack.c.bf16 %v14424_v57, %v15388_v61 }
0x16c1   : > { %8754 = vmatpush1.bf16.msra.mxu1 %v8496_v34  ;;  %v15393_v34 = vpack.c.bf16 %v14462_v5, %v14374_v30 }
0x16c2   : > { %v14725_v10 = vpop.permute.xlu1 %8631  ;;  %8755 = vmatprep.subr.bf16.mxu1 %v8495_v35  ;;  %v14727_v15 = vpop.permute.xlu0 %8633 }
0x16c3   : > { %v8643_v47 = vsel %vm2914_vm3, %v14714_v12, %v14725_v10 }
0x16c5   : > { %8756 = vmatpush1.bf16.msra.mxu1 %v8494_v24 }
0x16c6   : > { %v14731_v25 = vpop.permute.xlu1 %8592  ;;  %v14733_v54 = vpop.permute.xlu0 %8594 }
0x16ca   : > { %v14735_v42 = vpop.permute.xlu1 %8525  ;;  %v14737_v56 = vpop.permute.xlu0 %8523 }
0x16ce   : > { %v8666_v13 = vpop.permute.xlu1 %8665  ;;  %v8450_v21 = vpop.permute.xlu0 %8449 }
0x16d2   : > { %v14739_v26 = vpop.permute.xlu1 %8519  ;;  %v8558_v19 = vpop.permute.xlu0 %8557 }
0x16d6   : > { %v8454_v51 = vpop.permute.xlu1 %8453  ;;  %v8452_v18 = vpop.permute.xlu0 %8451 }
0x16d7   : > { %v8459_v2 = vsel %vm5946_vm4, %v8450_v21, %v8452_v18  ;;  %v8460_v60 = vsel %vm5946_vm4, %v8452_v18, %v8454_v51 }
0x16d8   : > { %8757 = vmatprep.subr.bf16.mxu1 %v8460_v60 }
0x16d9   : > { %8758 = vmatpush1.bf16.msra.mxu1 %v8459_v2 }
0x16da   : > { %v8668_v38 = vpop.permute.xlu1 %8667  ;;  %8759 = vmatprep.subr.bf16.mxu1 %v8458_v11  ;;  %v14744_v43 = vpop.permute.xlu0 %8521 }
0x16db   : > { %v8535_v21 = vsel %vm5976_vm2, %v14744_v43, %v14737_v56 }
0x16dd   : > { %8760 = vmatpush1.bf16.msra.mxu1 %v8457_v48 }
0x16de   : > { %v8636_v32 = vpop.permute.xlu1 %8635  ;;  %8761 = vmatprep.subr.bf16.mxu1 %v14636_v63  ;;  %v14748_v37 = vpop.permute.xlu0 %8517 }
0x16e1   : > { %8762 = vmatpush1.bf16.msra.mxu1 %v14633_v14  ;;  %v8675_v14 = vsel %vm6030_vm0, %v8666_v13, %v8668_v38  ;;  %v8604_v13 = vsel %vm6003_vm15, %v14718_v7, %v14731_v25 }
0x16e2   : > { %v8562_v9 = vpop.permute.xlu1 %8561  ;;  %8763 = vmatprep.subr.bf16.mxu1 %v15387_v45  ;;  %v14754_v46 = vpop.permute.xlu0 %8515 }
0x16e3   : > { %v8533_v18 = vsel %vm5976_vm2, %v14754_v46, %v14748_v37 }
0x16e5   : > { %8764 = vmatpush1.bf16.msra.mxu1 %v15389_v6 }
0x16e6   : > { %v8597_v55 = vpop.permute.xlu1 %8596  ;;  %8765 = vmatprep.subr.bf16.mxu1 %v15390_v31  ;;  %v8670_v63 = vpop.permute.xlu0 %8669 }
0x16e7   : > { %v8676_v1 = vsel %vm6030_vm0, %v8668_v38, %v8670_v63 }
0x16e8   : > { %8794 = vmatprep.subr.bf16.mxu0 %v8676_v1 }
0x16e9   : > { %8766 = vmatpush1.bf16.msra.mxu1 %v15391_v53  ;;  %8795 = vmatpush1.bf16.msra.mxu0 %v8675_v14 }
0x16ea   : > { %v14768_v57 = vpop.permute.xlu1 %8704  ;;  %8767 = vmatprep.subr.bf16.mxu1 %v15392_v41  ;;  %8796 = vmatprep.subr.bf16.mxu0 %v8674_v59  ;;  %v8560_v3 = vpop.permute.xlu0 %8559 }
0x16eb   : > { %v8568_v58 = vsel %vm5988_vm14, %v8560_v3, %v8562_v9  ;;  %v8567_v30 = vsel %vm5988_vm14, %v8558_v19, %v8560_v3 }
0x16ed   : > { %8768 = vmatpush1.bf16.msra.mxu1 %v15393_v34  ;;  %8797 = vmatpush1.bf16.msra.mxu0 %v8673_v28 }
0x16ee   : > { %v8638_v33 = vpop.permute.xlu1 %8637  ;;  %8769 = vmatprep.subr.bf16.mxu1 %v14702_v17  ;;  %8798 = vmatprep.subr.bf16.mxu0 %v14650_v39  ;;  %v8528_v0 = vpop.permute.xlu0 %8527  ;;  %v8566_v39 = vsel %vm5988_vm14, %v14720_v22, %v14716_v52 }
0x16ef   : > { %v8645_v5 = vsel %vm2914_vm3, %v8636_v32, %v8638_v33 }
0x16f1   : > { %8770 = vmatpush2.bf16.msra.mxu1 %v14699_v50  ;;  %8799 = vmatpush1.bf16.msra.mxu0 %v14647_v40  ;;  %v8644_v40 = vsel %vm2914_vm3, %v14725_v10, %v14727_v15 }
0x16f2   : > { %v8701_v27 = vpop.permute.xlu1 %8700  ;;  %8771 = vmatprep.subr.bf16.mxu1 %v8568_v58  ;;  %v8640_v49 = vpop.permute.xlu0 %8639 }
0x16f3   : > { %v8646_v8 = vsel %vm2914_vm3, %v8638_v33, %v8640_v49  ;;  %vm15398_vm3 = vcmask 31744  }
0x16f4   : > { %8800 = vmatprep.subr.bf16.mxu0 %v8646_v8 }
0x16f5   : > { %8772 = vmatpush2.bf16.msra.mxu1 %v8567_v30  ;;  %8801 = vmatpush1.bf16.msra.mxu0 %v8645_v5 }
0x16f6   : > { %v8699_v50 = vpop.permute.xlu1 %8698  ;;  %8773 = vmatprep.subr.bf16.mxu1 %v8566_v39  ;;  %8802 = vmatprep.subr.bf16.mxu0 %v8644_v40  ;;  %v8703_v17 = vpop.permute.xlu0 %8702 }
0x16f7   : > { %v8712_v11 = vsel %vm6042_vm13, %v8699_v50, %v8701_v27 }
0x16f9   : > { %8774 = vmatpush2.bf16.msra.mxu1 %v8565_v16  ;;  %8803 = vmatpush1.bf16.msra.mxu0 %v8643_v47 }
0x16fa   : > { %v8599_v35 = vpop.permute.xlu1 %8598  ;;  %8775 = vmatprep.subr.bf16.mxu1 %v14685_v29  ;;  %8804 = vmatprep.subr.bf16.mxu0 %v14708_v62  ;;  %v8601_v52 = vpop.permute.xlu0 %8600  ;;  %v8605_v29 = vsel %vm6003_vm15, %v14731_v25, %v14733_v54  ;;  %v8713_v25 = vsel %vm6042_vm13, %v8701_v27, %v8703_v17 }
0x16fb   : > { %v8607_v15 = vsel %vm6003_vm15, %v8599_v35, %v8601_v52  ;;  %v8606_v10 = vsel %vm6003_vm15, %v8597_v55, %v8599_v35 }
0x16fd   : > { %8776 = vmatpush2.bf16.msra.mxu1 %v14682_v23  ;;  %8805 = vmatpush1.bf16.msra.mxu0 %v14705_v4  ;;  %v8536_v23 = vsel %vm5976_vm2, %v14737_v56, %v14735_v42  ;;  %v8534_v42 = vsel %vm5976_vm2, %v14748_v37, %v14739_v26  ;;  %v15394_v37 = vmov 0.0  }
0x16fe   : > { %v8532_v24 = vpop.permute.xlu1 %8531  ;;  %8806 = vmatprep.subr.bf16.mxu0 %v8607_v15  ;;  %v8530_v36 = vpop.permute.xlu0 %8529 }
0x16ff   : > { %v8537_v22 = vsel %vm5976_vm2, %v8528_v0, %v8530_v36  ;;  %v8538_v12 = vsel %vm5976_vm2, %v8530_v36, %v8532_v24 }
0x1700   : > { %8777 = vmatprep.subr.bf16.mxu1 %v8538_v12 }
0x1701   : > { %8778 = vmatpush2.bf16.msra.mxu1 %v8537_v22  ;;  %8807 = vmatpush1.bf16.msra.mxu0 %v8606_v10 }
0x1702   : > { %v8707_v4 = vpop.permute.xlu1 %8706  ;;  %8779 = vmatprep.subr.bf16.mxu1 %v8536_v23  ;;  %8808 = vmatprep.subr.bf16.mxu0 %v8605_v29  ;;  %v8489_v62 = vpop.permute.xlu0 %8488 }
0x1703   : > { %v8714_v7 = vsel %vm6042_vm13, %v14768_v57, %v8707_v4 }
0x1705   : > { %8780 = vmatpush2.bf16.msra.mxu1 %v8535_v21  ;;  %8809 = vmatpush1.bf16.msra.mxu0 %v8604_v13 }
0x1706   : > { %v8695_v19 = vpop.permute.xlu1 %8694  ;;  %8781 = vmatprep.subr.bf16.mxu1 %v8534_v42  ;;  %v8709_v54 = vpop.permute.xlu0 %8708 }
0x1707   : > { %v8715_v51 = vsel %vm6042_vm13, %v8707_v4, %v8709_v54 }
0x1708   : > { %8820 = vmatprep.subr.bf16.mxu0 %v8715_v51 }
0x1709   : > { %8782 = vmatpush2.bf16.msra.mxu1 %v8533_v18  ;;  %8821 = vmatpush2.bf16.msra.mxu0 %v8714_v7  ;;  %v8878_v18 = vld [vmem:[%s15396_s6] sm:$0x3f] }
0x170a   : > { %v8493_v56 = vpop.permute.xlu1 %8492  ;;  %8822 = vmatprep.subr.bf16.mxu0 %v8713_v25  ;;  %v8491_v26 = vpop.permute.xlu0 %8490 }
0x170b   : > { %v8498_v2 = vsel %vm5961_vm9, %v8489_v62, %v8491_v26  ;;  %v8499_v60 = vsel %vm5961_vm9, %v8491_v26, %v8493_v56 }
0x170c   : > { %8783 = vmatprep.subr.bf16.mxu1 %v8499_v60 }
0x170d   : > { %8784 = vmatpush2.bf16.msra.mxu1 %v8498_v2  ;;  %8823 = vmatpush2.bf16.msra.mxu0 %v8712_v11 }
0x170e   : > { %v8693_v38 = vpop.permute.xlu1 %8692  ;;  %v8697_v43 = vpop.permute.xlu0 %8696 }
0x170f   : > { %v8710_v48 = vsel %vm6042_vm13, %v8693_v38, %v8695_v19  ;;  %v8711_v32 = vsel %vm6042_vm13, %v8695_v19, %v8697_v43 }
0x1710   : > { %8786 = vmatmul.mubr.bf16.vlgmr.msra.gmra.mxu1 %v14658_v20  ;;  %8824 = vmatprep.subr.bf16.mxu0 %v8711_v32 }
0x1711   : > { %8825 = vmatpush2.bf16.msra.mxu0 %v8710_v48 }
0x1714   : > { %8827 = vmatmul.mubr.bf16.vlgmr.msra.gmra.mxu0 %v14667_v44 }
0x1715   : > { %8950 = vmatprep.mubr.f32.mxu0 %v15394_v37 }
0x171b   : > { %v8727_v45 = vpop.permute.xlu0 %8726 }
0x17d0   : > { %v8787_v9 = vpop.f32.mrf.mxu1 }
0x17d1   : > { %v8788_v61 = vadd.f32 %v8787_v9, %v8727_v45 }
0x17d2   : > { %v8789_v46 = vpop.f32.mrf.mxu1 }
0x17d3   : > { %v8790_v31 = vadd.f32 %v8789_v46, %v8727_v45 }
0x17d4   : > { %v8791_v6 = vpop.f32.mrf.mxu1  ;;  %v8828_v55 = vpop.f32.mrf.mxu0 }
0x17d5   : > { %v8829_v63 = vadd.f32 %v8828_v55, %v8788_v61 }
0x17d6   : > { %v8792_v1 = vpop.f32.mrf.mxu1  ;;  %v8830_v14 = vpop.f32.mrf.mxu0 }
0x17d7   : > { %v8835_v53 = vsel %vm1948_vm8, %v8829_v63, -inf  ;;  %v8831_v59 = vadd.f32 %v8830_v14, %v8790_v31 }
0x17d8   : > { %v8836_v20 = vrot.slane %v8835_v53, 4  ;;  %v8832_v57 = vpop.f32.mrf.mxu0 }
0x17d9   : > { %v8842_v41 = vsel %vm1948_vm8, %v8831_v59, -inf }
0x17da   : > { %v8837_v44 = vmax.f32 %v8835_v53, %v8836_v20  ;;  %v8843_v3 = vrot.slane %v8842_v41, 4  ;;  %v8833_v28 = vpop.f32.mrf.mxu0 }
0x17dc   : > { %v8838_v34 = vrot.slane %v8837_v44, 2  ;;  %v8844_v33 = vmax.f32 %v8842_v41, %v8843_v3 }
0x17de   : > { %v8839_v0 = vmax.f32 %v8837_v44, %v8838_v34  ;;  %v8845_v58 = vrot.slane %v8844_v33, 2 }
0x17e0   : > { %v8840_v27 = vrot.slane %v8839_v0, 1  ;;  %v8846_v49 = vmax.f32 %v8844_v33, %v8845_v58 }
0x17e2   : > { %v8841_v8 = vmax.f32 %v8839_v0, %v8840_v27  ;;  %v8847_v30 = vrot.slane %v8846_v49, 1 }
0x17e4   : > { %v8849_v5 = vsub.f32 %v8829_v63, %v8841_v8  ;;  %v8848_v39 = vmax.f32 %v8846_v49, %v8847_v30 }
0x17e6   : > { %v8851_v40 = vmul.f32 1.442695, %v8849_v5  ;;  %v8850_v50 = vsub.f32 %v8831_v59, %v8848_v39 }
0x17e8   : > { %10133 = vpow2.f32 %v8851_v40  ;;  %v8853_v17 = vmul.f32 1.442695, %v8850_v50 }
0x17ea   : > { %10135 = vpow2.f32 %v8853_v17 }
0x17f5   : > { %v10134_v16 = vpop.eup %10133 }
0x17f6   : > { %v8855_v47 = vsel %vm1948_vm8, %v10134_v16, 0.0 }
0x17f7   : > { %v10136_v35 = vpop.eup %10135  ;;  %v8856_v52 = vrot.slane %v8855_v47, 4 }
0x17f8   : > { %v8862_v15 = vsel %vm1948_vm8, %v10136_v35, 0.0 }
0x17f9   : > { %v8857_v24 = vadd.f32 %v8856_v52, %v8855_v47  ;;  %v8863_v36 = vrot.slane %v8862_v15, 4 }
0x17fb   : > { %v8858_v22 = vrot.slane %v8857_v24, 2  ;;  %v8864_v12 = vadd.f32 %v8863_v36, %v8862_v15 }
0x17fd   : > { %v8859_v10 = vadd.f32 %v8858_v22, %v8857_v24  ;;  %v8865_v23 = vrot.slane %v8864_v12, 2 }
0x17ff   : > { %v8860_v29 = vrot.slane %v8859_v10, 1  ;;  %v8866_v4 = vadd.f32 %v8865_v23, %v8864_v12 }
0x1801   : > { %v8861_v62 = vadd.f32 %v8860_v29, %v8859_v10  ;;  %v8867_v13 = vrot.slane %v8866_v4, 1 }
0x1803   : > { %10137 = vrcp.f32 %v8861_v62  ;;  %v8868_v21 = vadd.f32 %v8867_v13, %v8866_v4 }
0x1805   : > { %10139 = vrcp.f32 %v8868_v21 }
0x1810   : > { %v10138_v42 = vpop.eup %10137 }
0x1811   : > { %v8871_v54 = vmul.f32 %v10138_v42, %v10134_v16 }
0x1812   : > { %v10140_v19 = vpop.eup %10139 }
0x1813   : > { %v8872_v51 = vmul.f32 %v10140_v19, %v10136_v35 }
0x1815   : > { %v8875_v7 = vcombine.low %v8871_v54, %v8872_v51  ;;  %9430 = vmatprep.subr.msk.mxu0 %vm1948_vm8, %v8872_v51 }
0x1816   : > { %9431 = vmatpush1.msk.msra.mxu0 %vm1948_vm8, %v8871_v54 }
0x1817   : > { %8877 = vst [vmem:[%s1618_s11] sm:$0xff] %v8875_v7  ;;  %9432 = vmatmul.mubr.msk.f32.vlgmr.msra.gmra.mxu0 %vm15398_vm3, %v8878_v18 }
0x18d7   : > { %v8952_v25 = vpop.f32.mrf.mxu0 }
0x18d8   : > { %8957 = vst [vmem:[%s1623_s0] sm:$0x3f] %v8952_v25 }
0x18d9   : > { %v8954_v56 = vpop.f32.mrf.mxu0 }
0x18da   : > { %8958 = vst [vmem:[%s1623_s0 + $0x8] sm:$0x3f] %v8954_v56 }
0x18db PF: > { %s118_s7 = sadd.s32 1, %s10152_s7  }
0x18dc   : > { %p115_p4 = scmp.ge.s32.totalorder %s118_s7, 4  }
0x18de   :  { %117 = sbr.rel (!%p115_p4) target bundleno = 101 (0x65), region = 371 }

</bundles_post_ra>
